<compile_context>
chip_gen: v6e
topology: v6e:2x2x1
jax: 0.10.0
libtpu: 0.0.40
codegen_flags: <defaults>
</compile_context>

<pallas_src>
import functools

import jax
import jax.numpy as jnp
from jax.experimental import pallas as pl
from jax.experimental.pallas import tpu as pltpu

IN_DIM = 7
N_HIDDEN_1 = 32
N_HIDDEN_2 = 128
N_HIDDEN_3 = 512
N_HIDDEN_4 = 1024
N_HIDDEN_5 = 2048
OUT_PAD = 128            # lane-dense padded width of the final layer / output
LEAKY_SLOPE = 0.01       # torch.nn.LeakyReLU default negative_slope
MAX_BATCH_TILE = 256


def _leaky_relu(x):
    return jnp.where(x > 0, x, LEAKY_SLOPE * x)


def _round_up(n, m):
    return ((n + m - 1) // m) * m


def _mlp_kernel(x_ref, xo_ref,
                w1_ref, b1_ref, w2_ref, b2_ref, w3_ref, b3_ref,
                w4_ref, b4_ref, w5_ref, b5_ref, o_ref, *, keep):
    def layer(h, w_ref, b_ref, act):
        # bf16 MXU inputs, f32 accumulation, f32 bias-add / activation.
        y = jnp.dot(h.astype(jnp.bfloat16), w_ref[...],
                    preferred_element_type=jnp.float32) + b_ref[...]
        return _leaky_relu(y) if act else y

    h = layer(x_ref[...], w1_ref, b1_ref, True)     # 2048 -> 1024
    h = layer(h, w2_ref, b2_ref, True)              # 1024 -> 512
    h = layer(h, w3_ref, b3_ref, True)              # 512  -> 128
    h = layer(h, w4_ref, b4_ref, True)              # 128  -> 32
    out = layer(h, w5_ref, b5_ref, False)           # 32   -> 128 (padded from 7)

    if keep > 0:  # static Python condition: fused Missing_item column overwrite
        lane = jax.lax.broadcasted_iota(jnp.int32, out.shape, 1)
        out = jnp.where(lane < keep, xo_ref[...], out)

    o_ref[...] = out.astype(o_ref.dtype)


def _run_mlp(x_pad, xo_pad, params, keep, tb):
    B_pad = x_pad.shape[0]
    w1, b1, w2, b2, w3, b3, w4, b4, w5, b5 = params

    def const_spec(a):
        # Full-array block, constant index -> weights/biases stay VMEM-resident
        # across the batch grid (no re-DMA).
        return pl.BlockSpec(a.shape, lambda i: (0, 0))

    return pl.pallas_call(
        functools.partial(_mlp_kernel, keep=keep),
        out_shape=jax.ShapeDtypeStruct((B_pad, OUT_PAD), jnp.float32),
        grid=(B_pad // tb,),
        in_specs=[
            pl.BlockSpec((tb, N_HIDDEN_5), lambda i: (i, 0)),   # x tile
            pl.BlockSpec((tb, OUT_PAD), lambda i: (i, 0)),      # x_the_other tile
            const_spec(w1), const_spec(b1),
            const_spec(w2), const_spec(b2),
            const_spec(w3), const_spec(b3),
            const_spec(w4), const_spec(b4),
            const_spec(w5), const_spec(b5),
        ],
        out_specs=pl.BlockSpec((tb, OUT_PAD), lambda i: (i, 0)),
        compiler_params=pltpu.CompilerParams(
            dimension_semantics=("parallel",),   # megacore sharding on v7x
            vmem_limit_bytes=32 << 20,           # working set ~15 MiB; safe on v7x 64 MiB
        ),
    )(x_pad, xo_pad, w1, b1, w2, b2, w3, b3, w4, b4, w5, b5)


@functools.partial(jax.jit, static_argnames=("missing_item",))
def _forward_jit(x, x_the_other, params, missing_item):
    B = x.shape[0]
    x = x.astype(jnp.float32)
    xo = x_the_other.astype(jnp.float32)
    keep = 0 if missing_item == IN_DIM else IN_DIM - missing_item

    tb = min(MAX_BATCH_TILE, _round_up(B, 8))
    B_pad = _round_up(B, tb)

    x_pad = jnp.pad(x, ((0, B_pad - B), (0, 0)))
    xo_pad = jnp.pad(xo, ((0, B_pad - B), (0, OUT_PAD - xo.shape[1])))

    out_pad = _run_mlp(x_pad, xo_pad, params, keep, tb)
    out = out_pad[:B, :IN_DIM]

    # NaN flag computed on-device inside the jit; host sync only if requested.
    nan_flag = jnp.isnan(jnp.sum(x))
    return out, nan_flag


def generator_tabular_4_forward(params, x, x_the_other, Missing_item, batch_size,
                                check_nan=True):
    """Mirrors Generator_tabular_4.forward semantics."""
    out, nan_flag = _forward_jit(x, x_the_other, params, Missing_item)

    if out.shape[0] != batch_size:
        raise ValueError("batch size does not match")

    # TODO(synk): the ValueError raises are host-side Python control flow, not kernel ops.
    if check_nan and bool(nan_flag):  # device->host sync; pass check_nan=False in hot loops
        raise ValueError("NaN detected in input data")

    return out


def init_params(key):
    """Deterministic parameter init (PyTorch Linear default init, shapes from __init__)."""
    keys = jax.random.split(key, 10)

    def linear(kw, kb, fan_in, fan_out):
        bound = 1.0 / jnp.sqrt(jnp.float32(fan_in))
        w = jax.random.uniform(kw, (fan_in, fan_out), jnp.float32, -bound, bound)
        b = jax.random.uniform(kb, (1, fan_out), jnp.float32, -bound, bound)
        return w, b

    w1, b1 = linear(keys[0], keys[1], N_HIDDEN_5, N_HIDDEN_4)
    w2, b2 = linear(keys[2], keys[3], N_HIDDEN_4, N_HIDDEN_3)
    w3, b3 = linear(keys[4], keys[5], N_HIDDEN_3, N_HIDDEN_2)
    w4, b4 = linear(keys[6], keys[7], N_HIDDEN_2, N_HIDDEN_1)
    w5, b5 = linear(keys[8], keys[9], N_HIDDEN_1, IN_DIM)

    # Last layer padded to a lane-dense 128-wide output (zeros beyond column 7).
    w5p = jnp.zeros((N_HIDDEN_1, OUT_PAD), jnp.float32).at[:, :IN_DIM].set(w5)
    b5p = jnp.zeros((1, OUT_PAD), jnp.float32).at[:, :IN_DIM].set(b5)

    bf16 = lambda w: w.astype(jnp.bfloat16)
    return (bf16(w1), b1, bf16(w2), b2, bf16(w3), b3, bf16(w4), b4, bf16(w5p), b5p)


def _reference(params, x, x_the_other, Missing_item):
    """Pure-JAX reference matching the kernel's numerics (bf16 MXU inputs, f32 math)."""
    w1, b1, w2, b2, w3, b3, w4, b4, w5, b5 = params

    def lin(h, w, b):
        return jnp.dot(h.astype(jnp.bfloat16).astype(jnp.float32),
                       w.astype(jnp.float32)) + b

    h = _leaky_relu(lin(x, w1, b1))
    h = _leaky_relu(lin(h, w2, b2))
    h = _leaky_relu(lin(h, w3, b3))
    h = _leaky_relu(lin(h, w4, b4))
    out = lin(h, w5, b5)[:, :IN_DIM]
    if Missing_item != IN_DIM:
        keep = IN_DIM - Missing_item
        out = out.at[:, :keep].set(x_the_other[:, :keep])
    return out


if __name__ == "__main__":
    key = jax.random.PRNGKey(0)
    kp, kx, ko, kx2, ko2 = jax.random.split(key, 5)

    params = init_params(kp)

    # Case 1: batch 8, Missing_item = 3 (first 4 output columns from x_the_other)
    batch_size = 8
    Missing_item = 3
    x = jax.random.normal(kx, (batch_size, N_HIDDEN_5), jnp.float32)
    x_the_other = jax.random.normal(ko, (batch_size, IN_DIM), jnp.float32)

    out = generator_tabular_4_forward(params, x, x_the_other, Missing_item, batch_size)
    out = jax.block_until_ready(out)
    ref = _reference(params, x, x_the_other, Missing_item)
    assert out.shape == (batch_size, IN_DIM)
    assert bool(jnp.allclose(out, ref, atol=2e-3, rtol=2e-3))

    # Case 2: non-multiple-of-8 batch, Missing_item == in_dim (no overwrite)
    batch_size2 = 5
    x2 = jax.random.normal(kx2, (batch_size2, N_HIDDEN_5), jnp.float32)
    xo2 = jax.random.normal(ko2, (batch_size2, IN_DIM), jnp.float32)
    out2 = generator_tabular_4_forward(params, x2, xo2, IN_DIM, batch_size2)
    out2 = jax.block_until_ready(out2)
    ref2 = _reference(params, x2, xo2, IN_DIM)
    assert out2.shape == (batch_size2, IN_DIM)
    assert bool(jnp.allclose(out2, ref2, atol=2e-3, rtol=2e-3))

    print("KERNEL_OK")
</pallas_src>

<mosaic_0001>
module attributes {stable_mosaic.version = 11 : i64} {
  func.func @_mlp_kernel(%arg0: i32, %arg1: memref<8x2048xf32, #tpu.memory_space<vmem>>, %arg2: memref<8x128xf32, #tpu.memory_space<vmem>>, %arg3: memref<2048x1024xbf16, #tpu.memory_space<vmem>>, %arg4: memref<1x1024xf32, #tpu.memory_space<vmem>>, %arg5: memref<1024x512xbf16, #tpu.memory_space<vmem>>, %arg6: memref<1x512xf32, #tpu.memory_space<vmem>>, %arg7: memref<512x128xbf16, #tpu.memory_space<vmem>>, %arg8: memref<1x128xf32, #tpu.memory_space<vmem>>, %arg9: memref<128x32xbf16, #tpu.memory_space<vmem>>, %arg10: memref<1x32xf32, #tpu.memory_space<vmem>>, %arg11: memref<32x128xbf16, #tpu.memory_space<vmem>>, %arg12: memref<1x128xf32, #tpu.memory_space<vmem>>, %arg13: memref<8x128xf32, #tpu.memory_space<vmem>>) attributes {dimension_semantics = [#tpu.dimension_semantics<parallel>], iteration_bounds = array<i64: 1>, scalar_prefetch = 0 : i64, scratch_operands = 0 : i64, tpu.core_type = #tpu.core_type<tc>, window_params = [{transform_indices = @transform_0, window_bounds = array<i64: 8, 2048>}, {transform_indices = @transform_1, window_bounds = array<i64: 8, 128>}, {pipeline_mode = #tpu.pipeline_mode<synchronous>, transform_indices = @transform_2, window_bounds = array<i64: 2048, 1024>}, {pipeline_mode = #tpu.pipeline_mode<synchronous>, transform_indices = @transform_3, window_bounds = array<i64: 1, 1024>}, {pipeline_mode = #tpu.pipeline_mode<synchronous>, transform_indices = @transform_4, window_bounds = array<i64: 1024, 512>}, {pipeline_mode = #tpu.pipeline_mode<synchronous>, transform_indices = @transform_5, window_bounds = array<i64: 1, 512>}, {pipeline_mode = #tpu.pipeline_mode<synchronous>, transform_indices = @transform_6, window_bounds = array<i64: 512, 128>}, {pipeline_mode = #tpu.pipeline_mode<synchronous>, transform_indices = @transform_7, window_bounds = array<i64: 1, 128>}, {pipeline_mode = #tpu.pipeline_mode<synchronous>, transform_indices = @transform_8, window_bounds = array<i64: 128, 32>}, {pipeline_mode = #tpu.pipeline_mode<synchronous>, transform_indices = @transform_9, window_bounds = array<i64: 1, 32>}, {pipeline_mode = #tpu.pipeline_mode<synchronous>, transform_indices = @transform_10, window_bounds = array<i64: 32, 128>}, {pipeline_mode = #tpu.pipeline_mode<synchronous>, transform_indices = @transform_11, window_bounds = array<i64: 1, 128>}, {transform_indices = @transform_12, window_bounds = array<i64: 8, 128>}]} {
    %c0 = arith.constant 0 : index
    %c0_0 = arith.constant 0 : index
    %0 = vector.load %arg1[%c0, %c0_0] : memref<8x2048xf32, #tpu.memory_space<vmem>>, vector<8x2048xf32>
    %1 = arith.truncf %0 : vector<8x2048xf32> to vector<8x2048xbf16>
    %c0_1 = arith.constant 0 : index
    %c0_2 = arith.constant 0 : index
    %2 = vector.load %arg3[%c0_1, %c0_2] : memref<2048x1024xbf16, #tpu.memory_space<vmem>>, vector<2048x1024xbf16>
    %cst = arith.constant dense<0.000000e+00> : vector<8x1024xf32>
    %3 = tpu.matmul %1, %2, %cst {dimension_numbers = #tpu.dot_dimension_numbers<[1], [0], [0], [1], [0, 0, 1, 1], [], []>} : vector<8x2048xbf16>, vector<2048x1024xbf16>, vector<8x1024xf32> -> vector<8x1024xf32>
    %c0_3 = arith.constant 0 : index
    %c0_4 = arith.constant 0 : index
    %4 = vector.load %arg4[%c0_3, %c0_4] : memref<1x1024xf32, #tpu.memory_space<vmem>>, vector<1x1024xf32>
    %5 = vector.broadcast %4 : vector<1x1024xf32> to vector<8x1024xf32>
    %6 = arith.addf %3, %5 : vector<8x1024xf32>
    %cst_5 = arith.constant 0.000000e+00 : f32
    %7 = vector.broadcast %cst_5 : f32 to vector<8x1024xf32>
    %8 = arith.cmpf ogt, %6, %7 : vector<8x1024xf32>
    %cst_6 = arith.constant 0.00999999977 : f32
    %9 = vector.broadcast %cst_6 : f32 to vector<8x1024xf32>
    %10 = arith.mulf %9, %6 : vector<8x1024xf32>
    %11 = arith.select %8, %6, %10 : vector<8x1024xi1>, vector<8x1024xf32>
    %12 = arith.truncf %11 : vector<8x1024xf32> to vector<8x1024xbf16>
    %c0_7 = arith.constant 0 : index
    %c0_8 = arith.constant 0 : index
    %13 = vector.load %arg5[%c0_7, %c0_8] : memref<1024x512xbf16, #tpu.memory_space<vmem>>, vector<1024x512xbf16>
    %cst_9 = arith.constant dense<0.000000e+00> : vector<8x512xf32>
    %14 = tpu.matmul %12, %13, %cst_9 {dimension_numbers = #tpu.dot_dimension_numbers<[1], [0], [0], [1], [0, 0, 1, 1], [], []>} : vector<8x1024xbf16>, vector<1024x512xbf16>, vector<8x512xf32> -> vector<8x512xf32>
    %c0_10 = arith.constant 0 : index
    %c0_11 = arith.constant 0 : index
    %15 = vector.load %arg6[%c0_10, %c0_11] : memref<1x512xf32, #tpu.memory_space<vmem>>, vector<1x512xf32>
    %16 = vector.broadcast %15 : vector<1x512xf32> to vector<8x512xf32>
    %17 = arith.addf %14, %16 : vector<8x512xf32>
    %cst_12 = arith.constant 0.000000e+00 : f32
    %18 = vector.broadcast %cst_12 : f32 to vector<8x512xf32>
    %19 = arith.cmpf ogt, %17, %18 : vector<8x512xf32>
    %cst_13 = arith.constant 0.00999999977 : f32
    %20 = vector.broadcast %cst_13 : f32 to vector<8x512xf32>
    %21 = arith.mulf %20, %17 : vector<8x512xf32>
    %22 = arith.select %19, %17, %21 : vector<8x512xi1>, vector<8x512xf32>
    %23 = arith.truncf %22 : vector<8x512xf32> to vector<8x512xbf16>
    %c0_14 = arith.constant 0 : index
    %c0_15 = arith.constant 0 : index
    %24 = vector.load %arg7[%c0_14, %c0_15] : memref<512x128xbf16, #tpu.memory_space<vmem>>, vector<512x128xbf16>
    %cst_16 = arith.constant dense<0.000000e+00> : vector<8x128xf32>
    %25 = tpu.matmul %23, %24, %cst_16 {dimension_numbers = #tpu.dot_dimension_numbers<[1], [0], [0], [1], [0, 0, 1, 1], [], []>} : vector<8x512xbf16>, vector<512x128xbf16>, vector<8x128xf32> -> vector<8x128xf32>
    %c0_17 = arith.constant 0 : index
    %c0_18 = arith.constant 0 : index
    %26 = vector.load %arg8[%c0_17, %c0_18] : memref<1x128xf32, #tpu.memory_space<vmem>>, vector<1x128xf32>
    %27 = vector.broadcast %26 : vector<1x128xf32> to vector<8x128xf32>
    %28 = arith.addf %25, %27 : vector<8x128xf32>
    %cst_19 = arith.constant 0.000000e+00 : f32
    %29 = vector.broadcast %cst_19 : f32 to vector<8x128xf32>
    %30 = arith.cmpf ogt, %28, %29 : vector<8x128xf32>
    %cst_20 = arith.constant 0.00999999977 : f32
    %31 = vector.broadcast %cst_20 : f32 to vector<8x128xf32>
    %32 = arith.mulf %31, %28 : vector<8x128xf32>
    %33 = arith.select %30, %28, %32 : vector<8x128xi1>, vector<8x128xf32>
    %34 = arith.truncf %33 : vector<8x128xf32> to vector<8x128xbf16>
    %c0_21 = arith.constant 0 : index
    %c0_22 = arith.constant 0 : index
    %35 = vector.load %arg9[%c0_21, %c0_22] : memref<128x32xbf16, #tpu.memory_space<vmem>>, vector<128x32xbf16>
    %cst_23 = arith.constant dense<0.000000e+00> : vector<8x32xf32>
    %36 = tpu.matmul %34, %35, %cst_23 {dimension_numbers = #tpu.dot_dimension_numbers<[1], [0], [0], [1], [0, 0, 1, 1], [], []>} : vector<8x128xbf16>, vector<128x32xbf16>, vector<8x32xf32> -> vector<8x32xf32>
    %c0_24 = arith.constant 0 : index
    %c0_25 = arith.constant 0 : index
    %37 = vector.load %arg10[%c0_24, %c0_25] : memref<1x32xf32, #tpu.memory_space<vmem>>, vector<1x32xf32>
    %38 = vector.broadcast %37 : vector<1x32xf32> to vector<8x32xf32>
    %39 = arith.addf %36, %38 : vector<8x32xf32>
    %cst_26 = arith.constant 0.000000e+00 : f32
    %40 = vector.broadcast %cst_26 : f32 to vector<8x32xf32>
    %41 = arith.cmpf ogt, %39, %40 : vector<8x32xf32>
    %cst_27 = arith.constant 0.00999999977 : f32
    %42 = vector.broadcast %cst_27 : f32 to vector<8x32xf32>
    %43 = arith.mulf %42, %39 : vector<8x32xf32>
    %44 = arith.select %41, %39, %43 : vector<8x32xi1>, vector<8x32xf32>
    %45 = arith.truncf %44 : vector<8x32xf32> to vector<8x32xbf16>
    %c0_28 = arith.constant 0 : index
    %c0_29 = arith.constant 0 : index
    %46 = vector.load %arg11[%c0_28, %c0_29] : memref<32x128xbf16, #tpu.memory_space<vmem>>, vector<32x128xbf16>
    %cst_30 = arith.constant dense<0.000000e+00> : vector<8x128xf32>
    %47 = tpu.matmul %45, %46, %cst_30 {dimension_numbers = #tpu.dot_dimension_numbers<[1], [0], [0], [1], [0, 0, 1, 1], [], []>} : vector<8x32xbf16>, vector<32x128xbf16>, vector<8x128xf32> -> vector<8x128xf32>
    %c0_31 = arith.constant 0 : index
    %c0_32 = arith.constant 0 : index
    %48 = vector.load %arg12[%c0_31, %c0_32] : memref<1x128xf32, #tpu.memory_space<vmem>>, vector<1x128xf32>
    %49 = vector.broadcast %48 : vector<1x128xf32> to vector<8x128xf32>
    %50 = arith.addf %47, %49 : vector<8x128xf32>
    %51 = tpu.iota {dimensions = array<i32: 1>} : vector<8x128xi32>
    %c4_i32 = arith.constant 4 : i32
    %52 = vector.broadcast %c4_i32 : i32 to vector<8x128xi32>
    %53 = arith.cmpi slt, %51, %52 : vector<8x128xi32>
    %c0_33 = arith.constant 0 : index
    %c0_34 = arith.constant 0 : index
    %54 = vector.load %arg2[%c0_33, %c0_34] : memref<8x128xf32, #tpu.memory_space<vmem>>, vector<8x128xf32>
    %55 = arith.select %53, %54, %50 : vector<8x128xi1>, vector<8x128xf32>
    %c0_35 = arith.constant 0 : index
    %c0_36 = arith.constant 0 : index
    %56 = vector.load %arg13[%c0_35, %c0_36] : memref<8x128xf32, #tpu.memory_space<vmem>>, vector<8x128xf32>
    tpu.vector_store %arg13[%c0_35, %c0_36], %55 {strides = array<i32>} : memref<8x128xf32, #tpu.memory_space<vmem>>, vector<8x128xf32>,
    return
  }
  func.func @transform_0(%arg0: i32) -> (i32, i32) {
    %c0_i32 = arith.constant 0 : i32
    %c0_i32_0 = arith.constant 0 : i32
    return %arg0, %c0_i32 : i32, i32
  }
  func.func @transform_1(%arg0: i32) -> (i32, i32) {
    %c0_i32 = arith.constant 0 : i32
    %c0_i32_0 = arith.constant 0 : i32
    return %arg0, %c0_i32 : i32, i32
  }
  func.func @transform_2(%arg0: i32) -> (i32, i32) {
    %c0_i32 = arith.constant 0 : i32
    %c0_i32_0 = arith.constant 0 : i32
    %c0_i32_1 = arith.constant 0 : i32
    return %c0_i32, %c0_i32_0 : i32, i32
  }
  func.func @transform_3(%arg0: i32) -> (i32, i32) {
    %c0_i32 = arith.constant 0 : i32
    %c0_i32_0 = arith.constant 0 : i32
    %c0_i32_1 = arith.constant 0 : i32
    return %c0_i32, %c0_i32_0 : i32, i32
  }
  func.func @transform_4(%arg0: i32) -> (i32, i32) {
    %c0_i32 = arith.constant 0 : i32
    %c0_i32_0 = arith.constant 0 : i32
    %c0_i32_1 = arith.constant 0 : i32
    return %c0_i32, %c0_i32_0 : i32, i32
  }
  func.func @transform_5(%arg0: i32) -> (i32, i32) {
    %c0_i32 = arith.constant 0 : i32
    %c0_i32_0 = arith.constant 0 : i32
    %c0_i32_1 = arith.constant 0 : i32
    return %c0_i32, %c0_i32_0 : i32, i32
  }
  func.func @transform_6(%arg0: i32) -> (i32, i32) {
    %c0_i32 = arith.constant 0 : i32
    %c0_i32_0 = arith.constant 0 : i32
    %c0_i32_1 = arith.constant 0 : i32
    return %c0_i32, %c0_i32_0 : i32, i32
  }
  func.func @transform_7(%arg0: i32) -> (i32, i32) {
    %c0_i32 = arith.constant 0 : i32
    %c0_i32_0 = arith.constant 0 : i32
    %c0_i32_1 = arith.constant 0 : i32
    return %c0_i32, %c0_i32_0 : i32, i32
  }
  func.func @transform_8(%arg0: i32) -> (i32, i32) {
    %c0_i32 = arith.constant 0 : i32
    %c0_i32_0 = arith.constant 0 : i32
    %c0_i32_1 = arith.constant 0 : i32
    return %c0_i32, %c0_i32_0 : i32, i32
  }
  func.func @transform_9(%arg0: i32) -> (i32, i32) {
    %c0_i32 = arith.constant 0 : i32
    %c0_i32_0 = arith.constant 0 : i32
    %c0_i32_1 = arith.constant 0 : i32
    return %c0_i32, %c0_i32_0 : i32, i32
  }
  func.func @transform_10(%arg0: i32) -> (i32, i32) {
    %c0_i32 = arith.constant 0 : i32
    %c0_i32_0 = arith.constant 0 : i32
    %c0_i32_1 = arith.constant 0 : i32
    return %c0_i32, %c0_i32_0 : i32, i32
  }
  func.func @transform_11(%arg0: i32) -> (i32, i32) {
    %c0_i32 = arith.constant 0 : i32
    %c0_i32_0 = arith.constant 0 : i32
    %c0_i32_1 = arith.constant 0 : i32
    return %c0_i32, %c0_i32_0 : i32, i32
  }
  func.func @transform_12(%arg0: i32) -> (i32, i32) {
    %c0_i32 = arith.constant 0 : i32
    %c0_i32_0 = arith.constant 0 : i32
    return %arg0, %c0_i32 : i32, i32
  }
}

</mosaic_0001>

<bundles_post_ra>
// kernel: _forward_jit.1
= control target key start
LH: loop header
LB: loop body
LE: loop exit
PB: predicated region body
PF: predicated region fallthrough
CT: control target
= control target key end

     0   :  { %17 = vsyncpa [#allocation3], 0  ;;  %s12713_s0 = inlined_call_operand.hbm [shape: f32[8,2048], index: 0, kind: input, shape index: {}]   ;;  %s12714_s1 = inlined_call_operand.vmem [shape: f32[8,128], index: 1, kind: input, shape index: {}]   ;;  %s12715_s2 = inlined_call_operand.hbm [shape: bf16[2048,1024], index: 2, kind: input, shape index: {}]   ;;  %s12716_s3 = inlined_call_operand.hbm [shape: f32[1,1024], index: 3, kind: input, shape index: {}]   ;;  %s12717_s4 = inlined_call_operand.hbm [shape: bf16[1024,512], index: 4, kind: input, shape index: {}]   ;;  %s12718_s5 = inlined_call_operand.hbm [shape: f32[1,512], index: 5, kind: input, shape index: {}]   ;;  %s12719_s6 = inlined_call_operand.hbm [shape: bf16[512,128], index: 6, kind: input, shape index: {}]   ;;  %s12720_s7 = inlined_call_operand.hbm [shape: f32[1,128], index: 7, kind: input, shape index: {}]   ;;  %s12721_s8 = inlined_call_operand.vmem [shape: bf16[128,32], index: 8, kind: input, shape index: {}]   ;;  %s12722_s9 = inlined_call_operand.hbm [shape: f32[1,32], index: 9, kind: input, shape index: {}]   ;;  %s12723_s10 = inlined_call_operand.hbm [shape: bf16[32,128], index: 10, kind: input, shape index: {}]   ;;  %s12724_s11 = inlined_call_operand.hbm [shape: f32[1,128], index: 11, kind: input, shape index: {}]   ;;  %s12725_s12 = inlined_call_operand.hbm [shape: f32[8,128], index: 12, kind: output, shape index: {}]  }
   0x1   :  { %18 = vsyncpa [#allocation6], 0 }
   0x2   :  { %19 = vsyncpa [#allocation9], 0 }
   0x3   :  { %20 = vsyncpa [#allocation12], 0 }
   0x4   :  { %21 = vsyncpa [#allocation15], 0 }
   0x5   :  { %22 = vsyncpa [#allocation18], 0 }
   0x6   :  { %23 = vsyncpa [#allocation4], 0  ;;  %s12278_s21 = smov [#allocation5]  }
   0x7   :  { %s41_s22 = sshll.u32 %s12278_s21, 4  ;;  %s42_s22 = int_to_ptr.vmem [resolvable:$true] %s41_s22 }
   0x8   :  { %s12052_s23 = scalar_lea.vmem %s42_s22, 131072  ;;  %p12057_p1 = scmp.lt.s32.totalorder %s42_s22, %s42_s22 }
   0x9   :  { %p12053_p0 = scmp.ne.s32.totalorder %s42_s22, %s12052_s23  ;;  %p12058_p2 = scmp.lt.s32.totalorder %s12052_s23, %s12052_s23 }
   0xb   :  { %p12059_p3 = por %p12058_p2, %p12057_p1 }
   0xd   :  { %p12060_p4 = pnand %p12059_p3, %p12053_p0 }
   0xf   :  { %12063 = shalt.err (!%p12060_p4)
}
  0x10   :  { %s12279_s24 = smov 512   ;;  %s12280_s25 = smov 32  }
  0x11   :  { %47 = dma.hbm_to_vmem [thread:$0]  %s12715_s2, 131072, %s42_s22, [#allocation6], %s12279_s24, %s12279_s24, %s12280_s25  }
  0x12   :  { %s12281_s28 = smov [#allocation8]  }
  0x13   :  { %s63_s29 = sshll.u32 %s12281_s28, 4  ;;  %s64_s29 = int_to_ptr.vmem [resolvable:$true] %s63_s29 }
  0x14   :  { %s12072_s30 = scalar_lea.vmem %s64_s29, 32768  ;;  %p12077_p6 = scmp.lt.s32.totalorder %s64_s29, %s64_s29 }
  0x15   :  { %p12073_p5 = scmp.ne.s32.totalorder %s64_s29, %s12072_s30  ;;  %p12078_p7 = scmp.lt.s32.totalorder %s12072_s30, %s12072_s30 }
  0x17   :  { %p12079_p8 = por %p12078_p7, %p12077_p6 }
  0x19   :  { %p12080_p9 = pnand %p12079_p8, %p12073_p5 }
  0x1b   :  { %12083 = shalt.err (!%p12080_p9)
}
  0x1c   :  { %s12282_s13 = smov 256   ;;  %s12283_s14 = smov 16  }
  0x1d   :  { %69 = dma.hbm_to_vmem [thread:$0]  %s12717_s4, 32768, %s64_s29, [#allocation9], %s12282_s13, %s12282_s13, %s12283_s14  }
  0x1e   :  { %s12284_s17 = smov [#allocation11]  }
  0x1f   :  { %s85_s18 = sshll.u32 %s12284_s17, 4  ;;  %s86_s18 = int_to_ptr.vmem [resolvable:$true] %s85_s18 }
  0x20   :  { %s12092_s2 = scalar_lea.vmem %s86_s18, 4096  ;;  %p12097_p11 = scmp.lt.s32.totalorder %s86_s18, %s86_s18 }
  0x21   :  { %p12093_p10 = scmp.ne.s32.totalorder %s86_s18, %s12092_s2  ;;  %p12098_p12 = scmp.lt.s32.totalorder %s12092_s2, %s12092_s2 }
  0x23   :  { %p12099_p13 = por %p12098_p12, %p12097_p11 }
  0x25   :  { %p12100_p0 = pnand %p12099_p13, %p12093_p10 }
  0x27   :  { %12103 = shalt.err (!%p12100_p0)
}
  0x28   :  { %s12285_s19 = smov 64   ;;  %s12286_s20 = smov 4  }
  0x29   :  { %91 = dma.hbm_to_vmem [thread:$0]  %s12719_s6, 4096, %s86_s18, [#allocation12], %s12285_s19, %s12285_s19, %s12286_s20  }
  0x2a   :  { %s12287_s4 = smov [#allocation14]   ;;  %s12288_s24 = smov [#allocation2]  }
  0x2b   :  { %s110_s23 = sshll.u32 %s12287_s4, 4  ;;  %s30_s25 = sshll.u32 %s12288_s24, 4  ;;  %s111_s23 = int_to_ptr.vmem [resolvable:$true] %s110_s23  ;;  %s31_s25 = int_to_ptr.vmem [resolvable:$true] %s30_s25 }
  0x2c   :  { %s12112_s26 = scalar_lea.vmem %s111_s23, 16  ;;  %s12116_s27 = scalar_lea.vmem %s111_s23, 32 }
  0x2d   :  { %p12113_p1 = scmp.ne.s32.totalorder %s111_s23, %s12112_s26  ;;  %p12117_p2 = scmp.lt.s32.totalorder %s111_s23, %s111_s23 }
  0x2e   :  { %p12118_p3 = scmp.lt.s32.totalorder %s12116_s27, %s12112_s26 }
  0x30   :  { %p12119_p4 = por %p12118_p3, %p12117_p2 }
  0x32   :  { %p12120_p5 = pnand %p12119_p4, %p12113_p1 }
  0x34   :  { %12123 = shalt.err (!%p12120_p5)
}
  0x35   :  { %113 = dma.hbm_to_vmem [thread:$0]  %s12722_s9, 16, %s111_s23, [#allocation15]  }
  0x36   :  { %s12132_s30 = scalar_lea.vmem %s31_s25, 2048  ;;  %p12137_p7 = scmp.lt.s32.totalorder %s31_s25, %s31_s25 }
  0x37   :  { %p12133_p6 = scmp.ne.s32.totalorder %s31_s25, %s12132_s30  ;;  %p12138_p8 = scmp.lt.s32.totalorder %s12132_s30, %s12132_s30 }
  0x39   :  { %p12139_p9 = por %p12138_p8, %p12137_p7 }
  0x3b   :  { %p12140_p10 = pnand %p12139_p9, %p12133_p6 }
  0x3d   :  { %12143 = shalt.err (!%p12140_p10)
}
  0x3e   :  { %33 = dma.hbm_to_vmem [thread:$0]  %s12713_s0, 2048, %s31_s25, [#allocation3]  }
  0x3f   :  { %s12289_s14 = smov [#allocation7]   ;;  %s12290_s16 = smov [#allocation10]  }
  0x40   :  { %s54_s15 = sshll.u32 %s12289_s14, 4  ;;  %s76_s17 = sshll.u32 %s12290_s16, 4  ;;  %s55_s15 = int_to_ptr.vmem [resolvable:$true] %s54_s15  ;;  %s77_s17 = int_to_ptr.vmem [resolvable:$true] %s76_s17 }
  0x41   :  { %s12152_s18 = scalar_lea.vmem %s55_s15, 128  ;;  %p12157_p12 = scmp.lt.s32.totalorder %s55_s15, %s55_s15 }
  0x42   :  { %p12153_p11 = scmp.ne.s32.totalorder %s55_s15, %s12152_s18  ;;  %p12158_p13 = scmp.lt.s32.totalorder %s12152_s18, %s12152_s18 }
  0x44   :  { %p12159_p0 = por %p12158_p13, %p12157_p12 }
  0x46   :  { %p12160_p1 = pnand %p12159_p0, %p12153_p11 }
  0x48   :  { %12163 = shalt.err (!%p12160_p1)
}
  0x49   :  { %57 = dma.hbm_to_vmem [thread:$0]  %s12716_s3, 128, %s55_s15, [#allocation6]  }
  0x4a   :  { %s12172_s21 = scalar_lea.vmem %s77_s17, 64  ;;  %p12177_p3 = scmp.lt.s32.totalorder %s77_s17, %s77_s17 }
  0x4b   :  { %p12173_p2 = scmp.ne.s32.totalorder %s77_s17, %s12172_s21  ;;  %p12178_p4 = scmp.lt.s32.totalorder %s12172_s21, %s12172_s21 }
  0x4d   :  { %p12179_p5 = por %p12178_p4, %p12177_p3 }
  0x4f   :  { %p12180_p6 = pnand %p12179_p5, %p12173_p2 }
  0x51   :  { %12183 = shalt.err (!%p12180_p6)
}
  0x52   :  { %79 = dma.hbm_to_vmem [thread:$0]  %s12718_s5, 64, %s77_s17, [#allocation9]  }
  0x53   :  { %s12291_s4 = smov [#allocation13]   ;;  %s12292_s24 = smov [#allocation16]  }
  0x54   :  { %s98_s23 = sshll.u32 %s12291_s4, 4  ;;  %s119_s25 = sshll.u32 %s12292_s24, 4  ;;  %s99_s23 = int_to_ptr.vmem [resolvable:$true] %s98_s23  ;;  %s120_s25 = int_to_ptr.vmem [resolvable:$true] %s119_s25 }
  0x55   :  { %s12192_s26 = scalar_lea.vmem %s99_s23, 16  ;;  %s12196_s3 = scalar_lea.vmem %s99_s23, 32 }
  0x56   :  { %p12193_p7 = scmp.ne.s32.totalorder %s99_s23, %s12192_s26  ;;  %p12197_p8 = scmp.lt.s32.totalorder %s99_s23, %s99_s23 }
  0x57   :  { %p12198_p9 = scmp.lt.s32.totalorder %s12196_s3, %s12192_s26 }
  0x59   :  { %p12199_p10 = por %p12198_p9, %p12197_p8 }
  0x5b   :  { %p12200_p11 = pnand %p12199_p10, %p12193_p7 }
  0x5d   :  { %12203 = shalt.err (!%p12200_p11)
}
  0x5e   :  { %101 = dma.hbm_to_vmem [thread:$0]  %s12720_s7, 16, %s99_s23, [#allocation12]  }
  0x5f   :  { %s12212_s29 = scalar_lea.vmem %s120_s25, 256  ;;  %p12217_p13 = scmp.lt.s32.totalorder %s120_s25, %s120_s25 }
  0x60   :  { %p12213_p12 = scmp.ne.s32.totalorder %s120_s25, %s12212_s29  ;;  %p12218_p0 = scmp.lt.s32.totalorder %s12212_s29, %s12212_s29 }
  0x62   :  { %p12219_p1 = por %p12218_p0, %p12217_p13 }
  0x64   :  { %p12220_p2 = pnand %p12219_p1, %p12213_p12 }
  0x66   :  { %12223 = shalt.err (!%p12220_p2)
}
  0x67   :  { %125 = dma.hbm_to_vmem [thread:$0]  %s12723_s10, 256, %s120_s25, [#allocation15], %s12285_s19, %s12285_s19, %s12286_s20  }
  0x68   :  { %s12293_s6 = smov [#allocation17]  }
  0x69   :  { %s132_s13 = sshll.u32 %s12293_s6, 4  ;;  %s133_s13 = int_to_ptr.vmem [resolvable:$true] %s132_s13 }
  0x6a   :  { %s12232_s14 = scalar_lea.vmem %s133_s13, 16  ;;  %s12236_s7 = scalar_lea.vmem %s133_s13, 32 }
  0x6b   :  { %p12233_p3 = scmp.ne.s32.totalorder %s133_s13, %s12232_s14  ;;  %p12237_p4 = scmp.lt.s32.totalorder %s133_s13, %s133_s13 }
  0x6c   :  { %p12238_p5 = scmp.lt.s32.totalorder %s12236_s7, %s12232_s14 }
  0x6e   :  { %p12239_p6 = por %p12238_p5, %p12237_p4 }
  0x70   :  { %p12240_p7 = pnand %p12239_p6, %p12233_p3 }
  0x72   :  { %12243 = shalt.err (!%p12240_p7)
}
  0x73   :  { %135 = dma.hbm_to_vmem [thread:$0]  %s12724_s11, 16, %s133_s13, [#allocation18]  }
  0x74   :  { %12264 = dma.done.wait [#allocation3], 2048  }
  0x75   :  { %12265 = vsyncadd [#allocation3], 4294965248 }
  0x76   :  { %12266 = dma.done.wait [#allocation6], 131200  }
  0x77   :  { %12267 = vsyncadd [#allocation6], 4294836096 }
  0x78   :  { %12268 = dma.done.wait [#allocation9], 32832  }
  0x79   :  { %12269 = vsyncadd [#allocation9], 4294934464 }
  0x7a   :  { %12270 = dma.done.wait [#allocation12], 4112  }
  0x7b   :  { %12271 = vsyncadd [#allocation12], 4294963184 }
  0x7c   :  { %12272 = dma.done.wait [#allocation15], 272  }
  0x7d   :  { %12273 = vsyncadd [#allocation15], 4294967024 }
  0x7e   :  { %12274 = dma.done.wait [#allocation18], 16  }
  0x7f   :  { %12275 = vsyncadd [#allocation18], 4294967280  ;;  %v255_v0 = vld [vmem:[#allocation5 + $0x1c0] sm:$0xff]  ;;  %v168_v53 = vld [vmem:[#allocation2 + $0x8] sm:$0xff]  ;;  %vm12295_vm12 = vmmov 0   ;;  %vm10116_vm15 = vcmask 261120  }
  0x80   :  { %v259_v1 = vld [vmem:[#allocation5 + $0x1e0] sm:$0xff]  ;;  %v170_v54 = vld [vmem:[#allocation2 + $0x18] sm:$0xff]  ;;  %v12398_v58 = vpack.c.bf16 %v168_v53, %v168_v53 }
  0x81   :  { %v383_v2 = vld [vmem:[#allocation5 + $0x5c0] sm:$0xff]  ;;  %v10243_v3 = vcombine.high %v255_v0, %v259_v1  ;;  %v10242_v5 = vcombine.low %v255_v0, %v259_v1  ;;  %v12400_v59 = vpack.c.bf16 %v170_v54, %v170_v54 }
  0x82   :  { %v387_v4 = vld [vmem:[#allocation5 + $0x5e0] sm:$0xff]  ;;  %6417 = vmatprep.mubr.bf16.mxu0 %v12398_v58 }
  0x83   :  { %v247_v6 = vld [vmem:[#allocation5 + $0x180] sm:$0xff]  ;;  %v10371_v8 = vcombine.high %v383_v2, %v387_v4  ;;  %v10370_v9 = vcombine.low %v383_v2, %v387_v4  ;;  %6385 = vmatprep.subr.bf16.mxu0 %v10243_v3  ;;  %6458 = vmatprep.mubr.bf16.mxu1 %v12400_v59 }
  0x84   :  { %v251_v7 = vld [vmem:[#allocation5 + $0x1a0] sm:$0xff]  ;;  %6386 = vmatpush1.bf16.msra.mxu0 %v10242_v5 }
  0x85   :  { %v10235_v10 = vcombine.high %v247_v6, %v251_v7  ;;  %v375_v11 = vld [vmem:[#allocation5 + $0x580] sm:$0xff]  ;;  %6426 = vmatprep.subr.bf16.mxu1 %v10371_v8  ;;  %v10234_v18 = vcombine.low %v247_v6, %v251_v7 }
  0x86   :  { %v379_v12 = vld [vmem:[#allocation5 + $0x5a0] sm:$0xff]  ;;  %6427 = vmatpush1.bf16.msra.mxu1 %v10370_v9 }
  0x87   :  { %v239_v13 = vld [vmem:[#allocation5 + $0x140] sm:$0xff]  ;;  %v10363_v14 = vcombine.high %v375_v11, %v379_v12  ;;  %6387 = vmatprep.subr.bf16.mxu0 %v10235_v10  ;;  %v10362_v19 = vcombine.low %v375_v11, %v379_v12 }
  0x88   :  { %v243_v15 = vld [vmem:[#allocation5 + $0x160] sm:$0xff]  ;;  %6388 = vmatpush1.bf16.msra.mxu0 %v10234_v18 }
  0x89   :  { %v367_v16 = vld [vmem:[#allocation5 + $0x540] sm:$0xff]  ;;  %v10227_v20 = vcombine.high %v239_v13, %v243_v15  ;;  %6428 = vmatprep.subr.bf16.mxu1 %v10363_v14  ;;  %v10226_v26 = vcombine.low %v239_v13, %v243_v15 }
  0x8a   :  { %v371_v17 = vld [vmem:[#allocation5 + $0x560] sm:$0xff]  ;;  %6429 = vmatpush1.bf16.msra.mxu1 %v10362_v19 }
  0x8b   :  { %v10355_v21 = vcombine.high %v367_v16, %v371_v17  ;;  %v231_v22 = vld [vmem:[#allocation5 + $0x100] sm:$0xff]  ;;  %6389 = vmatprep.subr.bf16.mxu0 %v10227_v20  ;;  %v10354_v27 = vcombine.low %v367_v16, %v371_v17 }
  0x8c   :  { %v235_v23 = vld [vmem:[#allocation5 + $0x120] sm:$0xff]  ;;  %6390 = vmatpush1.bf16.msra.mxu0 %v10226_v26 }
  0x8d   :  { %v359_v24 = vld [vmem:[#allocation5 + $0x500] sm:$0xff]  ;;  %v10219_v28 = vcombine.high %v231_v22, %v235_v23  ;;  %6430 = vmatprep.subr.bf16.mxu1 %v10355_v21  ;;  %v10218_v34 = vcombine.low %v231_v22, %v235_v23 }
  0x8e   :  { %v363_v25 = vld [vmem:[#allocation5 + $0x520] sm:$0xff]  ;;  %6431 = vmatpush1.bf16.msra.mxu1 %v10354_v27 }
  0x8f   :  { %v10347_v29 = vcombine.high %v359_v24, %v363_v25  ;;  %v223_v30 = vld [vmem:[#allocation5 + $0xc0] sm:$0xff]  ;;  %6391 = vmatprep.subr.bf16.mxu0 %v10219_v28  ;;  %v10346_v35 = vcombine.low %v359_v24, %v363_v25 }
  0x90   :  { %v227_v31 = vld [vmem:[#allocation5 + $0xe0] sm:$0xff]  ;;  %6392 = vmatpush1.bf16.msra.mxu0 %v10218_v34 }
  0x91   :  { %v351_v32 = vld [vmem:[#allocation5 + $0x4c0] sm:$0xff]  ;;  %v10211_v36 = vcombine.high %v223_v30, %v227_v31  ;;  %6432 = vmatprep.subr.bf16.mxu1 %v10347_v29  ;;  %v10210_v42 = vcombine.low %v223_v30, %v227_v31 }
  0x92   :  { %v355_v33 = vld [vmem:[#allocation5 + $0x4e0] sm:$0xff]  ;;  %6433 = vmatpush1.bf16.msra.mxu1 %v10346_v35 }
  0x93   :  { %v10339_v37 = vcombine.high %v351_v32, %v355_v33  ;;  %v215_v38 = vld [vmem:[#allocation5 + $0x80] sm:$0xff]  ;;  %6393 = vmatprep.subr.bf16.mxu0 %v10211_v36  ;;  %v10338_v43 = vcombine.low %v351_v32, %v355_v33 }
  0x94   :  { %v219_v39 = vld [vmem:[#allocation5 + $0xa0] sm:$0xff]  ;;  %6394 = vmatpush1.bf16.msra.mxu0 %v10210_v42 }
  0x95   :  { %v343_v40 = vld [vmem:[#allocation5 + $0x480] sm:$0xff]  ;;  %v10203_v44 = vcombine.high %v215_v38, %v219_v39  ;;  %6434 = vmatprep.subr.bf16.mxu1 %v10339_v37  ;;  %v10202_v50 = vcombine.low %v215_v38, %v219_v39 }
  0x96   :  { %v347_v41 = vld [vmem:[#allocation5 + $0x4a0] sm:$0xff]  ;;  %6435 = vmatpush1.bf16.msra.mxu1 %v10338_v43 }
  0x97   :  { %v10331_v45 = vcombine.high %v343_v40, %v347_v41  ;;  %v207_v46 = vld [vmem:[#allocation5 + $0x40] sm:$0xff]  ;;  %6395 = vmatprep.subr.bf16.mxu0 %v10203_v44  ;;  %v10330_v51 = vcombine.low %v343_v40, %v347_v41 }
  0x98   :  { %v211_v47 = vld [vmem:[#allocation5 + $0x60] sm:$0xff]  ;;  %6396 = vmatpush1.bf16.msra.mxu0 %v10202_v50 }
  0x99   :  { %v335_v48 = vld [vmem:[#allocation5 + $0x440] sm:$0xff]  ;;  %v10195_v52 = vcombine.high %v207_v46, %v211_v47  ;;  %6436 = vmatprep.subr.bf16.mxu1 %v10331_v45  ;;  %v10194_v62 = vcombine.low %v207_v46, %v211_v47 }
  0x9a   :  { %v339_v49 = vld [vmem:[#allocation5 + $0x460] sm:$0xff]  ;;  %6437 = vmatpush1.bf16.msra.mxu1 %v10330_v51 }
  0x9b   :  { %v10323_v55 = vcombine.high %v335_v48, %v339_v49  ;;  %v199_v56 = vld [vmem:[#allocation5] sm:$0xff]  ;;  %6397 = vmatprep.subr.bf16.mxu0 %v10195_v52  ;;  %v10322_v63 = vcombine.low %v335_v48, %v339_v49 }
  0x9c   :  { %v203_v57 = vld [vmem:[#allocation5 + $0x20] sm:$0xff]  ;;  %6398 = vmatpush1.bf16.msra.mxu0 %v10194_v62 }
  0x9d   :  { %v327_v60 = vld [vmem:[#allocation5 + $0x400] sm:$0xff]  ;;  %v10187_v0 = vcombine.high %v199_v56, %v203_v57  ;;  %6438 = vmatprep.subr.bf16.mxu1 %v10323_v55  ;;  %v10186_v6 = vcombine.low %v199_v56, %v203_v57 }
  0x9e   :  { %v331_v61 = vld [vmem:[#allocation5 + $0x420] sm:$0xff]  ;;  %6439 = vmatpush1.bf16.msra.mxu1 %v10322_v63 }
  0x9f   :  { %v10315_v1 = vcombine.high %v327_v60, %v331_v61  ;;  %v319_v2 = vld [vmem:[#allocation5 + $0x3c0] sm:$0xff]  ;;  %6399 = vmatprep.subr.bf16.mxu0 %v10187_v0  ;;  %v10314_v7 = vcombine.low %v327_v60, %v331_v61 }
  0xa0   :  { %v323_v3 = vld [vmem:[#allocation5 + $0x3e0] sm:$0xff]  ;;  %6400 = vmatpush1.bf16.msra.mxu0 %v10186_v6 }
  0xa1   :  { %v447_v4 = vld [vmem:[#allocation5 + $0x7c0] sm:$0xff]  ;;  %v10307_v8 = vcombine.high %v319_v2, %v323_v3  ;;  %6440 = vmatprep.subr.bf16.mxu1 %v10315_v1  ;;  %v10306_v14 = vcombine.low %v319_v2, %v323_v3 }
  0xa2   :  { %v451_v5 = vld [vmem:[#allocation5 + $0x7e0] sm:$0xff]  ;;  %6441 = vmatpush1.bf16.msra.mxu1 %v10314_v7 }
  0xa3   :  { %v10435_v9 = vcombine.high %v447_v4, %v451_v5  ;;  %v311_v10 = vld [vmem:[#allocation5 + $0x380] sm:$0xff]  ;;  %6401 = vmatprep.subr.bf16.mxu0 %v10307_v8  ;;  %v10434_v15 = vcombine.low %v447_v4, %v451_v5 }
  0xa4   :  { %v315_v11 = vld [vmem:[#allocation5 + $0x3a0] sm:$0xff]  ;;  %6402 = vmatpush2.bf16.msra.mxu0 %v10306_v14 }
  0xa5   :  { %v439_v12 = vld [vmem:[#allocation5 + $0x780] sm:$0xff]  ;;  %v10299_v16 = vcombine.high %v311_v10, %v315_v11  ;;  %6442 = vmatprep.subr.bf16.mxu1 %v10435_v9  ;;  %v10298_v22 = vcombine.low %v311_v10, %v315_v11  ;;  %v169_v11 = vld [vmem:[#allocation2 + $0x10] sm:$0xff] }
  0xa6   :  { %v443_v13 = vld [vmem:[#allocation5 + $0x7a0] sm:$0xff]  ;;  %6443 = vmatpush2.bf16.msra.mxu1 %v10434_v15 }
  0xa7   :  { %v10427_v17 = vcombine.high %v439_v12, %v443_v13  ;;  %v303_v18 = vld [vmem:[#allocation5 + $0x340] sm:$0xff]  ;;  %6403 = vmatprep.subr.bf16.mxu0 %v10299_v16  ;;  %v10426_v23 = vcombine.low %v439_v12, %v443_v13 }
  0xa8   :  { %v307_v19 = vld [vmem:[#allocation5 + $0x360] sm:$0xff]  ;;  %6404 = vmatpush2.bf16.msra.mxu0 %v10298_v22  ;;  %v174_v22 = vld [vmem:[#allocation2 + $0x38] sm:$0xff] }
  0xa9   :  { %v431_v20 = vld [vmem:[#allocation5 + $0x740] sm:$0xff]  ;;  %v10291_v24 = vcombine.high %v303_v18, %v307_v19  ;;  %6444 = vmatprep.subr.bf16.mxu1 %v10427_v17  ;;  %v10290_v30 = vcombine.low %v303_v18, %v307_v19  ;;  %v172_v19 = vld [vmem:[#allocation2 + $0x28] sm:$0xff] }
  0xaa   :  { %v435_v21 = vld [vmem:[#allocation5 + $0x760] sm:$0xff]  ;;  %6445 = vmatpush2.bf16.msra.mxu1 %v10426_v23 }
  0xab   :  { %v10419_v25 = vcombine.high %v431_v20, %v435_v21  ;;  %v295_v26 = vld [vmem:[#allocation5 + $0x300] sm:$0xff]  ;;  %6405 = vmatprep.subr.bf16.mxu0 %v10291_v24  ;;  %v10418_v31 = vcombine.low %v431_v20, %v435_v21  ;;  %v12406_v20 = vpack.c.bf16 %v169_v11, %v169_v11 }
  0xac   :  { %v299_v27 = vld [vmem:[#allocation5 + $0x320] sm:$0xff]  ;;  %6406 = vmatpush2.bf16.msra.mxu0 %v10290_v30 }
  0xad   :  { %v423_v28 = vld [vmem:[#allocation5 + $0x700] sm:$0xff]  ;;  %v10283_v32 = vcombine.high %v295_v26, %v299_v27  ;;  %6446 = vmatprep.subr.bf16.mxu1 %v10419_v25  ;;  %v10282_v38 = vcombine.low %v295_v26, %v299_v27 }
  0xae   :  { %v427_v29 = vld [vmem:[#allocation5 + $0x720] sm:$0xff]  ;;  %6447 = vmatpush2.bf16.msra.mxu1 %v10418_v31  ;;  %v12411_v31 = vpack.c.bf16 %v174_v22, %v174_v22 }
  0xaf   :  { %v10411_v33 = vcombine.high %v423_v28, %v427_v29  ;;  %v287_v34 = vld [vmem:[#allocation5 + $0x2c0] sm:$0xff]  ;;  %6407 = vmatprep.subr.bf16.mxu0 %v10283_v32  ;;  %v10410_v39 = vcombine.low %v423_v28, %v427_v29  ;;  %v12408_v28 = vpack.c.bf16 %v172_v19, %v172_v19 }
  0xb0   :  { %v291_v35 = vld [vmem:[#allocation5 + $0x2e0] sm:$0xff]  ;;  %6408 = vmatpush2.bf16.msra.mxu0 %v10282_v38 }
  0xb1   :  { %v415_v36 = vld [vmem:[#allocation5 + $0x6c0] sm:$0xff]  ;;  %v10275_v40 = vcombine.high %v287_v34, %v291_v35  ;;  %6448 = vmatprep.subr.bf16.mxu1 %v10411_v33  ;;  %v10274_v46 = vcombine.low %v287_v34, %v291_v35 }
  0xb2   :  { %v419_v37 = vld [vmem:[#allocation5 + $0x6e0] sm:$0xff]  ;;  %6449 = vmatpush2.bf16.msra.mxu1 %v10410_v39 }
  0xb3   :  { %v10403_v41 = vcombine.high %v415_v36, %v419_v37  ;;  %v279_v42 = vld [vmem:[#allocation5 + $0x280] sm:$0xff]  ;;  %6409 = vmatprep.subr.bf16.mxu0 %v10275_v40  ;;  %v10402_v47 = vcombine.low %v415_v36, %v419_v37 }
  0xb4   :  { %v283_v43 = vld [vmem:[#allocation5 + $0x2a0] sm:$0xff]  ;;  %6410 = vmatpush2.bf16.msra.mxu0 %v10274_v46 }
  0xb5   :  { %v407_v44 = vld [vmem:[#allocation5 + $0x680] sm:$0xff]  ;;  %v10267_v48 = vcombine.high %v279_v42, %v283_v43  ;;  %6450 = vmatprep.subr.bf16.mxu1 %v10403_v41  ;;  %v10266_v54 = vcombine.low %v279_v42, %v283_v43 }
  0xb6   :  { %v411_v45 = vld [vmem:[#allocation5 + $0x6a0] sm:$0xff]  ;;  %6451 = vmatpush2.bf16.msra.mxu1 %v10402_v47 }
  0xb7   :  { %v10395_v49 = vcombine.high %v407_v44, %v411_v45  ;;  %v271_v50 = vld [vmem:[#allocation5 + $0x240] sm:$0xff]  ;;  %6411 = vmatprep.subr.bf16.mxu0 %v10267_v48  ;;  %v10394_v55 = vcombine.low %v407_v44, %v411_v45 }
  0xb8   :  { %v275_v51 = vld [vmem:[#allocation5 + $0x260] sm:$0xff]  ;;  %6412 = vmatpush2.bf16.msra.mxu0 %v10266_v54 }
  0xb9   :  { %v399_v52 = vld [vmem:[#allocation5 + $0x640] sm:$0xff]  ;;  %v10259_v56 = vcombine.high %v271_v50, %v275_v51  ;;  %6452 = vmatprep.subr.bf16.mxu1 %v10395_v49  ;;  %v10258_v0 = vcombine.low %v271_v50, %v275_v51 }
  0xba   :  { %v403_v53 = vld [vmem:[#allocation5 + $0x660] sm:$0xff]  ;;  %6453 = vmatpush2.bf16.msra.mxu1 %v10394_v55 }
  0xbb   :  { %v10387_v57 = vcombine.high %v399_v52, %v403_v53  ;;  %v263_v60 = vld [vmem:[#allocation5 + $0x200] sm:$0xff]  ;;  %6413 = vmatprep.subr.bf16.mxu0 %v10259_v56  ;;  %v10386_v1 = vcombine.low %v399_v52, %v403_v53 }
  0xbc   :  { %v267_v61 = vld [vmem:[#allocation5 + $0x220] sm:$0xff]  ;;  %6414 = vmatpush2.bf16.msra.mxu0 %v10258_v0 }
  0xbd   :  { %v391_v62 = vld [vmem:[#allocation5 + $0x600] sm:$0xff]  ;;  %v10251_v2 = vcombine.high %v263_v60, %v267_v61  ;;  %6454 = vmatprep.subr.bf16.mxu1 %v10387_v57  ;;  %v10250_v8 = vcombine.low %v263_v60, %v267_v61 }
  0xbe   :  { %v395_v63 = vld [vmem:[#allocation5 + $0x620] sm:$0xff]  ;;  %6455 = vmatpush2.bf16.msra.mxu1 %v10386_v1 }
  0xbf   :  { %v10379_v3 = vcombine.high %v391_v62, %v395_v63  ;;  %v511_v4 = vld [vmem:[#allocation5 + $0x9c0] sm:$0xff]  ;;  %6415 = vmatprep.subr.bf16.mxu0 %v10251_v2  ;;  %v10378_v10 = vcombine.low %v391_v62, %v395_v63 }
  0xc0   :  { %v515_v5 = vld [vmem:[#allocation5 + $0x9e0] sm:$0xff]  ;;  %6416 = vmatpush2.bf16.msra.mxu0 %v10250_v8 }
  0xc1   :  { %v639_v6 = vld [vmem:[#allocation5 + $0xdc0] sm:$0xff]  ;;  %v10499_v12 = vcombine.high %v511_v4, %v515_v5  ;;  %6456 = vmatprep.subr.bf16.mxu1 %v10379_v3  ;;  %v10498_v21 = vcombine.low %v511_v4, %v515_v5 }
  0xc2   :  { %v643_v7 = vld [vmem:[#allocation5 + $0xde0] sm:$0xff]  ;;  %6457 = vmatpush2.bf16.msra.mxu1 %v10378_v10 }
  0xc3   :  { %v167_v9 = vld [vmem:[#allocation2] sm:$0xff]  ;;  %v10627_v13 = vcombine.high %v639_v6, %v643_v7  ;;  %6467 = vmatprep.subr.bf16.mxu0 %v10499_v12  ;;  %v10626_v23 = vcombine.low %v639_v6, %v643_v7 }
  0xc4   :  { %v503_v14 = vld [vmem:[#allocation5 + $0x980] sm:$0xff]  ;;  %v12404_v16 = vpack.c.bf16 %v167_v9, %v167_v9 }
  0xc5   :  { %v507_v15 = vld [vmem:[#allocation5 + $0x9a0] sm:$0xff]  ;;  %6508 = vmatprep.subr.bf16.mxu1 %v10627_v13  ;;  %6459 = vmatmul.mubr.bf16.vlgmr.msra.gmra.mxu1 %v12406_v20 }
  0xc6   :  { %v631_v17 = vld [vmem:[#allocation5 + $0xd80] sm:$0xff]  ;;  %v10491_v24 = vcombine.high %v503_v14, %v507_v15  ;;  %6418 = vmatmul.mubr.bf16.vlgmr.msra.gmra.mxu0 %v12404_v16  ;;  %v10490_v32 = vcombine.low %v503_v14, %v507_v15  ;;  %6509 = vmatpush1.bf16.msra.mxu1 %v10626_v23 }
  0xc7   :  { %v635_v18 = vld [vmem:[#allocation5 + $0xda0] sm:$0xff]  ;;  %6468 = vmatpush1.bf16.msra.mxu0 %v10498_v21  ;;  %6499 = vmatprep.mubr.bf16.mxu0 %v12408_v28 }
  0xc8   :  { %v10619_v25 = vcombine.high %v631_v17, %v635_v18  ;;  %v495_v26 = vld [vmem:[#allocation5 + $0x940] sm:$0xff]  ;;  %6469 = vmatprep.subr.bf16.mxu0 %v10491_v24  ;;  %v10618_v33 = vcombine.low %v631_v17, %v635_v18  ;;  %6540 = vmatprep.mubr.bf16.mxu1 %v12411_v31 }
  0xc9   :  { %v499_v27 = vld [vmem:[#allocation5 + $0x960] sm:$0xff] }
  0xca   :  { %v623_v29 = vld [vmem:[#allocation5 + $0xd40] sm:$0xff]  ;;  %v10483_v34 = vcombine.high %v495_v26, %v499_v27  ;;  %6510 = vmatprep.subr.bf16.mxu1 %v10619_v25  ;;  %v10482_v40 = vcombine.low %v495_v26, %v499_v27 }
  0xcb   :  { %v627_v30 = vld [vmem:[#allocation5 + $0xd60] sm:$0xff]  ;;  %6470 = vmatpush1.bf16.msra.mxu0 %v10490_v32  ;;  %6511 = vmatpush1.bf16.msra.mxu1 %v10618_v33 }
  0xcc   :  { %v487_v35 = vld [vmem:[#allocation5 + $0x900] sm:$0xff]  ;;  %v10611_v37 = vcombine.high %v623_v29, %v627_v30  ;;  %6471 = vmatprep.subr.bf16.mxu0 %v10483_v34  ;;  %v10610_v41 = vcombine.low %v623_v29, %v627_v30 }
  0xcd   :  { %v491_v36 = vld [vmem:[#allocation5 + $0x920] sm:$0xff] }
  0xce   :  { %v615_v38 = vld [vmem:[#allocation5 + $0xd00] sm:$0xff]  ;;  %v10475_v42 = vcombine.high %v487_v35, %v491_v36  ;;  %6512 = vmatprep.subr.bf16.mxu1 %v10611_v37  ;;  %v10474_v48 = vcombine.low %v487_v35, %v491_v36 }
  0xcf   :  { %v619_v39 = vld [vmem:[#allocation5 + $0xd20] sm:$0xff]  ;;  %6472 = vmatpush1.bf16.msra.mxu0 %v10482_v40  ;;  %6513 = vmatpush1.bf16.msra.mxu1 %v10610_v41 }
  0xd0   :  { %v479_v43 = vld [vmem:[#allocation5 + $0x8c0] sm:$0xff]  ;;  %v10603_v46 = vcombine.high %v615_v38, %v619_v39  ;;  %6473 = vmatprep.subr.bf16.mxu0 %v10475_v42  ;;  %v10602_v49 = vcombine.low %v615_v38, %v619_v39 }
  0xd1   :  { %v483_v44 = vld [vmem:[#allocation5 + $0x8e0] sm:$0xff] }
  0xd2   :  { %v607_v45 = vld [vmem:[#allocation5 + $0xcc0] sm:$0xff]  ;;  %v10467_v50 = vcombine.high %v479_v43, %v483_v44  ;;  %6514 = vmatprep.subr.bf16.mxu1 %v10603_v46  ;;  %v10466_v56 = vcombine.low %v479_v43, %v483_v44 }
  0xd3   :  { %v611_v47 = vld [vmem:[#allocation5 + $0xce0] sm:$0xff]  ;;  %6474 = vmatpush1.bf16.msra.mxu0 %v10474_v48  ;;  %6515 = vmatpush1.bf16.msra.mxu1 %v10602_v49 }
  0xd4   :  { %v471_v51 = vld [vmem:[#allocation5 + $0x880] sm:$0xff]  ;;  %v10595_v54 = vcombine.high %v607_v45, %v611_v47  ;;  %6475 = vmatprep.subr.bf16.mxu0 %v10467_v50  ;;  %v10594_v57 = vcombine.low %v607_v45, %v611_v47 }
  0xd5   :  { %v475_v52 = vld [vmem:[#allocation5 + $0x8a0] sm:$0xff] }
  0xd6   :  { %v599_v53 = vld [vmem:[#allocation5 + $0xc80] sm:$0xff]  ;;  %v10459_v60 = vcombine.high %v471_v51, %v475_v52  ;;  %6516 = vmatprep.subr.bf16.mxu1 %v10595_v54  ;;  %v10458_v2 = vcombine.low %v471_v51, %v475_v52 }
  0xd7   :  { %v603_v55 = vld [vmem:[#allocation5 + $0xca0] sm:$0xff]  ;;  %6476 = vmatpush1.bf16.msra.mxu0 %v10466_v56  ;;  %6517 = vmatpush1.bf16.msra.mxu1 %v10594_v57 }
  0xd8   :  { %v463_v61 = vld [vmem:[#allocation5 + $0x840] sm:$0xff]  ;;  %v10587_v0 = vcombine.high %v599_v53, %v603_v55  ;;  %6477 = vmatprep.subr.bf16.mxu0 %v10459_v60  ;;  %v10586_v3 = vcombine.low %v599_v53, %v603_v55 }
  0xd9   :  { %v467_v62 = vld [vmem:[#allocation5 + $0x860] sm:$0xff] }
  0xda   :  { %v591_v63 = vld [vmem:[#allocation5 + $0xc40] sm:$0xff]  ;;  %v10451_v4 = vcombine.high %v463_v61, %v467_v62  ;;  %6518 = vmatprep.subr.bf16.mxu1 %v10587_v0  ;;  %v10450_v10 = vcombine.low %v463_v61, %v467_v62 }
  0xdb   :  { %v595_v1 = vld [vmem:[#allocation5 + $0xc60] sm:$0xff]  ;;  %6478 = vmatpush1.bf16.msra.mxu0 %v10458_v2  ;;  %6519 = vmatpush1.bf16.msra.mxu1 %v10586_v3 }
  0xdc   :  { %v455_v5 = vld [vmem:[#allocation5 + $0x800] sm:$0xff]  ;;  %v10579_v8 = vcombine.high %v591_v63, %v595_v1  ;;  %6479 = vmatprep.subr.bf16.mxu0 %v10451_v4  ;;  %v10578_v11 = vcombine.low %v591_v63, %v595_v1 }
  0xdd   :  { %v459_v6 = vld [vmem:[#allocation5 + $0x820] sm:$0xff] }
  0xde   :  { %v583_v7 = vld [vmem:[#allocation5 + $0xc00] sm:$0xff]  ;;  %v10443_v12 = vcombine.high %v455_v5, %v459_v6  ;;  %6520 = vmatprep.subr.bf16.mxu1 %v10579_v8  ;;  %v10442_v19 = vcombine.low %v455_v5, %v459_v6 }
  0xdf   :  { %v587_v9 = vld [vmem:[#allocation5 + $0xc20] sm:$0xff]  ;;  %6480 = vmatpush1.bf16.msra.mxu0 %v10450_v10  ;;  %6521 = vmatpush1.bf16.msra.mxu1 %v10578_v11 }
  0xe0   :  { %v575_v13 = vld [vmem:[#allocation5 + $0xbc0] sm:$0xff]  ;;  %v10571_v17 = vcombine.high %v583_v7, %v587_v9  ;;  %6481 = vmatprep.subr.bf16.mxu0 %v10443_v12  ;;  %v10570_v21 = vcombine.low %v583_v7, %v587_v9 }
  0xe1   :  { %v579_v14 = vld [vmem:[#allocation5 + $0xbe0] sm:$0xff] }
  0xe2   :  { %v703_v15 = vld [vmem:[#allocation5 + $0xfc0] sm:$0xff]  ;;  %v10563_v22 = vcombine.high %v575_v13, %v579_v14  ;;  %6522 = vmatprep.subr.bf16.mxu1 %v10571_v17  ;;  %v10562_v29 = vcombine.low %v575_v13, %v579_v14 }
  0xe3   :  { %v707_v18 = vld [vmem:[#allocation5 + $0xfe0] sm:$0xff]  ;;  %6482 = vmatpush1.bf16.msra.mxu0 %v10442_v19  ;;  %6523 = vmatpush1.bf16.msra.mxu1 %v10570_v21 }
  0xe4   :  { %v567_v23 = vld [vmem:[#allocation5 + $0xb80] sm:$0xff]  ;;  %v10691_v26 = vcombine.high %v703_v15, %v707_v18  ;;  %6483 = vmatprep.subr.bf16.mxu0 %v10563_v22  ;;  %v10690_v30 = vcombine.low %v703_v15, %v707_v18 }
  0xe5   :  { %v571_v24 = vld [vmem:[#allocation5 + $0xba0] sm:$0xff] }
  0xe6   :  { %v695_v25 = vld [vmem:[#allocation5 + $0xf80] sm:$0xff]  ;;  %v10555_v32 = vcombine.high %v567_v23, %v571_v24  ;;  %6524 = vmatprep.subr.bf16.mxu1 %v10691_v26  ;;  %v10554_v38 = vcombine.low %v567_v23, %v571_v24 }
  0xe7   :  { %v699_v27 = vld [vmem:[#allocation5 + $0xfa0] sm:$0xff]  ;;  %6484 = vmatpush2.bf16.msra.mxu0 %v10562_v29  ;;  %6525 = vmatpush2.bf16.msra.mxu1 %v10690_v30 }
  0xe8   :  { %v559_v33 = vld [vmem:[#allocation5 + $0xb40] sm:$0xff]  ;;  %v10683_v36 = vcombine.high %v695_v25, %v699_v27  ;;  %6485 = vmatprep.subr.bf16.mxu0 %v10555_v32  ;;  %v10682_v39 = vcombine.low %v695_v25, %v699_v27  ;;  %v173_v27 = vld [vmem:[#allocation2 + $0x30] sm:$0xff] }
  0xe9   :  { %v563_v34 = vld [vmem:[#allocation5 + $0xb60] sm:$0xff] }
  0xea   :  { %v687_v35 = vld [vmem:[#allocation5 + $0xf40] sm:$0xff]  ;;  %v10547_v40 = vcombine.high %v559_v33, %v563_v34  ;;  %6526 = vmatprep.subr.bf16.mxu1 %v10683_v36  ;;  %v10546_v46 = vcombine.low %v559_v33, %v563_v34 }
  0xeb   :  { %v691_v37 = vld [vmem:[#allocation5 + $0xf60] sm:$0xff]  ;;  %6486 = vmatpush2.bf16.msra.mxu0 %v10554_v38  ;;  %6527 = vmatpush2.bf16.msra.mxu1 %v10682_v39  ;;  %v176_v38 = vld [vmem:[#allocation2 + $0x48] sm:$0xff] }
  0xec   :  { %v551_v41 = vld [vmem:[#allocation5 + $0xb00] sm:$0xff]  ;;  %v10675_v44 = vcombine.high %v687_v35, %v691_v37  ;;  %6487 = vmatprep.subr.bf16.mxu0 %v10547_v40  ;;  %v10674_v47 = vcombine.low %v687_v35, %v691_v37  ;;  %v12418_v40 = vpack.c.bf16 %v173_v27, %v173_v27 }
  0xed   :  { %v555_v42 = vld [vmem:[#allocation5 + $0xb20] sm:$0xff] }
  0xee   :  { %v679_v43 = vld [vmem:[#allocation5 + $0xf00] sm:$0xff]  ;;  %v10539_v48 = vcombine.high %v551_v41, %v555_v42  ;;  %6528 = vmatprep.subr.bf16.mxu1 %v10675_v44  ;;  %v10538_v54 = vcombine.low %v551_v41, %v555_v42  ;;  %v178_v42 = vld [vmem:[#allocation2 + $0x58] sm:$0xff] }
  0xef   :  { %v683_v45 = vld [vmem:[#allocation5 + $0xf20] sm:$0xff]  ;;  %6488 = vmatpush2.bf16.msra.mxu0 %v10546_v46  ;;  %6529 = vmatpush2.bf16.msra.mxu1 %v10674_v47 }
  0xf0   :  { %v543_v49 = vld [vmem:[#allocation5 + $0xac0] sm:$0xff]  ;;  %v10667_v52 = vcombine.high %v679_v43, %v683_v45  ;;  %6489 = vmatprep.subr.bf16.mxu0 %v10539_v48  ;;  %v10666_v55 = vcombine.low %v679_v43, %v683_v45 }
  0xf1   :  { %v547_v50 = vld [vmem:[#allocation5 + $0xae0] sm:$0xff] }
  0xf2   :  { %v671_v51 = vld [vmem:[#allocation5 + $0xec0] sm:$0xff]  ;;  %v10531_v56 = vcombine.high %v543_v49, %v547_v50  ;;  %6530 = vmatprep.subr.bf16.mxu1 %v10667_v52  ;;  %v10530_v0 = vcombine.low %v543_v49, %v547_v50  ;;  %v12420_v49 = vpack.c.bf16 %v176_v38, %v176_v38 }
  0xf3   :  { %v675_v53 = vld [vmem:[#allocation5 + $0xee0] sm:$0xff]  ;;  %6490 = vmatpush2.bf16.msra.mxu0 %v10538_v54  ;;  %6531 = vmatpush2.bf16.msra.mxu1 %v10666_v55 }
  0xf4   :  { %v535_v57 = vld [vmem:[#allocation5 + $0xa80] sm:$0xff]  ;;  %v10659_v62 = vcombine.high %v671_v51, %v675_v53  ;;  %6491 = vmatprep.subr.bf16.mxu0 %v10531_v56  ;;  %v10658_v1 = vcombine.low %v671_v51, %v675_v53  ;;  %v12423_v51 = vpack.c.bf16 %v178_v42, %v178_v42 }
  0xf5   :  { %v539_v60 = vld [vmem:[#allocation5 + $0xaa0] sm:$0xff] }
  0xf6   :  { %v663_v61 = vld [vmem:[#allocation5 + $0xe80] sm:$0xff]  ;;  %v10523_v2 = vcombine.high %v535_v57, %v539_v60  ;;  %6532 = vmatprep.subr.bf16.mxu1 %v10659_v62  ;;  %v10522_v8 = vcombine.low %v535_v57, %v539_v60 }
  0xf7   :  { %v667_v63 = vld [vmem:[#allocation5 + $0xea0] sm:$0xff]  ;;  %6492 = vmatpush2.bf16.msra.mxu0 %v10530_v0  ;;  %6533 = vmatpush2.bf16.msra.mxu1 %v10658_v1 }
  0xf8   :  { %v527_v3 = vld [vmem:[#allocation5 + $0xa40] sm:$0xff]  ;;  %v10651_v6 = vcombine.high %v663_v61, %v667_v63  ;;  %6493 = vmatprep.subr.bf16.mxu0 %v10523_v2  ;;  %v10650_v9 = vcombine.low %v663_v61, %v667_v63 }
  0xf9   :  { %v531_v4 = vld [vmem:[#allocation5 + $0xa60] sm:$0xff] }
  0xfa   :  { %v655_v5 = vld [vmem:[#allocation5 + $0xe40] sm:$0xff]  ;;  %v10515_v10 = vcombine.high %v527_v3, %v531_v4  ;;  %6534 = vmatprep.subr.bf16.mxu1 %v10651_v6  ;;  %v10514_v17 = vcombine.low %v527_v3, %v531_v4 }
  0xfb   :  { %v659_v7 = vld [vmem:[#allocation5 + $0xe60] sm:$0xff]  ;;  %6494 = vmatpush2.bf16.msra.mxu0 %v10522_v8  ;;  %6535 = vmatpush2.bf16.msra.mxu1 %v10650_v9 }
  0xfc   :  { %v519_v11 = vld [vmem:[#allocation5 + $0xa00] sm:$0xff]  ;;  %v10643_v14 = vcombine.high %v655_v5, %v659_v7  ;;  %6495 = vmatprep.subr.bf16.mxu0 %v10515_v10  ;;  %v10642_v18 = vcombine.low %v655_v5, %v659_v7 }
  0xfd   :  { %v523_v12 = vld [vmem:[#allocation5 + $0xa20] sm:$0xff] }
  0xfe   :  { %v647_v13 = vld [vmem:[#allocation5 + $0xe00] sm:$0xff]  ;;  %v10507_v19 = vcombine.high %v519_v11, %v523_v12  ;;  %6536 = vmatprep.subr.bf16.mxu1 %v10643_v14  ;;  %v10506_v29 = vcombine.low %v519_v11, %v523_v12 }
  0xff   :  { %v651_v15 = vld [vmem:[#allocation5 + $0xe20] sm:$0xff]  ;;  %6496 = vmatpush2.bf16.msra.mxu0 %v10514_v17  ;;  %6537 = vmatpush2.bf16.msra.mxu1 %v10642_v18 }
 0x100   :  { %v767_v21 = vld [vmem:[#allocation5 + $0x11c0] sm:$0xff]  ;;  %v10635_v24 = vcombine.high %v647_v13, %v651_v15  ;;  %6497 = vmatprep.subr.bf16.mxu0 %v10507_v19  ;;  %v10634_v32 = vcombine.low %v647_v13, %v651_v15 }
 0x101   :  { %v771_v22 = vld [vmem:[#allocation5 + $0x11e0] sm:$0xff] }
 0x102   :  { %v895_v23 = vld [vmem:[#allocation5 + $0x15c0] sm:$0xff]  ;;  %v10755_v33 = vcombine.high %v767_v21, %v771_v22  ;;  %6538 = vmatprep.subr.bf16.mxu1 %v10635_v24  ;;  %v10754_v41 = vcombine.low %v767_v21, %v771_v22 }
 0x103   :  { %v171_v25 = vld [vmem:[#allocation2 + $0x20] sm:$0xff]  ;;  %6498 = vmatpush2.bf16.msra.mxu0 %v10506_v29  ;;  %6539 = vmatpush2.bf16.msra.mxu1 %v10634_v32 }
 0x104   :  { %v899_v26 = vld [vmem:[#allocation5 + $0x15e0] sm:$0xff]  ;;  %v12416_v39 = vpack.c.bf16 %v171_v25, %v171_v25  ;;  %6549 = vmatprep.subr.bf16.mxu0 %v10755_v33 }
 0x105   :  { %v759_v30 = vld [vmem:[#allocation5 + $0x1180] sm:$0xff]  ;;  %v10883_v37 = vcombine.high %v895_v23, %v899_v26  ;;  %v10882_v43 = vcombine.low %v895_v23, %v899_v26 }
 0x106   :  { %v763_v34 = vld [vmem:[#allocation5 + $0x11a0] sm:$0xff]  ;;  %6500 = vmatmul.mubr.bf16.vlgmr.msra.gmra.mxu0 %v12416_v39  ;;  %6541 = vmatmul.mubr.bf16.vlgmr.msra.gmra.mxu1 %v12418_v40 }
 0x107   :  { %v887_v35 = vld [vmem:[#allocation5 + $0x1580] sm:$0xff]  ;;  %v10747_v44 = vcombine.high %v759_v30, %v763_v34  ;;  %6590 = vmatprep.subr.bf16.mxu1 %v10883_v37  ;;  %6550 = vmatpush1.bf16.msra.mxu0 %v10754_v41  ;;  %v10746_v52 = vcombine.low %v759_v30, %v763_v34 }
 0x108   :  { %v891_v36 = vld [vmem:[#allocation5 + $0x15a0] sm:$0xff]  ;;  %6591 = vmatpush1.bf16.msra.mxu1 %v10882_v43  ;;  %6581 = vmatprep.mubr.bf16.mxu0 %v12420_v49 }
 0x109   :  { %v10875_v45 = vcombine.high %v887_v35, %v891_v36  ;;  %v751_v46 = vld [vmem:[#allocation5 + $0x1140] sm:$0xff]  ;;  %6551 = vmatprep.subr.bf16.mxu0 %v10747_v44  ;;  %v10874_v53 = vcombine.low %v887_v35, %v891_v36  ;;  %6622 = vmatprep.mubr.bf16.mxu1 %v12423_v51 }
 0x10a   :  { %v755_v47 = vld [vmem:[#allocation5 + $0x1160] sm:$0xff] }
 0x10b   :  { %v879_v48 = vld [vmem:[#allocation5 + $0x1540] sm:$0xff]  ;;  %v10739_v54 = vcombine.high %v751_v46, %v755_v47  ;;  %6592 = vmatprep.subr.bf16.mxu1 %v10875_v45  ;;  %6552 = vmatpush1.bf16.msra.mxu0 %v10746_v52  ;;  %v10738_v62 = vcombine.low %v751_v46, %v755_v47 }
 0x10c   :  { %v883_v50 = vld [vmem:[#allocation5 + $0x1560] sm:$0xff]  ;;  %6593 = vmatpush1.bf16.msra.mxu1 %v10874_v53 }
 0x10d   :  { %v743_v55 = vld [vmem:[#allocation5 + $0x1100] sm:$0xff]  ;;  %v10867_v60 = vcombine.high %v879_v48, %v883_v50  ;;  %6553 = vmatprep.subr.bf16.mxu0 %v10739_v54  ;;  %v10866_v63 = vcombine.low %v879_v48, %v883_v50 }
 0x10e   :  { %v747_v56 = vld [vmem:[#allocation5 + $0x1120] sm:$0xff] }
 0x10f   :  { %v871_v57 = vld [vmem:[#allocation5 + $0x1500] sm:$0xff]  ;;  %v10731_v0 = vcombine.high %v743_v55, %v747_v56  ;;  %6594 = vmatprep.subr.bf16.mxu1 %v10867_v60  ;;  %6554 = vmatpush1.bf16.msra.mxu0 %v10738_v62  ;;  %v10730_v6 = vcombine.low %v743_v55, %v747_v56 }
 0x110   :  { %v875_v61 = vld [vmem:[#allocation5 + $0x1520] sm:$0xff]  ;;  %6595 = vmatpush1.bf16.msra.mxu1 %v10866_v63 }
 0x111   :  { %v735_v1 = vld [vmem:[#allocation5 + $0x10c0] sm:$0xff]  ;;  %v10859_v4 = vcombine.high %v871_v57, %v875_v61  ;;  %6555 = vmatprep.subr.bf16.mxu0 %v10731_v0  ;;  %v10858_v7 = vcombine.low %v871_v57, %v875_v61 }
 0x112   :  { %v739_v2 = vld [vmem:[#allocation5 + $0x10e0] sm:$0xff] }
 0x113   :  { %v863_v3 = vld [vmem:[#allocation5 + $0x14c0] sm:$0xff]  ;;  %v10723_v8 = vcombine.high %v735_v1, %v739_v2  ;;  %6596 = vmatprep.subr.bf16.mxu1 %v10859_v4  ;;  %6556 = vmatpush1.bf16.msra.mxu0 %v10730_v6  ;;  %v10722_v14 = vcombine.low %v735_v1, %v739_v2 }
 0x114   :  { %v867_v5 = vld [vmem:[#allocation5 + $0x14e0] sm:$0xff]  ;;  %6597 = vmatpush1.bf16.msra.mxu1 %v10858_v7 }
 0x115   :  { %v727_v9 = vld [vmem:[#allocation5 + $0x1080] sm:$0xff]  ;;  %v10851_v12 = vcombine.high %v863_v3, %v867_v5  ;;  %6557 = vmatprep.subr.bf16.mxu0 %v10723_v8  ;;  %v10850_v15 = vcombine.low %v863_v3, %v867_v5 }
 0x116   :  { %v731_v10 = vld [vmem:[#allocation5 + $0x10a0] sm:$0xff] }
 0x117   :  { %v855_v11 = vld [vmem:[#allocation5 + $0x1480] sm:$0xff]  ;;  %v10715_v17 = vcombine.high %v727_v9, %v731_v10  ;;  %6598 = vmatprep.subr.bf16.mxu1 %v10851_v12  ;;  %6558 = vmatpush1.bf16.msra.mxu0 %v10722_v14  ;;  %v10714_v24 = vcombine.low %v727_v9, %v731_v10 }
 0x118   :  { %v859_v13 = vld [vmem:[#allocation5 + $0x14a0] sm:$0xff]  ;;  %6599 = vmatpush1.bf16.msra.mxu1 %v10850_v15 }
 0x119   :  { %v719_v18 = vld [vmem:[#allocation5 + $0x1040] sm:$0xff]  ;;  %v10843_v22 = vcombine.high %v855_v11, %v859_v13  ;;  %6559 = vmatprep.subr.bf16.mxu0 %v10715_v17  ;;  %v10842_v25 = vcombine.low %v855_v11, %v859_v13 }
 0x11a   :  { %v723_v19 = vld [vmem:[#allocation5 + $0x1060] sm:$0xff] }
 0x11b   :  { %v847_v21 = vld [vmem:[#allocation5 + $0x1440] sm:$0xff]  ;;  %v10707_v26 = vcombine.high %v719_v18, %v723_v19  ;;  %6600 = vmatprep.subr.bf16.mxu1 %v10843_v22  ;;  %6560 = vmatpush1.bf16.msra.mxu0 %v10714_v24  ;;  %v10706_v34 = vcombine.low %v719_v18, %v723_v19 }
 0x11c   :  { %v851_v23 = vld [vmem:[#allocation5 + $0x1460] sm:$0xff]  ;;  %6601 = vmatpush1.bf16.msra.mxu1 %v10842_v25 }
 0x11d   :  { %v711_v27 = vld [vmem:[#allocation5 + $0x1000] sm:$0xff]  ;;  %v10835_v32 = vcombine.high %v847_v21, %v851_v23  ;;  %6561 = vmatprep.subr.bf16.mxu0 %v10707_v26  ;;  %v10834_v35 = vcombine.low %v847_v21, %v851_v23 }
 0x11e   :  { %v715_v29 = vld [vmem:[#allocation5 + $0x1020] sm:$0xff] }
 0x11f   :  { %v839_v30 = vld [vmem:[#allocation5 + $0x1400] sm:$0xff]  ;;  %v10699_v36 = vcombine.high %v711_v27, %v715_v29  ;;  %6602 = vmatprep.subr.bf16.mxu1 %v10835_v32  ;;  %6562 = vmatpush1.bf16.msra.mxu0 %v10706_v34  ;;  %v10698_v44 = vcombine.low %v711_v27, %v715_v29 }
 0x120   :  { %v843_v33 = vld [vmem:[#allocation5 + $0x1420] sm:$0xff]  ;;  %6603 = vmatpush1.bf16.msra.mxu1 %v10834_v35 }
 0x121   :  { %v831_v37 = vld [vmem:[#allocation5 + $0x13c0] sm:$0xff]  ;;  %v10827_v42 = vcombine.high %v839_v30, %v843_v33  ;;  %6563 = vmatprep.subr.bf16.mxu0 %v10699_v36  ;;  %v10826_v45 = vcombine.low %v839_v30, %v843_v33 }
 0x122   :  { %v835_v38 = vld [vmem:[#allocation5 + $0x13e0] sm:$0xff] }
 0x123   :  { %v959_v41 = vld [vmem:[#allocation5 + $0x17c0] sm:$0xff]  ;;  %v10819_v46 = vcombine.high %v831_v37, %v835_v38  ;;  %6604 = vmatprep.subr.bf16.mxu1 %v10827_v42  ;;  %6564 = vmatpush1.bf16.msra.mxu0 %v10698_v44  ;;  %v10818_v54 = vcombine.low %v831_v37, %v835_v38 }
 0x124   :  { %v963_v43 = vld [vmem:[#allocation5 + $0x17e0] sm:$0xff]  ;;  %6605 = vmatpush1.bf16.msra.mxu1 %v10826_v45 }
 0x125   :  { %v823_v47 = vld [vmem:[#allocation5 + $0x1380] sm:$0xff]  ;;  %v10947_v52 = vcombine.high %v959_v41, %v963_v43  ;;  %6565 = vmatprep.subr.bf16.mxu0 %v10819_v46  ;;  %v10946_v55 = vcombine.low %v959_v41, %v963_v43 }
 0x126   :  { %v827_v48 = vld [vmem:[#allocation5 + $0x13a0] sm:$0xff] }
 0x127   :  { %v951_v50 = vld [vmem:[#allocation5 + $0x1780] sm:$0xff]  ;;  %v10811_v56 = vcombine.high %v823_v47, %v827_v48  ;;  %6606 = vmatprep.subr.bf16.mxu1 %v10947_v52  ;;  %6566 = vmatpush2.bf16.msra.mxu0 %v10818_v54  ;;  %v10810_v0 = vcombine.low %v823_v47, %v827_v48 }
 0x128   :  { %v955_v53 = vld [vmem:[#allocation5 + $0x17a0] sm:$0xff]  ;;  %6607 = vmatpush2.bf16.msra.mxu1 %v10946_v55 }
 0x129   :  { %v815_v57 = vld [vmem:[#allocation5 + $0x1340] sm:$0xff]  ;;  %v10939_v62 = vcombine.high %v951_v50, %v955_v53  ;;  %6567 = vmatprep.subr.bf16.mxu0 %v10811_v56  ;;  %v10938_v1 = vcombine.low %v951_v50, %v955_v53 }
 0x12a   :  { %v819_v60 = vld [vmem:[#allocation5 + $0x1360] sm:$0xff] }
 0x12b   :  { %v943_v61 = vld [vmem:[#allocation5 + $0x1740] sm:$0xff]  ;;  %v10803_v2 = vcombine.high %v815_v57, %v819_v60  ;;  %6608 = vmatprep.subr.bf16.mxu1 %v10939_v62  ;;  %6568 = vmatpush2.bf16.msra.mxu0 %v10810_v0  ;;  %v10802_v8 = vcombine.low %v815_v57, %v819_v60  ;;  %v177_v57 = vld [vmem:[#allocation2 + $0x50] sm:$0xff] }
 0x12c   :  { %v947_v63 = vld [vmem:[#allocation5 + $0x1760] sm:$0xff]  ;;  %6609 = vmatpush2.bf16.msra.mxu1 %v10938_v1 }
 0x12d   :  { %v807_v3 = vld [vmem:[#allocation5 + $0x1300] sm:$0xff]  ;;  %v10931_v6 = vcombine.high %v943_v61, %v947_v63  ;;  %6569 = vmatprep.subr.bf16.mxu0 %v10803_v2  ;;  %v10930_v9 = vcombine.low %v943_v61, %v947_v63 }
 0x12e   :  { %v811_v4 = vld [vmem:[#allocation5 + $0x1320] sm:$0xff] }
 0x12f   :  { %v935_v5 = vld [vmem:[#allocation5 + $0x1700] sm:$0xff]  ;;  %v10795_v10 = vcombine.high %v807_v3, %v811_v4  ;;  %6610 = vmatprep.subr.bf16.mxu1 %v10931_v6  ;;  %6570 = vmatpush2.bf16.msra.mxu0 %v10802_v8  ;;  %v10794_v17 = vcombine.low %v807_v3, %v811_v4  ;;  %v180_v3 = vld [vmem:[#allocation2 + $0x68] sm:$0xff] }
 0x130   :  { %v939_v7 = vld [vmem:[#allocation5 + $0x1720] sm:$0xff]  ;;  %6611 = vmatpush2.bf16.msra.mxu1 %v10930_v9 }
 0x131   :  { %v799_v11 = vld [vmem:[#allocation5 + $0x12c0] sm:$0xff]  ;;  %v10923_v14 = vcombine.high %v935_v5, %v939_v7  ;;  %6571 = vmatprep.subr.bf16.mxu0 %v10795_v10  ;;  %v10922_v18 = vcombine.low %v935_v5, %v939_v7  ;;  %v182_v5 = vld [vmem:[#allocation2 + $0x78] sm:$0xff]  ;;  %v12430_v7 = vpack.c.bf16 %v177_v57, %v177_v57 }
 0x132   :  { %v803_v12 = vld [vmem:[#allocation5 + $0x12e0] sm:$0xff] }
 0x133   :  { %v927_v13 = vld [vmem:[#allocation5 + $0x16c0] sm:$0xff]  ;;  %v10787_v19 = vcombine.high %v799_v11, %v803_v12  ;;  %6612 = vmatprep.subr.bf16.mxu1 %v10923_v14  ;;  %6572 = vmatpush2.bf16.msra.mxu0 %v10794_v17  ;;  %v10786_v26 = vcombine.low %v799_v11, %v803_v12  ;;  %v12432_v17 = vpack.c.bf16 %v180_v3, %v180_v3 }
 0x134   :  { %v931_v15 = vld [vmem:[#allocation5 + $0x16e0] sm:$0xff]  ;;  %6613 = vmatpush2.bf16.msra.mxu1 %v10922_v18  ;;  %v12435_v18 = vpack.c.bf16 %v182_v5, %v182_v5 }
 0x135   :  { %v791_v21 = vld [vmem:[#allocation5 + $0x1280] sm:$0xff]  ;;  %v10915_v24 = vcombine.high %v927_v13, %v931_v15  ;;  %6573 = vmatprep.subr.bf16.mxu0 %v10787_v19  ;;  %v10914_v27 = vcombine.low %v927_v13, %v931_v15 }
 0x136   :  { %v795_v22 = vld [vmem:[#allocation5 + $0x12a0] sm:$0xff] }
 0x137   :  { %v919_v23 = vld [vmem:[#allocation5 + $0x1680] sm:$0xff]  ;;  %v10779_v29 = vcombine.high %v791_v21, %v795_v22  ;;  %6614 = vmatprep.subr.bf16.mxu1 %v10915_v24  ;;  %6574 = vmatpush2.bf16.msra.mxu0 %v10786_v26  ;;  %v10778_v36 = vcombine.low %v791_v21, %v795_v22 }
 0x138   :  { %v923_v25 = vld [vmem:[#allocation5 + $0x16a0] sm:$0xff]  ;;  %6615 = vmatpush2.bf16.msra.mxu1 %v10914_v27 }
 0x139   :  { %v783_v30 = vld [vmem:[#allocation5 + $0x1240] sm:$0xff]  ;;  %v10907_v34 = vcombine.high %v919_v23, %v923_v25  ;;  %6575 = vmatprep.subr.bf16.mxu0 %v10779_v29  ;;  %v10906_v37 = vcombine.low %v919_v23, %v923_v25 }
 0x13a   :  { %v787_v32 = vld [vmem:[#allocation5 + $0x1260] sm:$0xff] }
 0x13b   :  { %v911_v33 = vld [vmem:[#allocation5 + $0x1640] sm:$0xff]  ;;  %v10771_v38 = vcombine.high %v783_v30, %v787_v32  ;;  %6616 = vmatprep.subr.bf16.mxu1 %v10907_v34  ;;  %6576 = vmatpush2.bf16.msra.mxu0 %v10778_v36  ;;  %v10770_v46 = vcombine.low %v783_v30, %v787_v32 }
 0x13c   :  { %v915_v35 = vld [vmem:[#allocation5 + $0x1660] sm:$0xff]  ;;  %6617 = vmatpush2.bf16.msra.mxu1 %v10906_v37 }
 0x13d   :  { %v775_v41 = vld [vmem:[#allocation5 + $0x1200] sm:$0xff]  ;;  %v10899_v44 = vcombine.high %v911_v33, %v915_v35  ;;  %6577 = vmatprep.subr.bf16.mxu0 %v10771_v38  ;;  %v10898_v47 = vcombine.low %v911_v33, %v915_v35 }
 0x13e   :  { %v779_v42 = vld [vmem:[#allocation5 + $0x1220] sm:$0xff] }
 0x13f   :  { %v903_v43 = vld [vmem:[#allocation5 + $0x1600] sm:$0xff]  ;;  %v10763_v48 = vcombine.high %v775_v41, %v779_v42  ;;  %6618 = vmatprep.subr.bf16.mxu1 %v10899_v44  ;;  %6578 = vmatpush2.bf16.msra.mxu0 %v10770_v46  ;;  %v10762_v60 = vcombine.low %v775_v41, %v779_v42 }
 0x140   :  { %v907_v45 = vld [vmem:[#allocation5 + $0x1620] sm:$0xff]  ;;  %6619 = vmatpush2.bf16.msra.mxu1 %v10898_v47 }
 0x141   :  { %v1023_v50 = vld [vmem:[#allocation5 + $0x19c0] sm:$0xff]  ;;  %v10891_v54 = vcombine.high %v903_v43, %v907_v45  ;;  %6579 = vmatprep.subr.bf16.mxu0 %v10763_v48  ;;  %v10890_v63 = vcombine.low %v903_v43, %v907_v45 }
 0x142   :  { %v1027_v52 = vld [vmem:[#allocation5 + $0x19e0] sm:$0xff] }
 0x143   :  { %v1151_v53 = vld [vmem:[#allocation5 + $0x1dc0] sm:$0xff]  ;;  %v11011_v0 = vcombine.high %v1023_v50, %v1027_v52  ;;  %6620 = vmatprep.subr.bf16.mxu1 %v10891_v54  ;;  %6580 = vmatpush2.bf16.msra.mxu0 %v10762_v60  ;;  %v11010_v8 = vcombine.low %v1023_v50, %v1027_v52 }
 0x144   :  { %v175_v55 = vld [vmem:[#allocation2 + $0x40] sm:$0xff]  ;;  %6621 = vmatpush2.bf16.msra.mxu1 %v10890_v63 }
 0x145   :  { %v1155_v56 = vld [vmem:[#allocation5 + $0x1de0] sm:$0xff]  ;;  %v12428_v6 = vpack.c.bf16 %v175_v55, %v175_v55  ;;  %6631 = vmatprep.subr.bf16.mxu0 %v11011_v0 }
 0x146   :  { %v1015_v61 = vld [vmem:[#allocation5 + $0x1980] sm:$0xff]  ;;  %v11139_v4 = vcombine.high %v1151_v53, %v1155_v56  ;;  %v11138_v9 = vcombine.low %v1151_v53, %v1155_v56 }
 0x147   :  { %v1019_v62 = vld [vmem:[#allocation5 + $0x19a0] sm:$0xff]  ;;  %6582 = vmatmul.mubr.bf16.vlgmr.msra.gmra.mxu0 %v12428_v6  ;;  %6623 = vmatmul.mubr.bf16.vlgmr.msra.gmra.mxu1 %v12430_v7 }
 0x148   :  { %v1143_v1 = vld [vmem:[#allocation5 + $0x1d80] sm:$0xff]  ;;  %v11003_v10 = vcombine.high %v1015_v61, %v1019_v62  ;;  %6672 = vmatprep.subr.bf16.mxu1 %v11139_v4  ;;  %6632 = vmatpush1.bf16.msra.mxu0 %v11010_v8  ;;  %v11002_v19 = vcombine.low %v1015_v61, %v1019_v62 }
 0x149   :  { %v1147_v2 = vld [vmem:[#allocation5 + $0x1da0] sm:$0xff]  ;;  %6673 = vmatpush1.bf16.msra.mxu1 %v11138_v9  ;;  %6663 = vmatprep.mubr.bf16.mxu0 %v12432_v17 }
 0x14a   :  { %v1007_v11 = vld [vmem:[#allocation5 + $0x1940] sm:$0xff]  ;;  %v11131_v14 = vcombine.high %v1143_v1, %v1147_v2  ;;  %6633 = vmatprep.subr.bf16.mxu0 %v11003_v10  ;;  %v11130_v21 = vcombine.low %v1143_v1, %v1147_v2  ;;  %6704 = vmatprep.mubr.bf16.mxu1 %v12435_v18 }
 0x14b   :  { %v1011_v12 = vld [vmem:[#allocation5 + $0x1960] sm:$0xff] }
 0x14c   :  { %v1135_v13 = vld [vmem:[#allocation5 + $0x1d40] sm:$0xff]  ;;  %v10995_v22 = vcombine.high %v1007_v11, %v1011_v12  ;;  %6674 = vmatprep.subr.bf16.mxu1 %v11131_v14  ;;  %6634 = vmatpush1.bf16.msra.mxu0 %v11002_v19  ;;  %v10994_v29 = vcombine.low %v1007_v11, %v1011_v12 }
 0x14d   :  { %v1139_v15 = vld [vmem:[#allocation5 + $0x1d60] sm:$0xff]  ;;  %6675 = vmatpush1.bf16.msra.mxu1 %v11130_v21 }
 0x14e   :  { %v999_v23 = vld [vmem:[#allocation5 + $0x1900] sm:$0xff]  ;;  %v11123_v26 = vcombine.high %v1135_v13, %v1139_v15  ;;  %6635 = vmatprep.subr.bf16.mxu0 %v10995_v22  ;;  %v11122_v30 = vcombine.low %v1135_v13, %v1139_v15 }
 0x14f   :  { %v1003_v24 = vld [vmem:[#allocation5 + $0x1920] sm:$0xff] }
 0x150   :  { %v1127_v25 = vld [vmem:[#allocation5 + $0x1d00] sm:$0xff]  ;;  %v10987_v32 = vcombine.high %v999_v23, %v1003_v24  ;;  %6676 = vmatprep.subr.bf16.mxu1 %v11123_v26  ;;  %6636 = vmatpush1.bf16.msra.mxu0 %v10994_v29  ;;  %v10986_v38 = vcombine.low %v999_v23, %v1003_v24 }
 0x151   :  { %v1131_v27 = vld [vmem:[#allocation5 + $0x1d20] sm:$0xff]  ;;  %6677 = vmatpush1.bf16.msra.mxu1 %v11122_v30 }
 0x152   :  { %v991_v33 = vld [vmem:[#allocation5 + $0x18c0] sm:$0xff]  ;;  %v11115_v36 = vcombine.high %v1127_v25, %v1131_v27  ;;  %6637 = vmatprep.subr.bf16.mxu0 %v10987_v32  ;;  %v11114_v41 = vcombine.low %v1127_v25, %v1131_v27 }
 0x153   :  { %v995_v34 = vld [vmem:[#allocation5 + $0x18e0] sm:$0xff] }
 0x154   :  { %v1119_v35 = vld [vmem:[#allocation5 + $0x1cc0] sm:$0xff]  ;;  %v10979_v42 = vcombine.high %v991_v33, %v995_v34  ;;  %6678 = vmatprep.subr.bf16.mxu1 %v11115_v36  ;;  %6638 = vmatpush1.bf16.msra.mxu0 %v10986_v38  ;;  %v10978_v48 = vcombine.low %v991_v33, %v995_v34 }
 0x155   :  { %v1123_v37 = vld [vmem:[#allocation5 + $0x1ce0] sm:$0xff]  ;;  %6679 = vmatpush1.bf16.msra.mxu1 %v11114_v41 }
 0x156   :  { %v983_v43 = vld [vmem:[#allocation5 + $0x1880] sm:$0xff]  ;;  %v11107_v46 = vcombine.high %v1119_v35, %v1123_v37  ;;  %6639 = vmatprep.subr.bf16.mxu0 %v10979_v42  ;;  %v11106_v50 = vcombine.low %v1119_v35, %v1123_v37 }
 0x157   :  { %v987_v44 = vld [vmem:[#allocation5 + $0x18a0] sm:$0xff] }
 0x158   :  { %v1111_v45 = vld [vmem:[#allocation5 + $0x1c80] sm:$0xff]  ;;  %v10971_v52 = vcombine.high %v983_v43, %v987_v44  ;;  %6680 = vmatprep.subr.bf16.mxu1 %v11107_v46  ;;  %6640 = vmatpush1.bf16.msra.mxu0 %v10978_v48  ;;  %v10970_v60 = vcombine.low %v983_v43, %v987_v44 }
 0x159   :  { %v1115_v47 = vld [vmem:[#allocation5 + $0x1ca0] sm:$0xff]  ;;  %6681 = vmatpush1.bf16.msra.mxu1 %v11106_v50 }
 0x15a   :  { %v975_v53 = vld [vmem:[#allocation5 + $0x1840] sm:$0xff]  ;;  %v11099_v56 = vcombine.high %v1111_v45, %v1115_v47  ;;  %6641 = vmatprep.subr.bf16.mxu0 %v10971_v52  ;;  %v11098_v61 = vcombine.low %v1111_v45, %v1115_v47 }
 0x15b   :  { %v979_v54 = vld [vmem:[#allocation5 + $0x1860] sm:$0xff] }
 0x15c   :  { %v1103_v55 = vld [vmem:[#allocation5 + $0x1c40] sm:$0xff]  ;;  %v10963_v62 = vcombine.high %v975_v53, %v979_v54  ;;  %6682 = vmatprep.subr.bf16.mxu1 %v11099_v56  ;;  %6642 = vmatpush1.bf16.msra.mxu0 %v10970_v60  ;;  %v10962_v4 = vcombine.low %v975_v53, %v979_v54 }
 0x15d   :  { %v1107_v57 = vld [vmem:[#allocation5 + $0x1c60] sm:$0xff]  ;;  %6683 = vmatpush1.bf16.msra.mxu1 %v11098_v61 }
 0x15e   :  { %v967_v63 = vld [vmem:[#allocation5 + $0x1800] sm:$0xff]  ;;  %v11091_v2 = vcombine.high %v1103_v55, %v1107_v57  ;;  %6643 = vmatprep.subr.bf16.mxu0 %v10963_v62  ;;  %v11090_v5 = vcombine.low %v1103_v55, %v1107_v57 }
 0x15f   :  { %v971_v0 = vld [vmem:[#allocation5 + $0x1820] sm:$0xff] }
 0x160   :  { %v1095_v1 = vld [vmem:[#allocation5 + $0x1c00] sm:$0xff]  ;;  %v10955_v8 = vcombine.high %v967_v63, %v971_v0  ;;  %6684 = vmatprep.subr.bf16.mxu1 %v11091_v2  ;;  %6644 = vmatpush1.bf16.msra.mxu0 %v10962_v4  ;;  %v10954_v14 = vcombine.low %v967_v63, %v971_v0 }
 0x161   :  { %v1099_v3 = vld [vmem:[#allocation5 + $0x1c20] sm:$0xff]  ;;  %6685 = vmatpush1.bf16.msra.mxu1 %v11090_v5 }
 0x162   :  { %v1087_v9 = vld [vmem:[#allocation5 + $0x1bc0] sm:$0xff]  ;;  %v11083_v12 = vcombine.high %v1095_v1, %v1099_v3  ;;  %6645 = vmatprep.subr.bf16.mxu0 %v10955_v8  ;;  %v11082_v15 = vcombine.low %v1095_v1, %v1099_v3 }
 0x163   :  { %v1091_v10 = vld [vmem:[#allocation5 + $0x1be0] sm:$0xff] }
 0x164   :  { %v1215_v11 = vld [vmem:[#allocation5 + $0x1fc0] sm:$0xff]  ;;  %v11075_v19 = vcombine.high %v1087_v9, %v1091_v10  ;;  %6686 = vmatprep.subr.bf16.mxu1 %v11083_v12  ;;  %6646 = vmatpush1.bf16.msra.mxu0 %v10954_v14  ;;  %v11074_v26 = vcombine.low %v1087_v9, %v1091_v10 }
 0x165   :  { %v1219_v13 = vld [vmem:[#allocation5 + $0x1fe0] sm:$0xff]  ;;  %6687 = vmatpush1.bf16.msra.mxu1 %v11082_v15 }
 0x166   :  { %v1079_v21 = vld [vmem:[#allocation5 + $0x1b80] sm:$0xff]  ;;  %v11203_v24 = vcombine.high %v1215_v11, %v1219_v13  ;;  %6647 = vmatprep.subr.bf16.mxu0 %v11075_v19  ;;  %v11202_v27 = vcombine.low %v1215_v11, %v1219_v13  ;;  %v1225_v13 = vlaneseq }
 0x167   :  { %v1083_v22 = vld [vmem:[#allocation5 + $0x1ba0] sm:$0xff] }
 0x168   :  { %v1207_v23 = vld [vmem:[#allocation5 + $0x1f80] sm:$0xff]  ;;  %v11067_v29 = vcombine.high %v1079_v21, %v1083_v22  ;;  %6688 = vmatprep.subr.bf16.mxu1 %v11203_v24  ;;  %6648 = vmatpush2.bf16.msra.mxu0 %v11074_v26  ;;  %v11066_v36 = vcombine.low %v1079_v21, %v1083_v22  ;;  %v12441_v26 = vshrl.u32 %v1225_v13, 7 }
 0x169   :  { %v1211_v25 = vld [vmem:[#allocation5 + $0x1fa0] sm:$0xff]  ;;  %6689 = vmatpush2.bf16.msra.mxu1 %v11202_v27 }
 0x16a   :  { %v1071_v30 = vld [vmem:[#allocation5 + $0x1b40] sm:$0xff]  ;;  %v11195_v34 = vcombine.high %v1207_v23, %v1211_v25  ;;  %6649 = vmatprep.subr.bf16.mxu0 %v11067_v29  ;;  %v11194_v37 = vcombine.low %v1207_v23, %v1211_v25 }
 0x16b   :  { %v1075_v32 = vld [vmem:[#allocation5 + $0x1b60] sm:$0xff] }
 0x16c   :  { %v1199_v33 = vld [vmem:[#allocation5 + $0x1f40] sm:$0xff]  ;;  %v11059_v38 = vcombine.high %v1071_v30, %v1075_v32  ;;  %6690 = vmatprep.subr.bf16.mxu1 %v11195_v34  ;;  %6650 = vmatpush2.bf16.msra.mxu0 %v11066_v36  ;;  %v11058_v46 = vcombine.low %v1071_v30, %v1075_v32  ;;  %v256_v32 = vld [vmem:[#allocation5 + $0x1c8] sm:$0xff] }
 0x16d   :  { %v1203_v35 = vld [vmem:[#allocation5 + $0x1f60] sm:$0xff]  ;;  %6691 = vmatpush2.bf16.msra.mxu1 %v11194_v37  ;;  %v384_v34 = vld [vmem:[#allocation5 + $0x5c8] sm:$0xff]  ;;  %v1227_v37 = vsub.s32 0, %v12441_v26 }
 0x16e   :  { %v1063_v41 = vld [vmem:[#allocation5 + $0x1b00] sm:$0xff]  ;;  %v11187_v44 = vcombine.high %v1199_v33, %v1203_v35  ;;  %6651 = vmatprep.subr.bf16.mxu0 %v11059_v38  ;;  %v11186_v47 = vcombine.low %v1199_v33, %v1203_v35  ;;  %v260_v33 = vld [vmem:[#allocation5 + $0x1e8] sm:$0xff] }
 0x16f   :  { %v1067_v42 = vld [vmem:[#allocation5 + $0x1b20] sm:$0xff]  ;;  %v388_v35 = vld [vmem:[#allocation5 + $0x5e8] sm:$0xff] }
 0x170   :  { %v1191_v43 = vld [vmem:[#allocation5 + $0x1f00] sm:$0xff]  ;;  %v11051_v48 = vcombine.high %v1063_v41, %v1067_v42  ;;  %6692 = vmatprep.subr.bf16.mxu1 %v11187_v44  ;;  %6652 = vmatpush2.bf16.msra.mxu0 %v11058_v46  ;;  %v11050_v56 = vcombine.low %v1063_v41, %v1067_v42  ;;  %v10245_v44 = vcombine.high %v256_v32, %v260_v33  ;;  %v1231_v46 = vsub.s32 1, %v12441_v26 }
 0x171   :  { %v1195_v45 = vld [vmem:[#allocation5 + $0x1f20] sm:$0xff]  ;;  %6693 = vmatpush2.bf16.msra.mxu1 %v11186_v47  ;;  %v248_v47 = vld [vmem:[#allocation5 + $0x188] sm:$0xff] }
 0x172   :  { %v1055_v50 = vld [vmem:[#allocation5 + $0x1ac0] sm:$0xff]  ;;  %v11179_v54 = vcombine.high %v1191_v43, %v1195_v45  ;;  %6653 = vmatprep.subr.bf16.mxu0 %v11051_v48  ;;  %v11178_v57 = vcombine.low %v1191_v43, %v1195_v45  ;;  %v181_v43 = vld [vmem:[#allocation2 + $0x70] sm:$0xff]  ;;  %v10373_v45 = vcombine.high %v384_v34, %v388_v35  ;;  %v252_v48 = vld [vmem:[#allocation5 + $0x1a8] sm:$0xff] }
 0x173   :  { %v1059_v52 = vld [vmem:[#allocation5 + $0x1ae0] sm:$0xff] }
 0x174   :  { %v1183_v53 = vld [vmem:[#allocation5 + $0x1ec0] sm:$0xff]  ;;  %v11043_v60 = vcombine.high %v1055_v50, %v1059_v52  ;;  %6694 = vmatprep.subr.bf16.mxu1 %v11179_v54  ;;  %6654 = vmatpush2.bf16.msra.mxu0 %v11050_v56  ;;  %v11042_v2 = vcombine.low %v1055_v50, %v1059_v52  ;;  %v376_v52 = vld [vmem:[#allocation5 + $0x588] sm:$0xff]  ;;  %v10244_v56 = vcombine.low %v256_v32, %v260_v33 }
 0x175   :  { %v1187_v55 = vld [vmem:[#allocation5 + $0x1ee0] sm:$0xff]  ;;  %6695 = vmatpush2.bf16.msra.mxu1 %v11178_v57  ;;  %v10372_v57 = vcombine.low %v384_v34, %v388_v35 }
 0x176   :  { %v1047_v61 = vld [vmem:[#allocation5 + $0x1a80] sm:$0xff]  ;;  %v11171_v0 = vcombine.high %v1183_v53, %v1187_v55  ;;  %6655 = vmatprep.subr.bf16.mxu0 %v11043_v60  ;;  %v11170_v3 = vcombine.low %v1183_v53, %v1187_v55  ;;  %v380_v53 = vld [vmem:[#allocation5 + $0x5a8] sm:$0xff]  ;;  %v12449_v55 = vpack.c.bf16 %v181_v43, %v181_v43  ;;  %v10237_v60 = vcombine.high %v248_v47, %v252_v48 }
 0x177   :  { %v1051_v62 = vld [vmem:[#allocation5 + $0x1aa0] sm:$0xff]  ;;  %v356_v43 = vld [vmem:[#allocation5 + $0x4e8] sm:$0xff] }
 0x178   :  { %v1175_v63 = vld [vmem:[#allocation5 + $0x1e80] sm:$0xff]  ;;  %v11035_v4 = vcombine.high %v1047_v61, %v1051_v62  ;;  %6696 = vmatprep.subr.bf16.mxu1 %v11171_v0  ;;  %6656 = vmatpush2.bf16.msra.mxu0 %v11042_v2  ;;  %v11034_v12 = vcombine.low %v1047_v61, %v1051_v62  ;;  %v10365_v62 = vcombine.high %v376_v52, %v380_v53  ;;  %v244_v0 = vld [vmem:[#allocation5 + $0x168] sm:$0xff] }
 0x179   :  { %v1179_v1 = vld [vmem:[#allocation5 + $0x1ea0] sm:$0xff]  ;;  %6697 = vmatpush2.bf16.msra.mxu1 %v11170_v3  ;;  %v368_v2 = vld [vmem:[#allocation5 + $0x548] sm:$0xff] }
 0x17a   :  { %v1039_v5 = vld [vmem:[#allocation5 + $0x1a40] sm:$0xff]  ;;  %v11163_v8 = vcombine.high %v1175_v63, %v1179_v1  ;;  %6657 = vmatprep.subr.bf16.mxu0 %v11035_v4  ;;  %v11162_v14 = vcombine.low %v1175_v63, %v1179_v1  ;;  %v240_v63 = vld [vmem:[#allocation5 + $0x148] sm:$0xff] }
 0x17b   :  { %v1043_v9 = vld [vmem:[#allocation5 + $0x1a60] sm:$0xff]  ;;  %v372_v3 = vld [vmem:[#allocation5 + $0x568] sm:$0xff] }
 0x17c   :  { %v1167_v10 = vld [vmem:[#allocation5 + $0x1e40] sm:$0xff]  ;;  %v11027_v15 = vcombine.high %v1039_v5, %v1043_v9  ;;  %6698 = vmatprep.subr.bf16.mxu1 %v11163_v8  ;;  %6658 = vmatpush2.bf16.msra.mxu0 %v11034_v12  ;;  %v11026_v25 = vcombine.low %v1039_v5, %v1043_v9  ;;  %v10236_v8 = vcombine.low %v248_v47, %v252_v48 }
 0x17d   :  { %v1171_v11 = vld [vmem:[#allocation5 + $0x1e60] sm:$0xff]  ;;  %6699 = vmatpush2.bf16.msra.mxu1 %v11162_v14  ;;  %v10356_v33 = vcombine.low %v368_v2, %v372_v3 }
 0x17e   :  { %v11155_v19 = vcombine.high %v1167_v10, %v1171_v11  ;;  %v1031_v21 = vld [vmem:[#allocation5 + $0x1a00] sm:$0xff]  ;;  %6659 = vmatprep.subr.bf16.mxu0 %v11027_v15  ;;  %v11154_v27 = vcombine.low %v1167_v10, %v1171_v11  ;;  %v10364_v10 = vcombine.low %v376_v52, %v380_v53  ;;  %v10229_v11 = vcombine.high %v240_v63, %v244_v0  ;;  %v216_v52 = vld [vmem:[#allocation5 + $0x88] sm:$0xff] }
 0x17f   :  { %v1035_v22 = vld [vmem:[#allocation5 + $0x1a20] sm:$0xff]  ;;  %v220_v53 = vld [vmem:[#allocation5 + $0xa8] sm:$0xff] }
 0x180   :  { %v1159_v23 = vld [vmem:[#allocation5 + $0x1e00] sm:$0xff]  ;;  %v11019_v29 = vcombine.high %v1031_v21, %v1035_v22  ;;  %6700 = vmatprep.subr.bf16.mxu1 %v11155_v19  ;;  %6660 = vmatpush2.bf16.msra.mxu0 %v11026_v25  ;;  %v11018_v36 = vcombine.low %v1031_v21, %v1035_v22  ;;  %v10357_v19 = vcombine.high %v368_v2, %v372_v3  ;;  %v232_v21 = vld [vmem:[#allocation5 + $0x108] sm:$0xff] }
 0x181   :  { %v1163_v24 = vld [vmem:[#allocation5 + $0x1e20] sm:$0xff]  ;;  %6701 = vmatpush2.bf16.msra.mxu1 %v11154_v27  ;;  %v236_v22 = vld [vmem:[#allocation5 + $0x128] sm:$0xff]  ;;  %v10204_v3 = vcombine.low %v216_v52, %v220_v53 }
 0x182   :  { %v11147_v30 = vcombine.high %v1159_v23, %v1163_v24  ;;  %v179_v38 = vld [vmem:[#allocation2 + $0x60] sm:$0xff]  ;;  %6661 = vmatprep.subr.bf16.mxu0 %v11019_v29  ;;  %v11146_v41 = vcombine.low %v1159_v23, %v1163_v24  ;;  %v360_v24 = vld [vmem:[#allocation5 + $0x508] sm:$0xff]  ;;  %v10221_v34 = vcombine.high %v232_v21, %v236_v22 }
 0x183   :  { %v1223_v42 = vld [vmem:[#allocation7] sm:$0xff]  ;;  %v12445_v50 = vpack.c.bf16 %v179_v38, %v179_v38  ;;  %v364_v25 = vld [vmem:[#allocation5 + $0x528] sm:$0xff] }
 0x184   :  { %6702 = vmatprep.subr.bf16.mxu1 %v11147_v30  ;;  %6662 = vmatpush2.bf16.msra.mxu0 %v11018_v36  ;;  %v1228_v54 = vrot.slane %v1223_v42, %v1227_v37  ;;  %v1232_v61 = vrot.slane %v1223_v42, %v1231_v46  ;;  %v10228_v30 = vcombine.low %v240_v63, %v244_v0  ;;  %v224_v38 = vld [vmem:[#allocation5 + $0xc8] sm:$0xff] }
 0x185   :  { %6703 = vmatpush2.bf16.msra.mxu1 %v11146_v41  ;;  %6713 = vmatprep.subr.bf16.mxu0 %v10245_v44  ;;  %v6460_v5 = vpop.f32.mrf.mxu1  ;;  %v10349_v36 = vcombine.high %v360_v24, %v364_v25  ;;  %v228_v41 = vld [vmem:[#allocation5 + $0xe8] sm:$0xff]  ;;  %v10220_v44 = vcombine.low %v232_v21, %v236_v22 }
 0x186   :  { %6754 = vmatprep.subr.bf16.mxu1 %v10373_v45  ;;  %v6419_v1 = vpop.f32.mrf.mxu0  ;;  %v352_v42 = vld [vmem:[#allocation5 + $0x4c8] sm:$0xff]  ;;  %v10348_v45 = vcombine.low %v360_v24, %v364_v25  ;;  %v10213_v47 = vcombine.high %v224_v38, %v228_v41 }
 0x187   :  { %6664 = vmatmul.mubr.bf16.vlgmr.msra.gmra.mxu0 %v12445_v50  ;;  %v6420_v4 = vadd.f32 %v6419_v1, %v1228_v54  ;;  %v6462_v15 = vpop.f32.mrf.mxu1  ;;  %v10341_v48 = vcombine.high %v352_v42, %v356_v43  ;;  %v344_v54 = vld [vmem:[#allocation5 + $0x488] sm:$0xff] }
 0x188   :  { %6705 = vmatmul.mubr.bf16.vlgmr.msra.gmra.mxu1 %v12449_v55  ;;  %6714 = vmatpush1.bf16.msra.mxu0 %v10244_v56  ;;  %v6421_v9 = vpop.f32.mrf.mxu0  ;;  %v348_v56 = vld [vmem:[#allocation5 + $0x4a8] sm:$0xff] }
 0x189   :  { %6755 = vmatpush1.bf16.msra.mxu1 %v10372_v57  ;;  %6715 = vmatprep.subr.bf16.mxu0 %v10237_v60  ;;  %v12455_v12 = vadd.f32 %v6460_v5, %v6420_v4  ;;  %v6422_v14 = vadd.f32 %v6421_v9, %v1232_v61  ;;  %v6464_v29 = vpop.f32.mrf.mxu1  ;;  %v10212_v57 = vcombine.low %v224_v38, %v228_v41  ;;  %v208_v63 = vld [vmem:[#allocation5 + $0x48] sm:$0xff] }
 0x18a   :  { %6756 = vmatprep.subr.bf16.mxu1 %v10365_v62  ;;  %6745 = vmatprep.mubr.bf16.mxu0 %v12398_v58  ;;  %v6423_v23 = vpop.f32.mrf.mxu0  ;;  %v10340_v60 = vcombine.low %v352_v42, %v356_v43  ;;  %v10205_v61 = vcombine.high %v216_v52, %v220_v53  ;;  %v10333_v62 = vcombine.high %v344_v54, %v348_v56  ;;  %v212_v0 = vld [vmem:[#allocation5 + $0x68] sm:$0xff] }
 0x18b   :  { %6786 = vmatprep.mubr.bf16.mxu1 %v12400_v59  ;;  %v12459_v27 = vadd.f32 %v6462_v15, %v6422_v14  ;;  %v6465_v35 = vpop.f32.mrf.mxu1  ;;  %v336_v1 = vld [vmem:[#allocation5 + $0x448] sm:$0xff]  ;;  %v10332_v4 = vcombine.low %v344_v54, %v348_v56  ;;  %v10197_v5 = vcombine.high %v208_v63, %v212_v0  ;;  %v10196_v15 = vcombine.low %v208_v63, %v212_v0 }
 0x18c   :  { %6716 = vmatpush1.bf16.msra.mxu0 %v10236_v8  ;;  %v6424_v32 = vpop.f32.mrf.mxu0  ;;  %v340_v2 = vld [vmem:[#allocation5 + $0x468] sm:$0xff] }
 0x18d   :  { %6757 = vmatpush1.bf16.msra.mxu1 %v10364_v10  ;;  %6717 = vmatprep.subr.bf16.mxu0 %v10229_v11  ;;  %v10325_v8 = vcombine.high %v336_v1, %v340_v2  ;;  %v200_v9 = vld [vmem:[#allocation5 + $0x8] sm:$0xff] }
 0x18e   :  { %6758 = vmatprep.subr.bf16.mxu1 %v10357_v19  ;;  %v204_v10 = vld [vmem:[#allocation5 + $0x28] sm:$0xff]  ;;  %v10324_v19 = vcombine.low %v336_v1, %v340_v2 }
 0x18f   :  { %v328_v11 = vld [vmem:[#allocation5 + $0x408] sm:$0xff]  ;;  %v10189_v21 = vcombine.high %v200_v9, %v204_v10 }
 0x190   :  { %6718 = vmatpush1.bf16.msra.mxu0 %v10228_v30  ;;  %v332_v14 = vld [vmem:[#allocation5 + $0x428] sm:$0xff]  ;;  %v10188_v30 = vcombine.low %v200_v9, %v204_v10 }
 0x191   :  { %6759 = vmatpush1.bf16.msra.mxu1 %v10356_v33  ;;  %6719 = vmatprep.subr.bf16.mxu0 %v10221_v34  ;;  %v10317_v22 = vcombine.high %v328_v11, %v332_v14  ;;  %v320_v23 = vld [vmem:[#allocation5 + $0x3c8] sm:$0xff]  ;;  %v10316_v32 = vcombine.low %v328_v11, %v332_v14 }
 0x192   :  { %6760 = vmatprep.subr.bf16.mxu1 %v10349_v36  ;;  %v324_v24 = vld [vmem:[#allocation5 + $0x3e8] sm:$0xff] }
 0x193   :  { %v448_v25 = vld [vmem:[#allocation5 + $0x7c8] sm:$0xff]  ;;  %v10309_v33 = vcombine.high %v320_v23, %v324_v24  ;;  %v10308_v42 = vcombine.low %v320_v23, %v324_v24 }
 0x194   :  { %6720 = vmatpush1.bf16.msra.mxu0 %v10220_v44  ;;  %v452_v29 = vld [vmem:[#allocation5 + $0x7e8] sm:$0xff] }
 0x195   :  { %6761 = vmatpush1.bf16.msra.mxu1 %v10348_v45  ;;  %6721 = vmatprep.subr.bf16.mxu0 %v10213_v47  ;;  %v10437_v34 = vcombine.high %v448_v25, %v452_v29  ;;  %v312_v35 = vld [vmem:[#allocation5 + $0x388] sm:$0xff]  ;;  %v10436_v43 = vcombine.low %v448_v25, %v452_v29 }
 0x196   :  { %6762 = vmatprep.subr.bf16.mxu1 %v10341_v48  ;;  %v316_v36 = vld [vmem:[#allocation5 + $0x3a8] sm:$0xff] }
 0x197   :  { %v440_v38 = vld [vmem:[#allocation5 + $0x788] sm:$0xff]  ;;  %v10301_v44 = vcombine.high %v312_v35, %v316_v36  ;;  %v10300_v54 = vcombine.low %v312_v35, %v316_v36 }
 0x198   :  { %6722 = vmatpush1.bf16.msra.mxu0 %v10212_v57  ;;  %v444_v41 = vld [vmem:[#allocation5 + $0x7a8] sm:$0xff] }
 0x199   :  { %6763 = vmatpush1.bf16.msra.mxu1 %v10340_v60  ;;  %6723 = vmatprep.subr.bf16.mxu0 %v10205_v61  ;;  %v10429_v45 = vcombine.high %v440_v38, %v444_v41  ;;  %v304_v47 = vld [vmem:[#allocation5 + $0x348] sm:$0xff]  ;;  %v10428_v56 = vcombine.low %v440_v38, %v444_v41 }
 0x19a   :  { %6764 = vmatprep.subr.bf16.mxu1 %v10333_v62  ;;  %v308_v48 = vld [vmem:[#allocation5 + $0x368] sm:$0xff] }
 0x19b   :  { %v432_v52 = vld [vmem:[#allocation5 + $0x748] sm:$0xff]  ;;  %v10293_v57 = vcombine.high %v304_v47, %v308_v48  ;;  %v10292_v1 = vcombine.low %v304_v47, %v308_v48 }
 0x19c   :  { %6724 = vmatpush1.bf16.msra.mxu0 %v10204_v3  ;;  %v436_v53 = vld [vmem:[#allocation5 + $0x768] sm:$0xff] }
 0x19d   :  { %6765 = vmatpush1.bf16.msra.mxu1 %v10332_v4  ;;  %6725 = vmatprep.subr.bf16.mxu0 %v10197_v5  ;;  %v10421_v60 = vcombine.high %v432_v52, %v436_v53  ;;  %v296_v61 = vld [vmem:[#allocation5 + $0x308] sm:$0xff]  ;;  %v10420_v2 = vcombine.low %v432_v52, %v436_v53 }
 0x19e   :  { %6766 = vmatprep.subr.bf16.mxu1 %v10325_v8  ;;  %v300_v62 = vld [vmem:[#allocation5 + $0x328] sm:$0xff] }
 0x19f   :  { %v424_v63 = vld [vmem:[#allocation5 + $0x708] sm:$0xff]  ;;  %v10285_v3 = vcombine.high %v296_v61, %v300_v62  ;;  %v10284_v11 = vcombine.low %v296_v61, %v300_v62 }
 0x1a0   :  { %6726 = vmatpush1.bf16.msra.mxu0 %v10196_v15  ;;  %v428_v0 = vld [vmem:[#allocation5 + $0x728] sm:$0xff] }
 0x1a1   :  { %6767 = vmatpush1.bf16.msra.mxu1 %v10324_v19  ;;  %6727 = vmatprep.subr.bf16.mxu0 %v10189_v21  ;;  %v10413_v4 = vcombine.high %v424_v63, %v428_v0  ;;  %v288_v5 = vld [vmem:[#allocation5 + $0x2c8] sm:$0xff]  ;;  %v10412_v14 = vcombine.low %v424_v63, %v428_v0 }
 0x1a2   :  { %6768 = vmatprep.subr.bf16.mxu1 %v10317_v22  ;;  %v292_v8 = vld [vmem:[#allocation5 + $0x2e8] sm:$0xff] }
 0x1a3   :  { %v416_v9 = vld [vmem:[#allocation5 + $0x6c8] sm:$0xff]  ;;  %v10277_v15 = vcombine.high %v288_v5, %v292_v8  ;;  %v10276_v25 = vcombine.low %v288_v5, %v292_v8 }
 0x1a4   :  { %6728 = vmatpush1.bf16.msra.mxu0 %v10188_v30  ;;  %v420_v10 = vld [vmem:[#allocation5 + $0x6e8] sm:$0xff] }
 0x1a5   :  { %6769 = vmatpush1.bf16.msra.mxu1 %v10316_v32  ;;  %6729 = vmatprep.subr.bf16.mxu0 %v10309_v33  ;;  %v10405_v19 = vcombine.high %v416_v9, %v420_v10  ;;  %v280_v21 = vld [vmem:[#allocation5 + $0x288] sm:$0xff]  ;;  %v10404_v29 = vcombine.low %v416_v9, %v420_v10 }
 0x1a6   :  { %6770 = vmatprep.subr.bf16.mxu1 %v10437_v34  ;;  %v284_v22 = vld [vmem:[#allocation5 + $0x2a8] sm:$0xff] }
 0x1a7   :  { %v408_v23 = vld [vmem:[#allocation5 + $0x688] sm:$0xff]  ;;  %v10269_v30 = vcombine.high %v280_v21, %v284_v22  ;;  %v10268_v38 = vcombine.low %v280_v21, %v284_v22 }
 0x1a8   :  { %6730 = vmatpush2.bf16.msra.mxu0 %v10308_v42  ;;  %v412_v24 = vld [vmem:[#allocation5 + $0x6a8] sm:$0xff] }
 0x1a9   :  { %6771 = vmatpush2.bf16.msra.mxu1 %v10436_v43  ;;  %6731 = vmatprep.subr.bf16.mxu0 %v10301_v44  ;;  %v10397_v32 = vcombine.high %v408_v23, %v412_v24  ;;  %v272_v33 = vld [vmem:[#allocation5 + $0x248] sm:$0xff]  ;;  %v10396_v41 = vcombine.low %v408_v23, %v412_v24 }
 0x1aa   :  { %6772 = vmatprep.subr.bf16.mxu1 %v10429_v45  ;;  %v276_v34 = vld [vmem:[#allocation5 + $0x268] sm:$0xff] }
 0x1ab   :  { %v400_v35 = vld [vmem:[#allocation5 + $0x648] sm:$0xff]  ;;  %v10261_v42 = vcombine.high %v272_v33, %v276_v34  ;;  %v10260_v52 = vcombine.low %v272_v33, %v276_v34 }
 0x1ac   :  { %6732 = vmatpush2.bf16.msra.mxu0 %v10300_v54  ;;  %v404_v36 = vld [vmem:[#allocation5 + $0x668] sm:$0xff] }
 0x1ad   :  { %6773 = vmatpush2.bf16.msra.mxu1 %v10428_v56  ;;  %6733 = vmatprep.subr.bf16.mxu0 %v10293_v57  ;;  %v10389_v43 = vcombine.high %v400_v35, %v404_v36  ;;  %v264_v44 = vld [vmem:[#allocation5 + $0x208] sm:$0xff]  ;;  %v10388_v53 = vcombine.low %v400_v35, %v404_v36 }
 0x1ae   :  { %6774 = vmatprep.subr.bf16.mxu1 %v10421_v60  ;;  %v268_v45 = vld [vmem:[#allocation5 + $0x228] sm:$0xff] }
 0x1af   :  { %v392_v47 = vld [vmem:[#allocation5 + $0x608] sm:$0xff]  ;;  %v10253_v54 = vcombine.high %v264_v44, %v268_v45  ;;  %v10252_v63 = vcombine.low %v264_v44, %v268_v45 }
 0x1b0   :  { %6734 = vmatpush2.bf16.msra.mxu0 %v10292_v1  ;;  %v396_v48 = vld [vmem:[#allocation5 + $0x628] sm:$0xff] }
 0x1b1   :  { %6775 = vmatpush2.bf16.msra.mxu1 %v10420_v2  ;;  %6735 = vmatprep.subr.bf16.mxu0 %v10285_v3  ;;  %v10381_v56 = vcombine.high %v392_v47, %v396_v48  ;;  %v512_v57 = vld [vmem:[#allocation5 + $0x9c8] sm:$0xff]  ;;  %v10380_v0 = vcombine.low %v392_v47, %v396_v48 }
 0x1b2   :  { %6776 = vmatprep.subr.bf16.mxu1 %v10413_v4  ;;  %v516_v60 = vld [vmem:[#allocation5 + $0x9e8] sm:$0xff] }
 0x1b3   :  { %v640_v61 = vld [vmem:[#allocation5 + $0xdc8] sm:$0xff]  ;;  %v10501_v1 = vcombine.high %v512_v57, %v516_v60  ;;  %v10500_v9 = vcombine.low %v512_v57, %v516_v60 }
 0x1b4   :  { %6736 = vmatpush2.bf16.msra.mxu0 %v10284_v11  ;;  %v644_v62 = vld [vmem:[#allocation5 + $0xde8] sm:$0xff] }
 0x1b5   :  { %6777 = vmatpush2.bf16.msra.mxu1 %v10412_v14  ;;  %6737 = vmatprep.subr.bf16.mxu0 %v10277_v15  ;;  %v10629_v2 = vcombine.high %v640_v61, %v644_v62  ;;  %v504_v3 = vld [vmem:[#allocation5 + $0x988] sm:$0xff]  ;;  %v10628_v10 = vcombine.low %v640_v61, %v644_v62 }
 0x1b6   :  { %6778 = vmatprep.subr.bf16.mxu1 %v10405_v19  ;;  %v508_v4 = vld [vmem:[#allocation5 + $0x9a8] sm:$0xff] }
 0x1b7   :  { %v632_v5 = vld [vmem:[#allocation5 + $0xd88] sm:$0xff]  ;;  %v10493_v11 = vcombine.high %v504_v3, %v508_v4 }
 0x1b8   :  { %6738 = vmatpush2.bf16.msra.mxu0 %v10276_v25  ;;  %v636_v8 = vld [vmem:[#allocation5 + $0xda8] sm:$0xff] }
 0x1b9   :  { %6779 = vmatpush2.bf16.msra.mxu1 %v10404_v29  ;;  %6739 = vmatprep.subr.bf16.mxu0 %v10269_v30  ;;  %v10621_v14 = vcombine.high %v632_v5, %v636_v8  ;;  %v496_v15 = vld [vmem:[#allocation5 + $0x948] sm:$0xff]  ;;  %v10492_v29 = vcombine.low %v504_v3, %v508_v4 }
 0x1ba   :  { %6780 = vmatprep.subr.bf16.mxu1 %v10397_v32  ;;  %v500_v19 = vld [vmem:[#allocation5 + $0x968] sm:$0xff]  ;;  %v10620_v32 = vcombine.low %v632_v5, %v636_v8 }
 0x1bb   :  { %v624_v22 = vld [vmem:[#allocation5 + $0xd48] sm:$0xff]  ;;  %v10485_v33 = vcombine.high %v496_v15, %v500_v19  ;;  %v10484_v48 = vcombine.low %v496_v15, %v500_v19 }
 0x1bc   :  { %6740 = vmatpush2.bf16.msra.mxu0 %v10268_v38  ;;  %v628_v23 = vld [vmem:[#allocation5 + $0xd68] sm:$0xff] }
 0x1bd   :  { %6781 = vmatpush2.bf16.msra.mxu1 %v10396_v41  ;;  %6741 = vmatprep.subr.bf16.mxu0 %v10261_v42  ;;  %v10613_v38 = vcombine.high %v624_v22, %v628_v23  ;;  %v488_v41 = vld [vmem:[#allocation5 + $0x908] sm:$0xff] }
 0x1be   :  { %6782 = vmatprep.subr.bf16.mxu1 %v10389_v43  ;;  %v492_v42 = vld [vmem:[#allocation5 + $0x928] sm:$0xff] }
 0x1bf   :  { %v616_v43 = vld [vmem:[#allocation5 + $0xd08] sm:$0xff] }
 0x1c0   :  { %6742 = vmatpush2.bf16.msra.mxu0 %v10260_v52  ;;  %v620_v44 = vld [vmem:[#allocation5 + $0xd28] sm:$0xff] }
 0x1c1   :  { %6783 = vmatpush2.bf16.msra.mxu1 %v10388_v53  ;;  %6743 = vmatprep.subr.bf16.mxu0 %v10253_v54  ;;  %v10477_v53 = vcombine.high %v488_v41, %v492_v42  ;;  %v480_v57 = vld [vmem:[#allocation5 + $0x8c8] sm:$0xff] }
 0x1c2   :  { %6784 = vmatprep.subr.bf16.mxu1 %v10381_v56  ;;  %v10605_v56 = vcombine.high %v616_v43, %v620_v44  ;;  %v484_v60 = vld [vmem:[#allocation5 + $0x8e8] sm:$0xff] }
 0x1c3   :  { %v608_v61 = vld [vmem:[#allocation5 + $0xcc8] sm:$0xff] }
 0x1c4   :  { %6744 = vmatpush2.bf16.msra.mxu0 %v10252_v63  ;;  %v612_v62 = vld [vmem:[#allocation5 + $0xce8] sm:$0xff]  ;;  %v10476_v63 = vcombine.low %v488_v41, %v492_v42 }
 0x1c5   :  { %6785 = vmatpush2.bf16.msra.mxu1 %v10380_v0  ;;  %6795 = vmatprep.subr.bf16.mxu0 %v10501_v1  ;;  %v10604_v0 = vcombine.low %v616_v43, %v620_v44  ;;  %v10469_v1 = vcombine.high %v480_v57, %v484_v60  ;;  %v472_v3 = vld [vmem:[#allocation5 + $0x888] sm:$0xff] }
 0x1c6   :  { %6836 = vmatprep.subr.bf16.mxu1 %v10629_v2  ;;  %v6501_v21 = vpop.f32.mrf.mxu0  ;;  %v6542_v25 = vpop.f32.mrf.mxu1  ;;  %v10597_v2 = vcombine.high %v608_v61, %v612_v62  ;;  %v476_v4 = vld [vmem:[#allocation5 + $0x8a8] sm:$0xff] }
 0x1c7   :  { %6746 = vmatmul.mubr.bf16.vlgmr.msra.gmra.mxu0 %v12404_v16  ;;  %v6502_v24 = vadd.f32 %v6501_v21, %v12455_v12  ;;  %v600_v5 = vld [vmem:[#allocation5 + $0xc88] sm:$0xff] }
 0x1c8   :  { %6787 = vmatmul.mubr.bf16.vlgmr.msra.gmra.mxu1 %v12406_v20  ;;  %6796 = vmatpush1.bf16.msra.mxu0 %v10500_v9  ;;  %v6503_v30 = vpop.f32.mrf.mxu0  ;;  %v6544_v36 = vpop.f32.mrf.mxu1  ;;  %v604_v8 = vld [vmem:[#allocation5 + $0xca8] sm:$0xff]  ;;  %v10468_v9 = vcombine.low %v480_v57, %v484_v60 }
 0x1c9   :  { %6837 = vmatpush1.bf16.msra.mxu1 %v10628_v10  ;;  %6797 = vmatprep.subr.bf16.mxu0 %v10493_v11  ;;  %v12464_v34 = vadd.f32 %v6542_v25, %v6502_v24  ;;  %v6504_v35 = vadd.f32 %v6503_v30, %v12459_v27  ;;  %v10612_v27 = vcombine.low %v624_v22, %v628_v23  ;;  %v464_v15 = vld [vmem:[#allocation5 + $0x848] sm:$0xff] }
 0x1ca   :  { %6838 = vmatprep.subr.bf16.mxu1 %v10621_v14  ;;  %6827 = vmatprep.mubr.bf16.mxu0 %v12408_v28  ;;  %v6505_v12 = vpop.f32.mrf.mxu0  ;;  %v6546_v47 = vpop.f32.mrf.mxu1  ;;  %v10596_v10 = vcombine.low %v608_v61, %v612_v62  ;;  %v10461_v11 = vcombine.high %v472_v3, %v476_v4  ;;  %v10589_v14 = vcombine.high %v600_v5, %v604_v8  ;;  %v468_v19 = vld [vmem:[#allocation5 + $0x868] sm:$0xff] }
 0x1cb   :  { %6868 = vmatprep.mubr.bf16.mxu1 %v12411_v31  ;;  %v12469_v45 = vadd.f32 %v6544_v36, %v6504_v35  ;;  %v592_v21 = vld [vmem:[#allocation5 + $0xc48] sm:$0xff]  ;;  %v10460_v23 = vcombine.low %v472_v3, %v476_v4  ;;  %v10588_v24 = vcombine.low %v600_v5, %v604_v8  ;;  %v10453_v25 = vcombine.high %v464_v15, %v468_v19 }
 0x1cc   :  { %6798 = vmatpush1.bf16.msra.mxu0 %v10492_v29  ;;  %v6506_v52 = vpop.f32.mrf.mxu0  ;;  %v6547_v54 = vpop.f32.mrf.mxu1  ;;  %v596_v22 = vld [vmem:[#allocation5 + $0xc68] sm:$0xff]  ;;  %v10452_v36 = vcombine.low %v464_v15, %v468_v19 }
 0x1cd   :  { %6839 = vmatpush1.bf16.msra.mxu1 %v10620_v32  ;;  %6799 = vmatprep.subr.bf16.mxu0 %v10485_v33  ;;  %v10581_v29 = vcombine.high %v592_v21, %v596_v22  ;;  %v456_v30 = vld [vmem:[#allocation5 + $0x808] sm:$0xff] }
 0x1ce   :  { %6840 = vmatprep.subr.bf16.mxu1 %v10613_v38  ;;  %v460_v32 = vld [vmem:[#allocation5 + $0x828] sm:$0xff]  ;;  %v10580_v38 = vcombine.low %v592_v21, %v596_v22 }
 0x1cf   :  { %v584_v33 = vld [vmem:[#allocation5 + $0xc08] sm:$0xff]  ;;  %v10445_v41 = vcombine.high %v456_v30, %v460_v32 }
 0x1d0   :  { %6800 = vmatpush1.bf16.msra.mxu0 %v10484_v48  ;;  %v588_v35 = vld [vmem:[#allocation5 + $0xc28] sm:$0xff]  ;;  %v10444_v48 = vcombine.low %v456_v30, %v460_v32 }
 0x1d1   :  { %6841 = vmatpush1.bf16.msra.mxu1 %v10612_v27  ;;  %6801 = vmatprep.subr.bf16.mxu0 %v10477_v53  ;;  %v10573_v42 = vcombine.high %v584_v33, %v588_v35  ;;  %v576_v12 = vld [vmem:[#allocation5 + $0xbc8] sm:$0xff]  ;;  %v10572_v52 = vcombine.low %v584_v33, %v588_v35 }
 0x1d2   :  { %6842 = vmatprep.subr.bf16.mxu1 %v10605_v56  ;;  %v580_v43 = vld [vmem:[#allocation5 + $0xbe8] sm:$0xff] }
 0x1d3   :  { %v704_v44 = vld [vmem:[#allocation5 + $0xfc8] sm:$0xff]  ;;  %v10565_v27 = vcombine.high %v576_v12, %v580_v43  ;;  %v10564_v61 = vcombine.low %v576_v12, %v580_v43 }
 0x1d4   :  { %6802 = vmatpush1.bf16.msra.mxu0 %v10476_v63  ;;  %v708_v47 = vld [vmem:[#allocation5 + $0xfe8] sm:$0xff] }
 0x1d5   :  { %6843 = vmatpush1.bf16.msra.mxu1 %v10604_v0  ;;  %6803 = vmatprep.subr.bf16.mxu0 %v10469_v1  ;;  %v10693_v53 = vcombine.high %v704_v44, %v708_v47  ;;  %v568_v54 = vld [vmem:[#allocation5 + $0xb88] sm:$0xff]  ;;  %v10692_v62 = vcombine.low %v704_v44, %v708_v47 }
 0x1d6   :  { %6844 = vmatprep.subr.bf16.mxu1 %v10597_v2  ;;  %v572_v56 = vld [vmem:[#allocation5 + $0xba8] sm:$0xff] }
 0x1d7   :  { %v696_v57 = vld [vmem:[#allocation5 + $0xf88] sm:$0xff]  ;;  %v10557_v63 = vcombine.high %v568_v54, %v572_v56  ;;  %v10556_v5 = vcombine.low %v568_v54, %v572_v56 }
 0x1d8   :  { %6804 = vmatpush1.bf16.msra.mxu0 %v10468_v9  ;;  %v700_v60 = vld [vmem:[#allocation5 + $0xfa8] sm:$0xff] }
 0x1d9   :  { %6845 = vmatpush1.bf16.msra.mxu1 %v10596_v10  ;;  %6805 = vmatprep.subr.bf16.mxu0 %v10461_v11  ;;  %v10685_v0 = vcombine.high %v696_v57, %v700_v60  ;;  %v560_v1 = vld [vmem:[#allocation5 + $0xb48] sm:$0xff]  ;;  %v10684_v8 = vcombine.low %v696_v57, %v700_v60 }
 0x1da   :  { %6846 = vmatprep.subr.bf16.mxu1 %v10589_v14  ;;  %v564_v2 = vld [vmem:[#allocation5 + $0xb68] sm:$0xff] }
 0x1db   :  { %v688_v3 = vld [vmem:[#allocation5 + $0xf48] sm:$0xff]  ;;  %v10549_v9 = vcombine.high %v560_v1, %v564_v2  ;;  %v10548_v21 = vcombine.low %v560_v1, %v564_v2 }
 0x1dc   :  { %6806 = vmatpush1.bf16.msra.mxu0 %v10460_v23  ;;  %v692_v4 = vld [vmem:[#allocation5 + $0xf68] sm:$0xff] }
 0x1dd   :  { %6847 = vmatpush1.bf16.msra.mxu1 %v10588_v24  ;;  %6807 = vmatprep.subr.bf16.mxu0 %v10453_v25  ;;  %v10677_v10 = vcombine.high %v688_v3, %v692_v4  ;;  %v552_v11 = vld [vmem:[#allocation5 + $0xb08] sm:$0xff]  ;;  %v10676_v22 = vcombine.low %v688_v3, %v692_v4 }
 0x1de   :  { %6848 = vmatprep.subr.bf16.mxu1 %v10581_v29  ;;  %v556_v14 = vld [vmem:[#allocation5 + $0xb28] sm:$0xff] }
 0x1df   :  { %v680_v15 = vld [vmem:[#allocation5 + $0xf08] sm:$0xff]  ;;  %v10541_v23 = vcombine.high %v552_v11, %v556_v14  ;;  %v10540_v33 = vcombine.low %v552_v11, %v556_v14 }
 0x1e0   :  { %6808 = vmatpush1.bf16.msra.mxu0 %v10452_v36  ;;  %v684_v19 = vld [vmem:[#allocation5 + $0xf28] sm:$0xff] }
 0x1e1   :  { %6849 = vmatpush1.bf16.msra.mxu1 %v10580_v38  ;;  %6809 = vmatprep.subr.bf16.mxu0 %v10445_v41  ;;  %v10669_v24 = vcombine.high %v680_v15, %v684_v19  ;;  %v544_v25 = vld [vmem:[#allocation5 + $0xac8] sm:$0xff]  ;;  %v10668_v35 = vcombine.low %v680_v15, %v684_v19 }
 0x1e2   :  { %6850 = vmatprep.subr.bf16.mxu1 %v10573_v42  ;;  %v548_v29 = vld [vmem:[#allocation5 + $0xae8] sm:$0xff] }
 0x1e3   :  { %v672_v30 = vld [vmem:[#allocation5 + $0xec8] sm:$0xff]  ;;  %v10533_v36 = vcombine.high %v544_v25, %v548_v29  ;;  %v10532_v44 = vcombine.low %v544_v25, %v548_v29 }
 0x1e4   :  { %6810 = vmatpush1.bf16.msra.mxu0 %v10444_v48  ;;  %v676_v32 = vld [vmem:[#allocation5 + $0xee8] sm:$0xff] }
 0x1e5   :  { %6851 = vmatpush1.bf16.msra.mxu1 %v10572_v52  ;;  %6811 = vmatprep.subr.bf16.mxu0 %v10565_v27  ;;  %v10661_v38 = vcombine.high %v672_v30, %v676_v32  ;;  %v536_v41 = vld [vmem:[#allocation5 + $0xa88] sm:$0xff]  ;;  %v10660_v47 = vcombine.low %v672_v30, %v676_v32 }
 0x1e6   :  { %6852 = vmatprep.subr.bf16.mxu1 %v10693_v53  ;;  %v540_v42 = vld [vmem:[#allocation5 + $0xaa8] sm:$0xff] }
 0x1e7   :  { %v664_v12 = vld [vmem:[#allocation5 + $0xe88] sm:$0xff]  ;;  %v10525_v48 = vcombine.high %v536_v41, %v540_v42  ;;  %v10524_v57 = vcombine.low %v536_v41, %v540_v42 }
 0x1e8   :  { %6812 = vmatpush2.bf16.msra.mxu0 %v10564_v61  ;;  %v668_v43 = vld [vmem:[#allocation5 + $0xea8] sm:$0xff] }
 0x1e9   :  { %6853 = vmatpush2.bf16.msra.mxu1 %v10692_v62  ;;  %6813 = vmatprep.subr.bf16.mxu0 %v10557_v63  ;;  %v10653_v52 = vcombine.high %v664_v12, %v668_v43  ;;  %v528_v27 = vld [vmem:[#allocation5 + $0xa48] sm:$0xff]  ;;  %v10652_v60 = vcombine.low %v664_v12, %v668_v43 }
 0x1ea   :  { %6854 = vmatprep.subr.bf16.mxu1 %v10685_v0  ;;  %v532_v53 = vld [vmem:[#allocation5 + $0xa68] sm:$0xff] }
 0x1eb   :  { %v656_v54 = vld [vmem:[#allocation5 + $0xe48] sm:$0xff]  ;;  %v10517_v61 = vcombine.high %v528_v27, %v532_v53  ;;  %v10516_v3 = vcombine.low %v528_v27, %v532_v53 }
 0x1ec   :  { %6814 = vmatpush2.bf16.msra.mxu0 %v10556_v5  ;;  %v660_v56 = vld [vmem:[#allocation5 + $0xe68] sm:$0xff] }
 0x1ed   :  { %6855 = vmatpush2.bf16.msra.mxu1 %v10684_v8  ;;  %6815 = vmatprep.subr.bf16.mxu0 %v10549_v9  ;;  %v10645_v62 = vcombine.high %v656_v54, %v660_v56  ;;  %v520_v63 = vld [vmem:[#allocation5 + $0xa08] sm:$0xff]  ;;  %v10644_v4 = vcombine.low %v656_v54, %v660_v56 }
 0x1ee   :  { %6856 = vmatprep.subr.bf16.mxu1 %v10677_v10  ;;  %v524_v0 = vld [vmem:[#allocation5 + $0xa28] sm:$0xff] }
 0x1ef   :  { %v648_v1 = vld [vmem:[#allocation5 + $0xe08] sm:$0xff]  ;;  %v10509_v5 = vcombine.high %v520_v63, %v524_v0  ;;  %v10508_v15 = vcombine.low %v520_v63, %v524_v0 }
 0x1f0   :  { %6816 = vmatpush2.bf16.msra.mxu0 %v10548_v21  ;;  %v652_v2 = vld [vmem:[#allocation5 + $0xe28] sm:$0xff] }
 0x1f1   :  { %6857 = vmatpush2.bf16.msra.mxu1 %v10676_v22  ;;  %6817 = vmatprep.subr.bf16.mxu0 %v10541_v23  ;;  %v10637_v8 = vcombine.high %v648_v1, %v652_v2  ;;  %v768_v9 = vld [vmem:[#allocation5 + $0x11c8] sm:$0xff]  ;;  %v10636_v19 = vcombine.low %v648_v1, %v652_v2 }
 0x1f2   :  { %6858 = vmatprep.subr.bf16.mxu1 %v10669_v24  ;;  %v772_v10 = vld [vmem:[#allocation5 + $0x11e8] sm:$0xff] }
 0x1f3   :  { %v896_v11 = vld [vmem:[#allocation5 + $0x15c8] sm:$0xff]  ;;  %v10757_v21 = vcombine.high %v768_v9, %v772_v10  ;;  %v10756_v30 = vcombine.low %v768_v9, %v772_v10 }
 0x1f4   :  { %6818 = vmatpush2.bf16.msra.mxu0 %v10540_v33  ;;  %v900_v14 = vld [vmem:[#allocation5 + $0x15e8] sm:$0xff] }
 0x1f5   :  { %6859 = vmatpush2.bf16.msra.mxu1 %v10668_v35  ;;  %6819 = vmatprep.subr.bf16.mxu0 %v10533_v36  ;;  %v10885_v22 = vcombine.high %v896_v11, %v900_v14  ;;  %v760_v23 = vld [vmem:[#allocation5 + $0x1188] sm:$0xff]  ;;  %v10884_v32 = vcombine.low %v896_v11, %v900_v14 }
 0x1f6   :  { %6860 = vmatprep.subr.bf16.mxu1 %v10661_v38  ;;  %v764_v24 = vld [vmem:[#allocation5 + $0x11a8] sm:$0xff] }
 0x1f7   :  { %v888_v25 = vld [vmem:[#allocation5 + $0x1588] sm:$0xff]  ;;  %v10749_v33 = vcombine.high %v760_v23, %v764_v24 }
 0x1f8   :  { %6820 = vmatpush2.bf16.msra.mxu0 %v10532_v44  ;;  %v892_v29 = vld [vmem:[#allocation5 + $0x15a8] sm:$0xff] }
 0x1f9   :  { %6861 = vmatpush2.bf16.msra.mxu1 %v10660_v47  ;;  %6821 = vmatprep.subr.bf16.mxu0 %v10525_v48  ;;  %v10877_v35 = vcombine.high %v888_v25, %v892_v29  ;;  %v752_v36 = vld [vmem:[#allocation5 + $0x1148] sm:$0xff]  ;;  %v10748_v47 = vcombine.low %v760_v23, %v764_v24 }
 0x1fa   :  { %6862 = vmatprep.subr.bf16.mxu1 %v10653_v52  ;;  %v756_v38 = vld [vmem:[#allocation5 + $0x1168] sm:$0xff]  ;;  %v10876_v52 = vcombine.low %v888_v25, %v892_v29 }
 0x1fb   :  { %v880_v42 = vld [vmem:[#allocation5 + $0x1548] sm:$0xff]  ;;  %v10741_v27 = vcombine.high %v752_v36, %v756_v38  ;;  %v10740_v2 = vcombine.low %v752_v36, %v756_v38 }
 0x1fc   :  { %6822 = vmatpush2.bf16.msra.mxu0 %v10524_v57  ;;  %v884_v12 = vld [vmem:[#allocation5 + $0x1568] sm:$0xff] }
 0x1fd   :  { %6863 = vmatpush2.bf16.msra.mxu1 %v10652_v60  ;;  %6823 = vmatprep.subr.bf16.mxu0 %v10517_v61  ;;  %v10869_v57 = vcombine.high %v880_v42, %v884_v12  ;;  %v744_v60 = vld [vmem:[#allocation5 + $0x1108] sm:$0xff] }
 0x1fe   :  { %6864 = vmatprep.subr.bf16.mxu1 %v10645_v62  ;;  %v748_v61 = vld [vmem:[#allocation5 + $0x1128] sm:$0xff] }
 0x1ff   :  { %v872_v62 = vld [vmem:[#allocation5 + $0x1508] sm:$0xff] }
 0x200   :  { %6824 = vmatpush2.bf16.msra.mxu0 %v10516_v3  ;;  %v876_v63 = vld [vmem:[#allocation5 + $0x1528] sm:$0xff] }
 0x201   :  { %6865 = vmatpush2.bf16.msra.mxu1 %v10644_v4  ;;  %6825 = vmatprep.subr.bf16.mxu0 %v10509_v5  ;;  %v10733_v4 = vcombine.high %v744_v60, %v748_v61  ;;  %v736_v9 = vld [vmem:[#allocation5 + $0x10c8] sm:$0xff] }
 0x202   :  { %6866 = vmatprep.subr.bf16.mxu1 %v10637_v8  ;;  %v10861_v8 = vcombine.high %v872_v62, %v876_v63  ;;  %v740_v10 = vld [vmem:[#allocation5 + $0x10e8] sm:$0xff] }
 0x203   :  { %v864_v11 = vld [vmem:[#allocation5 + $0x14c8] sm:$0xff] }
 0x204   :  { %6826 = vmatpush2.bf16.msra.mxu0 %v10508_v15  ;;  %v868_v14 = vld [vmem:[#allocation5 + $0x14e8] sm:$0xff]  ;;  %v10732_v15 = vcombine.low %v744_v60, %v748_v61 }
 0x205   :  { %6867 = vmatpush2.bf16.msra.mxu1 %v10636_v19  ;;  %6877 = vmatprep.subr.bf16.mxu0 %v10757_v21  ;;  %v10860_v19 = vcombine.low %v872_v62, %v876_v63  ;;  %v10725_v21 = vcombine.high %v736_v9, %v740_v10  ;;  %v728_v23 = vld [vmem:[#allocation5 + $0x1088] sm:$0xff] }
 0x206   :  { %6918 = vmatprep.subr.bf16.mxu1 %v10885_v22  ;;  %v10853_v22 = vcombine.high %v864_v11, %v868_v14  ;;  %v732_v24 = vld [vmem:[#allocation5 + $0x10a8] sm:$0xff] }
 0x207   :  { %v6583_v41 = vpop.f32.mrf.mxu0  ;;  %6828 = vmatmul.mubr.bf16.vlgmr.msra.gmra.mxu0 %v12416_v39  ;;  %v6624_v44 = vpop.f32.mrf.mxu1  ;;  %v856_v25 = vld [vmem:[#allocation5 + $0x1488] sm:$0xff] }
 0x208   :  { %v6584_v43 = vadd.f32 %v6583_v41, %v12464_v34  ;;  %6869 = vmatmul.mubr.bf16.vlgmr.msra.gmra.mxu1 %v12418_v40  ;;  %6878 = vmatpush1.bf16.msra.mxu0 %v10756_v30  ;;  %v860_v29 = vld [vmem:[#allocation5 + $0x14a8] sm:$0xff]  ;;  %v10724_v30 = vcombine.low %v736_v9, %v740_v10 }
 0x209   :  { %6919 = vmatpush1.bf16.msra.mxu1 %v10884_v32  ;;  %v6585_v48 = vpop.f32.mrf.mxu0  ;;  %6879 = vmatprep.subr.bf16.mxu0 %v10749_v33  ;;  %v6626_v56 = vpop.f32.mrf.mxu1  ;;  %v10852_v32 = vcombine.low %v864_v11, %v868_v14  ;;  %v10717_v33 = vcombine.high %v728_v23, %v732_v24  ;;  %v720_v36 = vld [vmem:[#allocation5 + $0x1048] sm:$0xff] }
 0x20a   :  { %v12474_v53 = vadd.f32 %v6624_v44, %v6584_v43  ;;  %v6586_v54 = vadd.f32 %v6585_v48, %v12469_v45  ;;  %6920 = vmatprep.subr.bf16.mxu1 %v10877_v35  ;;  %6909 = vmatprep.mubr.bf16.mxu0 %v12420_v49  ;;  %v10868_v45 = vcombine.low %v880_v42, %v884_v12  ;;  %v724_v38 = vld [vmem:[#allocation5 + $0x1068] sm:$0xff] }
 0x20b   :  { %v6587_v34 = vpop.f32.mrf.mxu0  ;;  %6950 = vmatprep.mubr.bf16.mxu1 %v12423_v51  ;;  %v6628_v1 = vpop.f32.mrf.mxu1  ;;  %v10845_v35 = vcombine.high %v856_v25, %v860_v29  ;;  %v848_v41 = vld [vmem:[#allocation5 + $0x1448] sm:$0xff]  ;;  %v10716_v12 = vcombine.low %v728_v23, %v732_v24  ;;  %v10844_v43 = vcombine.low %v856_v25, %v860_v29  ;;  %v10709_v44 = vcombine.high %v720_v36, %v724_v38 }
 0x20c   :  { %v12479_v0 = vadd.f32 %v6626_v56, %v6586_v54  ;;  %6880 = vmatpush1.bf16.msra.mxu0 %v10748_v47  ;;  %v852_v42 = vld [vmem:[#allocation5 + $0x1468] sm:$0xff]  ;;  %v10708_v56 = vcombine.low %v720_v36, %v724_v38 }
 0x20d   :  { %6921 = vmatpush1.bf16.msra.mxu1 %v10876_v52  ;;  %v6588_v3 = vpop.f32.mrf.mxu0  ;;  %6881 = vmatprep.subr.bf16.mxu0 %v10741_v27  ;;  %v6629_v5 = vpop.f32.mrf.mxu1  ;;  %v10837_v47 = vcombine.high %v848_v41, %v852_v42  ;;  %v712_v48 = vld [vmem:[#allocation5 + $0x1008] sm:$0xff] }
 0x20e   :  { %6922 = vmatprep.subr.bf16.mxu1 %v10869_v57  ;;  %v716_v52 = vld [vmem:[#allocation5 + $0x1028] sm:$0xff]  ;;  %v10836_v57 = vcombine.low %v848_v41, %v852_v42 }
 0x20f   :  { %v840_v27 = vld [vmem:[#allocation5 + $0x1408] sm:$0xff]  ;;  %v10701_v60 = vcombine.high %v712_v48, %v716_v52 }
 0x210   :  { %6882 = vmatpush1.bf16.msra.mxu0 %v10740_v2  ;;  %v844_v54 = vld [vmem:[#allocation5 + $0x1428] sm:$0xff]  ;;  %v10700_v2 = vcombine.low %v712_v48, %v716_v52 }
 0x211   :  { %6923 = vmatpush1.bf16.msra.mxu1 %v10868_v45  ;;  %6883 = vmatprep.subr.bf16.mxu0 %v10733_v4  ;;  %v10829_v61 = vcombine.high %v840_v27, %v844_v54  ;;  %v832_v34 = vld [vmem:[#allocation5 + $0x13c8] sm:$0xff]  ;;  %v10828_v3 = vcombine.low %v840_v27, %v844_v54 }
 0x212   :  { %6924 = vmatprep.subr.bf16.mxu1 %v10861_v8  ;;  %v836_v62 = vld [vmem:[#allocation5 + $0x13e8] sm:$0xff] }
 0x213   :  { %v960_v63 = vld [vmem:[#allocation5 + $0x17c8] sm:$0xff]  ;;  %v10821_v45 = vcombine.high %v832_v34, %v836_v62  ;;  %v10820_v11 = vcombine.low %v832_v34, %v836_v62 }
 0x214   :  { %6884 = vmatpush1.bf16.msra.mxu0 %v10732_v15  ;;  %v964_v1 = vld [vmem:[#allocation5 + $0x17e8] sm:$0xff] }
 0x215   :  { %6925 = vmatpush1.bf16.msra.mxu1 %v10860_v19  ;;  %6885 = vmatprep.subr.bf16.mxu0 %v10725_v21  ;;  %v10949_v4 = vcombine.high %v960_v63, %v964_v1  ;;  %v824_v5 = vld [vmem:[#allocation5 + $0x1388] sm:$0xff]  ;;  %v10948_v14 = vcombine.low %v960_v63, %v964_v1 }
 0x216   :  { %6926 = vmatprep.subr.bf16.mxu1 %v10853_v22  ;;  %v828_v8 = vld [vmem:[#allocation5 + $0x13a8] sm:$0xff] }
 0x217   :  { %v952_v9 = vld [vmem:[#allocation5 + $0x1788] sm:$0xff]  ;;  %v10813_v15 = vcombine.high %v824_v5, %v828_v8  ;;  %v10812_v25 = vcombine.low %v824_v5, %v828_v8 }
 0x218   :  { %6886 = vmatpush1.bf16.msra.mxu0 %v10724_v30  ;;  %v956_v10 = vld [vmem:[#allocation5 + $0x17a8] sm:$0xff] }
 0x219   :  { %6927 = vmatpush1.bf16.msra.mxu1 %v10852_v32  ;;  %6887 = vmatprep.subr.bf16.mxu0 %v10717_v33  ;;  %v10941_v19 = vcombine.high %v952_v9, %v956_v10  ;;  %v816_v21 = vld [vmem:[#allocation5 + $0x1348] sm:$0xff]  ;;  %v10940_v29 = vcombine.low %v952_v9, %v956_v10 }
 0x21a   :  { %6928 = vmatprep.subr.bf16.mxu1 %v10845_v35  ;;  %v820_v22 = vld [vmem:[#allocation5 + $0x1368] sm:$0xff] }
 0x21b   :  { %v944_v23 = vld [vmem:[#allocation5 + $0x1748] sm:$0xff]  ;;  %v10805_v30 = vcombine.high %v816_v21, %v820_v22  ;;  %v10804_v41 = vcombine.low %v816_v21, %v820_v22 }
 0x21c   :  { %6888 = vmatpush1.bf16.msra.mxu0 %v10716_v12  ;;  %v948_v24 = vld [vmem:[#allocation5 + $0x1768] sm:$0xff] }
 0x21d   :  { %6929 = vmatpush1.bf16.msra.mxu1 %v10844_v43  ;;  %6889 = vmatprep.subr.bf16.mxu0 %v10709_v44  ;;  %v10933_v32 = vcombine.high %v944_v23, %v948_v24  ;;  %v808_v33 = vld [vmem:[#allocation5 + $0x1308] sm:$0xff]  ;;  %v10932_v42 = vcombine.low %v944_v23, %v948_v24 }
 0x21e   :  { %6930 = vmatprep.subr.bf16.mxu1 %v10837_v47  ;;  %v812_v35 = vld [vmem:[#allocation5 + $0x1328] sm:$0xff] }
 0x21f   :  { %v936_v36 = vld [vmem:[#allocation5 + $0x1708] sm:$0xff]  ;;  %v10797_v12 = vcombine.high %v808_v33, %v812_v35  ;;  %v10796_v27 = vcombine.low %v808_v33, %v812_v35 }
 0x220   :  { %6890 = vmatpush1.bf16.msra.mxu0 %v10708_v56  ;;  %v940_v38 = vld [vmem:[#allocation5 + $0x1728] sm:$0xff] }
 0x221   :  { %6931 = vmatpush1.bf16.msra.mxu1 %v10836_v57  ;;  %6891 = vmatprep.subr.bf16.mxu0 %v10701_v60  ;;  %v10925_v43 = vcombine.high %v936_v36, %v940_v38  ;;  %v800_v44 = vld [vmem:[#allocation5 + $0x12c8] sm:$0xff]  ;;  %v10924_v54 = vcombine.low %v936_v36, %v940_v38 }
 0x222   :  { %6932 = vmatprep.subr.bf16.mxu1 %v10829_v61  ;;  %v804_v47 = vld [vmem:[#allocation5 + $0x12e8] sm:$0xff] }
 0x223   :  { %v928_v48 = vld [vmem:[#allocation5 + $0x16c8] sm:$0xff]  ;;  %v10789_v56 = vcombine.high %v800_v44, %v804_v47  ;;  %v10788_v63 = vcombine.low %v800_v44, %v804_v47 }
 0x224   :  { %6892 = vmatpush1.bf16.msra.mxu0 %v10700_v2  ;;  %v932_v52 = vld [vmem:[#allocation5 + $0x16e8] sm:$0xff] }
 0x225   :  { %6933 = vmatpush1.bf16.msra.mxu1 %v10828_v3  ;;  %6893 = vmatprep.subr.bf16.mxu0 %v10821_v45  ;;  %v10917_v57 = vcombine.high %v928_v48, %v932_v52  ;;  %v792_v60 = vld [vmem:[#allocation5 + $0x1288] sm:$0xff]  ;;  %v10916_v1 = vcombine.low %v928_v48, %v932_v52 }
 0x226   :  { %6934 = vmatprep.subr.bf16.mxu1 %v10949_v4  ;;  %v796_v61 = vld [vmem:[#allocation5 + $0x12a8] sm:$0xff] }
 0x227   :  { %v920_v34 = vld [vmem:[#allocation5 + $0x1688] sm:$0xff]  ;;  %v10781_v2 = vcombine.high %v792_v60, %v796_v61  ;;  %v10780_v9 = vcombine.low %v792_v60, %v796_v61 }
 0x228   :  { %6894 = vmatpush2.bf16.msra.mxu0 %v10820_v11  ;;  %v924_v62 = vld [vmem:[#allocation5 + $0x16a8] sm:$0xff] }
 0x229   :  { %6935 = vmatpush2.bf16.msra.mxu1 %v10948_v14  ;;  %6895 = vmatprep.subr.bf16.mxu0 %v10813_v15  ;;  %v10909_v3 = vcombine.high %v920_v34, %v924_v62  ;;  %v784_v45 = vld [vmem:[#allocation5 + $0x1248] sm:$0xff]  ;;  %v10908_v10 = vcombine.low %v920_v34, %v924_v62 }
 0x22a   :  { %6936 = vmatprep.subr.bf16.mxu1 %v10941_v19  ;;  %v788_v4 = vld [vmem:[#allocation5 + $0x1268] sm:$0xff] }
 0x22b   :  { %v912_v5 = vld [vmem:[#allocation5 + $0x1648] sm:$0xff]  ;;  %v10773_v11 = vcombine.high %v784_v45, %v788_v4  ;;  %v10772_v23 = vcombine.low %v784_v45, %v788_v4 }
 0x22c   :  { %6896 = vmatpush2.bf16.msra.mxu0 %v10812_v25  ;;  %v916_v8 = vld [vmem:[#allocation5 + $0x1668] sm:$0xff] }
 0x22d   :  { %6937 = vmatpush2.bf16.msra.mxu1 %v10940_v29  ;;  %6897 = vmatprep.subr.bf16.mxu0 %v10805_v30  ;;  %v10901_v14 = vcombine.high %v912_v5, %v916_v8  ;;  %v776_v15 = vld [vmem:[#allocation5 + $0x1208] sm:$0xff]  ;;  %v10900_v24 = vcombine.low %v912_v5, %v916_v8 }
 0x22e   :  { %6938 = vmatprep.subr.bf16.mxu1 %v10933_v32  ;;  %v780_v19 = vld [vmem:[#allocation5 + $0x1228] sm:$0xff] }
 0x22f   :  { %v904_v21 = vld [vmem:[#allocation5 + $0x1608] sm:$0xff]  ;;  %v10765_v25 = vcombine.high %v776_v15, %v780_v19  ;;  %v10764_v36 = vcombine.low %v776_v15, %v780_v19 }
 0x230   :  { %6898 = vmatpush2.bf16.msra.mxu0 %v10804_v41  ;;  %v908_v22 = vld [vmem:[#allocation5 + $0x1628] sm:$0xff] }
 0x231   :  { %6939 = vmatpush2.bf16.msra.mxu1 %v10932_v42  ;;  %6899 = vmatprep.subr.bf16.mxu0 %v10797_v12  ;;  %v10893_v29 = vcombine.high %v904_v21, %v908_v22  ;;  %v1024_v30 = vld [vmem:[#allocation5 + $0x19c8] sm:$0xff]  ;;  %v10892_v38 = vcombine.low %v904_v21, %v908_v22 }
 0x232   :  { %6940 = vmatprep.subr.bf16.mxu1 %v10925_v43  ;;  %v1028_v32 = vld [vmem:[#allocation5 + $0x19e8] sm:$0xff] }
 0x233   :  { %v1152_v33 = vld [vmem:[#allocation5 + $0x1dc8] sm:$0xff]  ;;  %v11013_v41 = vcombine.high %v1024_v30, %v1028_v32  ;;  %v11012_v48 = vcombine.low %v1024_v30, %v1028_v32 }
 0x234   :  { %6900 = vmatpush2.bf16.msra.mxu0 %v10796_v27  ;;  %v1156_v35 = vld [vmem:[#allocation5 + $0x1de8] sm:$0xff] }
 0x235   :  { %6941 = vmatpush2.bf16.msra.mxu1 %v10924_v54  ;;  %6901 = vmatprep.subr.bf16.mxu0 %v10789_v56  ;;  %v11141_v42 = vcombine.high %v1152_v33, %v1156_v35  ;;  %v1016_v12 = vld [vmem:[#allocation5 + $0x1988] sm:$0xff]  ;;  %v11140_v52 = vcombine.low %v1152_v33, %v1156_v35 }
 0x236   :  { %6942 = vmatprep.subr.bf16.mxu1 %v10917_v57  ;;  %v1020_v43 = vld [vmem:[#allocation5 + $0x19a8] sm:$0xff] }
 0x237   :  { %v1144_v44 = vld [vmem:[#allocation5 + $0x1d88] sm:$0xff]  ;;  %v11005_v27 = vcombine.high %v1016_v12, %v1020_v43 }
 0x238   :  { %6902 = vmatpush2.bf16.msra.mxu0 %v10788_v63  ;;  %v1148_v47 = vld [vmem:[#allocation5 + $0x1da8] sm:$0xff] }
 0x239   :  { %6943 = vmatpush2.bf16.msra.mxu1 %v10916_v1  ;;  %6903 = vmatprep.subr.bf16.mxu0 %v10781_v2  ;;  %v11133_v54 = vcombine.high %v1144_v44, %v1148_v47  ;;  %v1008_v56 = vld [vmem:[#allocation5 + $0x1948] sm:$0xff]  ;;  %v11004_v1 = vcombine.low %v1016_v12, %v1020_v43 }
 0x23a   :  { %6944 = vmatprep.subr.bf16.mxu1 %v10909_v3  ;;  %v1012_v57 = vld [vmem:[#allocation5 + $0x1968] sm:$0xff]  ;;  %v11132_v3 = vcombine.low %v1144_v44, %v1148_v47 }
 0x23b   :  { %v1136_v61 = vld [vmem:[#allocation5 + $0x1d48] sm:$0xff]  ;;  %v10997_v45 = vcombine.high %v1008_v56, %v1012_v57  ;;  %v10996_v22 = vcombine.low %v1008_v56, %v1012_v57 }
 0x23c   :  { %6904 = vmatpush2.bf16.msra.mxu0 %v10780_v9  ;;  %v1140_v34 = vld [vmem:[#allocation5 + $0x1d68] sm:$0xff] }
 0x23d   :  { %6945 = vmatpush2.bf16.msra.mxu1 %v10908_v10  ;;  %6905 = vmatprep.subr.bf16.mxu0 %v10773_v11  ;;  %v11125_v9 = vcombine.high %v1136_v61, %v1140_v34  ;;  %v1000_v10 = vld [vmem:[#allocation5 + $0x1908] sm:$0xff] }
 0x23e   :  { %6946 = vmatprep.subr.bf16.mxu1 %v10901_v14  ;;  %v1004_v11 = vld [vmem:[#allocation5 + $0x1928] sm:$0xff] }
 0x23f   :  { %v1128_v14 = vld [vmem:[#allocation5 + $0x1d08] sm:$0xff] }
 0x240   :  { %6906 = vmatpush2.bf16.msra.mxu0 %v10772_v23  ;;  %v1132_v15 = vld [vmem:[#allocation5 + $0x1d28] sm:$0xff] }
 0x241   :  { %6947 = vmatpush2.bf16.msra.mxu1 %v10900_v24  ;;  %6907 = vmatprep.subr.bf16.mxu0 %v10765_v25  ;;  %v10989_v24 = vcombine.high %v1000_v10, %v1004_v11  ;;  %v992_v30 = vld [vmem:[#allocation5 + $0x18c8] sm:$0xff] }
 0x242   :  { %6948 = vmatprep.subr.bf16.mxu1 %v10893_v29  ;;  %v11117_v29 = vcombine.high %v1128_v14, %v1132_v15  ;;  %v996_v32 = vld [vmem:[#allocation5 + $0x18e8] sm:$0xff] }
 0x243   :  { %v1120_v33 = vld [vmem:[#allocation5 + $0x1cc8] sm:$0xff] }
 0x244   :  { %6908 = vmatpush2.bf16.msra.mxu0 %v10764_v36  ;;  %v1124_v35 = vld [vmem:[#allocation5 + $0x1ce8] sm:$0xff]  ;;  %v10988_v36 = vcombine.low %v1000_v10, %v1004_v11 }
 0x245   :  { %6949 = vmatpush2.bf16.msra.mxu1 %v10892_v38  ;;  %6959 = vmatprep.subr.bf16.mxu0 %v11013_v41  ;;  %v11116_v38 = vcombine.low %v1128_v14, %v1132_v15  ;;  %v10981_v41 = vcombine.high %v992_v30, %v996_v32  ;;  %v984_v12 = vld [vmem:[#allocation5 + $0x1888] sm:$0xff] }
 0x246   :  { %7000 = vmatprep.subr.bf16.mxu1 %v11141_v42  ;;  %v11109_v42 = vcombine.high %v1120_v33, %v1124_v35  ;;  %v988_v43 = vld [vmem:[#allocation5 + $0x18a8] sm:$0xff] }
 0x247   :  { %v6665_v60 = vpop.f32.mrf.mxu0  ;;  %6910 = vmatmul.mubr.bf16.vlgmr.msra.gmra.mxu0 %v12428_v6  ;;  %v1112_v44 = vld [vmem:[#allocation5 + $0x1c88] sm:$0xff] }
 0x248   :  { %v6666_v62 = vadd.f32 %v6665_v60, %v12474_v53  ;;  %v6706_v63 = vpop.f32.mrf.mxu1  ;;  %6951 = vmatmul.mubr.bf16.vlgmr.msra.gmra.mxu1 %v12430_v7  ;;  %6960 = vmatpush1.bf16.msra.mxu0 %v11012_v48  ;;  %v1116_v47 = vld [vmem:[#allocation5 + $0x1ca8] sm:$0xff]  ;;  %v10980_v48 = vcombine.low %v992_v30, %v996_v32 }
 0x249   :  { %7001 = vmatpush1.bf16.msra.mxu1 %v11140_v52  ;;  %v6667_v2 = vpop.f32.mrf.mxu0  ;;  %6961 = vmatprep.subr.bf16.mxu0 %v11005_v27  ;;  %v11108_v52 = vcombine.low %v1120_v33, %v1124_v35  ;;  %v10973_v27 = vcombine.high %v984_v12, %v988_v43  ;;  %v976_v56 = vld [vmem:[#allocation5 + $0x1848] sm:$0xff] }
 0x24a   :  { %v12484_v4 = vadd.f32 %v6706_v63, %v6666_v62  ;;  %v6668_v5 = vadd.f32 %v6667_v2, %v12479_v0  ;;  %v6708_v8 = vpop.f32.mrf.mxu1  ;;  %7002 = vmatprep.subr.bf16.mxu1 %v11133_v54  ;;  %6991 = vmatprep.mubr.bf16.mxu0 %v12432_v17  ;;  %v11124_v0 = vcombine.low %v1136_v61, %v1140_v34  ;;  %v980_v57 = vld [vmem:[#allocation5 + $0x1868] sm:$0xff] }
 0x24b   :  { %v6669_v53 = vpop.f32.mrf.mxu0  ;;  %7032 = vmatprep.mubr.bf16.mxu1 %v12435_v18  ;;  %v11101_v54 = vcombine.high %v1112_v44, %v1116_v47  ;;  %v1104_v60 = vld [vmem:[#allocation5 + $0x1c48] sm:$0xff]  ;;  %v10972_v34 = vcombine.low %v984_v12, %v988_v43  ;;  %v11100_v62 = vcombine.low %v1112_v44, %v1116_v47  ;;  %v10965_v63 = vcombine.high %v976_v56, %v980_v57 }
 0x24c   :  { %v12489_v19 = vadd.f32 %v6708_v8, %v6668_v5  ;;  %v6710_v21 = vpop.f32.mrf.mxu1  ;;  %6962 = vmatpush1.bf16.msra.mxu0 %v11004_v1  ;;  %v1108_v61 = vld [vmem:[#allocation5 + $0x1c68] sm:$0xff]  ;;  %v10964_v8 = vcombine.low %v976_v56, %v980_v57  ;;  %vm7697_vm2 = vcmp.gt.f32.partialorder %v12484_v4, 0.0 }
 0x24d   :  { %7003 = vmatpush1.bf16.msra.mxu1 %v11132_v3  ;;  %v6670_v23 = vpop.f32.mrf.mxu0  ;;  %6963 = vmatprep.subr.bf16.mxu0 %v10997_v45  ;;  %v11093_v1 = vcombine.high %v1104_v60, %v1108_v61  ;;  %v968_v2 = vld [vmem:[#allocation5 + $0x1808] sm:$0xff] }
 0x24e   :  { %v6711_v25 = vpop.f32.mrf.mxu1  ;;  %7004 = vmatprep.subr.bf16.mxu1 %v11125_v9  ;;  %v972_v3 = vld [vmem:[#allocation5 + $0x1828] sm:$0xff]  ;;  %v11092_v9 = vcombine.low %v1104_v60, %v1108_v61  ;;  %vm7698_vm0 = vcmp.gt.f32.partialorder %v12489_v19, 0.0 }
 0x24f   :  { %v1096_v45 = vld [vmem:[#allocation5 + $0x1c08] sm:$0xff]  ;;  %v10957_v10 = vcombine.high %v968_v2, %v972_v3 }
 0x250   :  { %6964 = vmatpush1.bf16.msra.mxu0 %v10996_v22  ;;  %v1100_v5 = vld [vmem:[#allocation5 + $0x1c28] sm:$0xff]  ;;  %v10956_v22 = vcombine.low %v968_v2, %v972_v3 }
 0x251   :  { %7005 = vmatpush1.bf16.msra.mxu1 %v11124_v0  ;;  %6965 = vmatprep.subr.bf16.mxu0 %v10989_v24  ;;  %v11085_v11 = vcombine.high %v1096_v45, %v1100_v5  ;;  %v1088_v53 = vld [vmem:[#allocation5 + $0x1bc8] sm:$0xff]  ;;  %v11084_v23 = vcombine.low %v1096_v45, %v1100_v5 }
 0x252   :  { %7006 = vmatprep.subr.bf16.mxu1 %v11117_v29  ;;  %v1092_v14 = vld [vmem:[#allocation5 + $0x1be8] sm:$0xff] }
 0x253   :  { %v1216_v15 = vld [vmem:[#allocation5 + $0x1fc8] sm:$0xff]  ;;  %v11077_v0 = vcombine.high %v1088_v53, %v1092_v14  ;;  %v11076_v33 = vcombine.low %v1088_v53, %v1092_v14 }
 0x254   :  { %6966 = vmatpush1.bf16.msra.mxu0 %v10988_v36  ;;  %v1220_v21 = vld [vmem:[#allocation5 + $0x1fe8] sm:$0xff] }
 0x255   :  { %7007 = vmatpush1.bf16.msra.mxu1 %v11116_v38  ;;  %6967 = vmatprep.subr.bf16.mxu0 %v10981_v41  ;;  %v11205_v24 = vcombine.high %v1216_v15, %v1220_v21  ;;  %v1080_v25 = vld [vmem:[#allocation5 + $0x1b88] sm:$0xff]  ;;  %v11204_v35 = vcombine.low %v1216_v15, %v1220_v21 }
 0x256   :  { %7008 = vmatprep.subr.bf16.mxu1 %v11109_v42  ;;  %v1084_v29 = vld [vmem:[#allocation5 + $0x1ba8] sm:$0xff] }
 0x257   :  { %v1208_v30 = vld [vmem:[#allocation5 + $0x1f88] sm:$0xff]  ;;  %v11069_v36 = vcombine.high %v1080_v25, %v1084_v29  ;;  %v11068_v44 = vcombine.low %v1080_v25, %v1084_v29 }
 0x258   :  { %6968 = vmatpush1.bf16.msra.mxu0 %v10980_v48  ;;  %v1212_v32 = vld [vmem:[#allocation5 + $0x1fa8] sm:$0xff] }
 0x259   :  { %7009 = vmatpush1.bf16.msra.mxu1 %v11108_v52  ;;  %6969 = vmatprep.subr.bf16.mxu0 %v10973_v27  ;;  %v11197_v38 = vcombine.high %v1208_v30, %v1212_v32  ;;  %v1072_v41 = vld [vmem:[#allocation5 + $0x1b48] sm:$0xff]  ;;  %v11196_v47 = vcombine.low %v1208_v30, %v1212_v32 }
 0x25a   :  { %7010 = vmatprep.subr.bf16.mxu1 %v11101_v54  ;;  %v1076_v42 = vld [vmem:[#allocation5 + $0x1b68] sm:$0xff] }
 0x25b   :  { %v1200_v12 = vld [vmem:[#allocation5 + $0x1f48] sm:$0xff]  ;;  %v11061_v48 = vcombine.high %v1072_v41, %v1076_v42  ;;  %v11060_v60 = vcombine.low %v1072_v41, %v1076_v42 }
 0x25c   :  { %6970 = vmatpush1.bf16.msra.mxu0 %v10972_v34  ;;  %v1204_v43 = vld [vmem:[#allocation5 + $0x1f68] sm:$0xff] }
 0x25d   :  { %7011 = vmatpush1.bf16.msra.mxu1 %v11100_v62  ;;  %6971 = vmatprep.subr.bf16.mxu0 %v10965_v63  ;;  %v11189_v52 = vcombine.high %v1200_v12, %v1204_v43  ;;  %v1064_v27 = vld [vmem:[#allocation5 + $0x1b08] sm:$0xff]  ;;  %v11188_v61 = vcombine.low %v1200_v12, %v1204_v43 }
 0x25e   :  { %7012 = vmatprep.subr.bf16.mxu1 %v11093_v1  ;;  %v1068_v54 = vld [vmem:[#allocation5 + $0x1b28] sm:$0xff] }
 0x25f   :  { %v1192_v56 = vld [vmem:[#allocation5 + $0x1f08] sm:$0xff]  ;;  %v11053_v34 = vcombine.high %v1064_v27, %v1068_v54  ;;  %v11052_v45 = vcombine.low %v1064_v27, %v1068_v54  ;;  %v385_v27 = vld [vmem:[#allocation5 + $0x5d0] sm:$0xff] }
 0x260   :  { %6972 = vmatpush1.bf16.msra.mxu0 %v10964_v8  ;;  %v1196_v57 = vld [vmem:[#allocation5 + $0x1f28] sm:$0xff]  ;;  %v389_v54 = vld [vmem:[#allocation5 + $0x5f0] sm:$0xff] }
 0x261   :  { %7013 = vmatpush1.bf16.msra.mxu1 %v11092_v9  ;;  %6973 = vmatprep.subr.bf16.mxu0 %v10957_v10  ;;  %v11181_v62 = vcombine.high %v1192_v56, %v1196_v57  ;;  %v1056_v63 = vld [vmem:[#allocation5 + $0x1ac8] sm:$0xff]  ;;  %v11180_v5 = vcombine.low %v1192_v56, %v1196_v57  ;;  %v1235_v57 = vsub.s32 2, %v12441_v26 }
 0x262   :  { %7014 = vmatprep.subr.bf16.mxu1 %v11085_v11  ;;  %v1060_v1 = vld [vmem:[#allocation5 + $0x1ae8] sm:$0xff] }
 0x263   :  { %v1184_v2 = vld [vmem:[#allocation5 + $0x1ec8] sm:$0xff]  ;;  %v11045_v8 = vcombine.high %v1056_v63, %v1060_v1  ;;  %v11044_v15 = vcombine.low %v1056_v63, %v1060_v1  ;;  %v249_v63 = vld [vmem:[#allocation5 + $0x190] sm:$0xff] }
 0x264   :  { %6974 = vmatpush1.bf16.msra.mxu0 %v10956_v22  ;;  %v1188_v3 = vld [vmem:[#allocation5 + $0x1ee8] sm:$0xff]  ;;  %v253_v1 = vld [vmem:[#allocation5 + $0x1b0] sm:$0xff] }
 0x265   :  { %7015 = vmatpush1.bf16.msra.mxu1 %v11084_v23  ;;  %6975 = vmatprep.subr.bf16.mxu0 %v11077_v0  ;;  %v11173_v9 = vcombine.high %v1184_v2, %v1188_v3  ;;  %v1048_v10 = vld [vmem:[#allocation5 + $0x1a88] sm:$0xff]  ;;  %v11172_v21 = vcombine.low %v1184_v2, %v1188_v3  ;;  %v377_v2 = vld [vmem:[#allocation5 + $0x590] sm:$0xff] }
 0x266   :  { %7016 = vmatprep.subr.bf16.mxu1 %v11205_v24  ;;  %v1052_v11 = vld [vmem:[#allocation5 + $0x1aa8] sm:$0xff]  ;;  %v381_v3 = vld [vmem:[#allocation5 + $0x5b0] sm:$0xff] }
 0x267   :  { %v1176_v53 = vld [vmem:[#allocation5 + $0x1e88] sm:$0xff]  ;;  %v11037_v22 = vcombine.high %v1048_v10, %v1052_v11  ;;  %v11036_v30 = vcombine.low %v1048_v10, %v1052_v11  ;;  %v10239_v10 = vcombine.high %v249_v63, %v253_v1 }
 0x268   :  { %6976 = vmatpush2.bf16.msra.mxu0 %v11076_v33  ;;  %v1180_v14 = vld [vmem:[#allocation5 + $0x1ea8] sm:$0xff] }
 0x269   :  { %7017 = vmatpush2.bf16.msra.mxu1 %v11204_v35  ;;  %6977 = vmatprep.subr.bf16.mxu0 %v11069_v36  ;;  %v11165_v23 = vcombine.high %v1176_v53, %v1180_v14  ;;  %v1040_v0 = vld [vmem:[#allocation5 + $0x1a48] sm:$0xff]  ;;  %v11164_v32 = vcombine.low %v1176_v53, %v1180_v14  ;;  %v10367_v53 = vcombine.high %v377_v2, %v381_v3  ;;  %v241_v14 = vld [vmem:[#allocation5 + $0x150] sm:$0xff] }
 0x26a   :  { %7018 = vmatprep.subr.bf16.mxu1 %v11197_v38  ;;  %v1044_v24 = vld [vmem:[#allocation5 + $0x1a68] sm:$0xff] }
 0x26b   :  { %v1168_v25 = vld [vmem:[#allocation5 + $0x1e48] sm:$0xff]  ;;  %v11029_v33 = vcombine.high %v1040_v0, %v1044_v24  ;;  %v11028_v12 = vcombine.low %v1040_v0, %v1044_v24 }
 0x26c   :  { %6978 = vmatpush2.bf16.msra.mxu0 %v11068_v44  ;;  %v1172_v29 = vld [vmem:[#allocation5 + $0x1e68] sm:$0xff] }
 0x26d   :  { %7019 = vmatpush2.bf16.msra.mxu1 %v11196_v47  ;;  %6979 = vmatprep.subr.bf16.mxu0 %v11061_v48  ;;  %v11157_v35 = vcombine.high %v1168_v25, %v1172_v29  ;;  %v1032_v36 = vld [vmem:[#allocation5 + $0x1a08] sm:$0xff]  ;;  %v11156_v43 = vcombine.low %v1168_v25, %v1172_v29  ;;  %v257_v48 = vld [vmem:[#allocation5 + $0x1d0] sm:$0xff]  ;;  %v10238_v25 = vcombine.low %v249_v63, %v253_v1 }
 0x26e   :  { %7020 = vmatprep.subr.bf16.mxu1 %v11189_v52  ;;  %v1036_v38 = vld [vmem:[#allocation5 + $0x1a28] sm:$0xff]  ;;  %v261_v52 = vld [vmem:[#allocation5 + $0x1f0] sm:$0xff] }
 0x26f   :  { %v1160_v41 = vld [vmem:[#allocation5 + $0x1e08] sm:$0xff]  ;;  %v11021_v44 = vcombine.high %v1032_v36, %v1036_v38  ;;  %v11020_v56 = vcombine.low %v1032_v36, %v1036_v38  ;;  %v229_v63 = vld [vmem:[#allocation5 + $0xf0] sm:$0xff] }
 0x270   :  { %6980 = vmatpush2.bf16.msra.mxu0 %v11060_v60  ;;  %v1164_v42 = vld [vmem:[#allocation5 + $0x1e28] sm:$0xff]  ;;  %v353_v1 = vld [vmem:[#allocation5 + $0x4d0] sm:$0xff] }
 0x271   :  { %7021 = vmatpush2.bf16.msra.mxu1 %v11188_v61  ;;  %6981 = vmatprep.subr.bf16.mxu0 %v11053_v34  ;;  %v11149_v47 = vcombine.high %v1160_v41, %v1164_v42  ;;  %v11148_v60 = vcombine.low %v1160_v41, %v1164_v42  ;;  %v10247_v61 = vcombine.high %v257_v48, %v261_v52  ;;  %v233_v41 = vld [vmem:[#allocation5 + $0x110] sm:$0xff] }
 0x272   :  { %7022 = vmatprep.subr.bf16.mxu1 %v11181_v62  ;;  %v10375_v34 = vcombine.high %v385_v27, %v389_v54  ;;  %v1239_v62 = vsub.s32 3, %v12441_v26  ;;  %v237_v42 = vld [vmem:[#allocation5 + $0x130] sm:$0xff] }
 0x274   :  { %6982 = vmatpush2.bf16.msra.mxu0 %v11052_v45  ;;  %v12041_v45 = vld [vmem:[#allocation7] sm:$0xff] }
 0x275   :  { %7023 = vmatpush2.bf16.msra.mxu1 %v11180_v5  ;;  %6983 = vmatprep.subr.bf16.mxu0 %v11045_v8  ;;  %v1236_v5 = vrot.slane %v12041_v45, %v1235_v57  ;;  %v10246_v8 = vcombine.low %v257_v48, %v261_v52  ;;  %v1240_v11 = vrot.slane %v12041_v45, %v1239_v62 }
 0x276   :  { %7024 = vmatprep.subr.bf16.mxu1 %v11173_v9  ;;  %v10374_v9 = vcombine.low %v385_v27, %v389_v54 }
 0x278   :  { %6984 = vmatpush2.bf16.msra.mxu0 %v11044_v15  ;;  %v245_v15 = vld [vmem:[#allocation5 + $0x170] sm:$0xff] }
 0x279   :  { %7025 = vmatpush2.bf16.msra.mxu1 %v11172_v21  ;;  %6985 = vmatprep.subr.bf16.mxu0 %v11037_v22  ;;  %v369_v22 = vld [vmem:[#allocation5 + $0x550] sm:$0xff]  ;;  %v10230_v52 = vcombine.low %v241_v14, %v245_v15 }
 0x27a   :  { %7026 = vmatprep.subr.bf16.mxu1 %v11165_v23  ;;  %v373_v23 = vld [vmem:[#allocation5 + $0x570] sm:$0xff] }
 0x27b   :  { %v10359_v38 = vcombine.high %v369_v22, %v373_v23  ;;  %v10358_v54 = vcombine.low %v369_v22, %v373_v23  ;;  %v209_v23 = vld [vmem:[#allocation5 + $0x50] sm:$0xff] }
 0x27c   :  { %6986 = vmatpush2.bf16.msra.mxu0 %v11036_v30  ;;  %v10366_v30 = vcombine.low %v377_v2, %v381_v3  ;;  %v357_v2 = vld [vmem:[#allocation5 + $0x4f0] sm:$0xff]  ;;  %v10222_v3 = vcombine.low %v233_v41, %v237_v42 }
 0x27d   :  { %7027 = vmatpush2.bf16.msra.mxu1 %v11164_v32  ;;  %6987 = vmatprep.subr.bf16.mxu0 %v11029_v33  ;;  %v10231_v32 = vcombine.high %v241_v14, %v245_v15  ;;  %v10342_v15 = vcombine.low %v353_v1, %v357_v2 }
 0x27e   :  { %7028 = vmatprep.subr.bf16.mxu1 %v11157_v35 }
 0x280   :  { %6988 = vmatpush2.bf16.msra.mxu0 %v11028_v12 }
 0x281   :  { %7029 = vmatpush2.bf16.msra.mxu1 %v11156_v43  ;;  %6989 = vmatprep.subr.bf16.mxu0 %v11021_v44  ;;  %v361_v43 = vld [vmem:[#allocation5 + $0x510] sm:$0xff] }
 0x282   :  { %7030 = vmatprep.subr.bf16.mxu1 %v11149_v47  ;;  %v365_v44 = vld [vmem:[#allocation5 + $0x530] sm:$0xff] }
 0x283   :  { %v10350_v45 = vcombine.low %v361_v43, %v365_v44 }
 0x284   :  { %6990 = vmatpush2.bf16.msra.mxu0 %v11020_v56  ;;  %v10223_v56 = vcombine.high %v233_v41, %v237_v42  ;;  %v329_v41 = vld [vmem:[#allocation5 + $0x410] sm:$0xff] }
 0x285   :  { %7031 = vmatpush2.bf16.msra.mxu1 %v11148_v60  ;;  %7041 = vmatprep.subr.bf16.mxu0 %v10247_v61  ;;  %v10351_v61 = vcombine.high %v361_v43, %v365_v44  ;;  %v333_v42 = vld [vmem:[#allocation5 + $0x430] sm:$0xff] }
 0x286   :  { %7082 = vmatprep.subr.bf16.mxu1 %v10375_v34  ;;  %v225_v34 = vld [vmem:[#allocation5 + $0xd0] sm:$0xff] }
 0x287   :  { %v6747_v21 = vpop.f32.mrf.mxu0  ;;  %6992 = vmatmul.mubr.bf16.vlgmr.msra.gmra.mxu0 %v12445_v50  ;;  %v10214_v14 = vcombine.low %v225_v34, %v229_v63 }
 0x288   :  { %v6748_v0 = vadd.f32 %v6747_v21, %v1236_v5  ;;  %v6788_v24 = vpop.f32.mrf.mxu1  ;;  %7033 = vmatmul.mubr.bf16.vlgmr.msra.gmra.mxu1 %v12449_v55  ;;  %7042 = vmatpush1.bf16.msra.mxu0 %v10246_v8  ;;  %v10215_v5 = vcombine.high %v225_v34, %v229_v63  ;;  %v10343_v8 = vcombine.high %v353_v1, %v357_v2  ;;  %v313_v1 = vld [vmem:[#allocation5 + $0x390] sm:$0xff] }
 0x289   :  { %7083 = vmatpush1.bf16.msra.mxu1 %v10374_v9  ;;  %v6749_v29 = vpop.f32.mrf.mxu0  ;;  %7043 = vmatprep.subr.bf16.mxu0 %v10239_v10  ;;  %v217_v9 = vld [vmem:[#allocation5 + $0x90] sm:$0xff] }
 0x28a   :  { %v12499_v33 = vadd.f32 %v6788_v24, %v6748_v0  ;;  %v6750_v35 = vadd.f32 %v6749_v29, %v1240_v11  ;;  %v6790_v36 = vpop.f32.mrf.mxu1  ;;  %7084 = vmatprep.subr.bf16.mxu1 %v10367_v53  ;;  %7073 = vmatprep.mubr.bf16.mxu0 %v12398_v58  ;;  %v221_v10 = vld [vmem:[#allocation5 + $0xb0] sm:$0xff] }
 0x28b   :  { %v6751_v12 = vpop.f32.mrf.mxu0  ;;  %7114 = vmatprep.mubr.bf16.mxu1 %v12400_v59  ;;  %v345_v11 = vld [vmem:[#allocation5 + $0x490] sm:$0xff]  ;;  %v10207_v21 = vcombine.high %v217_v9, %v221_v10  ;;  %v10206_v29 = vcombine.low %v217_v9, %v221_v10 }
 0x28c   :  { %v12503_v47 = vadd.f32 %v6790_v36, %v6750_v35  ;;  %v6792_v48 = vpop.f32.mrf.mxu1  ;;  %7044 = vmatpush1.bf16.msra.mxu0 %v10238_v25  ;;  %v349_v53 = vld [vmem:[#allocation5 + $0x4b0] sm:$0xff] }
 0x28d   :  { %7085 = vmatpush1.bf16.msra.mxu1 %v10366_v30  ;;  %v6752_v27 = vpop.f32.mrf.mxu0  ;;  %7045 = vmatprep.subr.bf16.mxu0 %v10231_v32  ;;  %v10335_v22 = vcombine.high %v345_v11, %v349_v53  ;;  %v213_v0 = vld [vmem:[#allocation5 + $0x70] sm:$0xff]  ;;  %v10334_v30 = vcombine.low %v345_v11, %v349_v53  ;;  %v10319_v48 = vcombine.high %v329_v41, %v333_v42 }
 0x28e   :  { %v6793_v60 = vpop.f32.mrf.mxu1  ;;  %7086 = vmatprep.subr.bf16.mxu1 %v10359_v38  ;;  %v337_v24 = vld [vmem:[#allocation5 + $0x450] sm:$0xff]  ;;  %v10199_v32 = vcombine.high %v209_v23, %v213_v0  ;;  %v10198_v12 = vcombine.low %v209_v23, %v213_v0 }
 0x28f   :  { %v341_v25 = vld [vmem:[#allocation5 + $0x470] sm:$0xff] }
 0x290   :  { %7046 = vmatpush1.bf16.msra.mxu0 %v10230_v52  ;;  %v10327_v35 = vcombine.high %v337_v24, %v341_v25  ;;  %v201_v36 = vld [vmem:[#allocation5 + $0x10] sm:$0xff]  ;;  %v10326_v43 = vcombine.low %v337_v24, %v341_v25 }
 0x291   :  { %7087 = vmatpush1.bf16.msra.mxu1 %v10358_v54  ;;  %7047 = vmatprep.subr.bf16.mxu0 %v10223_v56  ;;  %v205_v38 = vld [vmem:[#allocation5 + $0x30] sm:$0xff] }
 0x292   :  { %7088 = vmatprep.subr.bf16.mxu1 %v10351_v61  ;;  %v10191_v44 = vcombine.high %v201_v36, %v205_v38  ;;  %v321_v52 = vld [vmem:[#allocation5 + $0x3d0] sm:$0xff]  ;;  %v10190_v60 = vcombine.low %v201_v36, %v205_v38  ;;  %v10318_v61 = vcombine.low %v329_v41, %v333_v42 }
 0x293   :  { %v325_v27 = vld [vmem:[#allocation5 + $0x3f0] sm:$0xff] }
 0x294   :  { %7048 = vmatpush1.bf16.msra.mxu0 %v10222_v3  ;;  %v449_v54 = vld [vmem:[#allocation5 + $0x7d0] sm:$0xff]  ;;  %v10311_v34 = vcombine.high %v321_v52, %v325_v27 }
 0x295   :  { %7089 = vmatpush1.bf16.msra.mxu1 %v10350_v45  ;;  %7049 = vmatprep.subr.bf16.mxu0 %v10215_v5  ;;  %v453_v56 = vld [vmem:[#allocation5 + $0x7f0] sm:$0xff]  ;;  %v10310_v5 = vcombine.low %v321_v52, %v325_v27 }
 0x296   :  { %7090 = vmatprep.subr.bf16.mxu1 %v10343_v8  ;;  %v10439_v63 = vcombine.high %v449_v54, %v453_v56  ;;  %v317_v2 = vld [vmem:[#allocation5 + $0x3b0] sm:$0xff]  ;;  %v10438_v8 = vcombine.low %v449_v54, %v453_v56 }
 0x297   :  { %v441_v3 = vld [vmem:[#allocation5 + $0x790] sm:$0xff]  ;;  %v10303_v9 = vcombine.high %v313_v1, %v317_v2 }
 0x298   :  { %7050 = vmatpush1.bf16.msra.mxu0 %v10214_v14  ;;  %v445_v45 = vld [vmem:[#allocation5 + $0x7b0] sm:$0xff] }
 0x299   :  { %7091 = vmatpush1.bf16.msra.mxu1 %v10342_v15  ;;  %7051 = vmatprep.subr.bf16.mxu0 %v10207_v21  ;;  %v10431_v10 = vcombine.high %v441_v3, %v445_v45  ;;  %v305_v11 = vld [vmem:[#allocation5 + $0x350] sm:$0xff]  ;;  %v10302_v21 = vcombine.low %v313_v1, %v317_v2 }
 0x29a   :  { %7092 = vmatprep.subr.bf16.mxu1 %v10335_v22  ;;  %v309_v53 = vld [vmem:[#allocation5 + $0x370] sm:$0xff]  ;;  %v10430_v22 = vcombine.low %v441_v3, %v445_v45 }
 0x29b   :  { %v433_v14 = vld [vmem:[#allocation5 + $0x750] sm:$0xff]  ;;  %v10295_v23 = vcombine.high %v305_v11, %v309_v53 }
 0x29c   :  { %7052 = vmatpush1.bf16.msra.mxu0 %v10206_v29  ;;  %v437_v15 = vld [vmem:[#allocation5 + $0x770] sm:$0xff] }
 0x29d   :  { %7093 = vmatpush1.bf16.msra.mxu1 %v10334_v30  ;;  %7053 = vmatprep.subr.bf16.mxu0 %v10199_v32  ;;  %v10423_v0 = vcombine.high %v433_v14, %v437_v15  ;;  %v297_v24 = vld [vmem:[#allocation5 + $0x310] sm:$0xff]  ;;  %v10294_v32 = vcombine.low %v305_v11, %v309_v53 }
 0x29e   :  { %7094 = vmatprep.subr.bf16.mxu1 %v10327_v35  ;;  %v301_v25 = vld [vmem:[#allocation5 + $0x330] sm:$0xff]  ;;  %v10422_v35 = vcombine.low %v433_v14, %v437_v15 }
 0x29f   :  { %v425_v29 = vld [vmem:[#allocation5 + $0x710] sm:$0xff]  ;;  %v10287_v36 = vcombine.high %v297_v24, %v301_v25 }
 0x2a0   :  { %7054 = vmatpush1.bf16.msra.mxu0 %v10198_v12  ;;  %v429_v30 = vld [vmem:[#allocation5 + $0x730] sm:$0xff] }
 0x2a1   :  { %7095 = vmatpush1.bf16.msra.mxu1 %v10326_v43  ;;  %7055 = vmatprep.subr.bf16.mxu0 %v10191_v44  ;;  %v10415_v38 = vcombine.high %v425_v29, %v429_v30  ;;  %v289_v41 = vld [vmem:[#allocation5 + $0x2d0] sm:$0xff]  ;;  %v10286_v44 = vcombine.low %v297_v24, %v301_v25 }
 0x2a2   :  { %7096 = vmatprep.subr.bf16.mxu1 %v10319_v48  ;;  %v293_v42 = vld [vmem:[#allocation5 + $0x2f0] sm:$0xff]  ;;  %v10414_v48 = vcombine.low %v425_v29, %v429_v30 }
 0x2a3   :  { %v417_v12 = vld [vmem:[#allocation5 + $0x6d0] sm:$0xff]  ;;  %v10279_v52 = vcombine.high %v289_v41, %v293_v42 }
 0x2a4   :  { %7056 = vmatpush1.bf16.msra.mxu0 %v10190_v60  ;;  %v421_v43 = vld [vmem:[#allocation5 + $0x6f0] sm:$0xff] }
 0x2a5   :  { %7097 = vmatpush1.bf16.msra.mxu1 %v10318_v61  ;;  %7057 = vmatprep.subr.bf16.mxu0 %v10311_v34  ;;  %v10407_v27 = vcombine.high %v417_v12, %v421_v43  ;;  %v281_v54 = vld [vmem:[#allocation5 + $0x290] sm:$0xff]  ;;  %v10278_v34 = vcombine.low %v289_v41, %v293_v42 }
 0x2a6   :  { %7098 = vmatprep.subr.bf16.mxu1 %v10439_v63  ;;  %v285_v56 = vld [vmem:[#allocation5 + $0x2b0] sm:$0xff]  ;;  %v10406_v63 = vcombine.low %v417_v12, %v421_v43 }
 0x2a7   :  { %v409_v60 = vld [vmem:[#allocation5 + $0x690] sm:$0xff]  ;;  %v10271_v1 = vcombine.high %v281_v54, %v285_v56 }
 0x2a8   :  { %7058 = vmatpush2.bf16.msra.mxu0 %v10310_v5  ;;  %v413_v61 = vld [vmem:[#allocation5 + $0x6b0] sm:$0xff] }
 0x2a9   :  { %7099 = vmatpush2.bf16.msra.mxu1 %v10438_v8  ;;  %7059 = vmatprep.subr.bf16.mxu0 %v10303_v9  ;;  %v10399_v2 = vcombine.high %v409_v60, %v413_v61  ;;  %v273_v3 = vld [vmem:[#allocation5 + $0x250] sm:$0xff]  ;;  %v10270_v9 = vcombine.low %v281_v54, %v285_v56 }
 0x2aa   :  { %7100 = vmatprep.subr.bf16.mxu1 %v10431_v10  ;;  %v277_v45 = vld [vmem:[#allocation5 + $0x270] sm:$0xff]  ;;  %v10398_v10 = vcombine.low %v409_v60, %v413_v61 }
 0x2ab   :  { %v401_v5 = vld [vmem:[#allocation5 + $0x650] sm:$0xff]  ;;  %v10263_v11 = vcombine.high %v273_v3, %v277_v45 }
 0x2ac   :  { %7060 = vmatpush2.bf16.msra.mxu0 %v10302_v21  ;;  %v405_v8 = vld [vmem:[#allocation5 + $0x670] sm:$0xff] }
 0x2ad   :  { %7101 = vmatpush2.bf16.msra.mxu1 %v10430_v22  ;;  %7061 = vmatprep.subr.bf16.mxu0 %v10295_v23  ;;  %v10391_v53 = vcombine.high %v401_v5, %v405_v8  ;;  %v265_v14 = vld [vmem:[#allocation5 + $0x210] sm:$0xff]  ;;  %v10262_v23 = vcombine.low %v273_v3, %v277_v45 }
 0x2ae   :  { %7102 = vmatprep.subr.bf16.mxu1 %v10423_v0  ;;  %v269_v15 = vld [vmem:[#allocation5 + $0x230] sm:$0xff]  ;;  %v10390_v0 = vcombine.low %v401_v5, %v405_v8 }
 0x2af   :  { %v393_v21 = vld [vmem:[#allocation5 + $0x610] sm:$0xff]  ;;  %v10255_v24 = vcombine.high %v265_v14, %v269_v15 }
 0x2b0   :  { %7062 = vmatpush2.bf16.msra.mxu0 %v10294_v32  ;;  %v397_v22 = vld [vmem:[#allocation5 + $0x630] sm:$0xff] }
 0x2b1   :  { %7103 = vmatpush2.bf16.msra.mxu1 %v10422_v35  ;;  %7063 = vmatprep.subr.bf16.mxu0 %v10287_v36  ;;  %v10383_v25 = vcombine.high %v393_v21, %v397_v22  ;;  %v513_v29 = vld [vmem:[#allocation5 + $0x9d0] sm:$0xff]  ;;  %v10254_v36 = vcombine.low %v265_v14, %v269_v15 }
 0x2b2   :  { %7104 = vmatprep.subr.bf16.mxu1 %v10415_v38  ;;  %v517_v30 = vld [vmem:[#allocation5 + $0x9f0] sm:$0xff]  ;;  %v10382_v38 = vcombine.low %v393_v21, %v397_v22 }
 0x2b3   :  { %v641_v32 = vld [vmem:[#allocation5 + $0xdd0] sm:$0xff]  ;;  %v10503_v41 = vcombine.high %v513_v29, %v517_v30 }
 0x2b4   :  { %7064 = vmatpush2.bf16.msra.mxu0 %v10286_v44  ;;  %v645_v35 = vld [vmem:[#allocation5 + $0xdf0] sm:$0xff] }
 0x2b5   :  { %7105 = vmatpush2.bf16.msra.mxu1 %v10414_v48  ;;  %7065 = vmatprep.subr.bf16.mxu0 %v10279_v52  ;;  %v10631_v42 = vcombine.high %v641_v32, %v645_v35  ;;  %v505_v12 = vld [vmem:[#allocation5 + $0x990] sm:$0xff]  ;;  %v10502_v52 = vcombine.low %v513_v29, %v517_v30 }
 0x2b6   :  { %7106 = vmatprep.subr.bf16.mxu1 %v10407_v27  ;;  %v509_v43 = vld [vmem:[#allocation5 + $0x9b0] sm:$0xff]  ;;  %v10630_v27 = vcombine.low %v641_v32, %v645_v35 }
 0x2b7   :  { %v633_v44 = vld [vmem:[#allocation5 + $0xd90] sm:$0xff]  ;;  %v10495_v54 = vcombine.high %v505_v12, %v509_v43  ;;  %v10494_v45 = vcombine.low %v505_v12, %v509_v43 }
 0x2b8   :  { %7066 = vmatpush2.bf16.msra.mxu0 %v10278_v34  ;;  %v637_v48 = vld [vmem:[#allocation5 + $0xdb0] sm:$0xff] }
 0x2b9   :  { %7107 = vmatpush2.bf16.msra.mxu1 %v10406_v63  ;;  %7067 = vmatprep.subr.bf16.mxu0 %v10271_v1  ;;  %v10623_v56 = vcombine.high %v633_v44, %v637_v48  ;;  %v497_v60 = vld [vmem:[#allocation5 + $0x950] sm:$0xff]  ;;  %v10622_v8 = vcombine.low %v633_v44, %v637_v48 }
 0x2ba   :  { %7108 = vmatprep.subr.bf16.mxu1 %v10399_v2  ;;  %v501_v61 = vld [vmem:[#allocation5 + $0x970] sm:$0xff] }
 0x2bb   :  { %v625_v63 = vld [vmem:[#allocation5 + $0xd50] sm:$0xff] }
 0x2bc   :  { %7068 = vmatpush2.bf16.msra.mxu0 %v10270_v9  ;;  %v629_v1 = vld [vmem:[#allocation5 + $0xd70] sm:$0xff]  ;;  %v10487_v9 = vcombine.high %v497_v60, %v501_v61 }
 0x2bd   :  { %7109 = vmatpush2.bf16.msra.mxu1 %v10398_v10  ;;  %7069 = vmatprep.subr.bf16.mxu0 %v10263_v11  ;;  %v10615_v14 = vcombine.high %v625_v63, %v629_v1  ;;  %v489_v15 = vld [vmem:[#allocation5 + $0x910] sm:$0xff] }
 0x2be   :  { %7110 = vmatprep.subr.bf16.mxu1 %v10391_v53  ;;  %v493_v21 = vld [vmem:[#allocation5 + $0x930] sm:$0xff] }
 0x2bf   :  { %v617_v22 = vld [vmem:[#allocation5 + $0xd10] sm:$0xff]  ;;  %v10479_v30 = vcombine.high %v489_v15, %v493_v21  ;;  %v10478_v12 = vcombine.low %v489_v15, %v493_v21 }
 0x2c0   :  { %7070 = vmatpush2.bf16.msra.mxu0 %v10262_v23  ;;  %v621_v23 = vld [vmem:[#allocation5 + $0xd30] sm:$0xff] }
 0x2c1   :  { %7111 = vmatpush2.bf16.msra.mxu1 %v10390_v0  ;;  %7071 = vmatprep.subr.bf16.mxu0 %v10255_v24  ;;  %v10607_v35 = vcombine.high %v617_v22, %v621_v23  ;;  %v10606_v43 = vcombine.low %v617_v22, %v621_v23  ;;  %v585_v15 = vld [vmem:[#allocation5 + $0xc10] sm:$0xff] }
 0x2c2   :  { %7112 = vmatprep.subr.bf16.mxu1 %v10383_v25  ;;  %v10486_v25 = vcombine.low %v497_v60, %v501_v61  ;;  %v589_v21 = vld [vmem:[#allocation5 + $0xc30] sm:$0xff] }
 0x2c4   :  { %7072 = vmatpush2.bf16.msra.mxu0 %v10254_v36  ;;  %v481_v36 = vld [vmem:[#allocation5 + $0x8d0] sm:$0xff] }
 0x2c5   :  { %7113 = vmatpush2.bf16.msra.mxu1 %v10382_v38  ;;  %7123 = vmatprep.subr.bf16.mxu0 %v10503_v41  ;;  %v485_v38 = vld [vmem:[#allocation5 + $0x8f0] sm:$0xff] }
 0x2c6   :  { %7164 = vmatprep.subr.bf16.mxu1 %v10631_v42  ;;  %v609_v41 = vld [vmem:[#allocation5 + $0xcd0] sm:$0xff]  ;;  %v10471_v44 = vcombine.high %v481_v36, %v485_v38  ;;  %v10470_v60 = vcombine.low %v481_v36, %v485_v38 }
 0x2c7   :  { %v6829_v34 = vpop.f32.mrf.mxu0  ;;  %7074 = vmatmul.mubr.bf16.vlgmr.msra.gmra.mxu0 %v12404_v16  ;;  %v613_v42 = vld [vmem:[#allocation5 + $0xcf0] sm:$0xff] }
 0x2c8   :  { %v6830_v2 = vadd.f32 %v6829_v34, %v12499_v33  ;;  %v6870_v3 = vpop.f32.mrf.mxu1  ;;  %7115 = vmatmul.mubr.bf16.vlgmr.msra.gmra.mxu1 %v12406_v20  ;;  %7124 = vmatpush1.bf16.msra.mxu0 %v10502_v52  ;;  %v10599_v48 = vcombine.high %v609_v41, %v613_v42  ;;  %v473_v52 = vld [vmem:[#allocation5 + $0x890] sm:$0xff]  ;;  %v10598_v61 = vcombine.low %v609_v41, %v613_v42 }
 0x2c9   :  { %7165 = vmatpush1.bf16.msra.mxu1 %v10630_v27  ;;  %v6831_v5 = vpop.f32.mrf.mxu0  ;;  %7125 = vmatprep.subr.bf16.mxu0 %v10495_v54  ;;  %v477_v27 = vld [vmem:[#allocation5 + $0x8b0] sm:$0xff] }
 0x2ca   :  { %v12508_v10 = vadd.f32 %v6870_v3, %v6830_v2  ;;  %v6832_v11 = vadd.f32 %v6831_v5, %v12503_v47  ;;  %v6872_v53 = vpop.f32.mrf.mxu1  ;;  %7166 = vmatprep.subr.bf16.mxu1 %v10623_v56  ;;  %7155 = vmatprep.mubr.bf16.mxu0 %v12408_v28  ;;  %v10614_v47 = vcombine.low %v625_v63, %v629_v1  ;;  %v601_v54 = vld [vmem:[#allocation5 + $0xc90] sm:$0xff] }
 0x2cb   :  { %v6833_v33 = vpop.f32.mrf.mxu0  ;;  %7196 = vmatprep.mubr.bf16.mxu1 %v12411_v31  ;;  %v605_v56 = vld [vmem:[#allocation5 + $0xcb0] sm:$0xff]  ;;  %v10463_v34 = vcombine.high %v473_v52, %v477_v27  ;;  %v10462_v5 = vcombine.low %v473_v52, %v477_v27 }
 0x2cc   :  { %v12513_v0 = vadd.f32 %v6872_v53, %v6832_v11  ;;  %v6874_v24 = vpop.f32.mrf.mxu1  ;;  %7126 = vmatpush1.bf16.msra.mxu0 %v10494_v45  ;;  %v10591_v63 = vcombine.high %v601_v54, %v605_v56  ;;  %v465_v1 = vld [vmem:[#allocation5 + $0x850] sm:$0xff] }
 0x2cd   :  { %7167 = vmatpush1.bf16.msra.mxu1 %v10622_v8  ;;  %v6834_v29 = vpop.f32.mrf.mxu0  ;;  %7127 = vmatprep.subr.bf16.mxu0 %v10487_v9  ;;  %v469_v2 = vld [vmem:[#allocation5 + $0x870] sm:$0xff]  ;;  %v10590_v8 = vcombine.low %v601_v54, %v605_v56  ;;  %v10575_v24 = vcombine.high %v585_v15, %v589_v21 }
 0x2ce   :  { %v6875_v32 = vpop.f32.mrf.mxu1  ;;  %7168 = vmatprep.subr.bf16.mxu1 %v10615_v14  ;;  %v593_v3 = vld [vmem:[#allocation5 + $0xc50] sm:$0xff]  ;;  %v10455_v9 = vcombine.high %v465_v1, %v469_v2  ;;  %v10454_v33 = vcombine.low %v465_v1, %v469_v2 }
 0x2cf   :  { %v597_v45 = vld [vmem:[#allocation5 + $0xc70] sm:$0xff] }
 0x2d0   :  { %7128 = vmatpush1.bf16.msra.mxu0 %v10486_v25  ;;  %v10583_v11 = vcombine.high %v593_v3, %v597_v45  ;;  %v457_v53 = vld [vmem:[#allocation5 + $0x810] sm:$0xff]  ;;  %v10582_v22 = vcombine.low %v593_v3, %v597_v45 }
 0x2d1   :  { %7169 = vmatpush1.bf16.msra.mxu1 %v10614_v47  ;;  %7129 = vmatprep.subr.bf16.mxu0 %v10479_v30  ;;  %v461_v14 = vld [vmem:[#allocation5 + $0x830] sm:$0xff] }
 0x2d2   :  { %7170 = vmatprep.subr.bf16.mxu1 %v10607_v35  ;;  %v10447_v23 = vcombine.high %v457_v53, %v461_v14  ;;  %v577_v25 = vld [vmem:[#allocation5 + $0xbd0] sm:$0xff]  ;;  %v10446_v32 = vcombine.low %v457_v53, %v461_v14  ;;  %v10574_v35 = vcombine.low %v585_v15, %v589_v21 }
 0x2d3   :  { %v581_v29 = vld [vmem:[#allocation5 + $0xbf0] sm:$0xff] }
 0x2d4   :  { %7130 = vmatpush1.bf16.msra.mxu0 %v10478_v12  ;;  %v705_v47 = vld [vmem:[#allocation5 + $0xfd0] sm:$0xff]  ;;  %v10567_v36 = vcombine.high %v577_v25, %v581_v29 }
 0x2d5   :  { %7171 = vmatpush1.bf16.msra.mxu1 %v10606_v43  ;;  %7131 = vmatprep.subr.bf16.mxu0 %v10471_v44  ;;  %v709_v30 = vld [vmem:[#allocation5 + $0xff0] sm:$0xff]  ;;  %v10566_v44 = vcombine.low %v577_v25, %v581_v29 }
 0x2d6   :  { %7172 = vmatprep.subr.bf16.mxu1 %v10599_v48  ;;  %v10695_v38 = vcombine.high %v705_v47, %v709_v30  ;;  %v569_v41 = vld [vmem:[#allocation5 + $0xb90] sm:$0xff]  ;;  %v10694_v48 = vcombine.low %v705_v47, %v709_v30 }
 0x2d7   :  { %v573_v42 = vld [vmem:[#allocation5 + $0xbb0] sm:$0xff] }
 0x2d8   :  { %7132 = vmatpush1.bf16.msra.mxu0 %v10470_v60  ;;  %v697_v12 = vld [vmem:[#allocation5 + $0xf90] sm:$0xff]  ;;  %v10559_v52 = vcombine.high %v569_v41, %v573_v42 }
 0x2d9   :  { %7173 = vmatpush1.bf16.msra.mxu1 %v10598_v61  ;;  %7133 = vmatprep.subr.bf16.mxu0 %v10463_v34  ;;  %v701_v43 = vld [vmem:[#allocation5 + $0xfb0] sm:$0xff]  ;;  %v10558_v34 = vcombine.low %v569_v41, %v573_v42 }
 0x2da   :  { %7174 = vmatprep.subr.bf16.mxu1 %v10591_v63  ;;  %v10687_v27 = vcombine.high %v697_v12, %v701_v43  ;;  %v561_v54 = vld [vmem:[#allocation5 + $0xb50] sm:$0xff]  ;;  %v10686_v63 = vcombine.low %v697_v12, %v701_v43 }
 0x2db   :  { %v565_v56 = vld [vmem:[#allocation5 + $0xb70] sm:$0xff] }
 0x2dc   :  { %7134 = vmatpush1.bf16.msra.mxu0 %v10462_v5  ;;  %v689_v60 = vld [vmem:[#allocation5 + $0xf50] sm:$0xff]  ;;  %v10551_v1 = vcombine.high %v561_v54, %v565_v56 }
 0x2dd   :  { %7175 = vmatpush1.bf16.msra.mxu1 %v10590_v8  ;;  %7135 = vmatprep.subr.bf16.mxu0 %v10455_v9  ;;  %v693_v61 = vld [vmem:[#allocation5 + $0xf70] sm:$0xff]  ;;  %v10550_v9 = vcombine.low %v561_v54, %v565_v56 }
 0x2de   :  { %7176 = vmatprep.subr.bf16.mxu1 %v10583_v11  ;;  %v10679_v2 = vcombine.high %v689_v60, %v693_v61  ;;  %v553_v3 = vld [vmem:[#allocation5 + $0xb10] sm:$0xff]  ;;  %v10678_v11 = vcombine.low %v689_v60, %v693_v61 }
 0x2df   :  { %v557_v45 = vld [vmem:[#allocation5 + $0xb30] sm:$0xff] }
 0x2e0   :  { %7136 = vmatpush1.bf16.msra.mxu0 %v10454_v33  ;;  %v681_v5 = vld [vmem:[#allocation5 + $0xf10] sm:$0xff]  ;;  %v10543_v53 = vcombine.high %v553_v3, %v557_v45 }
 0x2e1   :  { %7177 = vmatpush1.bf16.msra.mxu1 %v10582_v22  ;;  %7137 = vmatprep.subr.bf16.mxu0 %v10447_v23  ;;  %v685_v8 = vld [vmem:[#allocation5 + $0xf30] sm:$0xff]  ;;  %v10542_v23 = vcombine.low %v553_v3, %v557_v45 }
 0x2e2   :  { %7178 = vmatprep.subr.bf16.mxu1 %v10575_v24  ;;  %v10671_v14 = vcombine.high %v681_v5, %v685_v8  ;;  %v545_v15 = vld [vmem:[#allocation5 + $0xad0] sm:$0xff]  ;;  %v10670_v24 = vcombine.low %v681_v5, %v685_v8 }
 0x2e3   :  { %v549_v21 = vld [vmem:[#allocation5 + $0xaf0] sm:$0xff] }
 0x2e4   :  { %7138 = vmatpush1.bf16.msra.mxu0 %v10446_v32  ;;  %v673_v33 = vld [vmem:[#allocation5 + $0xed0] sm:$0xff]  ;;  %v10535_v25 = vcombine.high %v545_v15, %v549_v21 }
 0x2e5   :  { %7179 = vmatpush1.bf16.msra.mxu1 %v10574_v35  ;;  %7139 = vmatprep.subr.bf16.mxu0 %v10567_v36  ;;  %v677_v22 = vld [vmem:[#allocation5 + $0xef0] sm:$0xff]  ;;  %v10534_v36 = vcombine.low %v545_v15, %v549_v21 }
 0x2e6   :  { %7180 = vmatprep.subr.bf16.mxu1 %v10695_v38  ;;  %v10663_v29 = vcombine.high %v673_v33, %v677_v22  ;;  %v537_v47 = vld [vmem:[#allocation5 + $0xa90] sm:$0xff]  ;;  %v10662_v38 = vcombine.low %v673_v33, %v677_v22 }
 0x2e7   :  { %v541_v30 = vld [vmem:[#allocation5 + $0xab0] sm:$0xff] }
 0x2e8   :  { %7140 = vmatpush2.bf16.msra.mxu0 %v10566_v44  ;;  %v665_v32 = vld [vmem:[#allocation5 + $0xe90] sm:$0xff]  ;;  %v10527_v41 = vcombine.high %v537_v47, %v541_v30 }
 0x2e9   :  { %7181 = vmatpush2.bf16.msra.mxu1 %v10694_v48  ;;  %7141 = vmatprep.subr.bf16.mxu0 %v10559_v52  ;;  %v669_v35 = vld [vmem:[#allocation5 + $0xeb0] sm:$0xff]  ;;  %v10526_v52 = vcombine.low %v537_v47, %v541_v30 }
 0x2ea   :  { %7182 = vmatprep.subr.bf16.mxu1 %v10687_v27  ;;  %v10655_v42 = vcombine.high %v665_v32, %v669_v35  ;;  %v529_v12 = vld [vmem:[#allocation5 + $0xa50] sm:$0xff]  ;;  %v10654_v27 = vcombine.low %v665_v32, %v669_v35 }
 0x2eb   :  { %v533_v43 = vld [vmem:[#allocation5 + $0xa70] sm:$0xff] }
 0x2ec   :  { %7142 = vmatpush2.bf16.msra.mxu0 %v10558_v34  ;;  %v657_v44 = vld [vmem:[#allocation5 + $0xe50] sm:$0xff]  ;;  %v10519_v54 = vcombine.high %v529_v12, %v533_v43 }
 0x2ed   :  { %7183 = vmatpush2.bf16.msra.mxu1 %v10686_v63  ;;  %7143 = vmatprep.subr.bf16.mxu0 %v10551_v1  ;;  %v661_v48 = vld [vmem:[#allocation5 + $0xe70] sm:$0xff]  ;;  %v10518_v1 = vcombine.low %v529_v12, %v533_v43 }
 0x2ee   :  { %7184 = vmatprep.subr.bf16.mxu1 %v10679_v2  ;;  %v10647_v56 = vcombine.high %v657_v44, %v661_v48  ;;  %v521_v60 = vld [vmem:[#allocation5 + $0xa10] sm:$0xff]  ;;  %v10646_v2 = vcombine.low %v657_v44, %v661_v48 }
 0x2ef   :  { %v525_v61 = vld [vmem:[#allocation5 + $0xa30] sm:$0xff] }
 0x2f0   :  { %7144 = vmatpush2.bf16.msra.mxu0 %v10550_v9  ;;  %v649_v34 = vld [vmem:[#allocation5 + $0xe10] sm:$0xff]  ;;  %v10511_v3 = vcombine.high %v521_v60, %v525_v61 }
 0x2f1   :  { %7185 = vmatpush2.bf16.msra.mxu1 %v10678_v11  ;;  %7145 = vmatprep.subr.bf16.mxu0 %v10543_v53  ;;  %v653_v63 = vld [vmem:[#allocation5 + $0xe30] sm:$0xff]  ;;  %v10510_v53 = vcombine.low %v521_v60, %v525_v61 }
 0x2f2   :  { %7186 = vmatprep.subr.bf16.mxu1 %v10671_v14  ;;  %v10639_v45 = vcombine.high %v649_v34, %v653_v63  ;;  %v769_v5 = vld [vmem:[#allocation5 + $0x11d0] sm:$0xff]  ;;  %v10638_v14 = vcombine.low %v649_v34, %v653_v63 }
 0x2f3   :  { %v773_v8 = vld [vmem:[#allocation5 + $0x11f0] sm:$0xff] }
 0x2f4   :  { %7146 = vmatpush2.bf16.msra.mxu0 %v10542_v23  ;;  %v897_v9 = vld [vmem:[#allocation5 + $0x15d0] sm:$0xff]  ;;  %v10759_v15 = vcombine.high %v769_v5, %v773_v8 }
 0x2f5   :  { %7187 = vmatpush2.bf16.msra.mxu1 %v10670_v24  ;;  %7147 = vmatprep.subr.bf16.mxu0 %v10535_v25  ;;  %v901_v11 = vld [vmem:[#allocation5 + $0x15f0] sm:$0xff]  ;;  %v10758_v25 = vcombine.low %v769_v5, %v773_v8 }
 0x2f6   :  { %7188 = vmatprep.subr.bf16.mxu1 %v10663_v29  ;;  %v10887_v21 = vcombine.high %v897_v9, %v901_v11  ;;  %v761_v33 = vld [vmem:[#allocation5 + $0x1190] sm:$0xff]  ;;  %v10886_v29 = vcombine.low %v897_v9, %v901_v11 }
 0x2f7   :  { %v765_v22 = vld [vmem:[#allocation5 + $0x11b0] sm:$0xff] }
 0x2f8   :  { %7148 = vmatpush2.bf16.msra.mxu0 %v10534_v36  ;;  %v889_v23 = vld [vmem:[#allocation5 + $0x1590] sm:$0xff]  ;;  %v10751_v47 = vcombine.high %v761_v33, %v765_v22  ;;  %v10750_v43 = vcombine.low %v761_v33, %v765_v22 }
 0x2f9   :  { %7189 = vmatpush2.bf16.msra.mxu1 %v10662_v38  ;;  %7149 = vmatprep.subr.bf16.mxu0 %v10527_v41  ;;  %v893_v24 = vld [vmem:[#allocation5 + $0x15b0] sm:$0xff] }
 0x2fa   :  { %7190 = vmatprep.subr.bf16.mxu1 %v10655_v42  ;;  %v10879_v30 = vcombine.high %v889_v23, %v893_v24  ;;  %v753_v32 = vld [vmem:[#allocation5 + $0x1150] sm:$0xff]  ;;  %v10878_v48 = vcombine.low %v889_v23, %v893_v24 }
 0x2fb   :  { %v757_v35 = vld [vmem:[#allocation5 + $0x1170] sm:$0xff] }
 0x2fc   :  { %7150 = vmatpush2.bf16.msra.mxu0 %v10526_v52  ;;  %v881_v38 = vld [vmem:[#allocation5 + $0x1550] sm:$0xff]  ;;  %v10743_v52 = vcombine.high %v753_v32, %v757_v35 }
 0x2fd   :  { %7191 = vmatpush2.bf16.msra.mxu1 %v10654_v27  ;;  %7151 = vmatprep.subr.bf16.mxu0 %v10519_v54  ;;  %v885_v41 = vld [vmem:[#allocation5 + $0x1570] sm:$0xff] }
 0x2fe   :  { %7192 = vmatprep.subr.bf16.mxu1 %v10647_v56  ;;  %v10871_v60 = vcombine.high %v881_v38, %v885_v41  ;;  %v745_v61 = vld [vmem:[#allocation5 + $0x1110] sm:$0xff] }
 0x2ff   :  { %v749_v34 = vld [vmem:[#allocation5 + $0x1130] sm:$0xff] }
 0x300   :  { %7152 = vmatpush2.bf16.msra.mxu0 %v10518_v1  ;;  %v873_v63 = vld [vmem:[#allocation5 + $0x1510] sm:$0xff]  ;;  %v10735_v8 = vcombine.high %v745_v61, %v749_v34  ;;  %v10734_v33 = vcombine.low %v745_v61, %v749_v34 }
 0x301   :  { %7193 = vmatpush2.bf16.msra.mxu1 %v10646_v2  ;;  %7153 = vmatprep.subr.bf16.mxu0 %v10511_v3  ;;  %v877_v1 = vld [vmem:[#allocation5 + $0x1530] sm:$0xff] }
 0x302   :  { %7194 = vmatprep.subr.bf16.mxu1 %v10639_v45  ;;  %v10742_v45 = vcombine.low %v753_v32, %v757_v35  ;;  %v10863_v11 = vcombine.high %v873_v63, %v877_v1  ;;  %v10862_v22 = vcombine.low %v873_v63, %v877_v1  ;;  %v841_v61 = vld [vmem:[#allocation5 + $0x1410] sm:$0xff] }
 0x303   :  { %v845_v34 = vld [vmem:[#allocation5 + $0x1430] sm:$0xff] }
 0x304   :  { %7154 = vmatpush2.bf16.msra.mxu0 %v10510_v53  ;;  %v737_v53 = vld [vmem:[#allocation5 + $0x10d0] sm:$0xff] }
 0x305   :  { %7195 = vmatpush2.bf16.msra.mxu1 %v10638_v14  ;;  %7205 = vmatprep.subr.bf16.mxu0 %v10759_v15  ;;  %v741_v14 = vld [vmem:[#allocation5 + $0x10f0] sm:$0xff] }
 0x306   :  { %7246 = vmatprep.subr.bf16.mxu1 %v10887_v21  ;;  %v865_v15 = vld [vmem:[#allocation5 + $0x14d0] sm:$0xff]  ;;  %v10727_v23 = vcombine.high %v737_v53, %v741_v14  ;;  %v10726_v32 = vcombine.low %v737_v53, %v741_v14 }
 0x307   :  { %v6911_v36 = vpop.f32.mrf.mxu0  ;;  %7156 = vmatmul.mubr.bf16.vlgmr.msra.gmra.mxu0 %v12416_v39  ;;  %v869_v21 = vld [vmem:[#allocation5 + $0x14f0] sm:$0xff] }
 0x308   :  { %v6912_v42 = vadd.f32 %v6911_v36, %v12508_v10  ;;  %v6952_v12 = vpop.f32.mrf.mxu1  ;;  %7197 = vmatmul.mubr.bf16.vlgmr.msra.gmra.mxu1 %v12418_v40  ;;  %7206 = vmatpush1.bf16.msra.mxu0 %v10758_v25  ;;  %v10855_v24 = vcombine.high %v865_v15, %v869_v21  ;;  %v729_v25 = vld [vmem:[#allocation5 + $0x1090] sm:$0xff]  ;;  %v10854_v35 = vcombine.low %v865_v15, %v869_v21 }
 0x309   :  { %7247 = vmatpush1.bf16.msra.mxu1 %v10886_v29  ;;  %v6913_v44 = vpop.f32.mrf.mxu0  ;;  %7207 = vmatprep.subr.bf16.mxu0 %v10751_v47  ;;  %v733_v29 = vld [vmem:[#allocation5 + $0x10b0] sm:$0xff] }
 0x30a   :  { %v12518_v27 = vadd.f32 %v6952_v12, %v6912_v42  ;;  %v6914_v54 = vadd.f32 %v6913_v44, %v12513_v0  ;;  %v6954_v56 = vpop.f32.mrf.mxu1  ;;  %7248 = vmatprep.subr.bf16.mxu1 %v10879_v30  ;;  %7237 = vmatprep.mubr.bf16.mxu0 %v12420_v49  ;;  %v10870_v0 = vcombine.low %v881_v38, %v885_v41  ;;  %v857_v47 = vld [vmem:[#allocation5 + $0x1490] sm:$0xff] }
 0x30b   :  { %v6915_v10 = vpop.f32.mrf.mxu0  ;;  %7278 = vmatprep.mubr.bf16.mxu1 %v12423_v51  ;;  %v861_v30 = vld [vmem:[#allocation5 + $0x14b0] sm:$0xff]  ;;  %v10719_v36 = vcombine.high %v729_v25, %v733_v29  ;;  %v10718_v44 = vcombine.low %v729_v25, %v733_v29 }
 0x30c   :  { %v12523_v2 = vadd.f32 %v6954_v56, %v6914_v54  ;;  %v6956_v3 = vpop.f32.mrf.mxu1  ;;  %7208 = vmatpush1.bf16.msra.mxu0 %v10750_v43  ;;  %v10847_v38 = vcombine.high %v857_v47, %v861_v30  ;;  %v721_v41 = vld [vmem:[#allocation5 + $0x1050] sm:$0xff] }
 0x30d   :  { %7249 = vmatpush1.bf16.msra.mxu1 %v10878_v48  ;;  %v6916_v5 = vpop.f32.mrf.mxu0  ;;  %7209 = vmatprep.subr.bf16.mxu0 %v10743_v52  ;;  %v725_v42 = vld [vmem:[#allocation5 + $0x1070] sm:$0xff]  ;;  %v10846_v48 = vcombine.low %v857_v47, %v861_v30  ;;  %v10831_v3 = vcombine.high %v841_v61, %v845_v34 }
 0x30e   :  { %v6957_v9 = vpop.f32.mrf.mxu1  ;;  %7250 = vmatprep.subr.bf16.mxu1 %v10871_v60  ;;  %v849_v12 = vld [vmem:[#allocation5 + $0x1450] sm:$0xff]  ;;  %v10711_v52 = vcombine.high %v721_v41, %v725_v42  ;;  %v10710_v10 = vcombine.low %v721_v41, %v725_v42 }
 0x30f   :  { %v853_v43 = vld [vmem:[#allocation5 + $0x1470] sm:$0xff] }
 0x310   :  { %7210 = vmatpush1.bf16.msra.mxu0 %v10742_v45  ;;  %v10839_v54 = vcombine.high %v849_v12, %v853_v43  ;;  %v713_v56 = vld [vmem:[#allocation5 + $0x1010] sm:$0xff]  ;;  %v10838_v63 = vcombine.low %v849_v12, %v853_v43 }
 0x311   :  { %7251 = vmatpush1.bf16.msra.mxu1 %v10870_v0  ;;  %7211 = vmatprep.subr.bf16.mxu0 %v10735_v8  ;;  %v717_v60 = vld [vmem:[#allocation5 + $0x1030] sm:$0xff] }
 0x312   :  { %7252 = vmatprep.subr.bf16.mxu1 %v10863_v11  ;;  %v10703_v1 = vcombine.high %v713_v56, %v717_v60  ;;  %v833_v45 = vld [vmem:[#allocation5 + $0x13d0] sm:$0xff]  ;;  %v10702_v9 = vcombine.low %v713_v56, %v717_v60  ;;  %v10830_v11 = vcombine.low %v841_v61, %v845_v34 }
 0x313   :  { %v837_v5 = vld [vmem:[#allocation5 + $0x13f0] sm:$0xff] }
 0x314   :  { %7212 = vmatpush1.bf16.msra.mxu0 %v10734_v33  ;;  %v961_v0 = vld [vmem:[#allocation5 + $0x17d0] sm:$0xff]  ;;  %v10823_v53 = vcombine.high %v833_v45, %v837_v5 }
 0x315   :  { %7253 = vmatpush1.bf16.msra.mxu1 %v10862_v22  ;;  %7213 = vmatprep.subr.bf16.mxu0 %v10727_v23  ;;  %v965_v8 = vld [vmem:[#allocation5 + $0x17f0] sm:$0xff]  ;;  %v10822_v23 = vcombine.low %v833_v45, %v837_v5 }
 0x316   :  { %7254 = vmatprep.subr.bf16.mxu1 %v10855_v24  ;;  %v10951_v14 = vcombine.high %v961_v0, %v965_v8  ;;  %v825_v15 = vld [vmem:[#allocation5 + $0x1390] sm:$0xff]  ;;  %v10950_v24 = vcombine.low %v961_v0, %v965_v8 }
 0x317   :  { %v829_v21 = vld [vmem:[#allocation5 + $0x13b0] sm:$0xff] }
 0x318   :  { %7214 = vmatpush1.bf16.msra.mxu0 %v10726_v32  ;;  %v953_v33 = vld [vmem:[#allocation5 + $0x1790] sm:$0xff]  ;;  %v10815_v25 = vcombine.high %v825_v15, %v829_v21 }
 0x319   :  { %7255 = vmatpush1.bf16.msra.mxu1 %v10854_v35  ;;  %7215 = vmatprep.subr.bf16.mxu0 %v10719_v36  ;;  %v957_v22 = vld [vmem:[#allocation5 + $0x17b0] sm:$0xff]  ;;  %v10814_v36 = vcombine.low %v825_v15, %v829_v21 }
 0x31a   :  { %7256 = vmatprep.subr.bf16.mxu1 %v10847_v38  ;;  %v10943_v29 = vcombine.high %v953_v33, %v957_v22  ;;  %v817_v47 = vld [vmem:[#allocation5 + $0x1350] sm:$0xff]  ;;  %v10942_v38 = vcombine.low %v953_v33, %v957_v22 }
 0x31b   :  { %v821_v30 = vld [vmem:[#allocation5 + $0x1370] sm:$0xff] }
 0x31c   :  { %7216 = vmatpush1.bf16.msra.mxu0 %v10718_v44  ;;  %v945_v32 = vld [vmem:[#allocation5 + $0x1750] sm:$0xff]  ;;  %v10807_v41 = vcombine.high %v817_v47, %v821_v30 }
 0x31d   :  { %7257 = vmatpush1.bf16.msra.mxu1 %v10846_v48  ;;  %7217 = vmatprep.subr.bf16.mxu0 %v10711_v52  ;;  %v949_v35 = vld [vmem:[#allocation5 + $0x1770] sm:$0xff]  ;;  %v10806_v52 = vcombine.low %v817_v47, %v821_v30 }
 0x31e   :  { %7258 = vmatprep.subr.bf16.mxu1 %v10839_v54  ;;  %v10935_v42 = vcombine.high %v945_v32, %v949_v35  ;;  %v809_v12 = vld [vmem:[#allocation5 + $0x1310] sm:$0xff]  ;;  %v10934_v54 = vcombine.low %v945_v32, %v949_v35 }
 0x31f   :  { %v813_v43 = vld [vmem:[#allocation5 + $0x1330] sm:$0xff] }
 0x320   :  { %7218 = vmatpush1.bf16.msra.mxu0 %v10710_v10  ;;  %v937_v44 = vld [vmem:[#allocation5 + $0x1710] sm:$0xff]  ;;  %v10799_v56 = vcombine.high %v809_v12, %v813_v43 }
 0x321   :  { %7259 = vmatpush1.bf16.msra.mxu1 %v10838_v63  ;;  %7219 = vmatprep.subr.bf16.mxu0 %v10703_v1  ;;  %v941_v48 = vld [vmem:[#allocation5 + $0x1730] sm:$0xff]  ;;  %v10798_v1 = vcombine.low %v809_v12, %v813_v43 }
 0x322   :  { %7260 = vmatprep.subr.bf16.mxu1 %v10831_v3  ;;  %v10927_v60 = vcombine.high %v937_v44, %v941_v48  ;;  %v801_v61 = vld [vmem:[#allocation5 + $0x12d0] sm:$0xff]  ;;  %v10926_v3 = vcombine.low %v937_v44, %v941_v48 }
 0x323   :  { %v805_v34 = vld [vmem:[#allocation5 + $0x12f0] sm:$0xff] }
 0x324   :  { %7220 = vmatpush1.bf16.msra.mxu0 %v10702_v9  ;;  %v929_v10 = vld [vmem:[#allocation5 + $0x16d0] sm:$0xff]  ;;  %v10791_v45 = vcombine.high %v801_v61, %v805_v34 }
 0x325   :  { %7261 = vmatpush1.bf16.msra.mxu1 %v10830_v11  ;;  %7221 = vmatprep.subr.bf16.mxu0 %v10823_v53  ;;  %v933_v63 = vld [vmem:[#allocation5 + $0x16f0] sm:$0xff]  ;;  %v10790_v53 = vcombine.low %v801_v61, %v805_v34 }
 0x326   :  { %7262 = vmatprep.subr.bf16.mxu1 %v10951_v14  ;;  %v10919_v5 = vcombine.high %v929_v10, %v933_v63  ;;  %v793_v0 = vld [vmem:[#allocation5 + $0x1290] sm:$0xff]  ;;  %v10918_v14 = vcombine.low %v929_v10, %v933_v63 }
 0x327   :  { %v797_v8 = vld [vmem:[#allocation5 + $0x12b0] sm:$0xff] }
 0x328   :  { %7222 = vmatpush2.bf16.msra.mxu0 %v10822_v23  ;;  %v921_v9 = vld [vmem:[#allocation5 + $0x1690] sm:$0xff]  ;;  %v10783_v15 = vcombine.high %v793_v0, %v797_v8 }
 0x329   :  { %7263 = vmatpush2.bf16.msra.mxu1 %v10950_v24  ;;  %7223 = vmatprep.subr.bf16.mxu0 %v10815_v25  ;;  %v925_v11 = vld [vmem:[#allocation5 + $0x16b0] sm:$0xff]  ;;  %v10782_v25 = vcombine.low %v793_v0, %v797_v8 }
 0x32a   :  { %7264 = vmatprep.subr.bf16.mxu1 %v10943_v29  ;;  %v10911_v21 = vcombine.high %v921_v9, %v925_v11  ;;  %v785_v33 = vld [vmem:[#allocation5 + $0x1250] sm:$0xff]  ;;  %v10910_v29 = vcombine.low %v921_v9, %v925_v11 }
 0x32b   :  { %v789_v22 = vld [vmem:[#allocation5 + $0x1270] sm:$0xff] }
 0x32c   :  { %7224 = vmatpush2.bf16.msra.mxu0 %v10814_v36  ;;  %v913_v23 = vld [vmem:[#allocation5 + $0x1650] sm:$0xff]  ;;  %v10775_v47 = vcombine.high %v785_v33, %v789_v22 }
 0x32d   :  { %7265 = vmatpush2.bf16.msra.mxu1 %v10942_v38  ;;  %7225 = vmatprep.subr.bf16.mxu0 %v10807_v41  ;;  %v917_v24 = vld [vmem:[#allocation5 + $0x1670] sm:$0xff]  ;;  %v10774_v41 = vcombine.low %v785_v33, %v789_v22 }
 0x32e   :  { %7266 = vmatprep.subr.bf16.mxu1 %v10935_v42  ;;  %v10903_v30 = vcombine.high %v913_v23, %v917_v24  ;;  %v777_v32 = vld [vmem:[#allocation5 + $0x1210] sm:$0xff]  ;;  %v10902_v42 = vcombine.low %v913_v23, %v917_v24 }
 0x32f   :  { %v781_v35 = vld [vmem:[#allocation5 + $0x1230] sm:$0xff] }
 0x330   :  { %7226 = vmatpush2.bf16.msra.mxu0 %v10806_v52  ;;  %v905_v36 = vld [vmem:[#allocation5 + $0x1610] sm:$0xff]  ;;  %v10767_v12 = vcombine.high %v777_v32, %v781_v35 }
 0x331   :  { %7267 = vmatpush2.bf16.msra.mxu1 %v10934_v54  ;;  %7227 = vmatprep.subr.bf16.mxu0 %v10799_v56  ;;  %v909_v38 = vld [vmem:[#allocation5 + $0x1630] sm:$0xff]  ;;  %v10766_v56 = vcombine.low %v777_v32, %v781_v35 }
 0x332   :  { %7268 = vmatprep.subr.bf16.mxu1 %v10927_v60  ;;  %v10895_v43 = vcombine.high %v905_v36, %v909_v38  ;;  %v1025_v44 = vld [vmem:[#allocation5 + $0x19d0] sm:$0xff]  ;;  %v10894_v60 = vcombine.low %v905_v36, %v909_v38 }
 0x333   :  { %v1029_v48 = vld [vmem:[#allocation5 + $0x19f0] sm:$0xff] }
 0x334   :  { %7228 = vmatpush2.bf16.msra.mxu0 %v10798_v1  ;;  %v1153_v52 = vld [vmem:[#allocation5 + $0x1dd0] sm:$0xff]  ;;  %v11015_v61 = vcombine.high %v1025_v44, %v1029_v48 }
 0x335   :  { %7269 = vmatpush2.bf16.msra.mxu1 %v10926_v3  ;;  %7229 = vmatprep.subr.bf16.mxu0 %v10791_v45  ;;  %v1157_v54 = vld [vmem:[#allocation5 + $0x1df0] sm:$0xff]  ;;  %v11014_v45 = vcombine.low %v1025_v44, %v1029_v48 }
 0x336   :  { %7270 = vmatprep.subr.bf16.mxu1 %v10919_v5  ;;  %v11143_v34 = vcombine.high %v1153_v52, %v1157_v54  ;;  %v1017_v10 = vld [vmem:[#allocation5 + $0x1990] sm:$0xff]  ;;  %v11142_v5 = vcombine.low %v1153_v52, %v1157_v54 }
 0x337   :  { %v1021_v63 = vld [vmem:[#allocation5 + $0x19b0] sm:$0xff] }
 0x338   :  { %7230 = vmatpush2.bf16.msra.mxu0 %v10790_v53  ;;  %v1145_v1 = vld [vmem:[#allocation5 + $0x1d90] sm:$0xff]  ;;  %v11007_v0 = vcombine.high %v1017_v10, %v1021_v63  ;;  %v11006_v22 = vcombine.low %v1017_v10, %v1021_v63 }
 0x339   :  { %7271 = vmatpush2.bf16.msra.mxu1 %v10918_v14  ;;  %7231 = vmatprep.subr.bf16.mxu0 %v10783_v15  ;;  %v1149_v3 = vld [vmem:[#allocation5 + $0x1db0] sm:$0xff] }
 0x33a   :  { %7272 = vmatprep.subr.bf16.mxu1 %v10911_v21  ;;  %v11135_v8 = vcombine.high %v1145_v1, %v1149_v3  ;;  %v1009_v9 = vld [vmem:[#allocation5 + $0x1950] sm:$0xff]  ;;  %v11134_v24 = vcombine.low %v1145_v1, %v1149_v3 }
 0x33b   :  { %v1013_v11 = vld [vmem:[#allocation5 + $0x1970] sm:$0xff] }
 0x33c   :  { %7232 = vmatpush2.bf16.msra.mxu0 %v10782_v25  ;;  %v1137_v14 = vld [vmem:[#allocation5 + $0x1d50] sm:$0xff]  ;;  %v10999_v25 = vcombine.high %v1009_v9, %v1013_v11 }
 0x33d   :  { %7273 = vmatpush2.bf16.msra.mxu1 %v10910_v29  ;;  %7233 = vmatprep.subr.bf16.mxu0 %v10775_v47  ;;  %v1141_v15 = vld [vmem:[#allocation5 + $0x1d70] sm:$0xff] }
 0x33e   :  { %7274 = vmatprep.subr.bf16.mxu1 %v10903_v30  ;;  %v11127_v32 = vcombine.high %v1137_v14, %v1141_v15  ;;  %v1001_v35 = vld [vmem:[#allocation5 + $0x1910] sm:$0xff] }
 0x33f   :  { %v1005_v36 = vld [vmem:[#allocation5 + $0x1930] sm:$0xff] }
 0x340   :  { %7234 = vmatpush2.bf16.msra.mxu0 %v10774_v41  ;;  %v1129_v38 = vld [vmem:[#allocation5 + $0x1d10] sm:$0xff]  ;;  %v10991_v48 = vcombine.high %v1001_v35, %v1005_v36  ;;  %v10990_v10 = vcombine.low %v1001_v35, %v1005_v36 }
 0x341   :  { %7275 = vmatpush2.bf16.msra.mxu1 %v10902_v42  ;;  %7235 = vmatprep.subr.bf16.mxu0 %v10767_v12  ;;  %v1133_v41 = vld [vmem:[#allocation5 + $0x1d30] sm:$0xff] }
 0x342   :  { %7276 = vmatprep.subr.bf16.mxu1 %v10895_v43  ;;  %v10998_v43 = vcombine.low %v1009_v9, %v1013_v11  ;;  %v11119_v54 = vcombine.high %v1129_v38, %v1133_v41  ;;  %v11118_v63 = vcombine.low %v1129_v38, %v1133_v41  ;;  %v1097_v35 = vld [vmem:[#allocation5 + $0x1c10] sm:$0xff] }
 0x343   :  { %v1101_v36 = vld [vmem:[#allocation5 + $0x1c30] sm:$0xff] }
 0x344   :  { %7236 = vmatpush2.bf16.msra.mxu0 %v10766_v56  ;;  %v993_v56 = vld [vmem:[#allocation5 + $0x18d0] sm:$0xff] }
 0x345   :  { %7277 = vmatpush2.bf16.msra.mxu1 %v10894_v60  ;;  %7287 = vmatprep.subr.bf16.mxu0 %v11015_v61  ;;  %v997_v60 = vld [vmem:[#allocation5 + $0x18f0] sm:$0xff] }
 0x346   :  { %7328 = vmatprep.subr.bf16.mxu1 %v11143_v34  ;;  %v1121_v61 = vld [vmem:[#allocation5 + $0x1cd0] sm:$0xff]  ;;  %v10983_v1 = vcombine.high %v993_v56, %v997_v60  ;;  %v10982_v9 = vcombine.low %v993_v56, %v997_v60 }
 0x347   :  { %v6993_v53 = vpop.f32.mrf.mxu0  ;;  %7238 = vmatmul.mubr.bf16.vlgmr.msra.gmra.mxu0 %v12428_v6  ;;  %v1125_v34 = vld [vmem:[#allocation5 + $0x1cf0] sm:$0xff] }
 0x348   :  { %v6994_v21 = vadd.f32 %v6993_v53, %v12518_v27  ;;  %v7034_v33 = vpop.f32.mrf.mxu1  ;;  %7279 = vmatmul.mubr.bf16.vlgmr.msra.gmra.mxu1 %v12430_v7  ;;  %7288 = vmatpush1.bf16.msra.mxu0 %v11014_v45  ;;  %v11111_v3 = vcombine.high %v1121_v61, %v1125_v34  ;;  %v985_v45 = vld [vmem:[#allocation5 + $0x1890] sm:$0xff]  ;;  %v11110_v11 = vcombine.low %v1121_v61, %v1125_v34 }
 0x349   :  { %7329 = vmatpush1.bf16.msra.mxu1 %v11142_v5  ;;  %v6995_v23 = vpop.f32.mrf.mxu0  ;;  %7289 = vmatprep.subr.bf16.mxu0 %v11007_v0  ;;  %v989_v5 = vld [vmem:[#allocation5 + $0x18b0] sm:$0xff] }
 0x34a   :  { %v12528_v29 = vadd.f32 %v7034_v33, %v6994_v21  ;;  %v6996_v47 = vadd.f32 %v6995_v23, %v12523_v2  ;;  %v7036_v30 = vpop.f32.mrf.mxu1  ;;  %7330 = vmatprep.subr.bf16.mxu1 %v11135_v8  ;;  %7319 = vmatprep.mubr.bf16.mxu0 %v12432_v17  ;;  %v11126_v2 = vcombine.low %v1137_v14, %v1141_v15  ;;  %v1113_v0 = vld [vmem:[#allocation5 + $0x1c90] sm:$0xff] }
 0x34b   :  { %v6997_v27 = vpop.f32.mrf.mxu0  ;;  %7360 = vmatprep.mubr.bf16.mxu1 %v12435_v18  ;;  %v1117_v8 = vld [vmem:[#allocation5 + $0x1cb0] sm:$0xff]  ;;  %v10975_v53 = vcombine.high %v985_v45, %v989_v5  ;;  %v10974_v23 = vcombine.low %v985_v45, %v989_v5 }
 0x34c   :  { %v12533_v42 = vadd.f32 %v7036_v30, %v6996_v47  ;;  %v7038_v12 = vpop.f32.mrf.mxu1  ;;  %7290 = vmatpush1.bf16.msra.mxu0 %v11006_v22  ;;  %v11103_v14 = vcombine.high %v1113_v0, %v1117_v8  ;;  %v977_v15 = vld [vmem:[#allocation5 + $0x1850] sm:$0xff]  ;;  %vm7699_vm3 = vcmp.gt.f32.partialorder %v12528_v29, 0.0 }
 0x34d   :  { %7331 = vmatpush1.bf16.msra.mxu1 %v11134_v24  ;;  %v6998_v44 = vpop.f32.mrf.mxu0  ;;  %7291 = vmatprep.subr.bf16.mxu0 %v10999_v25  ;;  %v981_v21 = vld [vmem:[#allocation5 + $0x1870] sm:$0xff]  ;;  %v11102_v24 = vcombine.low %v1113_v0, %v1117_v8  ;;  %v11087_v12 = vcombine.high %v1097_v35, %v1101_v36 }
 0x34e   :  { %v7039_v52 = vpop.f32.mrf.mxu1  ;;  %7332 = vmatprep.subr.bf16.mxu1 %v11127_v32  ;;  %v1105_v33 = vld [vmem:[#allocation5 + $0x1c50] sm:$0xff]  ;;  %v10967_v25 = vcombine.high %v977_v15, %v981_v21  ;;  %v10966_v27 = vcombine.low %v977_v15, %v981_v21  ;;  %vm7700_vm1 = vcmp.gt.f32.partialorder %v12533_v42, 0.0 }
 0x34f   :  { %v1109_v22 = vld [vmem:[#allocation5 + $0x1c70] sm:$0xff] }
 0x350   :  { %7292 = vmatpush1.bf16.msra.mxu0 %v10998_v43  ;;  %v11095_v47 = vcombine.high %v1105_v33, %v1109_v22  ;;  %v969_v30 = vld [vmem:[#allocation5 + $0x1810] sm:$0xff]  ;;  %v11094_v38 = vcombine.low %v1105_v33, %v1109_v22 }
 0x351   :  { %7333 = vmatpush1.bf16.msra.mxu1 %v11126_v2  ;;  %7293 = vmatprep.subr.bf16.mxu0 %v10991_v48  ;;  %v973_v32 = vld [vmem:[#allocation5 + $0x1830] sm:$0xff] }
 0x352   :  { %7334 = vmatprep.subr.bf16.mxu1 %v11119_v54  ;;  %v10959_v41 = vcombine.high %v969_v30, %v973_v32  ;;  %v1089_v43 = vld [vmem:[#allocation5 + $0x1bd0] sm:$0xff]  ;;  %v10958_v52 = vcombine.low %v969_v30, %v973_v32  ;;  %v11086_v54 = vcombine.low %v1097_v35, %v1101_v36 }
 0x353   :  { %v1093_v44 = vld [vmem:[#allocation5 + $0x1bf0] sm:$0xff] }
 0x354   :  { %7294 = vmatpush1.bf16.msra.mxu0 %v10990_v10  ;;  %v1217_v2 = vld [vmem:[#allocation5 + $0x1fd0] sm:$0xff]  ;;  %v11079_v56 = vcombine.high %v1089_v43, %v1093_v44 }
 0x355   :  { %7335 = vmatpush1.bf16.msra.mxu1 %v11118_v63  ;;  %7295 = vmatprep.subr.bf16.mxu0 %v10983_v1  ;;  %v1221_v48 = vld [vmem:[#allocation5 + $0x1ff0] sm:$0xff]  ;;  %v11078_v1 = vcombine.low %v1089_v43, %v1093_v44 }
 0x356   :  { %7336 = vmatprep.subr.bf16.mxu1 %v11111_v3  ;;  %v11207_v60 = vcombine.high %v1217_v2, %v1221_v48  ;;  %v1081_v61 = vld [vmem:[#allocation5 + $0x1b90] sm:$0xff]  ;;  %v11206_v3 = vcombine.low %v1217_v2, %v1221_v48 }
 0x357   :  { %v1085_v34 = vld [vmem:[#allocation5 + $0x1bb0] sm:$0xff] }
 0x358   :  { %7296 = vmatpush1.bf16.msra.mxu0 %v10982_v9  ;;  %v1209_v10 = vld [vmem:[#allocation5 + $0x1f90] sm:$0xff]  ;;  %v11071_v45 = vcombine.high %v1081_v61, %v1085_v34 }
 0x359   :  { %7337 = vmatpush1.bf16.msra.mxu1 %v11110_v11  ;;  %7297 = vmatprep.subr.bf16.mxu0 %v10975_v53  ;;  %v1213_v63 = vld [vmem:[#allocation5 + $0x1fb0] sm:$0xff]  ;;  %v11070_v53 = vcombine.low %v1081_v61, %v1085_v34 }
 0x35a   :  { %7338 = vmatprep.subr.bf16.mxu1 %v11103_v14  ;;  %v11199_v5 = vcombine.high %v1209_v10, %v1213_v63  ;;  %v1073_v0 = vld [vmem:[#allocation5 + $0x1b50] sm:$0xff]  ;;  %v11198_v14 = vcombine.low %v1209_v10, %v1213_v63 }
 0x35b   :  { %v1077_v8 = vld [vmem:[#allocation5 + $0x1b70] sm:$0xff] }
 0x35c   :  { %7298 = vmatpush1.bf16.msra.mxu0 %v10974_v23  ;;  %v1201_v9 = vld [vmem:[#allocation5 + $0x1f50] sm:$0xff]  ;;  %v11063_v15 = vcombine.high %v1073_v0, %v1077_v8 }
 0x35d   :  { %7339 = vmatpush1.bf16.msra.mxu1 %v11102_v24  ;;  %7299 = vmatprep.subr.bf16.mxu0 %v10967_v25  ;;  %v1205_v11 = vld [vmem:[#allocation5 + $0x1f70] sm:$0xff]  ;;  %v11062_v25 = vcombine.low %v1073_v0, %v1077_v8 }
 0x35e   :  { %7340 = vmatprep.subr.bf16.mxu1 %v11095_v47  ;;  %v11191_v21 = vcombine.high %v1201_v9, %v1205_v11  ;;  %v1065_v33 = vld [vmem:[#allocation5 + $0x1b10] sm:$0xff]  ;;  %v11190_v47 = vcombine.low %v1201_v9, %v1205_v11 }
 0x35f   :  { %v1069_v22 = vld [vmem:[#allocation5 + $0x1b30] sm:$0xff] }
 0x360   :  { %7300 = vmatpush1.bf16.msra.mxu0 %v10966_v27  ;;  %v1193_v23 = vld [vmem:[#allocation5 + $0x1f10] sm:$0xff]  ;;  %v11055_v30 = vcombine.high %v1065_v33, %v1069_v22 }
 0x361   :  { %7341 = vmatpush1.bf16.msra.mxu1 %v11094_v38  ;;  %7301 = vmatprep.subr.bf16.mxu0 %v10959_v41  ;;  %v1197_v24 = vld [vmem:[#allocation5 + $0x1f30] sm:$0xff]  ;;  %v11054_v41 = vcombine.low %v1065_v33, %v1069_v22 }
 0x362   :  { %7342 = vmatprep.subr.bf16.mxu1 %v11087_v12  ;;  %v11183_v32 = vcombine.high %v1193_v23, %v1197_v24  ;;  %v1057_v35 = vld [vmem:[#allocation5 + $0x1ad0] sm:$0xff]  ;;  %v11182_v12 = vcombine.low %v1193_v23, %v1197_v24  ;;  %v258_v23 = vld [vmem:[#allocation5 + $0x1d8] sm:$0xff] }
 0x363   :  { %v1061_v36 = vld [vmem:[#allocation5 + $0x1af0] sm:$0xff]  ;;  %v262_v24 = vld [vmem:[#allocation5 + $0x1f8] sm:$0xff] }
 0x364   :  { %7302 = vmatpush1.bf16.msra.mxu0 %v10958_v52  ;;  %v1185_v27 = vld [vmem:[#allocation5 + $0x1ed0] sm:$0xff]  ;;  %v11047_v43 = vcombine.high %v1057_v35, %v1061_v36 }
 0x365   :  { %7343 = vmatpush1.bf16.msra.mxu1 %v11086_v54  ;;  %7303 = vmatprep.subr.bf16.mxu0 %v11079_v56  ;;  %v1189_v38 = vld [vmem:[#allocation5 + $0x1ef0] sm:$0xff]  ;;  %v11046_v56 = vcombine.low %v1057_v35, %v1061_v36  ;;  %v10249_v36 = vcombine.high %v258_v23, %v262_v24 }
 0x366   :  { %7344 = vmatprep.subr.bf16.mxu1 %v11207_v60  ;;  %v11175_v44 = vcombine.high %v1185_v27, %v1189_v38  ;;  %v1049_v2 = vld [vmem:[#allocation5 + $0x1a90] sm:$0xff]  ;;  %v11174_v60 = vcombine.low %v1185_v27, %v1189_v38  ;;  %v1247_v38 = vsub.s32 5, %v12441_v26 }
 0x367   :  { %v1053_v48 = vld [vmem:[#allocation5 + $0x1ab0] sm:$0xff] }
 0x368   :  { %7304 = vmatpush2.bf16.msra.mxu0 %v11078_v1  ;;  %v1177_v52 = vld [vmem:[#allocation5 + $0x1e90] sm:$0xff]  ;;  %v11039_v61 = vcombine.high %v1049_v2, %v1053_v48 }
 0x369   :  { %7345 = vmatpush2.bf16.msra.mxu1 %v11206_v3  ;;  %7305 = vmatprep.subr.bf16.mxu0 %v11071_v45  ;;  %v1181_v54 = vld [vmem:[#allocation5 + $0x1eb0] sm:$0xff]  ;;  %v11038_v45 = vcombine.low %v1049_v2, %v1053_v48  ;;  %v12042_v2 = vld [vmem:[#allocation7] sm:$0xff] }
 0x36a   :  { %7346 = vmatprep.subr.bf16.mxu1 %v11199_v5  ;;  %v11167_v34 = vcombine.high %v1177_v52, %v1181_v54  ;;  %v1041_v10 = vld [vmem:[#allocation5 + $0x1a50] sm:$0xff]  ;;  %v11166_v5 = vcombine.low %v1177_v52, %v1181_v54  ;;  %v10248_v52 = vcombine.low %v258_v23, %v262_v24  ;;  %v362_v24 = vld [vmem:[#allocation5 + $0x518] sm:$0xff] }
 0x36b   :  { %v1045_v63 = vld [vmem:[#allocation5 + $0x1a70] sm:$0xff] }
 0x36c   :  { %7306 = vmatpush2.bf16.msra.mxu0 %v11070_v53  ;;  %v1169_v1 = vld [vmem:[#allocation5 + $0x1e50] sm:$0xff]  ;;  %v11031_v0 = vcombine.high %v1041_v10, %v1045_v63 }
 0x36d   :  { %7347 = vmatpush2.bf16.msra.mxu1 %v11198_v14  ;;  %7307 = vmatprep.subr.bf16.mxu0 %v11063_v15  ;;  %v1173_v3 = vld [vmem:[#allocation5 + $0x1e70] sm:$0xff]  ;;  %v11030_v15 = vcombine.low %v1041_v10, %v1045_v63  ;;  %v246_v10 = vld [vmem:[#allocation5 + $0x178] sm:$0xff] }
 0x36e   :  { %7348 = vmatprep.subr.bf16.mxu1 %v11191_v21  ;;  %v11159_v8 = vcombine.high %v1169_v1, %v1173_v3  ;;  %v1033_v9 = vld [vmem:[#allocation5 + $0x1a10] sm:$0xff]  ;;  %v11158_v21 = vcombine.low %v1169_v1, %v1173_v3  ;;  %v370_v1 = vld [vmem:[#allocation5 + $0x558] sm:$0xff] }
 0x36f   :  { %v1037_v11 = vld [vmem:[#allocation5 + $0x1a30] sm:$0xff]  ;;  %v374_v3 = vld [vmem:[#allocation5 + $0x578] sm:$0xff] }
 0x370   :  { %7308 = vmatpush2.bf16.msra.mxu0 %v11062_v25  ;;  %v1161_v53 = vld [vmem:[#allocation5 + $0x1e10] sm:$0xff]  ;;  %v11023_v33 = vcombine.high %v1033_v9, %v1037_v11  ;;  %v386_v25 = vld [vmem:[#allocation5 + $0x5d8] sm:$0xff] }
 0x371   :  { %7349 = vmatpush2.bf16.msra.mxu1 %v11190_v47  ;;  %7309 = vmatprep.subr.bf16.mxu0 %v11055_v30  ;;  %v1165_v14 = vld [vmem:[#allocation5 + $0x1e30] sm:$0xff]  ;;  %v390_v47 = vld [vmem:[#allocation5 + $0x5f8] sm:$0xff]  ;;  %v11022_v30 = vcombine.low %v1033_v9, %v1037_v11 }
 0x372   :  { %7350 = vmatprep.subr.bf16.mxu1 %v11183_v32  ;;  %v11151_v22 = vcombine.high %v1161_v53, %v1165_v14  ;;  %v1243_v32 = vsub.s32 4, %v12441_v26  ;;  %v11150_v35 = vcombine.low %v1161_v53, %v1165_v14  ;;  %v10377_v27 = vcombine.high %v386_v25, %v390_v47 }
 0x373   :  { %v10376_v54 = vcombine.low %v386_v25, %v390_v47  ;;  %v366_v25 = vld [vmem:[#allocation5 + $0x538] sm:$0xff] }
 0x374   :  { %7310 = vmatpush2.bf16.msra.mxu0 %v11054_v41  ;;  %v250_v41 = vld [vmem:[#allocation5 + $0x198] sm:$0xff]  ;;  %v1244_v48 = vrot.slane %v12042_v2, %v1243_v32 }
 0x375   :  { %7351 = vmatpush2.bf16.msra.mxu1 %v11182_v12  ;;  %7311 = vmatprep.subr.bf16.mxu0 %v11047_v43  ;;  %v254_v12 = vld [vmem:[#allocation5 + $0x1b8] sm:$0xff] }
 0x376   :  { %7352 = vmatprep.subr.bf16.mxu1 %v11175_v44  ;;  %v378_v43 = vld [vmem:[#allocation5 + $0x598] sm:$0xff] }
 0x377   :  { %v382_v44 = vld [vmem:[#allocation5 + $0x5b8] sm:$0xff] }
 0x378   :  { %7312 = vmatpush2.bf16.msra.mxu0 %v11046_v56  ;;  %v10241_v56 = vcombine.high %v250_v41, %v254_v12  ;;  %v10368_v9 = vcombine.low %v378_v43, %v382_v44 }
 0x379   :  { %7353 = vmatpush2.bf16.msra.mxu1 %v11174_v60  ;;  %7313 = vmatprep.subr.bf16.mxu0 %v11039_v61  ;;  %v1248_v60 = vrot.slane %v12042_v2, %v1247_v38  ;;  %v10369_v61 = vcombine.high %v378_v43, %v382_v44  ;;  %v354_v43 = vld [vmem:[#allocation5 + $0x4d8] sm:$0xff] }
 0x37a   :  { %7354 = vmatprep.subr.bf16.mxu1 %v11167_v34  ;;  %v242_v34 = vld [vmem:[#allocation5 + $0x158] sm:$0xff] }
 0x37b   :  { %v10233_v11 = vcombine.high %v242_v34, %v246_v10  ;;  %v10232_v32 = vcombine.low %v242_v34, %v246_v10  ;;  %v358_v44 = vld [vmem:[#allocation5 + $0x4f8] sm:$0xff] }
 0x37c   :  { %7314 = vmatpush2.bf16.msra.mxu0 %v11038_v45  ;;  %v10344_v10 = vcombine.low %v354_v43, %v358_v44 }
 0x37d   :  { %7355 = vmatpush2.bf16.msra.mxu1 %v11166_v5  ;;  %7315 = vmatprep.subr.bf16.mxu0 %v11031_v0  ;;  %v10240_v0 = vcombine.low %v250_v41, %v254_v12  ;;  %v10353_v41 = vcombine.high %v362_v24, %v366_v25  ;;  %v226_v12 = vld [vmem:[#allocation5 + $0xd8] sm:$0xff] }
 0x37e   :  { %7356 = vmatprep.subr.bf16.mxu1 %v11159_v8 }
 0x380   :  { %7316 = vmatpush2.bf16.msra.mxu0 %v11030_v15 }
 0x381   :  { %7357 = vmatpush2.bf16.msra.mxu1 %v11158_v21  ;;  %7317 = vmatprep.subr.bf16.mxu0 %v11023_v33  ;;  %v10361_v21 = vcombine.high %v370_v1, %v374_v3  ;;  %v234_v33 = vld [vmem:[#allocation5 + $0x118] sm:$0xff] }
 0x382   :  { %7358 = vmatprep.subr.bf16.mxu1 %v11151_v22  ;;  %v238_v22 = vld [vmem:[#allocation5 + $0x138] sm:$0xff] }
 0x383   :  { %v10224_v2 = vcombine.low %v234_v33, %v238_v22 }
 0x384   :  { %7318 = vmatpush2.bf16.msra.mxu0 %v11022_v30 }
 0x385   :  { %7359 = vmatpush2.bf16.msra.mxu1 %v11150_v35  ;;  %7369 = vmatprep.subr.bf16.mxu0 %v10249_v36  ;;  %v10360_v36 = vcombine.low %v370_v1, %v374_v3  ;;  %v210_v3 = vld [vmem:[#allocation5 + $0x58] sm:$0xff] }
 0x386   :  { %7410 = vmatprep.subr.bf16.mxu1 %v10377_v27  ;;  %v10225_v27 = vcombine.high %v234_v33, %v238_v22  ;;  %v330_v33 = vld [vmem:[#allocation5 + $0x418] sm:$0xff] }
 0x387   :  { %v7075_v63 = vpop.f32.mrf.mxu0  ;;  %7320 = vmatmul.mubr.bf16.vlgmr.msra.gmra.mxu0 %v12445_v50  ;;  %v334_v22 = vld [vmem:[#allocation5 + $0x438] sm:$0xff] }
 0x388   :  { %v7076_v45 = vadd.f32 %v7075_v63, %v1244_v48  ;;  %v7116_v5 = vpop.f32.mrf.mxu1  ;;  %7361 = vmatmul.mubr.bf16.vlgmr.msra.gmra.mxu1 %v12449_v55  ;;  %7370 = vmatpush1.bf16.msra.mxu0 %v10248_v52  ;;  %v10345_v52 = vcombine.high %v354_v43, %v358_v44  ;;  %v314_v43 = vld [vmem:[#allocation5 + $0x398] sm:$0xff] }
 0x389   :  { %7411 = vmatpush1.bf16.msra.mxu1 %v10376_v54  ;;  %v7077_v8 = vpop.f32.mrf.mxu0  ;;  %7371 = vmatprep.subr.bf16.mxu0 %v10241_v56  ;;  %v218_v54 = vld [vmem:[#allocation5 + $0x98] sm:$0xff] }
 0x38a   :  { %v12539_v53 = vadd.f32 %v7116_v5, %v7076_v45  ;;  %v7078_v14 = vadd.f32 %v7077_v8, %v1248_v60  ;;  %v7118_v15 = vpop.f32.mrf.mxu1  ;;  %7412 = vmatprep.subr.bf16.mxu1 %v10369_v61  ;;  %7401 = vmatprep.mubr.bf16.mxu0 %v12398_v58  ;;  %v230_v58 = vld [vmem:[#allocation5 + $0xf8] sm:$0xff] }
 0x38b   :  { %v7079_v23 = vpop.f32.mrf.mxu0  ;;  %7442 = vmatprep.mubr.bf16.mxu1 %v12400_v59  ;;  %v10352_v59 = vcombine.low %v362_v24, %v366_v25  ;;  %v10217_v48 = vcombine.high %v226_v12, %v230_v58  ;;  %v222_v56 = vld [vmem:[#allocation5 + $0xb8] sm:$0xff]  ;;  %v10216_v34 = vcombine.low %v226_v12, %v230_v58 }
 0x38c   :  { %v12543_v47 = vadd.f32 %v7118_v15, %v7078_v14  ;;  %v7120_v30 = vpop.f32.mrf.mxu1  ;;  %7372 = vmatpush1.bf16.msra.mxu0 %v10240_v0  ;;  %v346_v60 = vld [vmem:[#allocation5 + $0x498] sm:$0xff]  ;;  %v10209_v63 = vcombine.high %v218_v54, %v222_v56  ;;  %v10208_v8 = vcombine.low %v218_v54, %v222_v56 }
 0x38d   :  { %7413 = vmatpush1.bf16.msra.mxu1 %v10368_v9  ;;  %v7080_v35 = vpop.f32.mrf.mxu0  ;;  %7373 = vmatprep.subr.bf16.mxu0 %v10233_v11  ;;  %v350_v61 = vld [vmem:[#allocation5 + $0x4b8] sm:$0xff]  ;;  %v10321_v30 = vcombine.high %v330_v33, %v334_v22 }
 0x38e   :  { %v7121_v38 = vpop.f32.mrf.mxu1  ;;  %7414 = vmatprep.subr.bf16.mxu1 %v10361_v21  ;;  %v10337_v1 = vcombine.high %v346_v60, %v350_v61  ;;  %v214_v45 = vld [vmem:[#allocation5 + $0x78] sm:$0xff]  ;;  %v10336_v9 = vcombine.low %v346_v60, %v350_v61 }
 0x38f   :  { %v338_v5 = vld [vmem:[#allocation5 + $0x458] sm:$0xff]  ;;  %v10201_v11 = vcombine.high %v210_v3, %v214_v45  ;;  %v10200_v23 = vcombine.low %v210_v3, %v214_v45 }
 0x390   :  { %7374 = vmatpush1.bf16.msra.mxu0 %v10232_v32  ;;  %v342_v0 = vld [vmem:[#allocation5 + $0x478] sm:$0xff] }
 0x391   :  { %7415 = vmatpush1.bf16.msra.mxu1 %v10360_v36  ;;  %7375 = vmatprep.subr.bf16.mxu0 %v10225_v27  ;;  %v10329_v14 = vcombine.high %v338_v5, %v342_v0  ;;  %v202_v15 = vld [vmem:[#allocation5 + $0x18] sm:$0xff]  ;;  %v10328_v24 = vcombine.low %v338_v5, %v342_v0 }
 0x392   :  { %7416 = vmatprep.subr.bf16.mxu1 %v10353_v41  ;;  %v206_v21 = vld [vmem:[#allocation5 + $0x38] sm:$0xff]  ;;  %v10320_v41 = vcombine.low %v330_v33, %v334_v22 }
 0x393   :  { %v10193_v25 = vcombine.high %v202_v15, %v206_v21  ;;  %v322_v32 = vld [vmem:[#allocation5 + $0x3d8] sm:$0xff]  ;;  %v10192_v38 = vcombine.low %v202_v15, %v206_v21 }
 0x394   :  { %7376 = vmatpush1.bf16.msra.mxu0 %v10224_v2  ;;  %v326_v35 = vld [vmem:[#allocation5 + $0x3f8] sm:$0xff] }
 0x395   :  { %7417 = vmatpush1.bf16.msra.mxu1 %v10352_v59  ;;  %7377 = vmatprep.subr.bf16.mxu0 %v10217_v48  ;;  %v450_v36 = vld [vmem:[#allocation5 + $0x7d8] sm:$0xff]  ;;  %v10313_v12 = vcombine.high %v322_v32, %v326_v35  ;;  %v10312_v48 = vcombine.low %v322_v32, %v326_v35 }
 0x396   :  { %7418 = vmatprep.subr.bf16.mxu1 %v10345_v52  ;;  %v454_v27 = vld [vmem:[#allocation5 + $0x7f8] sm:$0xff] }
 0x397   :  { %v10441_v58 = vcombine.high %v450_v36, %v454_v27  ;;  %v318_v44 = vld [vmem:[#allocation5 + $0x3b8] sm:$0xff]  ;;  %v10440_v52 = vcombine.low %v450_v36, %v454_v27 }
 0x398   :  { %7378 = vmatpush1.bf16.msra.mxu0 %v10216_v34  ;;  %v442_v2 = vld [vmem:[#allocation5 + $0x798] sm:$0xff]  ;;  %v10305_v54 = vcombine.high %v314_v43, %v318_v44 }
 0x399   :  { %7419 = vmatpush1.bf16.msra.mxu1 %v10344_v10  ;;  %7379 = vmatprep.subr.bf16.mxu0 %v10209_v63  ;;  %v446_v59 = vld [vmem:[#allocation5 + $0x7b8] sm:$0xff]  ;;  %v10304_v63 = vcombine.low %v314_v43, %v318_v44 }
 0x39a   :  { %7420 = vmatprep.subr.bf16.mxu1 %v10337_v1  ;;  %v10433_v56 = vcombine.high %v442_v2, %v446_v59  ;;  %v306_v60 = vld [vmem:[#allocation5 + $0x358] sm:$0xff]  ;;  %v10432_v1 = vcombine.low %v442_v2, %v446_v59 }
 0x39b   :  { %v310_v61 = vld [vmem:[#allocation5 + $0x378] sm:$0xff] }
 0x39c   :  { %7380 = vmatpush1.bf16.msra.mxu0 %v10208_v8  ;;  %v434_v34 = vld [vmem:[#allocation5 + $0x758] sm:$0xff]  ;;  %v10297_v3 = vcombine.high %v306_v60, %v310_v61 }
 0x39d   :  { %7421 = vmatpush1.bf16.msra.mxu1 %v10336_v9  ;;  %7381 = vmatprep.subr.bf16.mxu0 %v10201_v11  ;;  %v438_v10 = vld [vmem:[#allocation5 + $0x778] sm:$0xff]  ;;  %v10296_v11 = vcombine.low %v306_v60, %v310_v61 }
 0x39e   :  { %7422 = vmatprep.subr.bf16.mxu1 %v10329_v14  ;;  %v10425_v45 = vcombine.high %v434_v34, %v438_v10  ;;  %v298_v5 = vld [vmem:[#allocation5 + $0x318] sm:$0xff]  ;;  %v10424_v14 = vcombine.low %v434_v34, %v438_v10 }
 0x39f   :  { %v302_v0 = vld [vmem:[#allocation5 + $0x338] sm:$0xff] }
 0x3a0   :  { %7382 = vmatpush1.bf16.msra.mxu0 %v10200_v23  ;;  %v426_v8 = vld [vmem:[#allocation5 + $0x718] sm:$0xff]  ;;  %v10289_v15 = vcombine.high %v298_v5, %v302_v0 }
 0x3a1   :  { %7423 = vmatpush1.bf16.msra.mxu1 %v10328_v24  ;;  %7383 = vmatprep.subr.bf16.mxu0 %v10193_v25  ;;  %v430_v9 = vld [vmem:[#allocation5 + $0x738] sm:$0xff]  ;;  %v10288_v25 = vcombine.low %v298_v5, %v302_v0 }
 0x3a2   :  { %7424 = vmatprep.subr.bf16.mxu1 %v10321_v30  ;;  %v10417_v21 = vcombine.high %v426_v8, %v430_v9  ;;  %v290_v33 = vld [vmem:[#allocation5 + $0x2d8] sm:$0xff]  ;;  %v10416_v30 = vcombine.low %v426_v8, %v430_v9 }
 0x3a3   :  { %v294_v22 = vld [vmem:[#allocation5 + $0x2f8] sm:$0xff] }
 0x3a4   :  { %7384 = vmatpush1.bf16.msra.mxu0 %v10192_v38  ;;  %v418_v23 = vld [vmem:[#allocation5 + $0x6d8] sm:$0xff]  ;;  %v10281_v32 = vcombine.high %v290_v33, %v294_v22 }
 0x3a5   :  { %7425 = vmatpush1.bf16.msra.mxu1 %v10320_v41  ;;  %7385 = vmatprep.subr.bf16.mxu0 %v10313_v12  ;;  %v422_v24 = vld [vmem:[#allocation5 + $0x6f8] sm:$0xff]  ;;  %v10280_v12 = vcombine.low %v290_v33, %v294_v22 }
 0x3a6   :  { %7426 = vmatprep.subr.bf16.mxu1 %v10441_v58  ;;  %v10409_v35 = vcombine.high %v418_v23, %v422_v24  ;;  %v282_v36 = vld [vmem:[#allocation5 + $0x298] sm:$0xff]  ;;  %v10408_v58 = vcombine.low %v418_v23, %v422_v24 }
 0x3a7   :  { %v286_v27 = vld [vmem:[#allocation5 + $0x2b8] sm:$0xff] }
 0x3a8   :  { %7386 = vmatpush2.bf16.msra.mxu0 %v10312_v48  ;;  %v410_v38 = vld [vmem:[#allocation5 + $0x698] sm:$0xff]  ;;  %v10273_v43 = vcombine.high %v282_v36, %v286_v27 }
 0x3a9   :  { %7427 = vmatpush2.bf16.msra.mxu1 %v10440_v52  ;;  %7387 = vmatprep.subr.bf16.mxu0 %v10305_v54  ;;  %v414_v41 = vld [vmem:[#allocation5 + $0x6b8] sm:$0xff]  ;;  %v10272_v54 = vcombine.low %v282_v36, %v286_v27 }
 0x3aa   :  { %7428 = vmatprep.subr.bf16.mxu1 %v10433_v56  ;;  %v10401_v44 = vcombine.high %v410_v38, %v414_v41  ;;  %v274_v2 = vld [vmem:[#allocation5 + $0x258] sm:$0xff]  ;;  %v10400_v56 = vcombine.low %v410_v38, %v414_v41 }
 0x3ab   :  { %v278_v59 = vld [vmem:[#allocation5 + $0x278] sm:$0xff] }
 0x3ac   :  { %7388 = vmatpush2.bf16.msra.mxu0 %v10304_v63  ;;  %v402_v48 = vld [vmem:[#allocation5 + $0x658] sm:$0xff]  ;;  %v10265_v60 = vcombine.high %v274_v2, %v278_v59 }
 0x3ad   :  { %7429 = vmatpush2.bf16.msra.mxu1 %v10432_v1  ;;  %7389 = vmatprep.subr.bf16.mxu0 %v10297_v3  ;;  %v406_v52 = vld [vmem:[#allocation5 + $0x678] sm:$0xff]  ;;  %v10264_v3 = vcombine.low %v274_v2, %v278_v59 }
 0x3ae   :  { %7430 = vmatprep.subr.bf16.mxu1 %v10425_v45  ;;  %v10393_v61 = vcombine.high %v402_v48, %v406_v52  ;;  %v266_v34 = vld [vmem:[#allocation5 + $0x218] sm:$0xff]  ;;  %v10392_v45 = vcombine.low %v402_v48, %v406_v52 }
 0x3af   :  { %v270_v10 = vld [vmem:[#allocation5 + $0x238] sm:$0xff] }
 0x3b0   :  { %7390 = vmatpush2.bf16.msra.mxu0 %v10296_v11  ;;  %v394_v63 = vld [vmem:[#allocation5 + $0x618] sm:$0xff]  ;;  %v10257_v5 = vcombine.high %v266_v34, %v270_v10 }
 0x3b1   :  { %7431 = vmatpush2.bf16.msra.mxu1 %v10424_v14  ;;  %7391 = vmatprep.subr.bf16.mxu0 %v10289_v15  ;;  %v398_v1 = vld [vmem:[#allocation5 + $0x638] sm:$0xff]  ;;  %v10256_v15 = vcombine.low %v266_v34, %v270_v10 }
 0x3b2   :  { %7432 = vmatprep.subr.bf16.mxu1 %v10417_v21  ;;  %v10385_v0 = vcombine.high %v394_v63, %v398_v1  ;;  %v514_v8 = vld [vmem:[#allocation5 + $0x9d8] sm:$0xff]  ;;  %v10384_v21 = vcombine.low %v394_v63, %v398_v1 }
 0x3b3   :  { %v518_v9 = vld [vmem:[#allocation5 + $0x9f8] sm:$0xff] }
 0x3b4   :  { %7392 = vmatpush2.bf16.msra.mxu0 %v10288_v25  ;;  %v642_v11 = vld [vmem:[#allocation5 + $0xdd8] sm:$0xff]  ;;  %v10505_v33 = vcombine.high %v514_v8, %v518_v9 }
 0x3b5   :  { %7433 = vmatpush2.bf16.msra.mxu1 %v10416_v30  ;;  %7393 = vmatprep.subr.bf16.mxu0 %v10281_v32  ;;  %v646_v14 = vld [vmem:[#allocation5 + $0xdf8] sm:$0xff]  ;;  %v10504_v32 = vcombine.low %v514_v8, %v518_v9 }
 0x3b6   :  { %7434 = vmatprep.subr.bf16.mxu1 %v10409_v35  ;;  %v10633_v22 = vcombine.high %v642_v11, %v646_v14  ;;  %v506_v23 = vld [vmem:[#allocation5 + $0x998] sm:$0xff]  ;;  %v10632_v35 = vcombine.low %v642_v11, %v646_v14 }
 0x3b7   :  { %v510_v24 = vld [vmem:[#allocation5 + $0x9b8] sm:$0xff] }
 0x3b8   :  { %7394 = vmatpush2.bf16.msra.mxu0 %v10280_v12  ;;  %v634_v25 = vld [vmem:[#allocation5 + $0xd98] sm:$0xff]  ;;  %v10497_v36 = vcombine.high %v506_v23, %v510_v24  ;;  %v10496_v59 = vcombine.low %v506_v23, %v510_v24 }
 0x3b9   :  { %7435 = vmatpush2.bf16.msra.mxu1 %v10408_v58  ;;  %7395 = vmatprep.subr.bf16.mxu0 %v10273_v43  ;;  %v638_v30 = vld [vmem:[#allocation5 + $0xdb8] sm:$0xff] }
 0x3ba   :  { %7436 = vmatprep.subr.bf16.mxu1 %v10401_v44  ;;  %v10625_v27 = vcombine.high %v634_v25, %v638_v30  ;;  %v498_v38 = vld [vmem:[#allocation5 + $0x958] sm:$0xff]  ;;  %v10624_v52 = vcombine.low %v634_v25, %v638_v30 }
 0x3bb   :  { %v502_v41 = vld [vmem:[#allocation5 + $0x978] sm:$0xff] }
 0x3bc   :  { %7396 = vmatpush2.bf16.msra.mxu0 %v10272_v54  ;;  %v626_v58 = vld [vmem:[#allocation5 + $0xd58] sm:$0xff]  ;;  %v10489_v54 = vcombine.high %v498_v38, %v502_v41 }
 0x3bd   :  { %7437 = vmatpush2.bf16.msra.mxu1 %v10400_v56  ;;  %7397 = vmatprep.subr.bf16.mxu0 %v10265_v60  ;;  %v630_v43 = vld [vmem:[#allocation5 + $0xd78] sm:$0xff] }
 0x3be   :  { %7438 = vmatprep.subr.bf16.mxu1 %v10393_v61  ;;  %v490_v34 = vld [vmem:[#allocation5 + $0x918] sm:$0xff] }
 0x3bf   :  { %v494_v10 = vld [vmem:[#allocation5 + $0x938] sm:$0xff] }
 0x3c0   :  { %7398 = vmatpush2.bf16.msra.mxu0 %v10264_v3  ;;  %v622_v63 = vld [vmem:[#allocation5 + $0xd38] sm:$0xff] }
 0x3c1   :  { %7439 = vmatpush2.bf16.msra.mxu1 %v10392_v45  ;;  %7399 = vmatprep.subr.bf16.mxu0 %v10257_v5  ;;  %v10488_v45 = vcombine.low %v498_v38, %v502_v41  ;;  %v482_v11 = vld [vmem:[#allocation5 + $0x8d8] sm:$0xff] }
 0x3c2   :  { %7440 = vmatprep.subr.bf16.mxu1 %v10385_v0  ;;  %v10481_v0 = vcombine.high %v490_v34, %v494_v10  ;;  %v610_v14 = vld [vmem:[#allocation5 + $0xcd8] sm:$0xff] }
 0x3c3   :  { %v474_v23 = vld [vmem:[#allocation5 + $0x898] sm:$0xff] }
 0x3c4   :  { %7400 = vmatpush2.bf16.msra.mxu0 %v10256_v15  ;;  %v614_v15 = vld [vmem:[#allocation5 + $0xcf8] sm:$0xff] }
 0x3c5   :  { %7441 = vmatpush2.bf16.msra.mxu1 %v10384_v21  ;;  %7451 = vmatprep.subr.bf16.mxu0 %v10505_v33  ;;  %v10480_v21 = vcombine.low %v490_v34, %v494_v10  ;;  %v478_v24 = vld [vmem:[#allocation5 + $0x8b8] sm:$0xff] }
 0x3c6   :  { %7492 = vmatprep.subr.bf16.mxu1 %v10633_v22  ;;  %v10601_v22 = vcombine.high %v610_v14, %v614_v15  ;;  %v602_v25 = vld [vmem:[#allocation5 + $0xc98] sm:$0xff] }
 0x3c7   :  { %v7157_v12 = vpop.f32.mrf.mxu0  ;;  %7402 = vmatmul.mubr.bf16.vlgmr.msra.gmra.mxu0 %v12404_v16  ;;  %v10617_v16 = vcombine.high %v626_v58, %v630_v43  ;;  %v606_v30 = vld [vmem:[#allocation5 + $0xcb8] sm:$0xff] }
 0x3c8   :  { %v7158_v44 = vadd.f32 %v7157_v12, %v12539_v53  ;;  %v7198_v2 = vpop.f32.mrf.mxu1  ;;  %7443 = vmatmul.mubr.bf16.vlgmr.msra.gmra.mxu1 %v12406_v20  ;;  %7452 = vmatpush1.bf16.msra.mxu0 %v10504_v32  ;;  %v618_v20 = vld [vmem:[#allocation5 + $0xd18] sm:$0xff] }
 0x3c9   :  { %7493 = vmatpush1.bf16.msra.mxu1 %v10632_v35  ;;  %v7159_v48 = vpop.f32.mrf.mxu0  ;;  %7453 = vmatprep.subr.bf16.mxu0 %v10497_v36  ;;  %v10609_v9 = vcombine.high %v618_v20, %v622_v63  ;;  %v10600_v35 = vcombine.low %v610_v14, %v614_v15  ;;  %v10465_v36 = vcombine.high %v474_v23, %v478_v24  ;;  %v466_v38 = vld [vmem:[#allocation5 + $0x858] sm:$0xff] }
 0x3ca   :  { %v12548_v56 = vadd.f32 %v7198_v2, %v7158_v44  ;;  %v7160_v60 = vadd.f32 %v7159_v48, %v12543_v47  ;;  %v7200_v61 = vpop.f32.mrf.mxu1  ;;  %7494 = vmatprep.subr.bf16.mxu1 %v10625_v27  ;;  %7483 = vmatprep.mubr.bf16.mxu0 %v12408_v28  ;;  %v10616_v47 = vcombine.low %v626_v58, %v630_v43  ;;  %v486_v28 = vld [vmem:[#allocation5 + $0x8f8] sm:$0xff] }
 0x3cb   :  { %v7161_v53 = vpop.f32.mrf.mxu0  ;;  %7524 = vmatprep.mubr.bf16.mxu1 %v12411_v31  ;;  %v10608_v31 = vcombine.low %v618_v20, %v622_v63  ;;  %v10473_v33 = vcombine.high %v482_v11, %v486_v28  ;;  %v10472_v32 = vcombine.low %v482_v11, %v486_v28  ;;  %v10593_v27 = vcombine.high %v602_v25, %v606_v30  ;;  %v470_v41 = vld [vmem:[#allocation5 + $0x878] sm:$0xff] }
 0x3cc   :  { %v12553_v1 = vadd.f32 %v7200_v61, %v7160_v60  ;;  %v7202_v3 = vpop.f32.mrf.mxu1  ;;  %7454 = vmatpush1.bf16.msra.mxu0 %v10496_v59  ;;  %v594_v12 = vld [vmem:[#allocation5 + $0xc58] sm:$0xff]  ;;  %v10464_v43 = vcombine.low %v474_v23, %v478_v24  ;;  %v10592_v44 = vcombine.low %v602_v25, %v606_v30  ;;  %v10457_v2 = vcombine.high %v466_v38, %v470_v41 }
 0x3cd   :  { %7495 = vmatpush1.bf16.msra.mxu1 %v10624_v52  ;;  %v7162_v5 = vpop.f32.mrf.mxu0  ;;  %7455 = vmatprep.subr.bf16.mxu0 %v10489_v54  ;;  %v598_v58 = vld [vmem:[#allocation5 + $0xc78] sm:$0xff]  ;;  %v10456_v61 = vcombine.low %v466_v38, %v470_v41 }
 0x3ce   :  { %v7203_v8 = vpop.f32.mrf.mxu1  ;;  %7496 = vmatprep.subr.bf16.mxu1 %v10617_v16  ;;  %v10585_v59 = vcombine.high %v594_v12, %v598_v58  ;;  %v458_v48 = vld [vmem:[#allocation5 + $0x818] sm:$0xff]  ;;  %v10584_v16 = vcombine.low %v594_v12, %v598_v58 }
 0x3cf   :  { %v462_v52 = vld [vmem:[#allocation5 + $0x838] sm:$0xff] }
 0x3d0   :  { %7456 = vmatpush1.bf16.msra.mxu0 %v10488_v45  ;;  %v586_v54 = vld [vmem:[#allocation5 + $0xc18] sm:$0xff]  ;;  %v10449_v34 = vcombine.high %v458_v48, %v462_v52  ;;  %v10448_v45 = vcombine.low %v458_v48, %v462_v52 }
 0x3d1   :  { %7497 = vmatpush1.bf16.msra.mxu1 %v10616_v47  ;;  %7457 = vmatprep.subr.bf16.mxu0 %v10481_v0  ;;  %v590_v60 = vld [vmem:[#allocation5 + $0xc38] sm:$0xff] }
 0x3d2   :  { %7498 = vmatprep.subr.bf16.mxu1 %v10609_v9  ;;  %v10577_v10 = vcombine.high %v586_v54, %v590_v60  ;;  %v578_v53 = vld [vmem:[#allocation5 + $0xbd8] sm:$0xff]  ;;  %v10576_v5 = vcombine.low %v586_v54, %v590_v60 }
 0x3d3   :  { %v582_v20 = vld [vmem:[#allocation5 + $0xbf8] sm:$0xff] }
 0x3d4   :  { %7458 = vmatpush1.bf16.msra.mxu0 %v10480_v21  ;;  %v706_v63 = vld [vmem:[#allocation5 + $0xfd8] sm:$0xff]  ;;  %v10569_v47 = vcombine.high %v578_v53, %v582_v20  ;;  %v10568_v14 = vcombine.low %v578_v53, %v582_v20 }
 0x3d5   :  { %7499 = vmatpush1.bf16.msra.mxu1 %v10608_v31  ;;  %7459 = vmatprep.subr.bf16.mxu0 %v10473_v33  ;;  %v710_v3 = vld [vmem:[#allocation5 + $0xff8] sm:$0xff] }
 0x3d6   :  { %7500 = vmatprep.subr.bf16.mxu1 %v10601_v22  ;;  %v10697_v0 = vcombine.high %v706_v63, %v710_v3  ;;  %v570_v8 = vld [vmem:[#allocation5 + $0xb98] sm:$0xff]  ;;  %v10696_v15 = vcombine.low %v706_v63, %v710_v3 }
 0x3d7   :  { %v574_v9 = vld [vmem:[#allocation5 + $0xbb8] sm:$0xff] }
 0x3d8   :  { %7460 = vmatpush1.bf16.msra.mxu0 %v10472_v32  ;;  %v698_v11 = vld [vmem:[#allocation5 + $0xf98] sm:$0xff]  ;;  %v10561_v21 = vcombine.high %v570_v8, %v574_v9  ;;  %v10560_v25 = vcombine.low %v570_v8, %v574_v9 }
 0x3d9   :  { %7501 = vmatpush1.bf16.msra.mxu1 %v10600_v35  ;;  %7461 = vmatprep.subr.bf16.mxu0 %v10465_v36  ;;  %v702_v28 = vld [vmem:[#allocation5 + $0xfb8] sm:$0xff] }
 0x3da   :  { %7502 = vmatprep.subr.bf16.mxu1 %v10593_v27  ;;  %v10689_v31 = vcombine.high %v698_v11, %v702_v28  ;;  %v562_v33 = vld [vmem:[#allocation5 + $0xb58] sm:$0xff]  ;;  %v10688_v30 = vcombine.low %v698_v11, %v702_v28 }
 0x3db   :  { %v566_v22 = vld [vmem:[#allocation5 + $0xb78] sm:$0xff] }
 0x3dc   :  { %7462 = vmatpush1.bf16.msra.mxu0 %v10464_v43  ;;  %v690_v23 = vld [vmem:[#allocation5 + $0xf58] sm:$0xff]  ;;  %v10553_v32 = vcombine.high %v562_v33, %v566_v22  ;;  %v10552_v12 = vcombine.low %v562_v33, %v566_v22 }
 0x3dd   :  { %7503 = vmatpush1.bf16.msra.mxu1 %v10592_v44  ;;  %7463 = vmatprep.subr.bf16.mxu0 %v10457_v2  ;;  %v694_v24 = vld [vmem:[#allocation5 + $0xf78] sm:$0xff] }
 0x3de   :  { %7504 = vmatprep.subr.bf16.mxu1 %v10585_v59  ;;  %v10681_v35 = vcombine.high %v690_v23, %v694_v24  ;;  %v554_v36 = vld [vmem:[#allocation5 + $0xb18] sm:$0xff]  ;;  %v10680_v58 = vcombine.low %v690_v23, %v694_v24 }
 0x3df   :  { %v558_v27 = vld [vmem:[#allocation5 + $0xb38] sm:$0xff] }
 0x3e0   :  { %7464 = vmatpush1.bf16.msra.mxu0 %v10456_v61  ;;  %v682_v38 = vld [vmem:[#allocation5 + $0xf18] sm:$0xff]  ;;  %v10545_v43 = vcombine.high %v554_v36, %v558_v27  ;;  %v10544_v54 = vcombine.low %v554_v36, %v558_v27 }
 0x3e1   :  { %7505 = vmatpush1.bf16.msra.mxu1 %v10584_v16  ;;  %7465 = vmatprep.subr.bf16.mxu0 %v10449_v34  ;;  %v686_v41 = vld [vmem:[#allocation5 + $0xf38] sm:$0xff] }
 0x3e2   :  { %7506 = vmatprep.subr.bf16.mxu1 %v10577_v10  ;;  %v10673_v44 = vcombine.high %v682_v38, %v686_v41  ;;  %v546_v2 = vld [vmem:[#allocation5 + $0xad8] sm:$0xff]  ;;  %v10672_v60 = vcombine.low %v682_v38, %v686_v41 }
 0x3e3   :  { %v550_v59 = vld [vmem:[#allocation5 + $0xaf8] sm:$0xff] }
 0x3e4   :  { %7466 = vmatpush1.bf16.msra.mxu0 %v10448_v45  ;;  %v674_v48 = vld [vmem:[#allocation5 + $0xed8] sm:$0xff]  ;;  %v10537_v61 = vcombine.high %v546_v2, %v550_v59  ;;  %v10536_v63 = vcombine.low %v546_v2, %v550_v59 }
 0x3e5   :  { %7507 = vmatpush1.bf16.msra.mxu1 %v10576_v5  ;;  %7467 = vmatprep.subr.bf16.mxu0 %v10569_v47  ;;  %v678_v52 = vld [vmem:[#allocation5 + $0xef8] sm:$0xff] }
 0x3e6   :  { %7508 = vmatprep.subr.bf16.mxu1 %v10697_v0  ;;  %v10665_v16 = vcombine.high %v674_v48, %v678_v52  ;;  %v538_v34 = vld [vmem:[#allocation5 + $0xa98] sm:$0xff]  ;;  %v10664_v3 = vcombine.low %v674_v48, %v678_v52 }
 0x3e7   :  { %v542_v10 = vld [vmem:[#allocation5 + $0xab8] sm:$0xff] }
 0x3e8   :  { %7468 = vmatpush2.bf16.msra.mxu0 %v10568_v14  ;;  %v666_v53 = vld [vmem:[#allocation5 + $0xe98] sm:$0xff]  ;;  %v10529_v45 = vcombine.high %v538_v34, %v542_v10  ;;  %v10528_v11 = vcombine.low %v538_v34, %v542_v10 }
 0x3e9   :  { %7509 = vmatpush2.bf16.msra.mxu1 %v10696_v15  ;;  %7469 = vmatprep.subr.bf16.mxu0 %v10561_v21  ;;  %v670_v20 = vld [vmem:[#allocation5 + $0xeb8] sm:$0xff] }
 0x3ea   :  { %7510 = vmatprep.subr.bf16.mxu1 %v10689_v31  ;;  %v10657_v5 = vcombine.high %v666_v53, %v670_v20  ;;  %v530_v47 = vld [vmem:[#allocation5 + $0xa58] sm:$0xff]  ;;  %v10656_v28 = vcombine.low %v666_v53, %v670_v20 }
 0x3eb   :  { %v534_v0 = vld [vmem:[#allocation5 + $0xa78] sm:$0xff] }
 0x3ec   :  { %7470 = vmatpush2.bf16.msra.mxu0 %v10560_v25  ;;  %v658_v8 = vld [vmem:[#allocation5 + $0xe58] sm:$0xff]  ;;  %v10521_v14 = vcombine.high %v530_v47, %v534_v0  ;;  %v10520_v23 = vcombine.low %v530_v47, %v534_v0 }
 0x3ed   :  { %7511 = vmatpush2.bf16.msra.mxu1 %v10688_v30  ;;  %7471 = vmatprep.subr.bf16.mxu0 %v10553_v32  ;;  %v662_v9 = vld [vmem:[#allocation5 + $0xe78] sm:$0xff] }
 0x3ee   :  { %7512 = vmatprep.subr.bf16.mxu1 %v10681_v35  ;;  %v10649_v15 = vcombine.high %v658_v8, %v662_v9  ;;  %v522_v21 = vld [vmem:[#allocation5 + $0xa18] sm:$0xff]  ;;  %v10648_v24 = vcombine.low %v658_v8, %v662_v9 }
 0x3ef   :  { %v526_v31 = vld [vmem:[#allocation5 + $0xa38] sm:$0xff] }
 0x3f0   :  { %7472 = vmatpush2.bf16.msra.mxu0 %v10552_v12  ;;  %v650_v33 = vld [vmem:[#allocation5 + $0xe18] sm:$0xff]  ;;  %v10513_v25 = vcombine.high %v522_v21, %v526_v31  ;;  %v10512_v38 = vcombine.low %v522_v21, %v526_v31 }
 0x3f1   :  { %7513 = vmatpush2.bf16.msra.mxu1 %v10680_v58  ;;  %7473 = vmatprep.subr.bf16.mxu0 %v10545_v43  ;;  %v654_v22 = vld [vmem:[#allocation5 + $0xe38] sm:$0xff] }
 0x3f2   :  { %7514 = vmatprep.subr.bf16.mxu1 %v10673_v44  ;;  %v10641_v30 = vcombine.high %v650_v33, %v654_v22  ;;  %v770_v32 = vld [vmem:[#allocation5 + $0x11d8] sm:$0xff]  ;;  %v10640_v41 = vcombine.low %v650_v33, %v654_v22 }
 0x3f3   :  { %v774_v35 = vld [vmem:[#allocation5 + $0x11f8] sm:$0xff] }
 0x3f4   :  { %7474 = vmatpush2.bf16.msra.mxu0 %v10544_v54  ;;  %v898_v36 = vld [vmem:[#allocation5 + $0x15d8] sm:$0xff]  ;;  %v10761_v12 = vcombine.high %v770_v32, %v774_v35  ;;  %v10760_v48 = vcombine.low %v770_v32, %v774_v35 }
 0x3f5   :  { %7515 = vmatpush2.bf16.msra.mxu1 %v10672_v60  ;;  %7475 = vmatprep.subr.bf16.mxu0 %v10537_v61  ;;  %v902_v27 = vld [vmem:[#allocation5 + $0x15f8] sm:$0xff] }
 0x3f6   :  { %7516 = vmatprep.subr.bf16.mxu1 %v10665_v16  ;;  %v10889_v58 = vcombine.high %v898_v36, %v902_v27  ;;  %v762_v43 = vld [vmem:[#allocation5 + $0x1198] sm:$0xff]  ;;  %v10888_v52 = vcombine.low %v898_v36, %v902_v27 }
 0x3f7   :  { %v766_v44 = vld [vmem:[#allocation5 + $0x11b8] sm:$0xff] }
 0x3f8   :  { %7476 = vmatpush2.bf16.msra.mxu0 %v10536_v63  ;;  %v890_v2 = vld [vmem:[#allocation5 + $0x1598] sm:$0xff]  ;;  %v10753_v54 = vcombine.high %v762_v43, %v766_v44 }
 0x3f9   :  { %7517 = vmatpush2.bf16.msra.mxu1 %v10664_v3  ;;  %7477 = vmatprep.subr.bf16.mxu0 %v10529_v45  ;;  %v894_v59 = vld [vmem:[#allocation5 + $0x15b8] sm:$0xff]  ;;  %v10752_v3 = vcombine.low %v762_v43, %v766_v44 }
 0x3fa   :  { %7518 = vmatprep.subr.bf16.mxu1 %v10657_v5  ;;  %v10881_v60 = vcombine.high %v890_v2, %v894_v59  ;;  %v754_v61 = vld [vmem:[#allocation5 + $0x1158] sm:$0xff]  ;;  %v10880_v5 = vcombine.low %v890_v2, %v894_v59 }
 0x3fb   :  { %v758_v16 = vld [vmem:[#allocation5 + $0x1178] sm:$0xff] }
 0x3fc   :  { %7478 = vmatpush2.bf16.msra.mxu0 %v10528_v11  ;;  %v882_v10 = vld [vmem:[#allocation5 + $0x1558] sm:$0xff]  ;;  %v10745_v47 = vcombine.high %v754_v61, %v758_v16  ;;  %v10744_v31 = vcombine.low %v754_v61, %v758_v16 }
 0x3fd   :  { %7519 = vmatpush2.bf16.msra.mxu1 %v10656_v28  ;;  %7479 = vmatprep.subr.bf16.mxu0 %v10521_v14  ;;  %v886_v53 = vld [vmem:[#allocation5 + $0x1578] sm:$0xff] }
 0x3fe   :  { %7520 = vmatprep.subr.bf16.mxu1 %v10649_v15  ;;  %v746_v11 = vld [vmem:[#allocation5 + $0x1118] sm:$0xff] }
 0x3ff   :  { %v750_v28 = vld [vmem:[#allocation5 + $0x1138] sm:$0xff] }
 0x400   :  { %7480 = vmatpush2.bf16.msra.mxu0 %v10520_v23  ;;  %v878_v14 = vld [vmem:[#allocation5 + $0x1538] sm:$0xff]  ;;  %v10737_v22 = vcombine.high %v746_v11, %v750_v28  ;;  %v10736_v35 = vcombine.low %v746_v11, %v750_v28 }
 0x401   :  { %7521 = vmatpush2.bf16.msra.mxu1 %v10648_v24  ;;  %7481 = vmatprep.subr.bf16.mxu0 %v10513_v25  ;;  %v738_v25 = vld [vmem:[#allocation5 + $0x10d8] sm:$0xff] }
 0x402   :  { %7522 = vmatprep.subr.bf16.mxu1 %v10641_v30  ;;  %v866_v30 = vld [vmem:[#allocation5 + $0x14d8] sm:$0xff] }
 0x403   :  { %v870_v32 = vld [vmem:[#allocation5 + $0x14f8] sm:$0xff] }
 0x404   :  { %7482 = vmatpush2.bf16.msra.mxu0 %v10512_v38  ;;  %v10857_v27 = vcombine.high %v866_v30, %v870_v32  ;;  %v730_v38 = vld [vmem:[#allocation5 + $0x1098] sm:$0xff]  ;;  %v10856_v44 = vcombine.low %v866_v30, %v870_v32 }
 0x405   :  { %7523 = vmatpush2.bf16.msra.mxu1 %v10640_v41  ;;  %7533 = vmatprep.subr.bf16.mxu0 %v10761_v12  ;;  %v734_v41 = vld [vmem:[#allocation5 + $0x10b8] sm:$0xff] }
 0x406   :  { %7574 = vmatprep.subr.bf16.mxu1 %v10889_v58  ;;  %v858_v12 = vld [vmem:[#allocation5 + $0x1498] sm:$0xff]  ;;  %v10721_v2 = vcombine.high %v730_v38, %v734_v41  ;;  %v10720_v61 = vcombine.low %v730_v38, %v734_v41 }
 0x407   :  { %v7239_v34 = vpop.f32.mrf.mxu0  ;;  %7484 = vmatmul.mubr.bf16.vlgmr.msra.gmra.mxu0 %v12416_v39  ;;  %v10873_v39 = vcombine.high %v882_v10, %v886_v53  ;;  %v862_v58 = vld [vmem:[#allocation5 + $0x14b8] sm:$0xff] }
 0x408   :  { %v7240_v20 = vadd.f32 %v7239_v34, %v12548_v56  ;;  %v7280_v63 = vpop.f32.mrf.mxu1  ;;  %7525 = vmatmul.mubr.bf16.vlgmr.msra.gmra.mxu1 %v12418_v40  ;;  %7534 = vmatpush1.bf16.msra.mxu0 %v10760_v48  ;;  %v874_v40 = vld [vmem:[#allocation5 + $0x1518] sm:$0xff]  ;;  %v10849_v59 = vcombine.high %v858_v12, %v862_v58  ;;  %v10848_v16 = vcombine.low %v858_v12, %v862_v58 }
 0x409   :  { %7575 = vmatpush1.bf16.msra.mxu1 %v10888_v52  ;;  %v7241_v45 = vpop.f32.mrf.mxu0  ;;  %7535 = vmatprep.subr.bf16.mxu0 %v10753_v54  ;;  %v10865_v24 = vcombine.high %v874_v40, %v878_v14  ;;  %v722_v48 = vld [vmem:[#allocation5 + $0x1058] sm:$0xff] }
 0x40a   :  { %v12558_v0 = vadd.f32 %v7280_v63, %v7240_v20  ;;  %v7242_v8 = vadd.f32 %v7241_v45, %v12553_v1  ;;  %v7282_v9 = vpop.f32.mrf.mxu1  ;;  %7576 = vmatprep.subr.bf16.mxu1 %v10881_v60  ;;  %7565 = vmatprep.mubr.bf16.mxu0 %v12420_v49  ;;  %v10872_v1 = vcombine.low %v882_v10, %v886_v53  ;;  %v742_v49 = vld [vmem:[#allocation5 + $0x10f8] sm:$0xff] }
 0x40b   :  { %v7243_v56 = vpop.f32.mrf.mxu0  ;;  %7606 = vmatprep.mubr.bf16.mxu1 %v12423_v51  ;;  %v10864_v51 = vcombine.low %v874_v40, %v878_v14  ;;  %v10729_v36 = vcombine.high %v738_v25, %v742_v49  ;;  %v10728_v43 = vcombine.low %v738_v25, %v742_v49  ;;  %v726_v52 = vld [vmem:[#allocation5 + $0x1078] sm:$0xff] }
 0x40c   :  { %v12563_v15 = vadd.f32 %v7282_v9, %v7242_v8  ;;  %v7284_v21 = vpop.f32.mrf.mxu1  ;;  %7536 = vmatpush1.bf16.msra.mxu0 %v10752_v3  ;;  %v850_v54 = vld [vmem:[#allocation5 + $0x1458] sm:$0xff]  ;;  %v10713_v34 = vcombine.high %v722_v48, %v726_v52  ;;  %v10712_v45 = vcombine.low %v722_v48, %v726_v52 }
 0x40d   :  { %7577 = vmatpush1.bf16.msra.mxu1 %v10880_v5  ;;  %v7244_v33 = vpop.f32.mrf.mxu0  ;;  %7537 = vmatprep.subr.bf16.mxu0 %v10745_v47  ;;  %v854_v60 = vld [vmem:[#allocation5 + $0x1478] sm:$0xff] }
 0x40e   :  { %v7285_v23 = vpop.f32.mrf.mxu1  ;;  %7578 = vmatprep.subr.bf16.mxu1 %v10873_v39  ;;  %v10841_v10 = vcombine.high %v850_v54, %v854_v60  ;;  %v714_v53 = vld [vmem:[#allocation5 + $0x1018] sm:$0xff]  ;;  %v10840_v5 = vcombine.low %v850_v54, %v854_v60 }
 0x40f   :  { %v718_v20 = vld [vmem:[#allocation5 + $0x1038] sm:$0xff] }
 0x410   :  { %7538 = vmatpush1.bf16.msra.mxu0 %v10744_v31  ;;  %v842_v63 = vld [vmem:[#allocation5 + $0x1418] sm:$0xff]  ;;  %v10705_v47 = vcombine.high %v714_v53, %v718_v20  ;;  %v10704_v56 = vcombine.low %v714_v53, %v718_v20 }
 0x411   :  { %7579 = vmatpush1.bf16.msra.mxu1 %v10872_v1  ;;  %7539 = vmatprep.subr.bf16.mxu0 %v10737_v22  ;;  %v846_v3 = vld [vmem:[#allocation5 + $0x1438] sm:$0xff] }
 0x412   :  { %7580 = vmatprep.subr.bf16.mxu1 %v10865_v24  ;;  %v10833_v8 = vcombine.high %v842_v63, %v846_v3  ;;  %v834_v9 = vld [vmem:[#allocation5 + $0x13d8] sm:$0xff]  ;;  %v10832_v40 = vcombine.low %v842_v63, %v846_v3 }
 0x413   :  { %v838_v39 = vld [vmem:[#allocation5 + $0x13f8] sm:$0xff] }
 0x414   :  { %7540 = vmatpush1.bf16.msra.mxu0 %v10736_v35  ;;  %v962_v11 = vld [vmem:[#allocation5 + $0x17d8] sm:$0xff]  ;;  %v10825_v14 = vcombine.high %v834_v9, %v838_v39  ;;  %v10824_v23 = vcombine.low %v834_v9, %v838_v39 }
 0x415   :  { %7581 = vmatpush1.bf16.msra.mxu1 %v10864_v51  ;;  %7541 = vmatprep.subr.bf16.mxu0 %v10729_v36  ;;  %v966_v28 = vld [vmem:[#allocation5 + $0x17f8] sm:$0xff] }
 0x416   :  { %7582 = vmatprep.subr.bf16.mxu1 %v10857_v27  ;;  %v10953_v21 = vcombine.high %v962_v11, %v966_v28  ;;  %v826_v31 = vld [vmem:[#allocation5 + $0x1398] sm:$0xff]  ;;  %v10952_v24 = vcombine.low %v962_v11, %v966_v28 }
 0x417   :  { %v830_v33 = vld [vmem:[#allocation5 + $0x13b8] sm:$0xff] }
 0x418   :  { %7542 = vmatpush1.bf16.msra.mxu0 %v10728_v43  ;;  %v954_v1 = vld [vmem:[#allocation5 + $0x1798] sm:$0xff]  ;;  %v10817_v25 = vcombine.high %v826_v31, %v830_v33  ;;  %v10816_v36 = vcombine.low %v826_v31, %v830_v33 }
 0x419   :  { %7583 = vmatpush1.bf16.msra.mxu1 %v10856_v44  ;;  %7543 = vmatprep.subr.bf16.mxu0 %v10721_v2  ;;  %v958_v22 = vld [vmem:[#allocation5 + $0x17b8] sm:$0xff] }
 0x41a   :  { %7584 = vmatprep.subr.bf16.mxu1 %v10849_v59  ;;  %v10945_v49 = vcombine.high %v954_v1, %v958_v22  ;;  %v818_v30 = vld [vmem:[#allocation5 + $0x1358] sm:$0xff]  ;;  %v10944_v27 = vcombine.low %v954_v1, %v958_v22 }
 0x41b   :  { %v822_v32 = vld [vmem:[#allocation5 + $0x1378] sm:$0xff] }
 0x41c   :  { %7544 = vmatpush1.bf16.msra.mxu0 %v10720_v61  ;;  %v946_v35 = vld [vmem:[#allocation5 + $0x1758] sm:$0xff]  ;;  %v10809_v38 = vcombine.high %v818_v30, %v822_v32  ;;  %v10808_v2 = vcombine.low %v818_v30, %v822_v32 }
 0x41d   :  { %7585 = vmatpush1.bf16.msra.mxu1 %v10848_v16  ;;  %7545 = vmatprep.subr.bf16.mxu0 %v10713_v34  ;;  %v950_v51 = vld [vmem:[#allocation5 + $0x1778] sm:$0xff] }
 0x41e   :  { %7586 = vmatprep.subr.bf16.mxu1 %v10841_v10  ;;  %v10937_v41 = vcombine.high %v946_v35, %v950_v51  ;;  %v810_v12 = vld [vmem:[#allocation5 + $0x1318] sm:$0xff]  ;;  %v10936_v59 = vcombine.low %v946_v35, %v950_v51 }
 0x41f   :  { %v814_v58 = vld [vmem:[#allocation5 + $0x1338] sm:$0xff] }
 0x420   :  { %7546 = vmatpush1.bf16.msra.mxu0 %v10712_v45  ;;  %v938_v43 = vld [vmem:[#allocation5 + $0x1718] sm:$0xff]  ;;  %v10801_v48 = vcombine.high %v810_v12, %v814_v58  ;;  %v10800_v34 = vcombine.low %v810_v12, %v814_v58 }
 0x421   :  { %7587 = vmatpush1.bf16.msra.mxu1 %v10840_v5  ;;  %7547 = vmatprep.subr.bf16.mxu0 %v10705_v47  ;;  %v942_v44 = vld [vmem:[#allocation5 + $0x1738] sm:$0xff] }
 0x422   :  { %7588 = vmatprep.subr.bf16.mxu1 %v10833_v8  ;;  %v10929_v52 = vcombine.high %v938_v43, %v942_v44  ;;  %v802_v54 = vld [vmem:[#allocation5 + $0x12d8] sm:$0xff]  ;;  %v10928_v10 = vcombine.low %v938_v43, %v942_v44 }
 0x423   :  { %v806_v60 = vld [vmem:[#allocation5 + $0x12f8] sm:$0xff] }
 0x424   :  { %7548 = vmatpush1.bf16.msra.mxu0 %v10704_v56  ;;  %v930_v61 = vld [vmem:[#allocation5 + $0x16d8] sm:$0xff]  ;;  %v10793_v53 = vcombine.high %v802_v54, %v806_v60  ;;  %v10792_v47 = vcombine.low %v802_v54, %v806_v60 }
 0x425   :  { %7589 = vmatpush1.bf16.msra.mxu1 %v10832_v40  ;;  %7549 = vmatprep.subr.bf16.mxu0 %v10825_v14  ;;  %v934_v16 = vld [vmem:[#allocation5 + $0x16f8] sm:$0xff] }
 0x426   :  { %7590 = vmatprep.subr.bf16.mxu1 %v10953_v21  ;;  %v10921_v20 = vcombine.high %v930_v61, %v934_v16  ;;  %v794_v63 = vld [vmem:[#allocation5 + $0x1298] sm:$0xff]  ;;  %v10920_v8 = vcombine.low %v930_v61, %v934_v16 }
 0x427   :  { %v798_v3 = vld [vmem:[#allocation5 + $0x12b8] sm:$0xff] }
 0x428   :  { %7550 = vmatpush2.bf16.msra.mxu0 %v10824_v23  ;;  %v922_v45 = vld [vmem:[#allocation5 + $0x1698] sm:$0xff]  ;;  %v10785_v9 = vcombine.high %v794_v63, %v798_v3  ;;  %v10784_v14 = vcombine.low %v794_v63, %v798_v3 }
 0x429   :  { %7591 = vmatpush2.bf16.msra.mxu1 %v10952_v24  ;;  %7551 = vmatprep.subr.bf16.mxu0 %v10817_v25  ;;  %v926_v5 = vld [vmem:[#allocation5 + $0x16b8] sm:$0xff] }
 0x42a   :  { %7592 = vmatprep.subr.bf16.mxu1 %v10945_v49  ;;  %v10913_v39 = vcombine.high %v922_v45, %v926_v5  ;;  %v786_v11 = vld [vmem:[#allocation5 + $0x1258] sm:$0xff]  ;;  %v10912_v21 = vcombine.low %v922_v45, %v926_v5 }
 0x42b   :  { %v790_v28 = vld [vmem:[#allocation5 + $0x1278] sm:$0xff] }
 0x42c   :  { %7552 = vmatpush2.bf16.msra.mxu0 %v10816_v36  ;;  %v914_v56 = vld [vmem:[#allocation5 + $0x1658] sm:$0xff]  ;;  %v10777_v31 = vcombine.high %v786_v11, %v790_v28  ;;  %v10776_v25 = vcombine.low %v786_v11, %v790_v28 }
 0x42d   :  { %7593 = vmatpush2.bf16.msra.mxu1 %v10944_v27  ;;  %7553 = vmatprep.subr.bf16.mxu0 %v10809_v38  ;;  %v918_v40 = vld [vmem:[#allocation5 + $0x1678] sm:$0xff] }
 0x42e   :  { %7594 = vmatprep.subr.bf16.mxu1 %v10937_v41  ;;  %v10905_v33 = vcombine.high %v914_v56, %v918_v40  ;;  %v778_v1 = vld [vmem:[#allocation5 + $0x1218] sm:$0xff]  ;;  %v10904_v49 = vcombine.low %v914_v56, %v918_v40 }
 0x42f   :  { %v782_v22 = vld [vmem:[#allocation5 + $0x1238] sm:$0xff] }
 0x430   :  { %7554 = vmatpush2.bf16.msra.mxu0 %v10808_v2  ;;  %v906_v23 = vld [vmem:[#allocation5 + $0x1618] sm:$0xff]  ;;  %v10769_v30 = vcombine.high %v778_v1, %v782_v22  ;;  %v10768_v38 = vcombine.low %v778_v1, %v782_v22 }
 0x431   :  { %7595 = vmatpush2.bf16.msra.mxu1 %v10936_v59  ;;  %7555 = vmatprep.subr.bf16.mxu0 %v10801_v48  ;;  %v910_v24 = vld [vmem:[#allocation5 + $0x1638] sm:$0xff] }
 0x432   :  { %7596 = vmatprep.subr.bf16.mxu1 %v10929_v52  ;;  %v10897_v32 = vcombine.high %v906_v23, %v910_v24  ;;  %v1026_v35 = vld [vmem:[#allocation5 + $0x19d8] sm:$0xff]  ;;  %v10896_v41 = vcombine.low %v906_v23, %v910_v24 }
 0x433   :  { %v1030_v51 = vld [vmem:[#allocation5 + $0x19f8] sm:$0xff] }
 0x434   :  { %7556 = vmatpush2.bf16.msra.mxu0 %v10800_v34  ;;  %v1154_v36 = vld [vmem:[#allocation5 + $0x1dd8] sm:$0xff]  ;;  %v11017_v12 = vcombine.high %v1026_v35, %v1030_v51  ;;  %v11016_v48 = vcombine.low %v1026_v35, %v1030_v51 }
 0x435   :  { %7597 = vmatpush2.bf16.msra.mxu1 %v10928_v10  ;;  %7557 = vmatprep.subr.bf16.mxu0 %v10793_v53  ;;  %v1158_v27 = vld [vmem:[#allocation5 + $0x1df8] sm:$0xff] }
 0x436   :  { %7598 = vmatprep.subr.bf16.mxu1 %v10921_v20  ;;  %v11145_v58 = vcombine.high %v1154_v36, %v1158_v27  ;;  %v1018_v43 = vld [vmem:[#allocation5 + $0x1998] sm:$0xff]  ;;  %v11144_v52 = vcombine.low %v1154_v36, %v1158_v27 }
 0x437   :  { %v1022_v44 = vld [vmem:[#allocation5 + $0x19b8] sm:$0xff] }
 0x438   :  { %7558 = vmatpush2.bf16.msra.mxu0 %v10792_v47  ;;  %v1146_v2 = vld [vmem:[#allocation5 + $0x1d98] sm:$0xff]  ;;  %v11009_v54 = vcombine.high %v1018_v43, %v1022_v44  ;;  %v11008_v3 = vcombine.low %v1018_v43, %v1022_v44 }
 0x439   :  { %7599 = vmatpush2.bf16.msra.mxu1 %v10920_v8  ;;  %7559 = vmatprep.subr.bf16.mxu0 %v10785_v9  ;;  %v1150_v59 = vld [vmem:[#allocation5 + $0x1db8] sm:$0xff] }
 0x43a   :  { %7600 = vmatprep.subr.bf16.mxu1 %v10913_v39  ;;  %v11137_v60 = vcombine.high %v1146_v2, %v1150_v59  ;;  %v1010_v61 = vld [vmem:[#allocation5 + $0x1958] sm:$0xff]  ;;  %v11136_v5 = vcombine.low %v1146_v2, %v1150_v59 }
 0x43b   :  { %v1014_v16 = vld [vmem:[#allocation5 + $0x1978] sm:$0xff] }
 0x43c   :  { %7560 = vmatpush2.bf16.msra.mxu0 %v10784_v14  ;;  %v1138_v10 = vld [vmem:[#allocation5 + $0x1d58] sm:$0xff]  ;;  %v11001_v47 = vcombine.high %v1010_v61, %v1014_v16 }
 0x43d   :  { %7601 = vmatpush2.bf16.msra.mxu1 %v10912_v21  ;;  %7561 = vmatprep.subr.bf16.mxu0 %v10777_v31  ;;  %v1142_v53 = vld [vmem:[#allocation5 + $0x1d78] sm:$0xff]  ;;  %v11000_v21 = vcombine.low %v1010_v61, %v1014_v16 }
 0x43e   :  { %7602 = vmatprep.subr.bf16.mxu1 %v10905_v33  ;;  %v1002_v11 = vld [vmem:[#allocation5 + $0x1918] sm:$0xff] }
 0x43f   :  { %v1006_v28 = vld [vmem:[#allocation5 + $0x1938] sm:$0xff] }
 0x440   :  { %7562 = vmatpush2.bf16.msra.mxu0 %v10776_v25  ;;  %v1134_v56 = vld [vmem:[#allocation5 + $0x1d38] sm:$0xff]  ;;  %v10993_v33 = vcombine.high %v1002_v11, %v1006_v28 }
 0x441   :  { %7603 = vmatpush2.bf16.msra.mxu1 %v10904_v49  ;;  %7563 = vmatprep.subr.bf16.mxu0 %v10769_v30  ;;  %v994_v23 = vld [vmem:[#allocation5 + $0x18d8] sm:$0xff]  ;;  %v10992_v49 = vcombine.low %v1002_v11, %v1006_v28 }
 0x442   :  { %7604 = vmatprep.subr.bf16.mxu1 %v10897_v32  ;;  %v1122_v24 = vld [vmem:[#allocation5 + $0x1cd8] sm:$0xff] }
 0x443   :  { %v1126_v25 = vld [vmem:[#allocation5 + $0x1cf8] sm:$0xff] }
 0x444   :  { %7564 = vmatpush2.bf16.msra.mxu0 %v10768_v38  ;;  %v11113_v32 = vcombine.high %v1122_v24, %v1126_v25  ;;  %v986_v35 = vld [vmem:[#allocation5 + $0x1898] sm:$0xff] }
 0x445   :  { %7605 = vmatpush2.bf16.msra.mxu1 %v10896_v41  ;;  %7615 = vmatprep.subr.bf16.mxu0 %v11017_v12  ;;  %v990_v51 = vld [vmem:[#allocation5 + $0x18b8] sm:$0xff]  ;;  %v11112_v41 = vcombine.low %v1122_v24, %v1126_v25 }
 0x446   :  { %7656 = vmatprep.subr.bf16.mxu1 %v11145_v58  ;;  %v1114_v36 = vld [vmem:[#allocation5 + $0x1c98] sm:$0xff]  ;;  %v10977_v12 = vcombine.high %v986_v35, %v990_v51 }
 0x447   :  { %v7321_v34 = vpop.f32.mrf.mxu0  ;;  %7566 = vmatmul.mubr.bf16.vlgmr.msra.gmra.mxu0 %v12428_v6  ;;  %v11129_v6 = vcombine.high %v1138_v10, %v1142_v53  ;;  %v1118_v27 = vld [vmem:[#allocation5 + $0x1cb8] sm:$0xff] }
 0x448   :  { %v7322_v20 = vadd.f32 %v7321_v34, %v12558_v0  ;;  %v7362_v63 = vpop.f32.mrf.mxu1  ;;  %7607 = vmatmul.mubr.bf16.vlgmr.msra.gmra.mxu1 %v12430_v7  ;;  %7616 = vmatpush1.bf16.msra.mxu0 %v11016_v48  ;;  %v1130_v7 = vld [vmem:[#allocation5 + $0x1d18] sm:$0xff]  ;;  %v11105_v58 = vcombine.high %v1114_v36, %v1118_v27  ;;  %v10976_v48 = vcombine.low %v986_v35, %v990_v51 }
 0x449   :  { %7657 = vmatpush1.bf16.msra.mxu1 %v11144_v52  ;;  %v7323_v45 = vpop.f32.mrf.mxu0  ;;  %7617 = vmatprep.subr.bf16.mxu0 %v11009_v54  ;;  %v11121_v22 = vcombine.high %v1130_v7, %v1134_v56  ;;  %v978_v43 = vld [vmem:[#allocation5 + $0x1858] sm:$0xff]  ;;  %v11104_v52 = vcombine.low %v1114_v36, %v1118_v27 }
 0x44a   :  { %v12568_v8 = vadd.f32 %v7362_v63, %v7322_v20  ;;  %v7324_v9 = vadd.f32 %v7323_v45, %v12563_v15  ;;  %v7364_v39 = vpop.f32.mrf.mxu1  ;;  %7658 = vmatprep.subr.bf16.mxu1 %v11137_v60  ;;  %7647 = vmatprep.mubr.bf16.mxu0 %v12432_v17  ;;  %v11128_v15 = vcombine.low %v1138_v10, %v1142_v53  ;;  %v998_v17 = vld [vmem:[#allocation5 + $0x18f8] sm:$0xff] }
 0x44b   :  { %v7325_v0 = vpop.f32.mrf.mxu0  ;;  %7688 = vmatprep.mubr.bf16.mxu1 %v12435_v18  ;;  %v11120_v18 = vcombine.low %v1130_v7, %v1134_v56  ;;  %v10985_v30 = vcombine.high %v994_v23, %v998_v17  ;;  %v10984_v38 = vcombine.low %v994_v23, %v998_v17  ;;  %v982_v44 = vld [vmem:[#allocation5 + $0x1878] sm:$0xff] }
 0x44c   :  { %v12573_v40 = vadd.f32 %v7364_v39, %v7324_v9  ;;  %v7366_v14 = vpop.f32.mrf.mxu1  ;;  %7618 = vmatpush1.bf16.msra.mxu0 %v11008_v3  ;;  %v1106_v2 = vld [vmem:[#allocation5 + $0x1c58] sm:$0xff]  ;;  %v10969_v54 = vcombine.high %v978_v43, %v982_v44  ;;  %v10968_v53 = vcombine.low %v978_v43, %v982_v44  ;;  %vm7701_vm5 = vcmp.gt.f32.partialorder %v12568_v8, 0.0 }
 0x44d   :  { %7659 = vmatpush1.bf16.msra.mxu1 %v11136_v5  ;;  %v7326_v31 = vpop.f32.mrf.mxu0  ;;  %7619 = vmatprep.subr.bf16.mxu0 %v11001_v47  ;;  %v1110_v59 = vld [vmem:[#allocation5 + $0x1c78] sm:$0xff] }
 0x44e   :  { %v7367_v1 = vpop.f32.mrf.mxu1  ;;  %7660 = vmatprep.subr.bf16.mxu1 %v11129_v6  ;;  %v11097_v60 = vcombine.high %v1106_v2, %v1110_v59  ;;  %v970_v61 = vld [vmem:[#allocation5 + $0x1818] sm:$0xff]  ;;  %v11096_v20 = vcombine.low %v1106_v2, %v1110_v59  ;;  %vm7702_vm4 = vcmp.gt.f32.partialorder %v12573_v40, 0.0 }
 0x44f   :  { %v974_v16 = vld [vmem:[#allocation5 + $0x1838] sm:$0xff] }
 0x450   :  { %7620 = vmatpush1.bf16.msra.mxu0 %v11000_v21  ;;  %v1098_v34 = vld [vmem:[#allocation5 + $0x1c18] sm:$0xff]  ;;  %v10961_v63 = vcombine.high %v970_v61, %v974_v16  ;;  %v10960_v39 = vcombine.low %v970_v61, %v974_v16 }
 0x451   :  { %7661 = vmatpush1.bf16.msra.mxu1 %v11128_v15  ;;  %7621 = vmatprep.subr.bf16.mxu0 %v10993_v33  ;;  %v1102_v10 = vld [vmem:[#allocation5 + $0x1c38] sm:$0xff] }
 0x452   :  { %7662 = vmatprep.subr.bf16.mxu1 %v11121_v22  ;;  %v11089_v3 = vcombine.high %v1098_v34, %v1102_v10  ;;  %v1090_v45 = vld [vmem:[#allocation5 + $0x1bd8] sm:$0xff]  ;;  %v11088_v6 = vcombine.low %v1098_v34, %v1102_v10 }
 0x453   :  { %v1094_v5 = vld [vmem:[#allocation5 + $0x1bf8] sm:$0xff] }
 0x454   :  { %7622 = vmatpush1.bf16.msra.mxu0 %v10992_v49  ;;  %v1218_v47 = vld [vmem:[#allocation5 + $0x1fd8] sm:$0xff]  ;;  %v11081_v11 = vcombine.high %v1090_v45, %v1094_v5  ;;  %v11080_v21 = vcombine.low %v1090_v45, %v1094_v5 }
 0x455   :  { %7663 = vmatpush1.bf16.msra.mxu1 %v11120_v18  ;;  %7623 = vmatprep.subr.bf16.mxu0 %v10985_v30  ;;  %v1222_v9 = vld [vmem:[#allocation5 + $0x1ff8] sm:$0xff] }
 0x456   :  { %7664 = vmatprep.subr.bf16.mxu1 %v11113_v32  ;;  %v11209_v28 = vcombine.high %v1218_v47, %v1222_v9  ;;  %v1082_v0 = vld [vmem:[#allocation5 + $0x1b98] sm:$0xff]  ;;  %v11208_v31 = vcombine.low %v1218_v47, %v1222_v9 }
 0x457   :  { %v1086_v7 = vld [vmem:[#allocation5 + $0x1bb8] sm:$0xff] }
 0x458   :  { %7624 = vmatpush1.bf16.msra.mxu0 %v10984_v38  ;;  %v1210_v56 = vld [vmem:[#allocation5 + $0x1f98] sm:$0xff]  ;;  %v11073_v15 = vcombine.high %v1082_v0, %v1086_v7  ;;  %v11072_v24 = vcombine.low %v1082_v0, %v1086_v7 }
 0x459   :  { %7665 = vmatpush1.bf16.msra.mxu1 %v11112_v41  ;;  %7625 = vmatprep.subr.bf16.mxu0 %v10977_v12  ;;  %v1214_v14 = vld [vmem:[#allocation5 + $0x1fb8] sm:$0xff] }
 0x45a   :  { %7666 = vmatprep.subr.bf16.mxu1 %v11105_v58  ;;  %v11201_v33 = vcombine.high %v1210_v56, %v1214_v14  ;;  %v1074_v1 = vld [vmem:[#allocation5 + $0x1b58] sm:$0xff]  ;;  %v11200_v25 = vcombine.low %v1210_v56, %v1214_v14 }
 0x45b   :  { %v1078_v22 = vld [vmem:[#allocation5 + $0x1b78] sm:$0xff] }
 0x45c   :  { %7626 = vmatpush1.bf16.msra.mxu0 %v10976_v48  ;;  %v1202_v23 = vld [vmem:[#allocation5 + $0x1f58] sm:$0xff]  ;;  %v11065_v49 = vcombine.high %v1074_v1, %v1078_v22  ;;  %v11064_v36 = vcombine.low %v1074_v1, %v1078_v22  ;;  %v1251_v1 = vsub.s32 6, %v12441_v26  ;;  %v7708_v22 = vmul.f32 0.01, %v12533_v42 }
 0x45d   :  { %7667 = vmatpush1.bf16.msra.mxu1 %v11104_v52  ;;  %7627 = vmatprep.subr.bf16.mxu0 %v10969_v54  ;;  %v1206_v17 = vld [vmem:[#allocation5 + $0x1f78] sm:$0xff] }
 0x45e   :  { %7668 = vmatprep.subr.bf16.mxu1 %v11097_v60  ;;  %v11193_v18 = vcombine.high %v1202_v23, %v1206_v17  ;;  %v1066_v30 = vld [vmem:[#allocation5 + $0x1b18] sm:$0xff]  ;;  %v11192_v27 = vcombine.low %v1202_v23, %v1206_v17 }
 0x45f   :  { %v1070_v32 = vld [vmem:[#allocation5 + $0x1b38] sm:$0xff] }
 0x460   :  { %7628 = vmatpush1.bf16.msra.mxu0 %v10968_v53  ;;  %v1194_v35 = vld [vmem:[#allocation5 + $0x1f18] sm:$0xff]  ;;  %v11057_v38 = vcombine.high %v1066_v30, %v1070_v32  ;;  %v11056_v2 = vcombine.low %v1066_v30, %v1070_v32 }
 0x461   :  { %7669 = vmatpush1.bf16.msra.mxu1 %v11096_v20  ;;  %7629 = vmatprep.subr.bf16.mxu0 %v10961_v63  ;;  %v1198_v51 = vld [vmem:[#allocation5 + $0x1f38] sm:$0xff] }
 0x462   :  { %7670 = vmatprep.subr.bf16.mxu1 %v11089_v3  ;;  %v11185_v41 = vcombine.high %v1194_v35, %v1198_v51  ;;  %v1058_v12 = vld [vmem:[#allocation5 + $0x1ad8] sm:$0xff]  ;;  %v11184_v59 = vcombine.low %v1194_v35, %v1198_v51  ;;  %v7716_v51 = vsel %vm7700_vm1, %v12533_v42, %v7708_v22 }
 0x463   :  { %v1062_v58 = vld [vmem:[#allocation5 + $0x1af8] sm:$0xff] }
 0x464   :  { %7630 = vmatpush1.bf16.msra.mxu0 %v10960_v39  ;;  %v1186_v43 = vld [vmem:[#allocation5 + $0x1ed8] sm:$0xff]  ;;  %v11049_v48 = vcombine.high %v1058_v12, %v1062_v58  ;;  %v11048_v34 = vcombine.low %v1058_v12, %v1062_v58 }
 0x465   :  { %7671 = vmatpush1.bf16.msra.mxu1 %v11088_v6  ;;  %7631 = vmatprep.subr.bf16.mxu0 %v11081_v11  ;;  %v1190_v44 = vld [vmem:[#allocation5 + $0x1ef8] sm:$0xff] }
 0x466   :  { %7672 = vmatprep.subr.bf16.mxu1 %v11209_v28  ;;  %v11177_v52 = vcombine.high %v1186_v43, %v1190_v44  ;;  %v1050_v54 = vld [vmem:[#allocation5 + $0x1a98] sm:$0xff]  ;;  %v11176_v10 = vcombine.low %v1186_v43, %v1190_v44 }
 0x467   :  { %v1054_v60 = vld [vmem:[#allocation5 + $0x1ab8] sm:$0xff] }
 0x468   :  { %7632 = vmatpush2.bf16.msra.mxu0 %v11080_v21  ;;  %v1178_v61 = vld [vmem:[#allocation5 + $0x1e98] sm:$0xff]  ;;  %v11041_v53 = vcombine.high %v1050_v54, %v1054_v60  ;;  %v11040_v47 = vcombine.low %v1050_v54, %v1054_v60 }
 0x469   :  { %7673 = vmatpush2.bf16.msra.mxu1 %v11208_v31  ;;  %7633 = vmatprep.subr.bf16.mxu0 %v11073_v15  ;;  %v1182_v16 = vld [vmem:[#allocation5 + $0x1eb8] sm:$0xff]  ;;  %v7706_v15 = vmul.f32 0.01, %v12489_v19 }
 0x46a   :  { %7674 = vmatprep.subr.bf16.mxu1 %v11201_v33  ;;  %v11169_v20 = vcombine.high %v1178_v61, %v1182_v16  ;;  %v1042_v63 = vld [vmem:[#allocation5 + $0x1a58] sm:$0xff]  ;;  %v11168_v9 = vcombine.low %v1178_v61, %v1182_v16 }
 0x46b   :  { %v1046_v3 = vld [vmem:[#allocation5 + $0x1a78] sm:$0xff]  ;;  %v7714_v32 = vsel %vm7698_vm0, %v12489_v19, %v7706_v15  ;;  %v12587_v19 = vpack.c.bf16 %v7716_v51, %v7716_v51 }
 0x46c   :  { %7634 = vmatpush2.bf16.msra.mxu0 %v11072_v24  ;;  %v1170_v45 = vld [vmem:[#allocation5 + $0x1e58] sm:$0xff]  ;;  %v11033_v39 = vcombine.high %v1042_v63, %v1046_v3  ;;  %v11032_v56 = vcombine.low %v1042_v63, %v1046_v3 }
 0x46d   :  { %7675 = vmatpush2.bf16.msra.mxu1 %v11200_v25  ;;  %7635 = vmatprep.subr.bf16.mxu0 %v11065_v49  ;;  %v1174_v5 = vld [vmem:[#allocation5 + $0x1e78] sm:$0xff]  ;;  %v1255_v25 = vsub.s32 7, %v12441_v26  ;;  %v12043_v49 = vld [vmem:[#allocation7] sm:$0xff]  ;;  %v12032_v26 = vld [vmem:[%s12721_s8 + $0x30] sm:$0xff]  }
 0x46e   :  { %7676 = vmatprep.subr.bf16.mxu1 %v11193_v18  ;;  %v11161_v6 = vcombine.high %v1170_v45, %v1174_v5  ;;  %v1034_v11 = vld [vmem:[#allocation5 + $0x1a18] sm:$0xff]  ;;  %v11160_v14 = vcombine.low %v1170_v45, %v1174_v5  ;;  %v1252_v18 = vrot.slane %v12043_v49, %v1251_v1 }
 0x46f   :  { %v1038_v28 = vld [vmem:[#allocation5 + $0x1a38] sm:$0xff] }
 0x470   :  { %7636 = vmatpush2.bf16.msra.mxu0 %v11064_v36  ;;  %v1162_v0 = vld [vmem:[#allocation5 + $0x1e18] sm:$0xff]  ;;  %v11025_v21 = vcombine.high %v1034_v11, %v1038_v28  ;;  %v11024_v33 = vcombine.low %v1034_v11, %v1038_v28  ;;  %v1256_v36 = vrot.slane %v12043_v49, %v1255_v25 }
 0x471   :  { %7677 = vmatpush2.bf16.msra.mxu1 %v11192_v27  ;;  %7637 = vmatprep.subr.bf16.mxu0 %v11057_v38  ;;  %v1166_v7 = vld [vmem:[#allocation5 + $0x1e38] sm:$0xff] }
 0x472   :  { %7678 = vmatprep.subr.bf16.mxu1 %v11185_v41  ;;  %v11153_v31 = vcombine.high %v1162_v0, %v1166_v7  ;;  %v11152_v23 = vcombine.low %v1162_v0, %v1166_v7  ;;  %v11617_v17 = vld [vmem:[#allocation8 + $0xe4] ss:$16 sps:$4 sm:$0xff]   ;;  %v11615_v30 = vld [vmem:[#allocation8 + $0xe0] ss:$16 sps:$4 sm:$0xff]   ;;  %v12584_v41 = vpack.c.bf16 %v7714_v32, %v7714_v32 }
 0x473   :  { %v11620_v24 = vld [vmem:[#allocation8 + $0x2e4] ss:$16 sps:$4 sm:$0xff]   ;;  %v11618_v35 = vld [vmem:[#allocation8 + $0x2e0] ss:$16 sps:$4 sm:$0xff]  }
 0x474   :  { %7638 = vmatpush2.bf16.msra.mxu0 %v11056_v2  ;;  %v11623_v27 = vld [vmem:[#allocation8 + $0xc4] ss:$16 sps:$4 sm:$0xff]   ;;  %v11621_v44 = vld [vmem:[#allocation8 + $0xc0] ss:$16 sps:$4 sm:$0xff]  }
 0x475   :  { %7679 = vmatpush2.bf16.msra.mxu1 %v11184_v59  ;;  %7639 = vmatprep.subr.bf16.mxu0 %v11049_v48  ;;  %v11626_v12 = vld [vmem:[#allocation8 + $0x2c4] ss:$16 sps:$4 sm:$0xff]   ;;  %v11624_v2 = vld [vmem:[#allocation8 + $0x2c0] ss:$16 sps:$4 sm:$0xff]  }
 0x476   :  { %7680 = vmatprep.subr.bf16.mxu1 %v11177_v52  ;;  %v11629_v59 = vld [vmem:[#allocation8 + $0xa4] ss:$16 sps:$4 sm:$0xff]   ;;  %v11627_v16 = vld [vmem:[#allocation8 + $0xa0] ss:$16 sps:$4 sm:$0xff]  }
 0x477   :  { %v11632_v54 = vld [vmem:[#allocation8 + $0x2a4] ss:$16 sps:$4 sm:$0xff]   ;;  %v11633_v3 = vld [vmem:[#allocation8 + $0x80] ss:$16 sps:$4 sm:$0xff]  }
 0x478   :  { %7640 = vmatpush2.bf16.msra.mxu0 %v11048_v34  ;;  %v11638_v63 = vld [vmem:[#allocation8 + $0x284] ss:$16 sps:$4 sm:$0xff]   ;;  %v11636_v45 = vld [vmem:[#allocation8 + $0x280] ss:$16 sps:$4 sm:$0xff]  }
 0x479   :  { %7681 = vmatpush2.bf16.msra.mxu1 %v11176_v10  ;;  %7641 = vmatprep.subr.bf16.mxu0 %v11041_v53  ;;  %v11630_v10 = vld [vmem:[#allocation8 + $0x2a0] ss:$16 sps:$4 sm:$0xff]   ;;  %v11635_v53 = vld [vmem:[#allocation8 + $0x84] ss:$16 sps:$4 sm:$0xff]  }
 0x47a   :  { %7682 = vmatprep.subr.bf16.mxu1 %v11169_v20  ;;  %v11641_v5 = vld [vmem:[#allocation8 + $0x64] ss:$16 sps:$4 sm:$0xff]   ;;  %v11645_v28 = vld [vmem:[#allocation8 + $0x40] ss:$16 sps:$4 sm:$0xff]  }
 0x47b   :  { %v11650_v11 = vld [vmem:[#allocation8 + $0x244] ss:$16 sps:$4 sm:$0xff]   ;;  %v11648_v0 = vld [vmem:[#allocation8 + $0x240] ss:$16 sps:$4 sm:$0xff]  }
 0x47c   :  { %7642 = vmatpush2.bf16.msra.mxu0 %v11040_v47  ;;  %v11644_v47 = vld [vmem:[#allocation8 + $0x264] ss:$16 sps:$4 sm:$0xff]   ;;  %v11660_v1 = vld [vmem:[#allocation8 + $0x200] ss:$16 sps:$4 sm:$0xff]  }
 0x47d   :  { %7683 = vmatpush2.bf16.msra.mxu1 %v11168_v9  ;;  %7643 = vmatprep.subr.bf16.mxu0 %v11033_v39  ;;  %v11639_v9 = vld [vmem:[#allocation8 + $0x60] ss:$16 sps:$4 sm:$0xff]   ;;  %v11653_v7 = vld [vmem:[#allocation8 + $0x24] ss:$16 sps:$4 sm:$0xff]  }
 0x47e   :  { %7684 = vmatprep.subr.bf16.mxu1 %v11161_v6  ;;  %v11642_v39 = vld [vmem:[#allocation8 + $0x260] ss:$16 sps:$4 sm:$0xff]   ;;  %v11647_v6 = vld [vmem:[#allocation8 + $0x44] ss:$16 sps:$4 sm:$0xff]  }
 0x47f   :  { %v11662_v15 = vld [vmem:[#allocation8 + $0x204] ss:$16 sps:$4 sm:$0xff]   ;;  %v11675_v51 = vld [vmem:[#allocation8 + $0x1a0] ss:$16 sps:$4 sm:$0xff]  }
 0x480   :  { %7644 = vmatpush2.bf16.msra.mxu0 %v11032_v56  ;;  %v11656_v56 = vld [vmem:[#allocation8 + $0x224] ss:$16 sps:$4 sm:$0xff]  }
 0x481   :  { %7685 = vmatpush2.bf16.msra.mxu1 %v11160_v14  ;;  %7645 = vmatprep.subr.bf16.mxu0 %v11025_v21  ;;  %v11651_v14 = vld [vmem:[#allocation8 + $0x20] ss:$16 sps:$4 sm:$0xff]   ;;  %v11665_v22 = vld [vmem:[#allocation8 + $0x1e4] ss:$16 sps:$4 sm:$0xff]  }
 0x482   :  { %7686 = vmatprep.subr.bf16.mxu1 %v11153_v31  ;;  %v11654_v21 = vld [vmem:[#allocation8 + $0x220] ss:$16 sps:$4 sm:$0xff]   ;;  %v11659_v31 = vld [vmem:[#allocation8 + $0x4] ss:$16 sps:$4 sm:$0xff]  }
 0x483   :  { %v11671_v25 = vld [vmem:[#allocation8 + $0x1c4] ss:$16 sps:$4 sm:$0xff]  }
 0x484   :  { %7646 = vmatpush2.bf16.msra.mxu0 %v11024_v33  ;;  %v11657_v33 = vld [vmem:[#allocation8] ss:$16 sps:$4 sm:$0xff]   ;;  %v11674_v49 = vld [vmem:[#allocation8 + $0x3c4] ss:$16 sps:$4 sm:$0xff]  }
 0x485   :  { %7687 = vmatpush2.bf16.msra.mxu1 %v11152_v23  ;;  %9287 = vmatprep.subr.bf16.mxu0 %v11617_v17  ;;  %v11668_v23 = vld [vmem:[#allocation8 + $0x3e4] ss:$16 sps:$4 sm:$0xff]   ;;  %v11663_v17 = vld [vmem:[#allocation8 + $0x1e0] ss:$16 sps:$4 sm:$0xff]  }
 0x486   :  { %9328 = vmatprep.subr.bf16.mxu1 %v11620_v24  ;;  %v11666_v24 = vld [vmem:[#allocation8 + $0x3e0] ss:$16 sps:$4 sm:$0xff]   ;;  %v11677_v32 = vld [vmem:[#allocation8 + $0x1a4] ss:$16 sps:$4 sm:$0xff]  }
 0x487   :  { %v7403_v38 = vpop.f32.mrf.mxu0  ;;  %7648 = vmatmul.mubr.bf16.vlgmr.msra.gmra.mxu0 %v12445_v50 }
 0x488   :  { %v7404_v58 = vadd.f32 %v7403_v38, %v1252_v18  ;;  %v7444_v43 = vpop.f32.mrf.mxu1  ;;  %7689 = vmatmul.mubr.bf16.vlgmr.msra.gmra.mxu1 %v12449_v55  ;;  %9288 = vmatpush1.bf16.msra.mxu0 %v11615_v30  ;;  %v11669_v18 = vld [vmem:[#allocation8 + $0x1c0] ss:$16 sps:$4 sm:$0xff]   ;;  %v11686_v38 = vld [vmem:[#allocation8 + $0x384] ss:$16 sps:$4 sm:$0xff]  }
 0x489   :  { %9319 = vmatprep.mubr.bf16.mxu0 %v12584_v41  ;;  %9329 = vmatpush1.bf16.msra.mxu1 %v11618_v35  ;;  %v7405_v42 = vpop.f32.mrf.mxu0  ;;  %v11672_v30 = vld [vmem:[#allocation8 + $0x3c0] ss:$16 sps:$4 sm:$0xff]   ;;  %v11680_v35 = vld [vmem:[#allocation8 + $0x3a4] ss:$16 sps:$4 sm:$0xff]  }
 0x48a   :  { %v12590_v48 = vadd.f32 %v7444_v43, %v7404_v58  ;;  %9360 = vmatprep.mubr.bf16.mxu1 %v12587_v19  ;;  %v7406_v50 = vadd.f32 %v7405_v42, %v1256_v36  ;;  %v7446_v52 = vpop.f32.mrf.mxu1  ;;  %9289 = vmatprep.subr.bf16.mxu0 %v11623_v27  ;;  %v11678_v36 = vld [vmem:[#allocation8 + $0x3a0] ss:$16 sps:$4 sm:$0xff]   ;;  %v11683_v27 = vld [vmem:[#allocation8 + $0x184] ss:$16 sps:$4 sm:$0xff]  }
 0x48b   :  { %v7407_v60 = vpop.f32.mrf.mxu0  ;;  %9330 = vmatprep.subr.bf16.mxu1 %v11626_v12  ;;  %v11681_v12 = vld [vmem:[#allocation8 + $0x180] ss:$16 sps:$4 sm:$0xff]   ;;  %v11689_v43 = vld [vmem:[#allocation8 + $0x164] ss:$16 sps:$4 sm:$0xff]  }
 0x48c   :  { %v12593_v55 = vadd.f32 %v7446_v52, %v7406_v50  ;;  %v7448_v61 = vpop.f32.mrf.mxu1  ;;  %9290 = vmatpush1.bf16.msra.mxu0 %v11621_v44  ;;  %v11684_v58 = vld [vmem:[#allocation8 + $0x380] ss:$16 sps:$4 sm:$0xff]   ;;  %v11692_v44 = vld [vmem:[#allocation8 + $0x364] ss:$16 sps:$4 sm:$0xff]  }
 0x48d   :  { %9331 = vmatpush1.bf16.msra.mxu1 %v11624_v2  ;;  %v7408_v34 = vpop.f32.mrf.mxu0  ;;  %9291 = vmatprep.subr.bf16.mxu0 %v11629_v59  ;;  %v11687_v42 = vld [vmem:[#allocation8 + $0x160] ss:$16 sps:$4 sm:$0xff]   ;;  %v11695_v59 = vld [vmem:[#allocation8 + $0x144] ss:$16 sps:$4 sm:$0xff]  }
 0x48e   :  { %v7449_v20 = vpop.f32.mrf.mxu1  ;;  %9332 = vmatprep.subr.bf16.mxu1 %v11632_v54  ;;  %v11690_v2 = vld [vmem:[#allocation8 + $0x360] ss:$16 sps:$4 sm:$0xff]   ;;  %v11698_v50 = vld [vmem:[#allocation8 + $0x344] ss:$16 sps:$4 sm:$0xff]  }
 0x48f   :  { %v11693_v52 = vld [vmem:[#allocation8 + $0x140] ss:$16 sps:$4 sm:$0xff]   ;;  %v11701_v60 = vld [vmem:[#allocation8 + $0x124] ss:$16 sps:$4 sm:$0xff]  }
 0x490   :  { %9292 = vmatpush1.bf16.msra.mxu0 %v11627_v16  ;;  %v11696_v54 = vld [vmem:[#allocation8 + $0x340] ss:$16 sps:$4 sm:$0xff]   ;;  %v11704_v61 = vld [vmem:[#allocation8 + $0x324] ss:$16 sps:$4 sm:$0xff]  }
 0x491   :  { %9333 = vmatpush1.bf16.msra.mxu1 %v11630_v10  ;;  %9293 = vmatprep.subr.bf16.mxu0 %v11635_v53  ;;  %v11699_v16 = vld [vmem:[#allocation8 + $0x120] ss:$16 sps:$4 sm:$0xff]   ;;  %v11707_v10 = vld [vmem:[#allocation8 + $0x104] ss:$16 sps:$4 sm:$0xff]   ;;  %v7705_v53 = vmul.f32 0.01, %v12484_v4 }
 0x492   :  { %9334 = vmatprep.subr.bf16.mxu1 %v11638_v63  ;;  %v11702_v34 = vld [vmem:[#allocation8 + $0x320] ss:$16 sps:$4 sm:$0xff]   ;;  %v11710_v20 = vld [vmem:[#allocation8 + $0x304] ss:$16 sps:$4 sm:$0xff]   ;;  %v7707_v63 = vmul.f32 0.01, %v12528_v29 }
 0x494   :  { %9294 = vmatpush1.bf16.msra.mxu0 %v11633_v3  ;;  %v7710_v3 = vmul.f32 0.01, %v12573_v40 }
 0x495   :  { %9335 = vmatpush1.bf16.msra.mxu1 %v11636_v45  ;;  %9295 = vmatprep.subr.bf16.mxu0 %v11641_v5  ;;  %v11705_v45 = vld [vmem:[#allocation8 + $0x100] ss:$16 sps:$4 sm:$0xff]  }
 0x496   :  { %9336 = vmatprep.subr.bf16.mxu1 %v11644_v47  ;;  %v11708_v5 = vld [vmem:[#allocation8 + $0x300] ss:$16 sps:$4 sm:$0xff]   ;;  %v11713_v47 = vld [vmem:[#allocation8 + $0x4e4] ss:$16 sps:$4 sm:$0xff]  }
 0x498   :  { %9296 = vmatpush1.bf16.msra.mxu0 %v11639_v9  ;;  %v7713_v9 = vsel %vm7697_vm2, %v12484_v4, %v7705_v53  ;;  %v11737_v53 = vld [vmem:[#allocation8 + $0x5e4] ss:$16 sps:$4 sm:$0xff]  }
 0x499   :  { %9337 = vmatpush1.bf16.msra.mxu1 %v11642_v39  ;;  %9297 = vmatprep.subr.bf16.mxu0 %v11647_v6  ;;  %v11770_v39 = vld [vmem:[#allocation8 + $0x6e4] ss:$16 sps:$4 sm:$0xff]   ;;  %v7715_v6 = vsel %vm7699_vm3, %v12528_v29, %v7707_v63 }
 0x49a   :  { %9338 = vmatprep.subr.bf16.mxu1 %v11650_v11  ;;  %v11711_v11 = vld [vmem:[#allocation8 + $0x4e0] ss:$16 sps:$4 sm:$0xff]   ;;  %v11818_v63 = vld [vmem:[#allocation8 + $0x7e4] ss:$16 sps:$4 sm:$0xff]  }
 0x49c   :  { %9298 = vmatpush1.bf16.msra.mxu0 %v11645_v28  ;;  %v7718_v28 = vsel %vm7702_vm4, %v12573_v40, %v7710_v3  ;;  %v11714_v40 = vld [vmem:[#allocation8 + $0x4c0] ss:$16 sps:$4 sm:$0xff]  }
 0x49d   :  { %9339 = vmatpush1.bf16.msra.mxu1 %v11648_v0  ;;  %9299 = vmatprep.subr.bf16.mxu0 %v11653_v7  ;;  %v12604_v0 = vpack.c.bf16 %v7713_v9, %v7713_v9  ;;  %v11716_v7 = vld [vmem:[#allocation8 + $0x4c4] ss:$16 sps:$4 sm:$0xff]   ;;  %v12609_v4 = vpack.c.bf16 %v7718_v28, %v7718_v28  ;;  %v11735_v3 = vld [vmem:[#allocation8 + $0x5e0] ss:$16 sps:$4 sm:$0xff]  }
 0x49e   :  { %9340 = vmatprep.subr.bf16.mxu1 %v11656_v56  ;;  %v12606_v56 = vpack.c.bf16 %v7715_v6, %v7715_v6  ;;  %v11738_v9 = vld [vmem:[#allocation8 + $0x5c0] ss:$16 sps:$4 sm:$0xff]  }
 0x49f   :  { %v11822_v6 = vld [vmem:[#allocation8 + $0x7c0] ss:$16 sps:$4 sm:$0xff]  }
 0x4a0   :  { %9300 = vmatpush1.bf16.msra.mxu0 %v11651_v14  ;;  %v11768_v14 = vld [vmem:[#allocation8 + $0x6e0] ss:$16 sps:$4 sm:$0xff]  }
 0x4a1   :  { %9341 = vmatpush1.bf16.msra.mxu1 %v11654_v21  ;;  %9301 = vmatprep.subr.bf16.mxu0 %v11659_v31  ;;  %v11776_v31 = vld [vmem:[#allocation8 + $0x6c4] ss:$16 sps:$4 sm:$0xff]   ;;  %v11741_v28 = vld [vmem:[#allocation8 + $0x5a0] ss:$16 sps:$4 sm:$0xff]  }
 0x4a2   :  { %9342 = vmatprep.subr.bf16.mxu1 %v11662_v15 }
 0x4a4   :  { %9302 = vmatpush1.bf16.msra.mxu0 %v11657_v33 }
 0x4a5   :  { %9343 = vmatpush1.bf16.msra.mxu1 %v11660_v1  ;;  %9303 = vmatprep.subr.bf16.mxu0 %v11665_v22  ;;  %v11719_v1 = vld [vmem:[#allocation8 + $0x4a4] ss:$16 sps:$4 sm:$0xff]  }
 0x4a6   :  { %9344 = vmatprep.subr.bf16.mxu1 %v11668_v23 }
 0x4a8   :  { %9304 = vmatpush2.bf16.msra.mxu0 %v11663_v17 }
 0x4a9   :  { %9345 = vmatpush2.bf16.msra.mxu1 %v11666_v24  ;;  %9305 = vmatprep.subr.bf16.mxu0 %v11671_v25  ;;  %v11774_v24 = vld [vmem:[#allocation8 + $0x6c0] ss:$16 sps:$4 sm:$0xff]  }
 0x4aa   :  { %9346 = vmatprep.subr.bf16.mxu1 %v11674_v49 }
 0x4ac   :  { %9306 = vmatpush2.bf16.msra.mxu0 %v11669_v18 }
 0x4ad   :  { %9347 = vmatpush2.bf16.msra.mxu1 %v11672_v30  ;;  %9307 = vmatprep.subr.bf16.mxu0 %v11677_v32  ;;  %v11717_v30 = vld [vmem:[#allocation8 + $0x4a0] ss:$16 sps:$4 sm:$0xff]  }
 0x4ae   :  { %9348 = vmatprep.subr.bf16.mxu1 %v11680_v35  ;;  %v11722_v35 = vld [vmem:[#allocation8 + $0x484] ss:$16 sps:$4 sm:$0xff]  }
 0x4b0   :  { %9308 = vmatpush2.bf16.msra.mxu0 %v11675_v51 }
 0x4b1   :  { %9349 = vmatpush2.bf16.msra.mxu1 %v11678_v36  ;;  %9309 = vmatprep.subr.bf16.mxu0 %v11683_v27  ;;  %v11780_v36 = vld [vmem:[#allocation8 + $0x6a0] ss:$16 sps:$4 sm:$0xff]   ;;  %v11788_v27 = vld [vmem:[#allocation8 + $0x684] ss:$16 sps:$4 sm:$0xff]  }
 0x4b2   :  { %9350 = vmatprep.subr.bf16.mxu1 %v11686_v38  ;;  %v11725_v38 = vld [vmem:[#allocation8 + $0x464] ss:$16 sps:$4 sm:$0xff]  }
 0x4b4   :  { %9310 = vmatpush2.bf16.msra.mxu0 %v11681_v12  ;;  %v11786_v12 = vld [vmem:[#allocation8 + $0x680] ss:$16 sps:$4 sm:$0xff]  }
 0x4b5   :  { %9351 = vmatpush2.bf16.msra.mxu1 %v11684_v58  ;;  %9311 = vmatprep.subr.bf16.mxu0 %v11689_v43  ;;  %v11794_v58 = vld [vmem:[#allocation8 + $0x664] ss:$16 sps:$4 sm:$0xff]   ;;  %v11723_v43 = vld [vmem:[#allocation8 + $0x460] ss:$16 sps:$4 sm:$0xff]  }
 0x4b6   :  { %9352 = vmatprep.subr.bf16.mxu1 %v11692_v44  ;;  %v11728_v44 = vld [vmem:[#allocation8 + $0x444] ss:$16 sps:$4 sm:$0xff]  }
 0x4b8   :  { %9312 = vmatpush2.bf16.msra.mxu0 %v11687_v42  ;;  %v11792_v42 = vld [vmem:[#allocation8 + $0x660] ss:$16 sps:$4 sm:$0xff]  }
 0x4b9   :  { %9353 = vmatpush2.bf16.msra.mxu1 %v11690_v2  ;;  %9313 = vmatprep.subr.bf16.mxu0 %v11695_v59  ;;  %v11800_v2 = vld [vmem:[#allocation8 + $0x644] ss:$16 sps:$4 sm:$0xff]   ;;  %v11726_v59 = vld [vmem:[#allocation8 + $0x440] ss:$16 sps:$4 sm:$0xff]  }
 0x4ba   :  { %9354 = vmatprep.subr.bf16.mxu1 %v11698_v50  ;;  %v11731_v50 = vld [vmem:[#allocation8 + $0x424] ss:$16 sps:$4 sm:$0xff]  }
 0x4bc   :  { %9314 = vmatpush2.bf16.msra.mxu0 %v11693_v52  ;;  %v11798_v52 = vld [vmem:[#allocation8 + $0x640] ss:$16 sps:$4 sm:$0xff]  }
 0x4bd   :  { %9355 = vmatpush2.bf16.msra.mxu1 %v11696_v54  ;;  %9315 = vmatprep.subr.bf16.mxu0 %v11701_v60  ;;  %v11806_v54 = vld [vmem:[#allocation8 + $0x624] ss:$16 sps:$4 sm:$0xff]   ;;  %v11729_v60 = vld [vmem:[#allocation8 + $0x420] ss:$16 sps:$4 sm:$0xff]  }
 0x4be   :  { %9356 = vmatprep.subr.bf16.mxu1 %v11704_v61  ;;  %v11734_v61 = vld [vmem:[#allocation8 + $0x404] ss:$16 sps:$4 sm:$0xff]  }
 0x4c0   :  { %9316 = vmatpush2.bf16.msra.mxu0 %v11699_v16  ;;  %v11804_v16 = vld [vmem:[#allocation8 + $0x620] ss:$16 sps:$4 sm:$0xff]  }
 0x4c1   :  { %9357 = vmatpush2.bf16.msra.mxu1 %v11702_v34  ;;  %9317 = vmatprep.subr.bf16.mxu0 %v11707_v10  ;;  %v11812_v34 = vld [vmem:[#allocation8 + $0x604] ss:$16 sps:$4 sm:$0xff]   ;;  %v11732_v10 = vld [vmem:[#allocation8 + $0x400] ss:$16 sps:$4 sm:$0xff]  }
 0x4c2   :  { %9358 = vmatprep.subr.bf16.mxu1 %v11710_v20  ;;  %v11810_v20 = vld [vmem:[#allocation8 + $0x600] ss:$16 sps:$4 sm:$0xff]  }
 0x4c4   :  { %9318 = vmatpush2.bf16.msra.mxu0 %v11705_v45  ;;  %v11740_v45 = vld [vmem:[#allocation8 + $0x5c4] ss:$16 sps:$4 sm:$0xff]  }
 0x4c5   :  { %9359 = vmatpush2.bf16.msra.mxu1 %v11708_v5  ;;  %9369 = vmatprep.subr.bf16.mxu0 %v11713_v47  ;;  %v11816_v5 = vld [vmem:[#allocation8 + $0x7e0] ss:$16 sps:$4 sm:$0xff]   ;;  %v11824_v47 = vld [vmem:[#allocation8 + $0x7c4] ss:$16 sps:$4 sm:$0xff]  }
 0x4c6   :  { %9410 = vmatprep.subr.bf16.mxu1 %v11770_v39  ;;  %v11743_v39 = vld [vmem:[#allocation8 + $0x5a4] ss:$16 sps:$4 sm:$0xff]  }
 0x4c7   :  { %v7485_v21 = vpop.f32.mrf.mxu0  ;;  %9320 = vmatmul.mubr.bf16.vlgmr.msra.gmra.mxu0 %v12604_v0 }
 0x4c8   :  { %v7486_v29 = vadd.f32 %v7485_v21, %v12590_v48  ;;  %v7526_v15 = vpop.f32.mrf.mxu1  ;;  %9361 = vmatmul.mubr.bf16.vlgmr.msra.gmra.mxu1 %v12606_v56  ;;  %9370 = vmatpush1.bf16.msra.mxu0 %v11711_v11  ;;  %v11782_v48 = vld [vmem:[#allocation8 + $0x6a4] ss:$16 sps:$4 sm:$0xff]  }
 0x4c9   :  { %9401 = vmatprep.mubr.bf16.mxu0 %v12609_v4  ;;  %v7487_v33 = vpop.f32.mrf.mxu0  ;;  %9371 = vmatprep.subr.bf16.mxu0 %v11716_v7  ;;  %v11830_v11 = vld [vmem:[#allocation8 + $0x7a4] ss:$16 sps:$4 sm:$0xff]  }
 0x4ca   :  { %v12614_v22 = vadd.f32 %v7526_v15, %v7486_v29  ;;  %v7488_v23 = vadd.f32 %v7487_v33, %v12593_v55  ;;  %v7528_v17 = vpop.f32.mrf.mxu1  ;;  %9411 = vmatpush1.bf16.msra.mxu1 %v11768_v14  ;;  %v11720_v55 = vld [vmem:[#allocation8 + $0x480] ss:$16 sps:$4 sm:$0xff]   ;;  %v11746_v7 = vld [vmem:[#allocation8 + $0x584] ss:$16 sps:$4 sm:$0xff]  }
 0x4cb   :  { %v7489_v25 = vpop.f32.mrf.mxu0  ;;  %9412 = vmatprep.subr.bf16.mxu1 %v11776_v31  ;;  %v11828_v14 = vld [vmem:[#allocation8 + $0x7a0] ss:$16 sps:$4 sm:$0xff]   ;;  %v11836_v21 = vld [vmem:[#allocation8 + $0x784] ss:$16 sps:$4 sm:$0xff]  }
 0x4cc   :  { %v12617_v49 = vadd.f32 %v7528_v17, %v7488_v23  ;;  %v7530_v18 = vpop.f32.mrf.mxu1  ;;  %9372 = vmatpush1.bf16.msra.mxu0 %v11714_v40  ;;  %v11744_v31 = vld [vmem:[#allocation8 + $0x580] ss:$16 sps:$4 sm:$0xff]   ;;  %v11749_v29 = vld [vmem:[#allocation8 + $0x564] ss:$16 sps:$4 sm:$0xff]  }
 0x4cd   :  { %v7490_v32 = vpop.f32.mrf.mxu0  ;;  %9373 = vmatprep.subr.bf16.mxu0 %v11719_v1  ;;  %v11834_v15 = vld [vmem:[#allocation8 + $0x780] ss:$16 sps:$4 sm:$0xff]   ;;  %v11842_v40 = vld [vmem:[#allocation8 + $0x764] ss:$16 sps:$4 sm:$0xff]  }
 0x4ce   :  { %v7531_v51 = vpop.f32.mrf.mxu1  ;;  %9413 = vmatpush1.bf16.msra.mxu1 %v11774_v24  ;;  %v11747_v33 = vld [vmem:[#allocation8 + $0x560] ss:$16 sps:$4 sm:$0xff]   ;;  %v11752_v1 = vld [vmem:[#allocation8 + $0x544] ss:$16 sps:$4 sm:$0xff]  }
 0x4cf   :  { %9414 = vmatprep.subr.bf16.mxu1 %v11782_v48  ;;  %v11840_v23 = vld [vmem:[#allocation8 + $0x760] ss:$16 sps:$4 sm:$0xff]   ;;  %v11848_v17 = vld [vmem:[#allocation8 + $0x744] ss:$16 sps:$4 sm:$0xff]  }
 0x4d0   :  { %9374 = vmatpush1.bf16.msra.mxu0 %v11717_v30  ;;  %v11750_v24 = vld [vmem:[#allocation8 + $0x540] ss:$16 sps:$4 sm:$0xff]   ;;  %v11755_v25 = vld [vmem:[#allocation8 + $0x524] ss:$16 sps:$4 sm:$0xff]  }
 0x4d1   :  { %9375 = vmatprep.subr.bf16.mxu0 %v11722_v35  ;;  %v11846_v48 = vld [vmem:[#allocation8 + $0x740] ss:$16 sps:$4 sm:$0xff]   ;;  %v11854_v18 = vld [vmem:[#allocation8 + $0x724] ss:$16 sps:$4 sm:$0xff]   ;;  %v7709_v35 = vmul.f32 0.01, %v12568_v8 }
 0x4d2   :  { %9415 = vmatpush1.bf16.msra.mxu1 %v11780_v36  ;;  %v11753_v30 = vld [vmem:[#allocation8 + $0x520] ss:$16 sps:$4 sm:$0xff]   ;;  %v11758_v32 = vld [vmem:[#allocation8 + $0x504] ss:$16 sps:$4 sm:$0xff]  }
 0x4d3   :  { %9416 = vmatprep.subr.bf16.mxu1 %v11788_v27  ;;  %v11852_v51 = vld [vmem:[#allocation8 + $0x720] ss:$16 sps:$4 sm:$0xff]   ;;  %v11860_v36 = vld [vmem:[#allocation8 + $0x704] ss:$16 sps:$4 sm:$0xff]  }
 0x4d4   :  { %9376 = vmatpush1.bf16.msra.mxu0 %v11720_v55  ;;  %v11756_v27 = vld [vmem:[#allocation8 + $0x500] ss:$16 sps:$4 sm:$0xff]   ;;  %v11761_v55 = vld [vmem:[#allocation8 + $0xec] ss:$16 sps:$4 sm:$0xff]  }
 0x4d5   :  { %9377 = vmatprep.subr.bf16.mxu0 %v11725_v38  ;;  %v7717_v38 = vsel %vm7701_vm5, %v12568_v8, %v7709_v35  ;;  %v11762_v8 = vld [vmem:[#allocation8 + $0xc8] ss:$16 sps:$4 sm:$0xff]   ;;  %v11857_v35 = vld [vmem:[#allocation8 + $0x4cc] ss:$16 sps:$4 sm:$0xff]  }
 0x4d6   :  { %9417 = vmatpush1.bf16.msra.mxu1 %v11786_v12  ;;  %v11858_v12 = vld [vmem:[#allocation8 + $0x700] ss:$16 sps:$4 sm:$0xff]  }
 0x4d7   :  { %9418 = vmatprep.subr.bf16.mxu1 %v11794_v58  ;;  %v11866_v58 = vld [vmem:[#allocation8 + $0x2ec] ss:$16 sps:$4 sm:$0xff]  }
 0x4d8   :  { %9378 = vmatpush1.bf16.msra.mxu0 %v11723_v43  ;;  %v11759_v43 = vld [vmem:[#allocation8 + $0xe8] ss:$16 sps:$4 sm:$0xff]  }
 0x4d9   :  { %9379 = vmatprep.subr.bf16.mxu0 %v11728_v44  ;;  %v12622_v44 = vpack.c.bf16 %v7717_v38, %v7717_v38  ;;  %v11855_v38 = vld [vmem:[#allocation8 + $0x4c8] ss:$16 sps:$4 sm:$0xff]  }
 0x4da   :  { %9419 = vmatpush1.bf16.msra.mxu1 %v11792_v42  ;;  %v11764_v42 = vld [vmem:[#allocation8 + $0xcc] ss:$16 sps:$4 sm:$0xff]  }
 0x4db   :  { %9420 = vmatprep.subr.bf16.mxu1 %v11800_v2 }
 0x4dc   :  { %9380 = vmatpush1.bf16.msra.mxu0 %v11726_v59 }
 0x4dd   :  { %9381 = vmatprep.subr.bf16.mxu0 %v11731_v50 }
 0x4de   :  { %9421 = vmatpush1.bf16.msra.mxu1 %v11798_v52 }
 0x4df   :  { %9422 = vmatprep.subr.bf16.mxu1 %v11806_v54  ;;  %v11767_v54 = vld [vmem:[#allocation8 + $0xac] ss:$16 sps:$4 sm:$0xff]  }
 0x4e0   :  { %9382 = vmatpush1.bf16.msra.mxu0 %v11729_v60 }
 0x4e1   :  { %9383 = vmatprep.subr.bf16.mxu0 %v11734_v61 }
 0x4e2   :  { %9423 = vmatpush1.bf16.msra.mxu1 %v11804_v16 }
 0x4e3   :  { %9424 = vmatprep.subr.bf16.mxu1 %v11812_v34 }
 0x4e4   :  { %9384 = vmatpush1.bf16.msra.mxu0 %v11732_v10  ;;  %v11765_v10 = vld [vmem:[#allocation8 + $0xa8] ss:$16 sps:$4 sm:$0xff]  }
 0x4e5   :  { %9385 = vmatprep.subr.bf16.mxu0 %v11737_v53 }
 0x4e6   :  { %9425 = vmatpush1.bf16.msra.mxu1 %v11810_v20 }
 0x4e7   :  { %9426 = vmatprep.subr.bf16.mxu1 %v11818_v63  ;;  %v11771_v63 = vld [vmem:[#allocation8 + $0x88] ss:$16 sps:$4 sm:$0xff]  }
 0x4e8   :  { %9386 = vmatpush2.bf16.msra.mxu0 %v11735_v3  ;;  %v11777_v3 = vld [vmem:[#allocation8 + $0x68] ss:$16 sps:$4 sm:$0xff]  }
 0x4e9   :  { %9387 = vmatprep.subr.bf16.mxu0 %v11740_v45  ;;  %v11785_v45 = vld [vmem:[#allocation8 + $0x4c] ss:$16 sps:$4 sm:$0xff]  }
 0x4ea   :  { %9427 = vmatpush2.bf16.msra.mxu1 %v11816_v5  ;;  %v11783_v5 = vld [vmem:[#allocation8 + $0x48] ss:$16 sps:$4 sm:$0xff]  }
 0x4eb   :  { %9428 = vmatprep.subr.bf16.mxu1 %v11824_v47  ;;  %v11791_v47 = vld [vmem:[#allocation8 + $0x2c] ss:$16 sps:$4 sm:$0xff]  }
 0x4ec   :  { %9388 = vmatpush2.bf16.msra.mxu0 %v11738_v9  ;;  %v11789_v9 = vld [vmem:[#allocation8 + $0x28] ss:$16 sps:$4 sm:$0xff]  }
 0x4ed   :  { %9389 = vmatprep.subr.bf16.mxu0 %v11743_v39  ;;  %v11797_v39 = vld [vmem:[#allocation8 + $0xc] ss:$16 sps:$4 sm:$0xff]  }
 0x4ee   :  { %9429 = vmatpush2.bf16.msra.mxu1 %v11822_v6  ;;  %v11795_v6 = vld [vmem:[#allocation8 + $0x8] ss:$16 sps:$4 sm:$0xff]  }
 0x4ef   :  { %9430 = vmatprep.subr.bf16.mxu1 %v11830_v11  ;;  %v11803_v11 = vld [vmem:[#allocation8 + $0x1ec] ss:$16 sps:$4 sm:$0xff]  }
 0x4f0   :  { %9390 = vmatpush2.bf16.msra.mxu0 %v11741_v28  ;;  %v11801_v28 = vld [vmem:[#allocation8 + $0x1e8] ss:$16 sps:$4 sm:$0xff]  }
 0x4f1   :  { %9391 = vmatprep.subr.bf16.mxu0 %v11746_v7  ;;  %v11809_v7 = vld [vmem:[#allocation8 + $0x1cc] ss:$16 sps:$4 sm:$0xff]  }
 0x4f2   :  { %9431 = vmatpush2.bf16.msra.mxu1 %v11828_v14  ;;  %v11807_v14 = vld [vmem:[#allocation8 + $0x1c8] ss:$16 sps:$4 sm:$0xff]  }
 0x4f3   :  { %9432 = vmatprep.subr.bf16.mxu1 %v11836_v21  ;;  %v11815_v21 = vld [vmem:[#allocation8 + $0x1ac] ss:$16 sps:$4 sm:$0xff]  }
 0x4f4   :  { %9392 = vmatpush2.bf16.msra.mxu0 %v11744_v31  ;;  %v11813_v31 = vld [vmem:[#allocation8 + $0x1a8] ss:$16 sps:$4 sm:$0xff]  }
 0x4f5   :  { %9393 = vmatprep.subr.bf16.mxu0 %v11749_v29  ;;  %v11821_v29 = vld [vmem:[#allocation8 + $0x18c] ss:$16 sps:$4 sm:$0xff]  }
 0x4f6   :  { %9433 = vmatpush2.bf16.msra.mxu1 %v11834_v15  ;;  %v11819_v15 = vld [vmem:[#allocation8 + $0x188] ss:$16 sps:$4 sm:$0xff]  }
 0x4f7   :  { %9434 = vmatprep.subr.bf16.mxu1 %v11842_v40  ;;  %v11827_v40 = vld [vmem:[#allocation8 + $0x16c] ss:$16 sps:$4 sm:$0xff]  }
 0x4f8   :  { %9394 = vmatpush2.bf16.msra.mxu0 %v11747_v33  ;;  %v11825_v33 = vld [vmem:[#allocation8 + $0x168] ss:$16 sps:$4 sm:$0xff]  }
 0x4f9   :  { %9395 = vmatprep.subr.bf16.mxu0 %v11752_v1  ;;  %v11833_v1 = vld [vmem:[#allocation8 + $0x14c] ss:$16 sps:$4 sm:$0xff]  }
 0x4fa   :  { %9435 = vmatpush2.bf16.msra.mxu1 %v11840_v23  ;;  %v11831_v23 = vld [vmem:[#allocation8 + $0x148] ss:$16 sps:$4 sm:$0xff]  }
 0x4fb   :  { %9436 = vmatprep.subr.bf16.mxu1 %v11848_v17  ;;  %v11839_v17 = vld [vmem:[#allocation8 + $0x12c] ss:$16 sps:$4 sm:$0xff]  }
 0x4fc   :  { %9396 = vmatpush2.bf16.msra.mxu0 %v11750_v24  ;;  %v11837_v24 = vld [vmem:[#allocation8 + $0x128] ss:$16 sps:$4 sm:$0xff]  }
 0x4fd   :  { %9397 = vmatprep.subr.bf16.mxu0 %v11755_v25  ;;  %v11845_v25 = vld [vmem:[#allocation8 + $0x10c] ss:$16 sps:$4 sm:$0xff]  }
 0x4fe   :  { %9437 = vmatpush2.bf16.msra.mxu1 %v11846_v48  ;;  %v11843_v48 = vld [vmem:[#allocation8 + $0x108] ss:$16 sps:$4 sm:$0xff]  }
 0x4ff   :  { %9438 = vmatprep.subr.bf16.mxu1 %v11854_v18  ;;  %v11851_v18 = vld [vmem:[#allocation8 + $0x4ec] ss:$16 sps:$4 sm:$0xff]  }
 0x500   :  { %9398 = vmatpush2.bf16.msra.mxu0 %v11753_v30 }
 0x501   :  { %9399 = vmatprep.subr.bf16.mxu0 %v11758_v32  ;;  %v11849_v32 = vld [vmem:[#allocation8 + $0x4e8] ss:$16 sps:$4 sm:$0xff]  }
 0x502   :  { %9439 = vmatpush2.bf16.msra.mxu1 %v11852_v51 }
 0x503   :  { %9440 = vmatprep.subr.bf16.mxu1 %v11860_v36 }
 0x504   :  { %9400 = vmatpush2.bf16.msra.mxu0 %v11756_v27 }
 0x505   :  { %9451 = vmatprep.subr.bf16.mxu0 %v11761_v55 }
 0x506   :  { %9441 = vmatpush2.bf16.msra.mxu1 %v11858_v12 }
 0x507   :  { %v7567_v2 = vpop.f32.mrf.mxu0  ;;  %9402 = vmatmul.mubr.bf16.vlgmr.msra.gmra.mxu0 %v12622_v44  ;;  %9492 = vmatprep.subr.bf16.mxu1 %v11866_v58  ;;  %v11863_v58 = vld [vmem:[#allocation8 + $0x4ac] ss:$16 sps:$4 sm:$0xff]  }
 0x508   :  { %v7568_v59 = vadd.f32 %v7567_v2, %v12614_v22  ;;  %v7608_v50 = vpop.f32.mrf.mxu1  ;;  %9452 = vmatpush1.bf16.msra.mxu0 %v11759_v43  ;;  %9483 = vmatprep.mubr.bf16.mxu0 %v12584_v41  ;;  %v11773_v22 = vld [vmem:[#allocation8 + $0x8c] ss:$16 sps:$4 sm:$0xff]  }
 0x509   :  { %v12627_v52 = vpop.f32.mrf.mxu0  ;;  %9453 = vmatprep.subr.bf16.mxu0 %v11764_v42  ;;  %v11779_v41 = vld [vmem:[#allocation8 + $0x6c] ss:$16 sps:$4 sm:$0xff]  }
 0x50a   :  { %v12629_v60 = vadd.f32 %v7608_v50, %v7568_v59  ;;  %v12631_v61 = vpop.f32.mrf.mxu1  ;;  %v7570_v30 = vadd.f32 %v12627_v52, %v12617_v49 }
 0x50b   :  { %v7571_v16 = vpop.f32.mrf.mxu0 }
 0x50c   :  { %v7612_v34 = vpop.f32.mrf.mxu1  ;;  %9454 = vmatpush1.bf16.msra.mxu0 %v11762_v8  ;;  %v7611_v36 = vadd.f32 %v12631_v61, %v7570_v30  ;;  %v11861_v8 = vld [vmem:[#allocation8 + $0x4a8] ss:$16 sps:$4 sm:$0xff]   ;;  %v11917_v30 = vld [vmem:[#allocation8 + $0x58c] ss:$16 sps:$4 sm:$0xff]  }
 0x50d   :  { %v7572_v53 = vpop.f32.mrf.mxu0  ;;  %9455 = vmatprep.subr.bf16.mxu0 %v11767_v54  ;;  %v11869_v54 = vld [vmem:[#allocation8 + $0x48c] ss:$16 sps:$4 sm:$0xff]   ;;  %v11867_v34 = vld [vmem:[#allocation8 + $0x488] ss:$16 sps:$4 sm:$0xff]  }
 0x50e   :  { %v7613_v20 = vpop.f32.mrf.mxu1  ;;  %v11864_v53 = vld [vmem:[#allocation8 + $0x2e8] ss:$16 sps:$4 sm:$0xff]  }
 0x50f   :  { %v11872_v20 = vld [vmem:[#allocation8 + $0x2cc] ss:$16 sps:$4 sm:$0xff]  }
 0x510   :  { %9456 = vmatpush1.bf16.msra.mxu0 %v11765_v10 }
 0x511   :  { %9457 = vmatprep.subr.bf16.mxu0 %v11773_v22 }
 0x514   :  { %9458 = vmatpush1.bf16.msra.mxu0 %v11771_v63  ;;  %v11875_v63 = vld [vmem:[#allocation8 + $0x46c] ss:$16 sps:$4 sm:$0xff]  }
 0x515   :  { %9459 = vmatprep.subr.bf16.mxu0 %v11779_v41  ;;  %v11873_v41 = vld [vmem:[#allocation8 + $0x468] ss:$16 sps:$4 sm:$0xff]  }
 0x518   :  { %9460 = vmatpush1.bf16.msra.mxu0 %v11777_v3  ;;  %v11870_v3 = vld [vmem:[#allocation8 + $0x2c8] ss:$16 sps:$4 sm:$0xff]  }
 0x519   :  { %9461 = vmatprep.subr.bf16.mxu0 %v11785_v45  ;;  %v11881_v45 = vld [vmem:[#allocation8 + $0x44c] ss:$16 sps:$4 sm:$0xff]  }
 0x51c   :  { %9462 = vmatpush1.bf16.msra.mxu0 %v11783_v5  ;;  %v11878_v5 = vld [vmem:[#allocation8 + $0x2ac] ss:$16 sps:$4 sm:$0xff]  }
 0x51d   :  { %9463 = vmatprep.subr.bf16.mxu0 %v11791_v47  ;;  %v11879_v47 = vld [vmem:[#allocation8 + $0x448] ss:$16 sps:$4 sm:$0xff]  }
 0x520   :  { %9464 = vmatpush1.bf16.msra.mxu0 %v11789_v9  ;;  %v11876_v9 = vld [vmem:[#allocation8 + $0x2a8] ss:$16 sps:$4 sm:$0xff]  }
 0x521   :  { %9465 = vmatprep.subr.bf16.mxu0 %v11797_v39  ;;  %v11887_v39 = vld [vmem:[#allocation8 + $0x42c] ss:$16 sps:$4 sm:$0xff]  }
 0x524   :  { %9466 = vmatpush1.bf16.msra.mxu0 %v11795_v6  ;;  %v11884_v6 = vld [vmem:[#allocation8 + $0x28c] ss:$16 sps:$4 sm:$0xff]  }
 0x525   :  { %9467 = vmatprep.subr.bf16.mxu0 %v11803_v11  ;;  %v11885_v11 = vld [vmem:[#allocation8 + $0x428] ss:$16 sps:$4 sm:$0xff]  }
 0x528   :  { %9468 = vmatpush2.bf16.msra.mxu0 %v11801_v28  ;;  %v11882_v28 = vld [vmem:[#allocation8 + $0x288] ss:$16 sps:$4 sm:$0xff]  }
 0x529   :  { %9469 = vmatprep.subr.bf16.mxu0 %v11809_v7  ;;  %v11893_v7 = vld [vmem:[#allocation8 + $0x40c] ss:$16 sps:$4 sm:$0xff]  }
 0x52c   :  { %9470 = vmatpush2.bf16.msra.mxu0 %v11807_v14  ;;  %v11891_v14 = vld [vmem:[#allocation8 + $0x408] ss:$16 sps:$4 sm:$0xff]  }
 0x52d   :  { %9471 = vmatprep.subr.bf16.mxu0 %v11815_v21  ;;  %v11888_v21 = vld [vmem:[#allocation8 + $0x268] ss:$16 sps:$4 sm:$0xff]  }
 0x530   :  { %9472 = vmatpush2.bf16.msra.mxu0 %v11813_v31  ;;  %v11899_v31 = vld [vmem:[#allocation8 + $0x5ec] ss:$16 sps:$4 sm:$0xff]  }
 0x531   :  { %9473 = vmatprep.subr.bf16.mxu0 %v11821_v29  ;;  %v11896_v29 = vld [vmem:[#allocation8 + $0x24c] ss:$16 sps:$4 sm:$0xff]  }
 0x534   :  { %9474 = vmatpush2.bf16.msra.mxu0 %v11819_v15  ;;  %v11897_v15 = vld [vmem:[#allocation8 + $0x5e8] ss:$16 sps:$4 sm:$0xff]  }
 0x535   :  { %9475 = vmatprep.subr.bf16.mxu0 %v11827_v40  ;;  %v11894_v40 = vld [vmem:[#allocation8 + $0x248] ss:$16 sps:$4 sm:$0xff]  }
 0x538   :  { %9476 = vmatpush2.bf16.msra.mxu0 %v11825_v33  ;;  %v11905_v33 = vld [vmem:[#allocation8 + $0x5cc] ss:$16 sps:$4 sm:$0xff]  }
 0x539   :  { %9477 = vmatprep.subr.bf16.mxu0 %v11833_v1  ;;  %v11902_v1 = vld [vmem:[#allocation8 + $0x22c] ss:$16 sps:$4 sm:$0xff]  }
 0x53c   :  { %9478 = vmatpush2.bf16.msra.mxu0 %v11831_v23  ;;  %v11903_v23 = vld [vmem:[#allocation8 + $0x5c8] ss:$16 sps:$4 sm:$0xff]  }
 0x53d   :  { %9479 = vmatprep.subr.bf16.mxu0 %v11839_v17  ;;  %v11900_v17 = vld [vmem:[#allocation8 + $0x228] ss:$16 sps:$4 sm:$0xff]  }
 0x540   :  { %9480 = vmatpush2.bf16.msra.mxu0 %v11837_v24  ;;  %v11911_v24 = vld [vmem:[#allocation8 + $0x5ac] ss:$16 sps:$4 sm:$0xff]  }
 0x541   :  { %9481 = vmatprep.subr.bf16.mxu0 %v11845_v25  ;;  %v11908_v25 = vld [vmem:[#allocation8 + $0x20c] ss:$16 sps:$4 sm:$0xff]  }
 0x544   :  { %9482 = vmatpush2.bf16.msra.mxu0 %v11843_v48  ;;  %v11909_v48 = vld [vmem:[#allocation8 + $0x5a8] ss:$16 sps:$4 sm:$0xff]  }
 0x545   :  { %9533 = vmatprep.subr.bf16.mxu0 %v11851_v18  ;;  %v11906_v18 = vld [vmem:[#allocation8 + $0x208] ss:$16 sps:$4 sm:$0xff]  }
 0x547   :  { %v7649_v51 = vpop.f32.mrf.mxu0  ;;  %9484 = vmatmul.mubr.bf16.vlgmr.msra.gmra.mxu0 %v12604_v0 }
 0x548   :  { %v7650_v27 = vadd.f32 %v7649_v51, %v12629_v60  ;;  %v7690_v55 = vpop.f32.mrf.mxu1  ;;  %9534 = vmatpush1.bf16.msra.mxu0 %v11849_v32  ;;  %9565 = vmatprep.mubr.bf16.mxu0 %v12609_v4  ;;  %v11914_v32 = vld [vmem:[#allocation8 + $0x3ec] ss:$16 sps:$4 sm:$0xff]   ;;  %v11912_v51 = vld [vmem:[#allocation8 + $0x3e8] ss:$16 sps:$4 sm:$0xff]  }
 0x549   :  { %v7651_v12 = vpop.f32.mrf.mxu0  ;;  %9535 = vmatprep.subr.bf16.mxu0 %v11857_v35  ;;  %v11915_v35 = vld [vmem:[#allocation8 + $0x588] ss:$16 sps:$4 sm:$0xff]  }
 0x54a   :  { %v7691_v49 = vadd.f32 %v7690_v55, %v7650_v27  ;;  %v7652_v43 = vadd.f32 %v7651_v12, %v7611_v36  ;;  %v7692_v42 = vpop.f32.mrf.mxu1  ;;  %v11923_v36 = vld [vmem:[#allocation8 + $0x56c] ss:$16 sps:$4 sm:$0xff]   ;;  %v11921_v55 = vld [vmem:[#allocation8 + $0x568] ss:$16 sps:$4 sm:$0xff]  }
 0x54b   :  { %v7653_v2 = vpop.f32.mrf.mxu0  ;;  %v11920_v27 = vld [vmem:[#allocation8 + $0x3cc] ss:$16 sps:$4 sm:$0xff]  }
 0x54c   :  { %vm7703_vm6 = vcmp.gt.f32.partialorder %v7691_v49, 0.0  ;;  %v7711_v59 = vmul.f32 0.01, %v7691_v49  ;;  %v7693_v50 = vadd.f32 %v7692_v42, %v7652_v43  ;;  %v7694_v0 = vpop.f32.mrf.mxu1  ;;  %9536 = vmatpush1.bf16.msra.mxu0 %v11855_v38  ;;  %v11918_v38 = vld [vmem:[#allocation8 + $0x3c8] ss:$16 sps:$4 sm:$0xff]  }
 0x54d   :  { %v7654_v52 = vpop.f32.mrf.mxu0  ;;  %9537 = vmatprep.subr.bf16.mxu0 %v11863_v58  ;;  %v11929_v12 = vld [vmem:[#allocation8 + $0x54c] ss:$16 sps:$4 sm:$0xff]   ;;  %v11924_v43 = vld [vmem:[#allocation8 + $0x3a8] ss:$16 sps:$4 sm:$0xff]  }
 0x54e   :  { %vm7704_vm7 = vcmp.gt.f32.partialorder %v7693_v50, 0.0  ;;  %v7712_v60 = vmul.f32 0.01, %v7693_v50  ;;  %v7695_v4 = vpop.f32.mrf.mxu1  ;;  %v7719_v61 = vsel %vm7703_vm6, %v7691_v49, %v7711_v59  ;;  %v11926_v58 = vld [vmem:[#allocation8 + $0x3ac] ss:$16 sps:$4 sm:$0xff]  }
 0x54f   :  { %v12641_v22 = vpack.c.bf16 %v7719_v61, %v7719_v61  ;;  %v11927_v49 = vld [vmem:[#allocation8 + $0x548] ss:$16 sps:$4 sm:$0xff]   ;;  %v11935_v42 = vld [vmem:[#allocation8 + $0x52c] ss:$16 sps:$4 sm:$0xff]  }
 0x550   :  { %9538 = vmatpush1.bf16.msra.mxu0 %v11861_v8  ;;  %v7720_v16 = vsel %vm7704_vm7, %v7693_v50, %v7712_v60  ;;  %v11932_v2 = vld [vmem:[#allocation8 + $0x38c] ss:$16 sps:$4 sm:$0xff]   ;;  %v11933_v59 = vld [vmem:[#allocation8 + $0x528] ss:$16 sps:$4 sm:$0xff]   ;;  %v12646_v60 = vld [vmem:[#allocation10] sm:$0xf] }
 0x551   :  { %v12639_v10 = vpack.c.bf16 %v7720_v16, %v7720_v16  ;;  %9539 = vmatprep.subr.bf16.mxu0 %v11869_v54  ;;  %v11930_v50 = vld [vmem:[#allocation8 + $0x388] ss:$16 sps:$4 sm:$0xff]   ;;  %v11941_v0 = vld [vmem:[#allocation8 + $0x50c] ss:$16 sps:$4 sm:$0xff]   ;;  %v7990_v16 = vrot.slane %v12646_v60, %v1227_v37 }
 0x552   :  { %v11938_v8 = vld [vmem:[#allocation8 + $0x36c] ss:$16 sps:$4 sm:$0xff]   ;;  %v11939_v52 = vld [vmem:[#allocation8 + $0x508] ss:$16 sps:$4 sm:$0xff]  }
 0x553   :  { %9442 = vmatprep.mubr.bf16.mxu1 %v12639_v10  ;;  %v11936_v54 = vld [vmem:[#allocation8 + $0x368] ss:$16 sps:$4 sm:$0xff]   ;;  %v11999_v4 = vld [vmem:[#allocation11 + $0x78] sm:$0xff]  }
 0x554   :  { %9443 = vmatmul.mubr.bf16.vlgmr.msra.gmra.mxu1 %v12641_v22  ;;  %9540 = vmatpush1.bf16.msra.mxu0 %v11867_v34  ;;  %v11944_v61 = vld [vmem:[#allocation8 + $0x34c] ss:$16 sps:$4 sm:$0xff]  }
 0x555   :  { %9493 = vmatpush1.bf16.msra.mxu1 %v11864_v53  ;;  %9524 = vmatprep.mubr.bf16.mxu1 %v12587_v19  ;;  %v11890_v19 = vld [vmem:[#allocation8 + $0x26c] ss:$16 sps:$4 sm:$0xff]   ;;  %v11942_v53 = vld [vmem:[#allocation8 + $0x348] ss:$16 sps:$4 sm:$0xff]  }
 0x556   :  { %9494 = vmatprep.subr.bf16.mxu1 %v11872_v20  ;;  %9541 = vmatprep.subr.bf16.mxu0 %v11875_v63  ;;  %v12000_v34 = vld [vmem:[#allocation11 + $0x38] sm:$0xff]   ;;  %v12001_v20 = vld [vmem:[#allocation11 + $0x70] sm:$0xff]   ;;  %v7994_v63 = vrot.slane %v12646_v60, %v1231_v46 }
 0x558   :  { %9542 = vmatpush1.bf16.msra.mxu0 %v11873_v41  ;;  %v11947_v41 = vld [vmem:[#allocation8 + $0x32c] ss:$16 sps:$4 sm:$0xff]  }
 0x559   :  { %9495 = vmatpush1.bf16.msra.mxu1 %v11870_v3  ;;  %9543 = vmatprep.subr.bf16.mxu0 %v11881_v45 }
 0x55a   :  { %9496 = vmatprep.subr.bf16.mxu1 %v11878_v5 }
 0x55c   :  { %9544 = vmatpush1.bf16.msra.mxu0 %v11879_v47  ;;  %v12002_v47 = vld [vmem:[#allocation11 + $0x30] sm:$0xff]  }
 0x55d   :  { %9497 = vmatpush1.bf16.msra.mxu1 %v11876_v9  ;;  %9545 = vmatprep.subr.bf16.mxu0 %v11887_v39  ;;  %v11945_v9 = vld [vmem:[#allocation8 + $0x328] ss:$16 sps:$4 sm:$0xff]   ;;  %v12003_v39 = vld [vmem:[#allocation11 + $0x68] sm:$0xff]  }
 0x55e   :  { %9498 = vmatprep.subr.bf16.mxu1 %v11884_v6 }
 0x560   :  { %9546 = vmatpush1.bf16.msra.mxu0 %v11885_v11 }
 0x561   :  { %9499 = vmatpush1.bf16.msra.mxu1 %v11882_v28  ;;  %9547 = vmatprep.subr.bf16.mxu0 %v11893_v7  ;;  %v11950_v7 = vld [vmem:[#allocation8 + $0x30c] ss:$16 sps:$4 sm:$0xff]  }
 0x562   :  { %9500 = vmatprep.subr.bf16.mxu1 %v11890_v19 }
 0x564   :  { %9548 = vmatpush1.bf16.msra.mxu0 %v11891_v14 }
 0x565   :  { %9501 = vmatpush1.bf16.msra.mxu1 %v11888_v21  ;;  %9549 = vmatprep.subr.bf16.mxu0 %v11899_v31  ;;  %v11948_v31 = vld [vmem:[#allocation8 + $0x308] ss:$16 sps:$4 sm:$0xff]  }
 0x566   :  { %9502 = vmatprep.subr.bf16.mxu1 %v11896_v29  ;;  %v12005_v29 = vld [vmem:[#allocation11 + $0x60] sm:$0xff]  }
 0x568   :  { %9550 = vmatpush2.bf16.msra.mxu0 %v11897_v15 }
 0x569   :  { %9503 = vmatpush1.bf16.msra.mxu1 %v11894_v40  ;;  %9551 = vmatprep.subr.bf16.mxu0 %v11905_v33  ;;  %v11953_v40 = vld [vmem:[#allocation8 + $0x6ec] ss:$16 sps:$4 sm:$0xff]   ;;  %v12006_v33 = vld [vmem:[#allocation11 + $0x20] sm:$0xff]  }
 0x56a   :  { %9504 = vmatprep.subr.bf16.mxu1 %v11902_v1  ;;  %v11951_v1 = vld [vmem:[#allocation8 + $0x6e8] ss:$16 sps:$4 sm:$0xff]  }
 0x56c   :  { %9552 = vmatpush2.bf16.msra.mxu0 %v11903_v23  ;;  %v11956_v23 = vld [vmem:[#allocation8 + $0x6cc] ss:$16 sps:$4 sm:$0xff]  }
 0x56d   :  { %9505 = vmatpush1.bf16.msra.mxu1 %v11900_v17  ;;  %9553 = vmatprep.subr.bf16.mxu0 %v11911_v24  ;;  %v12007_v17 = vld [vmem:[#allocation11 + $0x58] sm:$0xff]  }
 0x56e   :  { %9506 = vmatprep.subr.bf16.mxu1 %v11908_v25  ;;  %v12008_v24 = vld [vmem:[#allocation11 + $0x18] sm:$0xff]   ;;  %v11954_v25 = vld [vmem:[#allocation8 + $0x6c8] ss:$16 sps:$4 sm:$0xff]  }
 0x570   :  { %9554 = vmatpush2.bf16.msra.mxu0 %v11909_v48  ;;  %v12009_v48 = vld [vmem:[#allocation11 + $0x50] sm:$0xff]  }
 0x571   :  { %9507 = vmatpush1.bf16.msra.mxu1 %v11906_v18  ;;  %9555 = vmatprep.subr.bf16.mxu0 %v11917_v30  ;;  %v11959_v18 = vld [vmem:[#allocation8 + $0x6ac] ss:$16 sps:$4 sm:$0xff]   ;;  %v12010_v30 = vld [vmem:[#allocation11 + $0x10] sm:$0xff]  }
 0x572   :  { %9508 = vmatprep.subr.bf16.mxu1 %v11914_v32  ;;  %v11957_v32 = vld [vmem:[#allocation8 + $0x6a8] ss:$16 sps:$4 sm:$0xff]  }
 0x574   :  { %9556 = vmatpush2.bf16.msra.mxu0 %v11915_v35  ;;  %v12011_v35 = vld [vmem:[#allocation11 + $0x48] sm:$0xff]  }
 0x575   :  { %9509 = vmatpush2.bf16.msra.mxu1 %v11912_v51  ;;  %9557 = vmatprep.subr.bf16.mxu0 %v11923_v36  ;;  %v11962_v51 = vld [vmem:[#allocation8 + $0x68c] ss:$16 sps:$4 sm:$0xff]   ;;  %v11960_v36 = vld [vmem:[#allocation8 + $0x688] ss:$16 sps:$4 sm:$0xff]  }
 0x576   :  { %9510 = vmatprep.subr.bf16.mxu1 %v11920_v27  ;;  %v12013_v27 = vld [vmem:[#allocation11 + $0x40] sm:$0xff]  }
 0x578   :  { %9558 = vmatpush2.bf16.msra.mxu0 %v11921_v55  ;;  %v12014_v55 = vld [vmem:[#allocation11] sm:$0xff]  }
 0x579   :  { %9511 = vmatpush2.bf16.msra.mxu1 %v11918_v38  ;;  %9559 = vmatprep.subr.bf16.mxu0 %v11929_v12  ;;  %v11963_v38 = vld [vmem:[#allocation8 + $0x668] ss:$16 sps:$4 sm:$0xff]   ;;  %v11968_v12 = vld [vmem:[#allocation8 + $0x64c] ss:$16 sps:$4 sm:$0xff]  }
 0x57a   :  { %9512 = vmatprep.subr.bf16.mxu1 %v11926_v58  ;;  %v11966_v58 = vld [vmem:[#allocation8 + $0x648] ss:$16 sps:$4 sm:$0xff]  }
 0x57c   :  { %9560 = vmatpush2.bf16.msra.mxu0 %v11927_v49  ;;  %v11971_v49 = vld [vmem:[#allocation8 + $0x62c] ss:$16 sps:$4 sm:$0xff]  }
 0x57d   :  { %9513 = vmatpush2.bf16.msra.mxu1 %v11924_v43  ;;  %9561 = vmatprep.subr.bf16.mxu0 %v11935_v42  ;;  %v11969_v43 = vld [vmem:[#allocation8 + $0x628] ss:$16 sps:$4 sm:$0xff]   ;;  %v11974_v42 = vld [vmem:[#allocation8 + $0x60c] ss:$16 sps:$4 sm:$0xff]  }
 0x57e   :  { %9514 = vmatprep.subr.bf16.mxu1 %v11932_v2  ;;  %v11972_v2 = vld [vmem:[#allocation8 + $0x608] ss:$16 sps:$4 sm:$0xff]  }
 0x580   :  { %9562 = vmatpush2.bf16.msra.mxu0 %v11933_v59  ;;  %v11977_v59 = vld [vmem:[#allocation8 + $0x7ec] ss:$16 sps:$4 sm:$0xff]  }
 0x581   :  { %9515 = vmatpush2.bf16.msra.mxu1 %v11930_v50  ;;  %9563 = vmatprep.subr.bf16.mxu0 %v11941_v0  ;;  %v11975_v50 = vld [vmem:[#allocation8 + $0x7e8] ss:$16 sps:$4 sm:$0xff]   ;;  %v11980_v0 = vld [vmem:[#allocation8 + $0x7cc] ss:$16 sps:$4 sm:$0xff]  }
 0x582   :  { %9516 = vmatprep.subr.bf16.mxu1 %v11938_v8  ;;  %v11978_v8 = vld [vmem:[#allocation8 + $0x7c8] ss:$16 sps:$4 sm:$0xff]  }
 0x584   :  { %9564 = vmatpush2.bf16.msra.mxu0 %v11939_v52  ;;  %v11983_v52 = vld [vmem:[#allocation8 + $0x7ac] ss:$16 sps:$4 sm:$0xff]  }
 0x585   :  { %9517 = vmatpush2.bf16.msra.mxu1 %v11936_v54  ;;  %11512 = vmatprep.subr.bf16.mxu0 %v11999_v4  ;;  %v11981_v54 = vld [vmem:[#allocation8 + $0x7a8] ss:$16 sps:$4 sm:$0xff]   ;;  %v11986_v4 = vld [vmem:[#allocation8 + $0x78c] ss:$16 sps:$4 sm:$0xff]  }
 0x586   :  { %9518 = vmatprep.subr.bf16.mxu1 %v11944_v61  ;;  %v11984_v61 = vld [vmem:[#allocation8 + $0x788] ss:$16 sps:$4 sm:$0xff]  }
 0x587   :  { %v9321_v3 = vpop.f32.mrf.mxu0  ;;  %9566 = vmatmul.mubr.bf16.vlgmr.msra.gmra.mxu0 %v12622_v44  ;;  %v12004_v44 = vld [vmem:[#allocation11 + $0x28] sm:$0xff]  }
 0x588   :  { %v9322_v45 = vadd.f32 %v9321_v3, %v7990_v16  ;;  %v9362_v5 = vpop.f32.mrf.mxu1  ;;  %11513 = vmatpush3.bf16.msra.mxu0 %v12000_v34  ;;  %v11989_v16 = vld [vmem:[#allocation8 + $0x76c] ss:$16 sps:$4 sm:$0xff]   ;;  %v11987_v34 = vld [vmem:[#allocation8 + $0x768] ss:$16 sps:$4 sm:$0xff]  }
 0x589   :  { %9519 = vmatpush2.bf16.msra.mxu1 %v11942_v53  ;;  %v9323_v37 = vpop.f32.mrf.mxu0  ;;  %11514 = vmatprep.subr.bf16.mxu0 %v12001_v20  ;;  %v11992_v53 = vld [vmem:[#allocation8 + $0x74c] ss:$16 sps:$4 sm:$0xff]   ;;  %v11990_v20 = vld [vmem:[#allocation8 + $0x748] ss:$16 sps:$4 sm:$0xff]  }
 0x58a   :  { %v12655_v6 = vadd.f32 %v9362_v5, %v9322_v45  ;;  %v9324_v11 = vadd.f32 %v9323_v37, %v7994_v63  ;;  %v9364_v28 = vpop.f32.mrf.mxu1  ;;  %9520 = vmatprep.subr.bf16.mxu1 %v11947_v41  ;;  %v11995_v63 = vld [vmem:[#allocation8 + $0x72c] ss:$16 sps:$4 sm:$0xff]   ;;  %v11993_v5 = vld [vmem:[#allocation8 + $0x728] ss:$16 sps:$4 sm:$0xff]  }
 0x58b   :  { %v9325_v46 = vpop.f32.mrf.mxu0  ;;  %v11998_v37 = vld [vmem:[#allocation8 + $0x70c] ss:$16 sps:$4 sm:$0xff]  }
 0x58c   :  { %v12657_v19 = vadd.f32 %v9364_v28, %v9324_v11  ;;  %v9366_v14 = vpop.f32.mrf.mxu1  ;;  %11515 = vmatpush3.bf16.msra.mxu0 %v12002_v47  ;;  %v11996_v11 = vld [vmem:[#allocation8 + $0x708] ss:$16 sps:$4 sm:$0xff]   ;;  %v12015_v28 = vld [vmem:[#allocation11 + $0xf8] sm:$0xff]  }
 0x58d   :  { %9521 = vmatpush2.bf16.msra.mxu1 %v11945_v9  ;;  %v9326_v21 = vpop.f32.mrf.mxu0  ;;  %11516 = vmatprep.subr.bf16.mxu0 %v12003_v39  ;;  %v12017_v46 = vld [vmem:[#allocation11 + $0xf0] sm:$0xff]   ;;  %v12019_v14 = vld [vmem:[#allocation11 + $0xe8] sm:$0xff]  }
 0x58e   :  { %v9367_v15 = vpop.f32.mrf.mxu1  ;;  %9522 = vmatprep.subr.bf16.mxu1 %v11950_v7  ;;  %v12016_v7 = vld [vmem:[#allocation11 + $0xb8] sm:$0xff]   ;;  %v12022_v21 = vld [vmem:[#allocation11 + $0xa0] sm:$0xff]  }
 0x590   :  { %11517 = vmatpush3.bf16.msra.mxu0 %v12004_v44  ;;  %v12021_v44 = vld [vmem:[#allocation11 + $0xe0] sm:$0xff]  }
 0x591   :  { %9523 = vmatpush2.bf16.msra.mxu1 %v11948_v31  ;;  %11518 = vmatprep.subr.bf16.mxu0 %v12005_v29  ;;  %v12023_v31 = vld [vmem:[#allocation11 + $0xd8] sm:$0xff]  }
 0x592   :  { %9574 = vmatprep.subr.bf16.mxu1 %v11953_v40  ;;  %v12024_v29 = vld [vmem:[#allocation11 + $0x98] sm:$0xff]  }
 0x594   :  { %9525 = vmatmul.mubr.bf16.vlgmr.msra.gmra.mxu1 %v12606_v56  ;;  %11519 = vmatpush3.bf16.msra.mxu0 %v12006_v33  ;;  %v12012_v56 = vld [vmem:[#allocation11 + $0x8] sm:$0xff]  }
 0x595   :  { %9575 = vmatpush1.bf16.msra.mxu1 %v11951_v1  ;;  %9606 = vmatprep.mubr.bf16.mxu1 %v12639_v10  ;;  %v11965_v10 = vld [vmem:[#allocation8 + $0x66c] ss:$16 sps:$4 sm:$0xff]  }
 0x596   :  { %9576 = vmatprep.subr.bf16.mxu1 %v11956_v23  ;;  %11520 = vmatprep.subr.bf16.mxu0 %v12007_v17  ;;  %v12026_v23 = vld [vmem:[#allocation11 + $0x90] sm:$0xff]  }
 0x598   :  { %11521 = vmatpush3.bf16.msra.mxu0 %v12008_v24 }
 0x599   :  { %9577 = vmatpush1.bf16.msra.mxu1 %v11954_v25  ;;  %11522 = vmatprep.subr.bf16.mxu0 %v12009_v48  ;;  %v12027_v48 = vld [vmem:[#allocation11 + $0xc8] sm:$0xff]  }
 0x59a   :  { %9578 = vmatprep.subr.bf16.mxu1 %v11959_v18 }
 0x59c   :  { %11523 = vmatpush3.bf16.msra.mxu0 %v12010_v30 }
 0x59d   :  { %9579 = vmatpush1.bf16.msra.mxu1 %v11957_v32  ;;  %11524 = vmatprep.subr.bf16.mxu0 %v12011_v35  ;;  %v12028_v32 = vld [vmem:[#allocation11 + $0x88] sm:$0xff]  }
 0x59e   :  { %9580 = vmatprep.subr.bf16.mxu1 %v11962_v51 }
 0x5a0   :  { %11525 = vmatpush3.bf16.msra.mxu0 %v12012_v56 }
 0x5a1   :  { %9581 = vmatpush1.bf16.msra.mxu1 %v11960_v36  ;;  %11526 = vmatprep.subr.bf16.mxu0 %v12013_v27  ;;  %v12029_v27 = vld [vmem:[#allocation11 + $0xc0] sm:$0xff]  }
 0x5a2   :  { %9582 = vmatprep.subr.bf16.mxu1 %v11965_v10  ;;  %v12030_v10 = vld [vmem:[#allocation11 + $0x80] sm:$0xff]  }
 0x5a4   :  { %11527 = vmatpush3.bf16.msra.mxu0 %v12014_v55 }
 0x5a5   :  { %9583 = vmatpush1.bf16.msra.mxu1 %v11963_v38 }
 0x5a6   :  { %9584 = vmatprep.subr.bf16.mxu1 %v11968_v12 }
 0x5a9   :  { %9585 = vmatpush1.bf16.msra.mxu1 %v11966_v58 }
 0x5aa   :  { %9586 = vmatprep.subr.bf16.mxu1 %v11971_v49 }
 0x5ad   :  { %9587 = vmatpush1.bf16.msra.mxu1 %v11969_v43 }
 0x5ae   :  { %9588 = vmatprep.subr.bf16.mxu1 %v11974_v42 }
 0x5b1   :  { %9589 = vmatpush1.bf16.msra.mxu1 %v11972_v2  ;;  %v7998_v2 = vrot.slane %v12646_v60, %v1235_v57  ;;  %v12033_v57 = vld [vmem:[%s12721_s8 + $0x28] sm:$0xff]  }
 0x5b2   :  { %9590 = vmatprep.subr.bf16.mxu1 %v11977_v59  ;;  %v8002_v59 = vrot.slane %v12646_v60, %v1239_v62  ;;  %v12034_v62 = vld [vmem:[%s12721_s8 + $0x20] sm:$0xff]   ;;  %v12035_v60 = vld [vmem:[%s12721_s8 + $0x18] sm:$0xff]  }
 0x5b5   :  { %9591 = vmatpush2.bf16.msra.mxu1 %v11975_v50 }
 0x5b6   :  { %9592 = vmatprep.subr.bf16.mxu1 %v11980_v0 }
 0x5b9   :  { %9593 = vmatpush2.bf16.msra.mxu1 %v11978_v8 }
 0x5ba   :  { %9594 = vmatprep.subr.bf16.mxu1 %v11983_v52 }
 0x5bd   :  { %9595 = vmatpush2.bf16.msra.mxu1 %v11981_v54 }
 0x5be   :  { %9596 = vmatprep.subr.bf16.mxu1 %v11986_v4 }
 0x5c1   :  { %9597 = vmatpush2.bf16.msra.mxu1 %v11984_v61 }
 0x5c2   :  { %9598 = vmatprep.subr.bf16.mxu1 %v11989_v16 }
 0x5c5   :  { %9599 = vmatpush2.bf16.msra.mxu1 %v11987_v34 }
 0x5c6   :  { %9600 = vmatprep.subr.bf16.mxu1 %v11992_v53 }
 0x5c7   :  { %v9403_v41 = vpop.f32.mrf.mxu0 }
 0x5c8   :  { %v9404_v3 = vadd.f32 %v9403_v41, %v12655_v6  ;;  %v12018_v6 = vld [vmem:[#allocation11 + $0xb0] sm:$0xff]  }
 0x5c9   :  { %9601 = vmatpush2.bf16.msra.mxu1 %v11990_v20  ;;  %v9405_v45 = vpop.f32.mrf.mxu0  ;;  %v12031_v20 = vld [vmem:[%s12721_s8 + $0x38] sm:$0xff]  }
 0x5ca   :  { %v9406_v47 = vadd.f32 %v9405_v45, %v12657_v19  ;;  %9602 = vmatprep.subr.bf16.mxu1 %v11995_v63  ;;  %v12020_v19 = vld [vmem:[#allocation11 + $0xa8] sm:$0xff]   ;;  %v12294_v63 = vmov 0.0  }
 0x5cb   :  { %v9407_v9 = vpop.f32.mrf.mxu0  ;;  %11568 = vmatprep.subr.bf16.mxu0 %v12294_v63 }
 0x5cd   :  { %9603 = vmatpush2.bf16.msra.mxu1 %v11993_v5  ;;  %v9408_v39 = vpop.f32.mrf.mxu0 }
 0x5ce   :  { %9604 = vmatprep.subr.bf16.mxu1 %v11998_v37 }
 0x5d1   :  { %9605 = vmatpush2.bf16.msra.mxu1 %v11996_v11 }
 0x5d2   :  { %11534 = vmatprep.subr.bf16.mxu1 %v12015_v28 }
 0x5d4   :  { %9607 = vmatmul.mubr.bf16.vlgmr.msra.gmra.mxu1 %v12641_v22  ;;  %v12025_v22 = vld [vmem:[#allocation11 + $0xd0] sm:$0xff]  }
 0x5d5   :  { %11535 = vmatpush3.bf16.msra.mxu1 %v12016_v7 }
 0x5d6   :  { %11536 = vmatprep.subr.bf16.mxu1 %v12017_v46 }
 0x5d9   :  { %11537 = vmatpush3.bf16.msra.mxu1 %v12018_v6 }
 0x5da   :  { %11538 = vmatprep.subr.bf16.mxu1 %v12019_v14  ;;  %v12036_v14 = vld [vmem:[%s12721_s8 + $0x10] sm:$0xff]  }
 0x5dd   :  { %11539 = vmatpush3.bf16.msra.mxu1 %v12020_v19 }
 0x5de   :  { %11540 = vmatprep.subr.bf16.mxu1 %v12021_v44 }
 0x5e1   :  { %11541 = vmatpush3.bf16.msra.mxu1 %v12022_v21 }
 0x5e2   :  { %11542 = vmatprep.subr.bf16.mxu1 %v12023_v31  ;;  %v12037_v31 = vld [vmem:[%s12721_s8 + $0x8] sm:$0xff]  }
 0x5e5   :  { %11543 = vmatpush3.bf16.msra.mxu1 %v12024_v29 }
 0x5e6   :  { %11544 = vmatprep.subr.bf16.mxu1 %v12025_v22  ;;  %v12038_v22 = vld [vmem:[%s12721_s8] sm:$0xff]   ;;  %s12296_s8 = smov [#allocation19]  }
 0x5e7   :  { %s10172_s3 = sshll.u32 %s12296_s8, 4  ;;  %s10173_s3 = int_to_ptr.vmem [resolvable:$true] %s10172_s3 }
 0x5e8   :  { %s12244_s29 = scalar_lea.vmem %s10173_s3, 128  ;;  %p12249_p9 = scmp.lt.s32.totalorder %s10173_s3, %s10173_s3 }
 0x5e9   :  { %11545 = vmatpush3.bf16.msra.mxu1 %v12026_v23  ;;  %p12245_p8 = scmp.ne.s32.totalorder %s10173_s3, %s12244_s29  ;;  %p12250_p10 = scmp.lt.s32.totalorder %s12244_s29, %s12244_s29 }
 0x5ea   :  { %11546 = vmatprep.subr.bf16.mxu1 %v12027_v48 }
 0x5eb   :  { %p12251_p11 = por %p12250_p10, %p12249_p9 }
 0x5ed   :  { %11547 = vmatpush3.bf16.msra.mxu1 %v12028_v32  ;;  %v12039_v32 = vld [vmem:[#allocation16 + $0x8] sm:$0xff]   ;;  %p12252_p12 = pnand %p12251_p11, %p12245_p8 }
 0x5ee   :  { %11548 = vmatprep.subr.bf16.mxu1 %v12029_v27 }
 0x5f1   :  { %11549 = vmatpush3.bf16.msra.mxu1 %v12030_v10 }
 0x5f2   :  { %11588 = vmatprep.subr.bf16.mxu1 %v12294_v63 }
 0x607   :  { %v9485_v15 = vpop.f32.mrf.mxu0 }
 0x608   :  { %v9486_v50 = vadd.f32 %v9485_v15, %v7998_v2  ;;  %v11466_v15 = vld [vmem:[#allocation13] ss:$0 sm:$0xff]  ;;  %v10163_v2 = vld [vmem:[%s12714_s1] sm:$0xff] }
 0x609   :  { %v9487_v40 = vpop.f32.mrf.mxu0 }
 0x60a   :  { %v9488_v8 = vadd.f32 %v9487_v40, %v8002_v59 }
 0x60b   :  { %v9489_v33 = vpop.f32.mrf.mxu0 }
 0x60d   :  { %v9490_v1 = vpop.f32.mrf.mxu0 }
 0x614   :  { %v9444_v17 = vpop.f32.mrf.mxu1 }
 0x615   :  { %v9445_v24 = vadd.f32 %v9444_v17, %v9404_v3 }
 0x616   :  { %v9446_v25 = vpop.f32.mrf.mxu1 }
 0x617   :  { %vm9615_vm8 = vcmp.gt.f32.partialorder %v9445_v24, 0.0  ;;  %v9619_v18 = vmul.f32 0.01, %v9445_v24  ;;  %v9447_v30 = vadd.f32 %v9446_v25, %v9406_v47 }
 0x618   :  { %v9448_v35 = vpop.f32.mrf.mxu1 }
 0x619   :  { %vm9616_vm9 = vcmp.gt.f32.partialorder %v9447_v30, 0.0  ;;  %v9620_v51 = vmul.f32 0.01, %v9447_v30  ;;  %v9623_v56 = vsel %vm9615_vm8, %v9445_v24, %v9619_v18  ;;  %v12040_v35 = vld [vmem:[#allocation16] sm:$0xff]  }
 0x61a   :  { %v9449_v36 = vpop.f32.mrf.mxu1  ;;  %v9627_v12 = vpack.c.bf16 %v9623_v56, %v9623_v56 }
 0x61b   :  { %v9624_v55 = vsel %vm9616_vm9, %v9447_v30, %v9620_v51  ;;  %v11499_v51 = vld [vmem:[#allocation14] ss:$0 sm:$0xff] }
 0x61c   :  { %v9628_v38 = vpack.c.bf16 %v9624_v55, %v9624_v55 }
 0x61e   :  { %9926 = vmatprep.mubr.bf16.mxu0 %v9628_v38 }
 0x61f   :  { %9927 = vmatmul.mubr.bf16.vlgmr.msra.gmra.mxu0 %v9627_v12 }
 0x620   :  { %11569 = vmatpush3.bf16.msra.mxu0 %v12031_v20  ;;  %11584 = vmatprep.mubr.msk.bf16.mxu0 %vm12295_vm12, %v12294_v63 }
 0x621   :  { %11570 = vmatprep.subr.bf16.mxu0 %v12294_v63 }
 0x624   :  { %11571 = vmatpush3.bf16.msra.mxu0 %v12032_v26 }
 0x625   :  { %11572 = vmatprep.subr.bf16.mxu0 %v12294_v63 }
 0x628   :  { %11573 = vmatpush3.bf16.msra.mxu0 %v12033_v57 }
 0x629   :  { %11574 = vmatprep.subr.bf16.mxu0 %v12294_v63 }
 0x62c   :  { %11575 = vmatpush3.bf16.msra.mxu0 %v12034_v62 }
 0x62d   :  { %11576 = vmatprep.subr.bf16.mxu0 %v12294_v63 }
 0x630   :  { %11577 = vmatpush3.bf16.msra.mxu0 %v12035_v60 }
 0x631   :  { %11578 = vmatprep.subr.bf16.mxu0 %v12294_v63 }
 0x634   :  { %11579 = vmatpush3.bf16.msra.mxu0 %v12036_v14 }
 0x635   :  { %11580 = vmatprep.subr.bf16.mxu0 %v12294_v63 }
 0x638   :  { %11581 = vmatpush3.bf16.msra.mxu0 %v12037_v31 }
 0x639   :  { %11582 = vmatprep.subr.bf16.mxu0 %v12294_v63 }
 0x63c   :  { %11583 = vmatpush3.bf16.msra.mxu0 %v12038_v22 }
 0x647   :  { %v9567_v58 = vpop.f32.mrf.mxu0 }
 0x649   :  { %v9569_v49 = vpop.f32.mrf.mxu0 }
 0x64b   :  { %v9571_v43 = vpop.f32.mrf.mxu0 }
 0x64c   :  { %v11508_v43 = vld [vmem:[#allocation17] ss:$0 sm:$0xff] }
 0x64d   :  { %v9572_v42 = vpop.f32.mrf.mxu0 }
 0x654   :  { %v9526_v0 = vpop.f32.mrf.mxu1 }
 0x655   :  { %v9527_v52 = vadd.f32 %v9526_v0, %v9486_v50 }
 0x656   :  { %v9528_v54 = vpop.f32.mrf.mxu1 }
 0x657   :  { %v9529_v4 = vadd.f32 %v9528_v54, %v9488_v8  ;;  %v9568_v61 = vadd.f32 %v9567_v58, %v9527_v52 }
 0x658   :  { %v9530_v16 = vpop.f32.mrf.mxu1 }
 0x659   :  { %v9570_v34 = vadd.f32 %v9569_v49, %v9529_v4  ;;  %v10161_v49 = vand.u32 127, %v1225_v13 }
 0x65a   :  { %v9531_v53 = vpop.f32.mrf.mxu1 }
 0x65b   :  { %vm10162_vm0 = vcmp.lt.s32.totalorder %v10161_v49, 4 }
 0x694   :  { %v9608_v41 = vpop.f32.mrf.mxu1 }
 0x695   :  { %v9609_v3 = vadd.f32 %v9608_v41, %v9568_v61 }
 0x696   :  { %v9610_v45 = vpop.f32.mrf.mxu1 }
 0x697   :  { %vm9617_vm10 = vcmp.gt.f32.partialorder %v9609_v3, 0.0  ;;  %v9621_v5 = vmul.f32 0.01, %v9609_v3  ;;  %v9611_v47 = vadd.f32 %v9610_v45, %v9570_v34 }
 0x698   :  { %v9612_v37 = vpop.f32.mrf.mxu1 }
 0x699   :  { %vm9618_vm11 = vcmp.gt.f32.partialorder %v9611_v47, 0.0  ;;  %v9622_v9 = vmul.f32 0.01, %v9611_v47  ;;  %v9625_v39 = vsel %vm9617_vm10, %v9609_v3, %v9621_v5 }
 0x69a   :  { %v9613_v11 = vpop.f32.mrf.mxu1  ;;  %v9629_v46 = vpack.c.bf16 %v9625_v39, %v9625_v39 }
 0x69b   :  { %v9626_v28 = vsel %vm9618_vm11, %v9611_v47, %v9622_v9 }
 0x69c   :  { %v9630_v7 = vpack.c.bf16 %v9626_v28, %v9626_v28 }
 0x69e   :  { %9966 = vmatprep.mubr.bf16.mxu1 %v9630_v7 }
 0x69f   :  { %9967 = vmatmul.mubr.bf16.vlgmr.msra.gmra.mxu1 %v9629_v46 }
 0x6a0   :  { %11592 = vmatprep.mubr.msk.bf16.mxu1 %vm12295_vm12, %v12294_v63  ;;  %11589 = vmatpush3.bf16.msra.mxu1 %v12039_v32 }
 0x6a1   :  { %11590 = vmatprep.subr.bf16.mxu1 %v12294_v63 }
 0x6a4   :  { %11591 = vmatpush3.bf16.msra.mxu1 %v12040_v35 }
 0x6df   :  { %v11528_v6 = vpop.f32.mrf.mxu0 }
 0x6e1   :  { %v11529_v19 = vpop.f32.mrf.mxu0 }
 0x6e2   :  { %v11530_v44 = vadd.f32 %v11529_v19, %v11528_v6 }
 0x6e3   :  { %v11531_v21 = vpop.f32.mrf.mxu0 }
 0x6e4   :  { %v9929_v1 = vadd.f32 %v11530_v44, %v11466_v15 }
 0x6e5   :  { %v11532_v29 = vpop.f32.mrf.mxu0 }
 0x75f   :  { %v11550_v40 = vpop.f32.mrf.mxu1 }
 0x761   :  { %v11551_v33 = vpop.f32.mrf.mxu1 }
 0x762   :  { %v11552_v23 = vadd.f32 %v11551_v33, %v11550_v40 }
 0x763   :  { %v11553_v17 = vpop.f32.mrf.mxu1 }
 0x764   :  { %v9969_v24 = vadd.f32 %v11552_v23, %v9929_v1 }
 0x765   :  { %v11554_v25 = vpop.f32.mrf.mxu1 }
 0x766   :  { %vm9974_vm13 = vcmp.gt.f32.partialorder %v9969_v24, 0.0  ;;  %v9975_v48 = vmul.f32 0.01, %v9969_v24 }
 0x768   :  { %v9976_v18 = vsel %vm9974_vm13, %v9969_v24, %v9975_v48 }
 0x769   :  { %v9977_v30 = vpack.c.bf16 %v9976_v18, %v9976_v18 }
 0x76b   :  { %11585 = vmatmul.mubr.bf16.vlgmr.msra.gmra.mxu0 %v9977_v30 }
 0x82b   :  { %v10083_v56 = vpop.f32.mrf.mxu0 }
 0x82c   :  { %v10084_v36 = vadd.f32 %v11499_v51, %v10083_v56 }
 0x82d   :  { %v11586_v27 = vpop.f32.mrf.mxu0 }
 0x82e   :  { %vm10089_vm14 = vcmp.gt.f32.partialorder %v10084_v36, 0.0  ;;  %v10090_v10 = vmul.f32 0.01, %v10084_v36 }
 0x82f   :  { %v10086_v55 = vpop.f32.mrf.mxu0 }
 0x830   :  { %v10091_v38 = vsel %vm10089_vm14, %v10084_v36, %v10090_v10 }
 0x831   :  { %v10092_v12 = vpack.c.bf16 %v10091_v38, %v10091_v38  ;;  %v11587_v58 = vpop.f32.mrf.mxu0 }
 0x833   :  { %11593 = vmatmul.mubr.msk.bf16.vlgmr.msra.gmra.mxu1 %vm10116_vm15, %v10092_v12 }
 0x8f3   :  { %v10154_v42 = vpop.f32.mrf.mxu1 }
 0x8f4   :  { %v10155_v59 = vadd.f32 %v11508_v43, %v10154_v42 }
 0x8f5   :  { %v11594_v50 = vpop.f32.mrf.mxu1 }
 0x8f6   :  { %v10164_v0 = vsel %vm10162_vm0, %v10163_v2, %v10155_v59 }
 0x8f7   :  { %v10157_v8 = vpop.f32.mrf.mxu1  ;;  %10165 = vst [vmem:[#allocation19] sm:$0xff] %v10164_v0 }
 0x8f8   :  { %12255 = shalt.err (!%p12252_p12)
}
 0x8f9   :  { %10175 = dma.vmem_to_hbm [thread:$0]  %s10173_s3, 128, %s12725_s12, [#allocation4]   ;;  %v11595_v13 = vpop.f32.mrf.mxu1 }
 0x8fa   :  { %12276 = dma.done.wait [#allocation4], 128  }
 0x8fb   :  { %12277 = vsyncadd [#allocation4], 4294967168 }
 0x8fc   :  { %10179 = vsyncpa [#allocation3], 1 }
 0x8fd   :  { %10180 = vsyncpa [#allocation6], 1 }
 0x8fe   :  { %10181 = vsyncpa [#allocation9], 1 }
 0x8ff   :  { %10182 = vsyncpa [#allocation12], 1 }
 0x900   :  { %10183 = vsyncpa [#allocation15], 1 }
 0x901   :  { %10184 = vsyncpa [#allocation18], 1 }
 0x902   :  { %10185 = vsyncpa [#allocation4], 1 }

</bundles_post_ra>
